<compile_context>
chip_gen: v6e
topology: v6e:2x2x1
jax: 0.10.0
libtpu: 0.0.40
codegen_flags: <defaults>
</compile_context>

<pallas_src>
import functools

import jax
import jax.numpy as jnp
from jax.experimental import pallas as pl
from jax.experimental.pallas import tpu as pltpu


LANE = 128
MATMUL_DTYPE = jnp.float32   # set to jnp.bfloat16 on v6e/v7x for ~2x MXU rate / half BW
VMEM_LIMIT_BYTES = 48 * 1024 * 1024
_CONV_VMEM_BUDGET = 10 * 1024 * 1024
_EW_VMEM_BUDGET = 12 * 1024 * 1024


def _round_up(x, m=LANE):
    return ((x + m - 1) // m) * m


def _choose_tile_h(h, bytes_per_row, budget_bytes):
    """Largest divisor of h whose tile fits the VMEM budget; prefer >=2 row tiles."""
    divisors = [d for d in range(1, h + 1) if h % d == 0]
    fits = [d for d in divisors if d * bytes_per_row <= budget_bytes]
    if not fits:
        return 1
    sub = [d for d in fits if d < h]
    if sub and max(sub) * 2 >= min(h, max(fits)):
        return max(sub)          # >=2 row tiles: DMA/compute overlap + megacore sharding
    return max(fits)


# ------------------------------ Pallas kernels ------------------------------ #

def _conv3x3_kernel(*refs, fuse_input):
    """3x3 same-conv over a halo row slab, bias add, BN partial stats.

    Optionally applies the *previous* layer's BatchNorm+ReLU affine to the input
    slab (fused prologue) so the intermediate activation never needs its own
    elementwise HBM pass.
    """
    if fuse_input:
        (x_hbm, w_ref, b_ref, isc_ref, ish_ref,
         o_ref, stats_ref, slab, sem) = refs
    else:
        x_hbm, w_ref, b_ref, o_ref, stats_ref, slab, sem = refs

    th, wd, cout = o_ref.shape[1], o_ref.shape[2], o_ref.shape[3]
    cin = slab.shape[2]

    n = pl.program_id(0)
    hidx = pl.program_id(1)
    row0 = hidx * th

    # Manual halo DMA: (tile_h + 2) padded rows straight from HBM into VMEM.
    cp = pltpu.make_async_copy(x_hbm.at[n, pl.ds(row0, th + 2)], slab, sem.at[0])
    cp.start()
    cp.wait()

    if fuse_input:
        # Previous layer's BN+ReLU applied in-place on the slab. The spatial zero
        # padding must hold AFTER the affine, so re-zero halo cols (always) and the
        # top/bottom halo row when this tile touches the image border.
        slab[...] = jnp.maximum(slab[...] * isc_ref[...] + ish_ref[...], 0.0)
        zcol = jnp.zeros((th + 2, cin), slab.dtype)
        slab[:, 0, :] = zcol
        slab[:, wd + 1, :] = zcol
        zrow = jnp.zeros((wd + 2, cin), slab.dtype)

        @pl.when(hidx == 0)
        def _():
            slab[0, :, :] = zrow

        @pl.when(hidx == pl.num_programs(1) - 1)
        def _():
            slab[th + 1, :, :] = zrow

    xp = slab[...]                                    # (th+2, wd+2, cin)

    # 3 lane-dense matmuls with K = 3*cin (instead of 9 tiny K=cin ones).
    acc = jnp.zeros((th * wd, cout), jnp.float32)
    for dy in range(3):
        patch = jnp.concatenate(
            [xp[dy:dy + th, dx:dx + wd, :] for dx in range(3)], axis=-1
        ).reshape(th * wd, 3 * cin)
        w_dy = w_ref[dy * 3 * cin:(dy + 1) * 3 * cin, :]
        acc = acc + jnp.dot(patch.astype(MATMUL_DTYPE),
                            w_dy.astype(MATMUL_DTYPE),
                            preferred_element_type=jnp.float32)

    y = acc + b_ref[...]                              # conv output incl. bias (pre-BN)

    # BatchNorm partial statistics as free side outputs of the conv pass.
    stats_ref[0, 0, 0:1, :] = jnp.sum(y, axis=0, keepdims=True)
    stats_ref[0, 0, 1:2, :] = jnp.sum(y * y, axis=0, keepdims=True)

    o_ref[0] = y.reshape(th, wd, cout).astype(o_ref.dtype)


def _bn_relu_kernel(y_ref, sc_ref, sh_ref, o_ref):
    o_ref[...] = jnp.maximum(y_ref[...] * sc_ref[...] + sh_ref[...], 0.0)


def _bn_relu_res_kernel(y_ref, sc_ref, sh_ref, r_ref, o_ref):
    o_ref[...] = r_ref[...] + jnp.maximum(y_ref[...] * sc_ref[...] + sh_ref[...], 0.0)


# ------------------------------ kernel wrappers ------------------------------ #

def conv3x3_stats(x, w_packed, b_packed, in_scale=None, in_shift=None):
    """3x3 same conv + bias (optionally fusing the previous layer's BN+ReLU into the
    input prologue). Returns (y_raw, per-channel [sum, sum_sq])."""
    n, h, wd, cin_p = x.shape
    cout_p = w_packed.shape[1]
    fuse = in_scale is not None

    bytes_per_row = 4 * ((wd + 2) * cin_p + 3 * wd * 3 * cin_p + 3 * wd * cout_p)
    th = _choose_tile_h(h, bytes_per_row, _CONV_VMEM_BUDGET)
    n_h = h // th

    xp = jnp.pad(x, ((0, 0), (1, 1), (1, 1), (0, 0)))   # spatial halo only

    in_specs = [
        pl.BlockSpec(memory_space=pl.ANY),                        # raw HBM; halo DMA'd in-kernel
        pl.BlockSpec((9 * cin_p, cout_p), lambda i, j: (0, 0)),
        pl.BlockSpec((1, cout_p), lambda i, j: (0, 0)),
    ]
    args = [xp, w_packed, b_packed]
    if fuse:
        vec_spec = pl.BlockSpec((1, cin_p), lambda i, j: (0, 0))
        in_specs += [vec_spec, vec_spec]
        args += [in_scale.reshape(1, cin_p), in_shift.reshape(1, cin_p)]

    y, stats = pl.pallas_call(
        functools.partial(_conv3x3_kernel, fuse_input=fuse),
        out_shape=(jax.ShapeDtypeStruct((n, h, wd, cout_p), jnp.float32),
                   jax.ShapeDtypeStruct((n, n_h, 2, cout_p), jnp.float32)),
        grid=(n, n_h),
        in_specs=in_specs,
        out_specs=(pl.BlockSpec((1, th, wd, cout_p), lambda i, j: (i, j, 0, 0)),
                   pl.BlockSpec((1, 1, 2, cout_p), lambda i, j: (i, j, 0, 0))),
        scratch_shapes=[pltpu.VMEM((th + 2, wd + 2, cin_p), jnp.float32),
                        pltpu.SemaphoreType.DMA((1,))],
        compiler_params=pltpu.CompilerParams(
            dimension_semantics=("parallel", "parallel"),
            vmem_limit_bytes=VMEM_LIMIT_BYTES),
    )(*args)
    return y, jnp.sum(stats, axis=(0, 1))     # (2, cout_p) total sum / sum-of-squares


def _bn_coeffs(stat_sums, gamma_p, beta_p, count, eps=1e-5):
    mean = stat_sums[0] / count
    var = jnp.maximum(stat_sums[1] / count - mean * mean, 0.0)   # biased batch var
    scale = gamma_p * jax.lax.rsqrt(var + eps)
    shift = beta_p - mean * scale
    return scale, shift


def bn_relu_apply(y, scale, shift, residual=None):
    """Fused y -> relu(y*scale + shift) [+ residual], lane-dense blocks."""
    n, h, wd, c = y.shape
    nbuf = 3 if residual is None else 4
    th = _choose_tile_h(h, 4 * wd * c * 2 * nbuf, _EW_VMEM_BUDGET)
    n_h = h // th

    blk = pl.BlockSpec((1, th, wd, c), lambda i, j: (i, j, 0, 0))
    vec = pl.BlockSpec((1, c), lambda i, j: (0, 0))
    cparams = pltpu.CompilerParams(dimension_semantics=("parallel", "parallel"),
                                   vmem_limit_bytes=VMEM_LIMIT_BYTES)
    out_shape = jax.ShapeDtypeStruct((n, h, wd, c), jnp.float32)
    sc2 = scale.reshape(1, c)
    sh2 = shift.reshape(1, c)

    if residual is None:
        return pl.pallas_call(_bn_relu_kernel, out_shape=out_shape, grid=(n, n_h),
                              in_specs=[blk, vec, vec], out_specs=blk,
                              compiler_params=cparams)(y, sc2, sh2)
    return pl.pallas_call(_bn_relu_res_kernel, out_shape=out_shape, grid=(n, n_h),
                          in_specs=[blk, vec, vec, blk], out_specs=blk,
                          compiler_params=cparams)(y, sc2, sh2, residual)


# ------------------------------ model (forward) ------------------------------ #

@jax.jit
def unet_forward(x_nchw, pp):
    n, cin, h, w = x_nchw.shape
    c0p = pp["w_1a"].shape[0] // 9          # padded input-channel count of layer 1a

    x = jnp.transpose(x_nchw, (0, 2, 3, 1))                       # NCHW -> NHWC (once)
    x = jnp.pad(x, ((0, 0), (0, 0), (0, 0), (0, c0p - cin)))      # lane-dense channels

    def dconv(x_in, la, lb, residual=None):
        n_, h_, w_, _ = x_in.shape
        cnt = n_ * h_ * w_
        y_a, s_a = conv3x3_stats(x_in, pp[f"w_{la}"], pp[f"b_{la}"])
        sc_a, sh_a = _bn_coeffs(s_a, pp[f"g_{la}"], pp[f"bt_{la}"], cnt)
        # layer-a's BN+ReLU is fused into layer-b's conv prologue (no extra pass)
        y_b, s_b = conv3x3_stats(y_a, pp[f"w_{lb}"], pp[f"b_{lb}"],
                                 in_scale=sc_a, in_shift=sh_a)
        sc_b, sh_b = _bn_coeffs(s_b, pp[f"g_{lb}"], pp[f"bt_{lb}"], cnt)
        return bn_relu_apply(y_b, sc_b, sh_b, residual=residual)

    sl = dconv(x, "1a", "1b")                                     # DoubleConv(in, 4*in)
    # TODO(synk): MaxPool2d(2) is a trivial bandwidth-bound reshuffle; left as XLA glue.
    pooled = sl.reshape(n, h // 2, 2, w // 2, 2, sl.shape[-1]).max(axis=(2, 4))
    xc = dconv(pooled, "2a", "2b", residual=pooled)               # Constant (residual)
    # TODO(synk): nearest Upsample(x2) + skip add left as fused XLA glue.
    sr = jnp.repeat(jnp.repeat(xc, 2, axis=1), 2, axis=2)
    skip = sl + sr
    out = dconv(skip, "3a", "3b")                                 # DoubleConv(4*in, in)

    out = out[..., :cin]                                          # drop channel padding
    return jnp.transpose(out, (0, 3, 1, 2))                       # NHWC -> NCHW (once)


# ------------------------------ parameters ------------------------------ #

def init_unet_params(key, in_ch):
    c1 = in_ch * 4
    layer_dims = {"1a": (in_ch, c1), "1b": (c1, c1),
                  "2a": (c1, c1), "2b": (c1, c1),
                  "3a": (c1, in_ch), "3b": (in_ch, in_ch)}   # (cin, cout)
    raw = {}
    keys = jax.random.split(key, len(layer_dims))
    for k, (name, (cin, cout)) in zip(keys, layer_dims.items()):
        kw, kb = jax.random.split(k)
        bound = 1.0 / (cin * 9) ** 0.5
        raw[f"w_{name}"] = jax.random.uniform(kw, (cout, cin, 3, 3), jnp.float32,
                                              -bound, bound)
        raw[f"b_{name}"] = jax.random.uniform(kb, (cout,), jnp.float32, -bound, bound)
        raw[f"g_{name}"] = jnp.ones((cout,), jnp.float32)      # BN gamma (PyTorch default)
        raw[f"bt_{name}"] = jnp.zeros((cout,), jnp.float32)    # BN beta
    return raw, layer_dims


def pack_unet_params(raw, layer_dims):
    """Zero-pad channels to 128-lane multiples and pack conv weights as (9*Cin_p, Cout_p)."""
    pp = {}
    for name, (cin, cout) in layer_dims.items():
        cin_p, cout_p = _round_up(cin), _round_up(cout)
        w = raw[f"w_{name}"]                                   # (cout, cin, 3, 3)
        w9 = jnp.transpose(w, (2, 3, 1, 0)).reshape(9, cin, cout)
        wp = jnp.zeros((9, cin_p, cout_p), jnp.float32).at[:, :cin, :cout].set(w9)
        pp[f"w_{name}"] = wp.reshape(9 * cin_p, cout_p)
        pp[f"b_{name}"] = jnp.zeros((1, cout_p), jnp.float32).at[0, :cout].set(
            raw[f"b_{name}"])
        # zero-padded gamma/beta keep padded channels exactly zero after BN+ReLU
        pp[f"g_{name}"] = jnp.zeros((cout_p,), jnp.float32).at[:cout].set(
            raw[f"g_{name}"])
        pp[f"bt_{name}"] = jnp.zeros((cout_p,), jnp.float32).at[:cout].set(
            raw[f"bt_{name}"])
    return pp


# ------------------------------ pure-JAX reference ------------------------------ #

@jax.jit
def _ref_unet(x_nchw, raw, eps=1e-5):
    x = jnp.transpose(x_nchw, (0, 2, 3, 1))

    def cbr(t, name):
        w_hwio = jnp.transpose(raw[f"w_{name}"], (2, 3, 1, 0))
        y = jax.lax.conv_general_dilated(
            t, w_hwio, (1, 1), "SAME",
            dimension_numbers=("NHWC", "HWIO", "NHWC"),
            precision=jax.lax.Precision.HIGHEST) + raw[f"b_{name}"]
        m = jnp.mean(y, axis=(0, 1, 2))
        v = jnp.var(y, axis=(0, 1, 2))
        return jnp.maximum((y - m) * (raw[f"g_{name}"] / jnp.sqrt(v + eps))
                           + raw[f"bt_{name}"], 0.0)

    def dconv(t, la, lb):
        return cbr(cbr(t, la), lb)

    n, h, w, _ = x.shape
    sl = dconv(x, "1a", "1b")
    pooled = sl.reshape(n, h // 2, 2, w // 2, 2, sl.shape[-1]).max(axis=(2, 4))
    xc = pooled + dconv(pooled, "2a", "2b")
    sr = jnp.repeat(jnp.repeat(xc, 2, axis=1), 2, axis=2)
    out = dconv(sl + sr, "3a", "3b")
    return jnp.transpose(out, (0, 3, 1, 2))


# ------------------------------ demo ------------------------------ #

if __name__ == "__main__":
    key = jax.random.PRNGKey(0)
    kx, kp = jax.random.split(key)

    N, IN_CH, H, W = 2, 4, 16, 16
    x = jax.random.normal(kx, (N, IN_CH, H, W), jnp.float32)     # NCHW like PyTorch

    raw, layer_dims = init_unet_params(kp, IN_CH)
    packed = pack_unet_params(raw, layer_dims)

    out = jax.block_until_ready(unet_forward(x, packed))
    assert out.shape == (N, IN_CH, H, W)
    assert bool(jnp.all(jnp.isfinite(out)))

    ref = jax.block_until_ready(_ref_unet(x, raw))
    err = float(jnp.max(jnp.abs(out - ref)))
    assert err < 5e-3, f"mismatch vs pure-JAX reference: max abs err = {err}"

    print("KERNEL_OK")
</pallas_src>

<mosaic_0001>
module attributes {stable_mosaic.version = 11 : i64} {
  func.func @_conv3x3_kernel(%arg0: i32, %arg1: i32, %arg2: memref<2x18x18x128xf32, #tpu.memory_space<any>>, %arg3: memref<1152x128xf32, #tpu.memory_space<vmem>>, %arg4: memref<1x128xf32, #tpu.memory_space<vmem>>, %arg5: memref<1x8x16x128xf32, #tpu.memory_space<vmem>>, %arg6: memref<1x1x2x128xf32, #tpu.memory_space<vmem>>, %arg7: memref<10x18x128xf32, #tpu.memory_space<vmem>>, %arg8: memref<1x!tpu.dma_semaphore, #tpu.memory_space<semaphore_mem>>) attributes {dimension_semantics = [#tpu.dimension_semantics<parallel>, #tpu.dimension_semantics<parallel>], iteration_bounds = array<i64: 2, 2>, scalar_prefetch = 0 : i64, scratch_operands = 2 : i64, tpu.core_type = #tpu.core_type<tc>, window_params = [{}, {pipeline_mode = #tpu.pipeline_mode<synchronous>, transform_indices = @transform_1, window_bounds = array<i64: 1152, 128>}, {pipeline_mode = #tpu.pipeline_mode<synchronous>, transform_indices = @transform_2, window_bounds = array<i64: 1, 128>}, {transform_indices = @transform_3, window_bounds = array<i64: 1, 8, 16, 128>}, {transform_indices = @transform_4, window_bounds = array<i64: 1, 1, 2, 128>}]} {
    %c8_i32 = arith.constant 8 : i32
    %0 = arith.muli %arg1, %c8_i32 : i32
    %c0_i32 = arith.constant 0 : i32
    %c0_i32_0 = arith.constant 0 : i32
    %c0_i32_1 = arith.constant 0 : i32
    %1 = tpu.memref_slice %arg2[%arg0, %0, %c0_i32_0, %c0_i32_1] : memref<2x18x18x128xf32, #tpu.memory_space<any>> -> memref<1x10x18x128xf32, #tpu.memory_space<any>>
    %2 = tpu.memref_squeeze %1 : memref<1x10x18x128xf32, #tpu.memory_space<any>> -> memref<10x18x128xf32, #tpu.memory_space<any>>
    %3 = tpu.memref_slice %arg8[%c0_i32] : memref<1x!tpu.dma_semaphore, #tpu.memory_space<semaphore_mem>> -> memref<1x!tpu.dma_semaphore, #tpu.memory_space<semaphore_mem>>
    %4 = tpu.memref_squeeze %3 : memref<1x!tpu.dma_semaphore, #tpu.memory_space<semaphore_mem>> -> memref<!tpu.dma_semaphore, #tpu.memory_space<semaphore_mem>>
    tpu.enqueue_dma source(%2 : memref<10x18x128xf32, #tpu.memory_space<any>>) target(%arg7 : memref<10x18x128xf32, #tpu.memory_space<vmem>>) target_semaphore(%4 : memref<!tpu.dma_semaphore, #tpu.memory_space<semaphore_mem>>)
    %c0_i32_2 = arith.constant 0 : i32
    %c0_i32_3 = arith.constant 0 : i32
    %c0_i32_4 = arith.constant 0 : i32
    %5 = tpu.memref_slice %arg2[%arg0, %0, %c0_i32_3, %c0_i32_4] : memref<2x18x18x128xf32, #tpu.memory_space<any>> -> memref<1x10x18x128xf32, #tpu.memory_space<any>>
    %6 = tpu.memref_squeeze %5 : memref<1x10x18x128xf32, #tpu.memory_space<any>> -> memref<10x18x128xf32, #tpu.memory_space<any>>
    %7 = tpu.memref_slice %arg8[%c0_i32_2] : memref<1x!tpu.dma_semaphore, #tpu.memory_space<semaphore_mem>> -> memref<1x!tpu.dma_semaphore, #tpu.memory_space<semaphore_mem>>
    %8 = tpu.memref_squeeze %7 : memref<1x!tpu.dma_semaphore, #tpu.memory_space<semaphore_mem>> -> memref<!tpu.dma_semaphore, #tpu.memory_space<semaphore_mem>>
    tpu.wait_dma2 semaphore(%8 : memref<!tpu.dma_semaphore, #tpu.memory_space<semaphore_mem>>) src(%6 : memref<10x18x128xf32, #tpu.memory_space<any>>) dst(%arg7 : memref<10x18x128xf32, #tpu.memory_space<vmem>>)
    %c0 = arith.constant 0 : index
    %c0_5 = arith.constant 0 : index
    %c0_6 = arith.constant 0 : index
    %9 = vector.load %arg7[%c0, %c0_5, %c0_6] : memref<10x18x128xf32, #tpu.memory_space<vmem>>, vector<10x18x128xf32>
    %cst = arith.constant 0.000000e+00 : f32
    %10 = vector.broadcast %cst : f32 to vector<128x128xf32>
    %11 = vector.extract_strided_slice %9 {offsets = [0, 0, 0], sizes = [8, 16, 128], strides = [1, 1, 1]} : vector<10x18x128xf32> to vector<8x16x128xf32>
    %12 = vector.extract_strided_slice %9 {offsets = [0, 1, 0], sizes = [8, 16, 128], strides = [1, 1, 1]} : vector<10x18x128xf32> to vector<8x16x128xf32>
    %13 = vector.extract_strided_slice %9 {offsets = [0, 2, 0], sizes = [8, 16, 128], strides = [1, 1, 1]} : vector<10x18x128xf32> to vector<8x16x128xf32>
    %14 = tpu.concatenate %11, %12, %13 in 2 : vector<8x16x128xf32>, vector<8x16x128xf32>, vector<8x16x128xf32> -> vector<8x16x384xf32>
    %15 = vector.shape_cast %14 : vector<8x16x384xf32> to vector<128x384xf32>
    %c0_7 = arith.constant 0 : index
    %c0_8 = arith.constant 0 : index
    %16 = vector.load %arg3[%c0_7, %c0_8] : memref<1152x128xf32, #tpu.memory_space<vmem>>, vector<384x128xf32>
    %cst_9 = arith.constant dense<0.000000e+00> : vector<128x128xf32>
    %17 = tpu.matmul %15, %16, %cst_9 {dimension_numbers = #tpu.dot_dimension_numbers<[1], [0], [0], [1], [0, 0, 1, 1], [], []>} : vector<128x384xf32>, vector<384x128xf32>, vector<128x128xf32> -> vector<128x128xf32>
    %18 = arith.addf %10, %17 : vector<128x128xf32>
    %19 = vector.extract_strided_slice %9 {offsets = [1, 0, 0], sizes = [8, 16, 128], strides = [1, 1, 1]} : vector<10x18x128xf32> to vector<8x16x128xf32>
    %20 = vector.extract_strided_slice %9 {offsets = [1, 1, 0], sizes = [8, 16, 128], strides = [1, 1, 1]} : vector<10x18x128xf32> to vector<8x16x128xf32>
    %21 = vector.extract_strided_slice %9 {offsets = [1, 2, 0], sizes = [8, 16, 128], strides = [1, 1, 1]} : vector<10x18x128xf32> to vector<8x16x128xf32>
    %22 = tpu.concatenate %19, %20, %21 in 2 : vector<8x16x128xf32>, vector<8x16x128xf32>, vector<8x16x128xf32> -> vector<8x16x384xf32>
    %23 = vector.shape_cast %22 : vector<8x16x384xf32> to vector<128x384xf32>
    %c384 = arith.constant 384 : index
    %c0_10 = arith.constant 0 : index
    %24 = vector.load %arg3[%c384, %c0_10] : memref<1152x128xf32, #tpu.memory_space<vmem>>, vector<384x128xf32>
    %cst_11 = arith.constant dense<0.000000e+00> : vector<128x128xf32>
    %25 = tpu.matmul %23, %24, %cst_11 {dimension_numbers = #tpu.dot_dimension_numbers<[1], [0], [0], [1], [0, 0, 1, 1], [], []>} : vector<128x384xf32>, vector<384x128xf32>, vector<128x128xf32> -> vector<128x128xf32>
    %26 = arith.addf %18, %25 : vector<128x128xf32>
    %27 = vector.extract_strided_slice %9 {offsets = [2, 0, 0], sizes = [8, 16, 128], strides = [1, 1, 1]} : vector<10x18x128xf32> to vector<8x16x128xf32>
    %28 = vector.extract_strided_slice %9 {offsets = [2, 1, 0], sizes = [8, 16, 128], strides = [1, 1, 1]} : vector<10x18x128xf32> to vector<8x16x128xf32>
    %29 = vector.extract_strided_slice %9 {offsets = [2, 2, 0], sizes = [8, 16, 128], strides = [1, 1, 1]} : vector<10x18x128xf32> to vector<8x16x128xf32>
    %30 = tpu.concatenate %27, %28, %29 in 2 : vector<8x16x128xf32>, vector<8x16x128xf32>, vector<8x16x128xf32> -> vector<8x16x384xf32>
    %31 = vector.shape_cast %30 : vector<8x16x384xf32> to vector<128x384xf32>
    %c768 = arith.constant 768 : index
    %c0_12 = arith.constant 0 : index
    %32 = vector.load %arg3[%c768, %c0_12] : memref<1152x128xf32, #tpu.memory_space<vmem>>, vector<384x128xf32>
    %cst_13 = arith.constant dense<0.000000e+00> : vector<128x128xf32>
    %33 = tpu.matmul %31, %32, %cst_13 {dimension_numbers = #tpu.dot_dimension_numbers<[1], [0], [0], [1], [0, 0, 1, 1], [], []>} : vector<128x384xf32>, vector<384x128xf32>, vector<128x128xf32> -> vector<128x128xf32>
    %34 = arith.addf %26, %33 : vector<128x128xf32>
    %c0_14 = arith.constant 0 : index
    %c0_15 = arith.constant 0 : index
    %35 = vector.load %arg4[%c0_14, %c0_15] : memref<1x128xf32, #tpu.memory_space<vmem>>, vector<1x128xf32>
    %36 = vector.broadcast %35 : vector<1x128xf32> to vector<128x128xf32>
    %37 = arith.addf %34, %36 : vector<128x128xf32>
    %cst_16 = arith.constant dense<0.000000e+00> : vector<128xf32>
    %38 = vector.multi_reduction <add>, %37, %cst_16 [0] : vector<128x128xf32> to vector<128xf32>
    %39 = vector.shape_cast %38 : vector<128xf32> to vector<1x128xf32>
    %c0_17 = arith.constant 0 : index
    %c0_18 = arith.constant 0 : index
    %c0_19 = arith.constant 0 : index
    %c0_20 = arith.constant 0 : index
    %40 = vector.load %arg6[%c0_17, %c0_18, %c0_19, %c0_20] : memref<1x1x2x128xf32, #tpu.memory_space<vmem>>, vector<1x1x1x128xf32>
    %41 = vector.shape_cast %40 : vector<1x1x1x128xf32> to vector<1x128xf32>
    %42 = vector.shape_cast %39 : vector<1x128xf32> to vector<1x1x1x128xf32>
    tpu.vector_store %arg6[%c0_17, %c0_18, %c0_19, %c0_20], %42 {strides = array<i32>} : memref<1x1x2x128xf32, #tpu.memory_space<vmem>>, vector<1x1x1x128xf32>,
    %43 = arith.mulf %37, %37 : vector<128x128xf32>
    %cst_21 = arith.constant dense<0.000000e+00> : vector<128xf32>
    %44 = vector.multi_reduction <add>, %43, %cst_21 [0] : vector<128x128xf32> to vector<128xf32>
    %45 = vector.shape_cast %44 : vector<128xf32> to vector<1x128xf32>
    %c0_22 = arith.constant 0 : index
    %c0_23 = arith.constant 0 : index
    %c1 = arith.constant 1 : index
    %c0_24 = arith.constant 0 : index
    %46 = vector.load %arg6[%c0_22, %c0_23, %c1, %c0_24] : memref<1x1x2x128xf32, #tpu.memory_space<vmem>>, vector<1x1x1x128xf32>
    %47 = vector.shape_cast %46 : vector<1x1x1x128xf32> to vector<1x128xf32>
    %48 = vector.shape_cast %45 : vector<1x128xf32> to vector<1x1x1x128xf32>
    tpu.vector_store %arg6[%c0_22, %c0_23, %c1, %c0_24], %48 {strides = array<i32>} : memref<1x1x2x128xf32, #tpu.memory_space<vmem>>, vector<1x1x1x128xf32>,
    %49 = vector.shape_cast %37 : vector<128x128xf32> to vector<8x16x128xf32>
    %c0_25 = arith.constant 0 : index
    %c0_26 = arith.constant 0 : index
    %c0_27 = arith.constant 0 : index
    %c0_28 = arith.constant 0 : index
    %50 = vector.load %arg5[%c0_25, %c0_26, %c0_27, %c0_28] : memref<1x8x16x128xf32, #tpu.memory_space<vmem>>, vector<1x8x16x128xf32>
    %51 = vector.shape_cast %50 : vector<1x8x16x128xf32> to vector<8x16x128xf32>
    %52 = vector.shape_cast %49 : vector<8x16x128xf32> to vector<1x8x16x128xf32>
    tpu.vector_store %arg5[%c0_25, %c0_26, %c0_27, %c0_28], %52 {strides = array<i32>} : memref<1x8x16x128xf32, #tpu.memory_space<vmem>>, vector<1x8x16x128xf32>,
    return
  }
  func.func @transform_1(%arg0: i32, %arg1: i32) -> (i32, i32) {
    %c0_i32 = arith.constant 0 : i32
    %c0_i32_0 = arith.constant 0 : i32
    %c0_i32_1 = arith.constant 0 : i32
    return %c0_i32, %c0_i32_0 : i32, i32
  }
  func.func @transform_2(%arg0: i32, %arg1: i32) -> (i32, i32) {
    %c0_i32 = arith.constant 0 : i32
    %c0_i32_0 = arith.constant 0 : i32
    %c0_i32_1 = arith.constant 0 : i32
    return %c0_i32, %c0_i32_0 : i32, i32
  }
  func.func @transform_3(%arg0: i32, %arg1: i32) -> (i32, i32, i32, i32) {
    %c0_i32 = arith.constant 0 : i32
    %c0_i32_0 = arith.constant 0 : i32
    %c0_i32_1 = arith.constant 0 : i32
    return %arg0, %arg1, %c0_i32, %c0_i32_0 : i32, i32, i32, i32
  }
  func.func @transform_4(%arg0: i32, %arg1: i32) -> (i32, i32, i32, i32) {
    %c0_i32 = arith.constant 0 : i32
    %c0_i32_0 = arith.constant 0 : i32
    %c0_i32_1 = arith.constant 0 : i32
    return %arg0, %arg1, %c0_i32, %c0_i32_0 : i32, i32, i32, i32
  }
}

module attributes {stable_mosaic.version = 11 : i64} {
  func.func @_conv3x3_kernel(%arg0: i32, %arg1: i32, %arg2: memref<2x18x18x128xf32, #tpu.memory_space<any>>, %arg3: memref<1152x128xf32, #tpu.memory_space<vmem>>, %arg4: memref<1x128xf32, #tpu.memory_space<vmem>>, %arg5: memref<1x128xf32, #tpu.memory_space<vmem>>, %arg6: memref<1x128xf32, #tpu.memory_space<vmem>>, %arg7: memref<1x8x16x128xf32, #tpu.memory_space<vmem>>, %arg8: memref<1x1x2x128xf32, #tpu.memory_space<vmem>>, %arg9: memref<10x18x128xf32, #tpu.memory_space<vmem>>, %arg10: memref<1x!tpu.dma_semaphore, #tpu.memory_space<semaphore_mem>>) attributes {dimension_semantics = [#tpu.dimension_semantics<parallel>, #tpu.dimension_semantics<parallel>], iteration_bounds = array<i64: 2, 2>, scalar_prefetch = 0 : i64, scratch_operands = 2 : i64, tpu.core_type = #tpu.core_type<tc>, window_params = [{}, {pipeline_mode = #tpu.pipeline_mode<synchronous>, transform_indices = @transform_1, window_bounds = array<i64: 1152, 128>}, {pipeline_mode = #tpu.pipeline_mode<synchronous>, transform_indices = @transform_2, window_bounds = array<i64: 1, 128>}, {pipeline_mode = #tpu.pipeline_mode<synchronous>, transform_indices = @transform_3, window_bounds = array<i64: 1, 128>}, {pipeline_mode = #tpu.pipeline_mode<synchronous>, transform_indices = @transform_4, window_bounds = array<i64: 1, 128>}, {transform_indices = @transform_5, window_bounds = array<i64: 1, 8, 16, 128>}, {transform_indices = @transform_6, window_bounds = array<i64: 1, 1, 2, 128>}]} {
    %c8_i32 = arith.constant 8 : i32
    %0 = arith.muli %arg1, %c8_i32 : i32
    %c0_i32 = arith.constant 0 : i32
    %c0_i32_0 = arith.constant 0 : i32
    %c0_i32_1 = arith.constant 0 : i32
    %1 = tpu.memref_slice %arg2[%arg0, %0, %c0_i32_0, %c0_i32_1] : memref<2x18x18x128xf32, #tpu.memory_space<any>> -> memref<1x10x18x128xf32, #tpu.memory_space<any>>
    %2 = tpu.memref_squeeze %1 : memref<1x10x18x128xf32, #tpu.memory_space<any>> -> memref<10x18x128xf32, #tpu.memory_space<any>>
    %3 = tpu.memref_slice %arg10[%c0_i32] : memref<1x!tpu.dma_semaphore, #tpu.memory_space<semaphore_mem>> -> memref<1x!tpu.dma_semaphore, #tpu.memory_space<semaphore_mem>>
    %4 = tpu.memref_squeeze %3 : memref<1x!tpu.dma_semaphore, #tpu.memory_space<semaphore_mem>> -> memref<!tpu.dma_semaphore, #tpu.memory_space<semaphore_mem>>
    tpu.enqueue_dma source(%2 : memref<10x18x128xf32, #tpu.memory_space<any>>) target(%arg9 : memref<10x18x128xf32, #tpu.memory_space<vmem>>) target_semaphore(%4 : memref<!tpu.dma_semaphore, #tpu.memory_space<semaphore_mem>>)
    %c0_i32_2 = arith.constant 0 : i32
    %c0_i32_3 = arith.constant 0 : i32
    %c0_i32_4 = arith.constant 0 : i32
    %5 = tpu.memref_slice %arg2[%arg0, %0, %c0_i32_3, %c0_i32_4] : memref<2x18x18x128xf32, #tpu.memory_space<any>> -> memref<1x10x18x128xf32, #tpu.memory_space<any>>
    %6 = tpu.memref_squeeze %5 : memref<1x10x18x128xf32, #tpu.memory_space<any>> -> memref<10x18x128xf32, #tpu.memory_space<any>>
    %7 = tpu.memref_slice %arg10[%c0_i32_2] : memref<1x!tpu.dma_semaphore, #tpu.memory_space<semaphore_mem>> -> memref<1x!tpu.dma_semaphore, #tpu.memory_space<semaphore_mem>>
    %8 = tpu.memref_squeeze %7 : memref<1x!tpu.dma_semaphore, #tpu.memory_space<semaphore_mem>> -> memref<!tpu.dma_semaphore, #tpu.memory_space<semaphore_mem>>
    tpu.wait_dma2 semaphore(%8 : memref<!tpu.dma_semaphore, #tpu.memory_space<semaphore_mem>>) src(%6 : memref<10x18x128xf32, #tpu.memory_space<any>>) dst(%arg9 : memref<10x18x128xf32, #tpu.memory_space<vmem>>)
    %c0 = arith.constant 0 : index
    %c0_5 = arith.constant 0 : index
    %c0_6 = arith.constant 0 : index
    %9 = vector.load %arg9[%c0, %c0_5, %c0_6] : memref<10x18x128xf32, #tpu.memory_space<vmem>>, vector<10x18x128xf32>
    %c0_7 = arith.constant 0 : index
    %c0_8 = arith.constant 0 : index
    %10 = vector.load %arg5[%c0_7, %c0_8] : memref<1x128xf32, #tpu.memory_space<vmem>>, vector<1x128xf32>
    %11 = vector.shape_cast %10 : vector<1x128xf32> to vector<1x1x128xf32>
    %12 = vector.broadcast %11 : vector<1x1x128xf32> to vector<10x18x128xf32>
    %13 = arith.mulf %9, %12 : vector<10x18x128xf32>
    %c0_9 = arith.constant 0 : index
    %c0_10 = arith.constant 0 : index
    %14 = vector.load %arg6[%c0_9, %c0_10] : memref<1x128xf32, #tpu.memory_space<vmem>>, vector<1x128xf32>
    %15 = vector.shape_cast %14 : vector<1x128xf32> to vector<1x1x128xf32>
    %16 = vector.broadcast %15 : vector<1x1x128xf32> to vector<10x18x128xf32>
    %17 = arith.addf %13, %16 : vector<10x18x128xf32>
    %cst = arith.constant 0.000000e+00 : f32
    %18 = vector.broadcast %cst : f32 to vector<10x18x128xf32>
    %19 = arith.maximumf %17, %18 : vector<10x18x128xf32>
    %c0_11 = arith.constant 0 : index
    %c0_12 = arith.constant 0 : index
    %c0_13 = arith.constant 0 : index
    %20 = vector.load %arg9[%c0_11, %c0_12, %c0_13] : memref<10x18x128xf32, #tpu.memory_space<vmem>>, vector<10x18x128xf32>
    tpu.vector_store %arg9[%c0_11, %c0_12, %c0_13], %19 {strides = array<i32>} : memref<10x18x128xf32, #tpu.memory_space<vmem>>, vector<10x18x128xf32>,
    %cst_14 = arith.constant 0.000000e+00 : f32
    %21 = vector.broadcast %cst_14 : f32 to vector<10x128xf32>
    %c0_15 = arith.constant 0 : index
    %c0_16 = arith.constant 0 : index
    %c0_17 = arith.constant 0 : index
    %22 = vector.load %arg9[%c0_15, %c0_16, %c0_17] : memref<10x18x128xf32, #tpu.memory_space<vmem>>, vector<10x1x128xf32>
    %23 = vector.shape_cast %22 : vector<10x1x128xf32> to vector<10x128xf32>
    %24 = vector.shape_cast %21 : vector<10x128xf32> to vector<10x1x128xf32>
    tpu.vector_store %arg9[%c0_15, %c0_16, %c0_17], %24 {strides = array<i32>} : memref<10x18x128xf32, #tpu.memory_space<vmem>>, vector<10x1x128xf32>,
    %c0_18 = arith.constant 0 : index
    %c17 = arith.constant 17 : index
    %c0_19 = arith.constant 0 : index
    %25 = vector.load %arg9[%c0_18, %c17, %c0_19] : memref<10x18x128xf32, #tpu.memory_space<vmem>>, vector<10x1x128xf32>
    %26 = vector.shape_cast %25 : vector<10x1x128xf32> to vector<10x128xf32>
    %27 = vector.shape_cast %21 : vector<10x128xf32> to vector<10x1x128xf32>
    tpu.vector_store %arg9[%c0_18, %c17, %c0_19], %27 {strides = array<i32>} : memref<10x18x128xf32, #tpu.memory_space<vmem>>, vector<10x1x128xf32>,
    %cst_20 = arith.constant 0.000000e+00 : f32
    %28 = vector.broadcast %cst_20 : f32 to vector<18x128xf32>
    %c0_i32_21 = arith.constant 0 : i32
    %29 = arith.cmpi eq, %arg1, %c0_i32_21 : i32
    %30 = arith.extui %29 : i1 to i32
    %c0_i32_22 = arith.constant 0 : i32
    %31 = arith.cmpi ne, %30, %c0_i32_22 : i32
    scf.if %31 {
      %c0_50 = arith.constant 0 : index
      %c0_51 = arith.constant 0 : index
      %c0_52 = arith.constant 0 : index
      %79 = vector.load %arg9[%c0_50, %c0_51, %c0_52] : memref<10x18x128xf32, #tpu.memory_space<vmem>>, vector<1x18x128xf32>
      %80 = vector.shape_cast %79 : vector<1x18x128xf32> to vector<18x128xf32>
      %81 = vector.shape_cast %28 : vector<18x128xf32> to vector<1x18x128xf32>
      tpu.vector_store %arg9[%c0_50, %c0_51, %c0_52], %81 {strides = array<i32>} : memref<10x18x128xf32, #tpu.memory_space<vmem>>, vector<1x18x128xf32>,
    } else {
    }
    %c1_i32 = arith.constant 1 : i32
    %32 = arith.cmpi eq, %arg1, %c1_i32 : i32
    %33 = arith.extui %32 : i1 to i32
    %c0_i32_23 = arith.constant 0 : i32
    %34 = arith.cmpi ne, %33, %c0_i32_23 : i32
    scf.if %34 {
      %c9 = arith.constant 9 : index
      %c0_50 = arith.constant 0 : index
      %c0_51 = arith.constant 0 : index
      %79 = vector.load %arg9[%c9, %c0_50, %c0_51] : memref<10x18x128xf32, #tpu.memory_space<vmem>>, vector<1x18x128xf32>
      %80 = vector.shape_cast %79 : vector<1x18x128xf32> to vector<18x128xf32>
      %81 = vector.shape_cast %28 : vector<18x128xf32> to vector<1x18x128xf32>
      tpu.vector_store %arg9[%c9, %c0_50, %c0_51], %81 {strides = array<i32>} : memref<10x18x128xf32, #tpu.memory_space<vmem>>, vector<1x18x128xf32>,
    } else {
    }
    %c0_24 = arith.constant 0 : index
    %c0_25 = arith.constant 0 : index
    %c0_26 = arith.constant 0 : index
    %35 = vector.load %arg9[%c0_24, %c0_25, %c0_26] : memref<10x18x128xf32, #tpu.memory_space<vmem>>, vector<10x18x128xf32>
    %cst_27 = arith.constant 0.000000e+00 : f32
    %36 = vector.broadcast %cst_27 : f32 to vector<128x128xf32>
    %37 = vector.extract_strided_slice %35 {offsets = [0, 0, 0], sizes = [8, 16, 128], strides = [1, 1, 1]} : vector<10x18x128xf32> to vector<8x16x128xf32>
    %38 = vector.extract_strided_slice %35 {offsets = [0, 1, 0], sizes = [8, 16, 128], strides = [1, 1, 1]} : vector<10x18x128xf32> to vector<8x16x128xf32>
    %39 = vector.extract_strided_slice %35 {offsets = [0, 2, 0], sizes = [8, 16, 128], strides = [1, 1, 1]} : vector<10x18x128xf32> to vector<8x16x128xf32>
    %40 = tpu.concatenate %37, %38, %39 in 2 : vector<8x16x128xf32>, vector<8x16x128xf32>, vector<8x16x128xf32> -> vector<8x16x384xf32>
    %41 = vector.shape_cast %40 : vector<8x16x384xf32> to vector<128x384xf32>
    %c0_28 = arith.constant 0 : index
    %c0_29 = arith.constant 0 : index
    %42 = vector.load %arg3[%c0_28, %c0_29] : memref<1152x128xf32, #tpu.memory_space<vmem>>, vector<384x128xf32>
    %cst_30 = arith.constant dense<0.000000e+00> : vector<128x128xf32>
    %43 = tpu.matmul %41, %42, %cst_30 {dimension_numbers = #tpu.dot_dimension_numbers<[1], [0], [0], [1], [0, 0, 1, 1], [], []>} : vector<128x384xf32>, vector<384x128xf32>, vector<128x128xf32> -> vector<128x128xf32>
    %44 = arith.addf %36, %43 : vector<128x128xf32>
    %45 = vector.extract_strided_slice %35 {offsets = [1, 0, 0], sizes = [8, 16, 128], strides = [1, 1, 1]} : vector<10x18x128xf32> to vector<8x16x128xf32>
    %46 = vector.extract_strided_slice %35 {offsets = [1, 1, 0], sizes = [8, 16, 128], strides = [1, 1, 1]} : vector<10x18x128xf32> to vector<8x16x128xf32>
    %47 = vector.extract_strided_slice %35 {offsets = [1, 2, 0], sizes = [8, 16, 128], strides = [1, 1, 1]} : vector<10x18x128xf32> to vector<8x16x128xf32>
    %48 = tpu.concatenate %45, %46, %47 in 2 : vector<8x16x128xf32>, vector<8x16x128xf32>, vector<8x16x128xf32> -> vector<8x16x384xf32>
    %49 = vector.shape_cast %48 : vector<8x16x384xf32> to vector<128x384xf32>
    %c384 = arith.constant 384 : index
    %c0_31 = arith.constant 0 : index
    %50 = vector.load %arg3[%c384, %c0_31] : memref<1152x128xf32, #tpu.memory_space<vmem>>, vector<384x128xf32>
    %cst_32 = arith.constant dense<0.000000e+00> : vector<128x128xf32>
    %51 = tpu.matmul %49, %50, %cst_32 {dimension_numbers = #tpu.dot_dimension_numbers<[1], [0], [0], [1], [0, 0, 1, 1], [], []>} : vector<128x384xf32>, vector<384x128xf32>, vector<128x128xf32> -> vector<128x128xf32>
    %52 = arith.addf %44, %51 : vector<128x128xf32>
    %53 = vector.extract_strided_slice %35 {offsets = [2, 0, 0], sizes = [8, 16, 128], strides = [1, 1, 1]} : vector<10x18x128xf32> to vector<8x16x128xf32>
    %54 = vector.extract_strided_slice %35 {offsets = [2, 1, 0], sizes = [8, 16, 128], strides = [1, 1, 1]} : vector<10x18x128xf32> to vector<8x16x128xf32>
    %55 = vector.extract_strided_slice %35 {offsets = [2, 2, 0], sizes = [8, 16, 128], strides = [1, 1, 1]} : vector<10x18x128xf32> to vector<8x16x128xf32>
    %56 = tpu.concatenate %53, %54, %55 in 2 : vector<8x16x128xf32>, vector<8x16x128xf32>, vector<8x16x128xf32> -> vector<8x16x384xf32>
    %57 = vector.shape_cast %56 : vector<8x16x384xf32> to vector<128x384xf32>
    %c768 = arith.constant 768 : index
    %c0_33 = arith.constant 0 : index
    %58 = vector.load %arg3[%c768, %c0_33] : memref<1152x128xf32, #tpu.memory_space<vmem>>, vector<384x128xf32>
    %cst_34 = arith.constant dense<0.000000e+00> : vector<128x128xf32>
    %59 = tpu.matmul %57, %58, %cst_34 {dimension_numbers = #tpu.dot_dimension_numbers<[1], [0], [0], [1], [0, 0, 1, 1], [], []>} : vector<128x384xf32>, vector<384x128xf32>, vector<128x128xf32> -> vector<128x128xf32>
    %60 = arith.addf %52, %59 : vector<128x128xf32>
    %c0_35 = arith.constant 0 : index
    %c0_36 = arith.constant 0 : index
    %61 = vector.load %arg4[%c0_35, %c0_36] : memref<1x128xf32, #tpu.memory_space<vmem>>, vector<1x128xf32>
    %62 = vector.broadcast %61 : vector<1x128xf32> to vector<128x128xf32>
    %63 = arith.addf %60, %62 : vector<128x128xf32>
    %cst_37 = arith.constant dense<0.000000e+00> : vector<128xf32>
    %64 = vector.multi_reduction <add>, %63, %cst_37 [0] : vector<128x128xf32> to vector<128xf32>
    %65 = vector.shape_cast %64 : vector<128xf32> to vector<1x128xf32>
    %c0_38 = arith.constant 0 : index
    %c0_39 = arith.constant 0 : index
    %c0_40 = arith.constant 0 : index
    %c0_41 = arith.constant 0 : index
    %66 = vector.load %arg8[%c0_38, %c0_39, %c0_40, %c0_41] : memref<1x1x2x128xf32, #tpu.memory_space<vmem>>, vector<1x1x1x128xf32>
    %67 = vector.shape_cast %66 : vector<1x1x1x128xf32> to vector<1x128xf32>
    %68 = vector.shape_cast %65 : vector<1x128xf32> to vector<1x1x1x128xf32>
    tpu.vector_store %arg8[%c0_38, %c0_39, %c0_40, %c0_41], %68 {strides = array<i32>} : memref<1x1x2x128xf32, #tpu.memory_space<vmem>>, vector<1x1x1x128xf32>,
    %69 = arith.mulf %63, %63 : vector<128x128xf32>
    %cst_42 = arith.constant dense<0.000000e+00> : vector<128xf32>
    %70 = vector.multi_reduction <add>, %69, %cst_42 [0] : vector<128x128xf32> to vector<128xf32>
    %71 = vector.shape_cast %70 : vector<128xf32> to vector<1x128xf32>
    %c0_43 = arith.constant 0 : index
    %c0_44 = arith.constant 0 : index
    %c1 = arith.constant 1 : index
    %c0_45 = arith.constant 0 : index
    %72 = vector.load %arg8[%c0_43, %c0_44, %c1, %c0_45] : memref<1x1x2x128xf32, #tpu.memory_space<vmem>>, vector<1x1x1x128xf32>
    %73 = vector.shape_cast %72 : vector<1x1x1x128xf32> to vector<1x128xf32>
    %74 = vector.shape_cast %71 : vector<1x128xf32> to vector<1x1x1x128xf32>
    tpu.vector_store %arg8[%c0_43, %c0_44, %c1, %c0_45], %74 {strides = array<i32>} : memref<1x1x2x128xf32, #tpu.memory_space<vmem>>, vector<1x1x1x128xf32>,
    %75 = vector.shape_cast %63 : vector<128x128xf32> to vector<8x16x128xf32>
    %c0_46 = arith.constant 0 : index
    %c0_47 = arith.constant 0 : index
    %c0_48 = arith.constant 0 : index
    %c0_49 = arith.constant 0 : index
    %76 = vector.load %arg7[%c0_46, %c0_47, %c0_48, %c0_49] : memref<1x8x16x128xf32, #tpu.memory_space<vmem>>, vector<1x8x16x128xf32>
    %77 = vector.shape_cast %76 : vector<1x8x16x128xf32> to vector<8x16x128xf32>
    %78 = vector.shape_cast %75 : vector<8x16x128xf32> to vector<1x8x16x128xf32>
    tpu.vector_store %arg7[%c0_46, %c0_47, %c0_48, %c0_49], %78 {strides = array<i32>} : memref<1x8x16x128xf32, #tpu.memory_space<vmem>>, vector<1x8x16x128xf32>,
    return
  }
  func.func @transform_1(%arg0: i32, %arg1: i32) -> (i32, i32) {
    %c0_i32 = arith.constant 0 : i32
    %c0_i32_0 = arith.constant 0 : i32
    %c0_i32_1 = arith.constant 0 : i32
    return %c0_i32, %c0_i32_0 : i32, i32
  }
  func.func @transform_2(%arg0: i32, %arg1: i32) -> (i32, i32) {
    %c0_i32 = arith.constant 0 : i32
    %c0_i32_0 = arith.constant 0 : i32
    %c0_i32_1 = arith.constant 0 : i32
    return %c0_i32, %c0_i32_0 : i32, i32
  }
  func.func @transform_3(%arg0: i32, %arg1: i32) -> (i32, i32) {
    %c0_i32 = arith.constant 0 : i32
    %c0_i32_0 = arith.constant 0 : i32
    %c0_i32_1 = arith.constant 0 : i32
    return %c0_i32, %c0_i32_0 : i32, i32
  }
  func.func @transform_4(%arg0: i32, %arg1: i32) -> (i32, i32) {
    %c0_i32 = arith.constant 0 : i32
    %c0_i32_0 = arith.constant 0 : i32
    %c0_i32_1 = arith.constant 0 : i32
    return %c0_i32, %c0_i32_0 : i32, i32
  }
  func.func @transform_5(%arg0: i32, %arg1: i32) -> (i32, i32, i32, i32) {
    %c0_i32 = arith.constant 0 : i32
    %c0_i32_0 = arith.constant 0 : i32
    %c0_i32_1 = arith.constant 0 : i32
    return %arg0, %arg1, %c0_i32, %c0_i32_0 : i32, i32, i32, i32
  }
  func.func @transform_6(%arg0: i32, %arg1: i32) -> (i32, i32, i32, i32) {
    %c0_i32 = arith.constant 0 : i32
    %c0_i32_0 = arith.constant 0 : i32
    %c0_i32_1 = arith.constant 0 : i32
    return %arg0, %arg1, %c0_i32, %c0_i32_0 : i32, i32, i32, i32
  }
}

module attributes {stable_mosaic.version = 11 : i64} {
  func.func @_bn_relu_kernel(%arg0: i32, %arg1: i32, %arg2: memref<1x8x16x128xf32, #tpu.memory_space<vmem>>, %arg3: memref<1x128xf32, #tpu.memory_space<vmem>>, %arg4: memref<1x128xf32, #tpu.memory_space<vmem>>, %arg5: memref<1x8x16x128xf32, #tpu.memory_space<vmem>>) attributes {dimension_semantics = [#tpu.dimension_semantics<parallel>, #tpu.dimension_semantics<parallel>], iteration_bounds = array<i64: 2, 2>, scalar_prefetch = 0 : i64, scratch_operands = 0 : i64, tpu.core_type = #tpu.core_type<tc>, window_params = [{transform_indices = @transform_0, window_bounds = array<i64: 1, 8, 16, 128>}, {pipeline_mode = #tpu.pipeline_mode<synchronous>, transform_indices = @transform_1, window_bounds = array<i64: 1, 128>}, {pipeline_mode = #tpu.pipeline_mode<synchronous>, transform_indices = @transform_2, window_bounds = array<i64: 1, 128>}, {transform_indices = @transform_3, window_bounds = array<i64: 1, 8, 16, 128>}]} {
    %c0 = arith.constant 0 : index
    %c0_0 = arith.constant 0 : index
    %c0_1 = arith.constant 0 : index
    %c0_2 = arith.constant 0 : index
    %0 = vector.load %arg2[%c0, %c0_0, %c0_1, %c0_2] : memref<1x8x16x128xf32, #tpu.memory_space<vmem>>, vector<1x8x16x128xf32>
    %c0_3 = arith.constant 0 : index
    %c0_4 = arith.constant 0 : index
    %1 = vector.load %arg3[%c0_3, %c0_4] : memref<1x128xf32, #tpu.memory_space<vmem>>, vector<1x128xf32>
    %2 = vector.shape_cast %1 : vector<1x128xf32> to vector<1x1x1x128xf32>
    %3 = vector.broadcast %2 : vector<1x1x1x128xf32> to vector<1x8x16x128xf32>
    %4 = arith.mulf %0, %3 : vector<1x8x16x128xf32>
    %c0_5 = arith.constant 0 : index
    %c0_6 = arith.constant 0 : index
    %5 = vector.load %arg4[%c0_5, %c0_6] : memref<1x128xf32, #tpu.memory_space<vmem>>, vector<1x128xf32>
    %6 = vector.shape_cast %5 : vector<1x128xf32> to vector<1x1x1x128xf32>
    %7 = vector.broadcast %6 : vector<1x1x1x128xf32> to vector<1x8x16x128xf32>
    %8 = arith.addf %4, %7 : vector<1x8x16x128xf32>
    %cst = arith.constant 0.000000e+00 : f32
    %9 = vector.broadcast %cst : f32 to vector<1x8x16x128xf32>
    %10 = arith.maximumf %8, %9 : vector<1x8x16x128xf32>
    %c0_7 = arith.constant 0 : index
    %c0_8 = arith.constant 0 : index
    %c0_9 = arith.constant 0 : index
    %c0_10 = arith.constant 0 : index
    %11 = vector.load %arg5[%c0_7, %c0_8, %c0_9, %c0_10] : memref<1x8x16x128xf32, #tpu.memory_space<vmem>>, vector<1x8x16x128xf32>
    tpu.vector_store %arg5[%c0_7, %c0_8, %c0_9, %c0_10], %10 {strides = array<i32>} : memref<1x8x16x128xf32, #tpu.memory_space<vmem>>, vector<1x8x16x128xf32>,
    return
  }
  func.func @transform_0(%arg0: i32, %arg1: i32) -> (i32, i32, i32, i32) {
    %c0_i32 = arith.constant 0 : i32
    %c0_i32_0 = arith.constant 0 : i32
    %c0_i32_1 = arith.constant 0 : i32
    return %arg0, %arg1, %c0_i32, %c0_i32_0 : i32, i32, i32, i32
  }
  func.func @transform_1(%arg0: i32, %arg1: i32) -> (i32, i32) {
    %c0_i32 = arith.constant 0 : i32
    %c0_i32_0 = arith.constant 0 : i32
    %c0_i32_1 = arith.constant 0 : i32
    return %c0_i32, %c0_i32_0 : i32, i32
  }
  func.func @transform_2(%arg0: i32, %arg1: i32) -> (i32, i32) {
    %c0_i32 = arith.constant 0 : i32
    %c0_i32_0 = arith.constant 0 : i32
    %c0_i32_1 = arith.constant 0 : i32
    return %c0_i32, %c0_i32_0 : i32, i32
  }
  func.func @transform_3(%arg0: i32, %arg1: i32) -> (i32, i32, i32, i32) {
    %c0_i32 = arith.constant 0 : i32
    %c0_i32_0 = arith.constant 0 : i32
    %c0_i32_1 = arith.constant 0 : i32
    return %arg0, %arg1, %c0_i32, %c0_i32_0 : i32, i32, i32, i32
  }
}

module attributes {stable_mosaic.version = 11 : i64} {
  func.func @_conv3x3_kernel(%arg0: i32, %arg1: i32, %arg2: memref<2x10x10x128xf32, #tpu.memory_space<any>>, %arg3: memref<1152x128xf32, #tpu.memory_space<vmem>>, %arg4: memref<1x128xf32, #tpu.memory_space<vmem>>, %arg5: memref<1x4x8x128xf32, #tpu.memory_space<vmem>>, %arg6: memref<1x1x2x128xf32, #tpu.memory_space<vmem>>, %arg7: memref<6x10x128xf32, #tpu.memory_space<vmem>>, %arg8: memref<1x!tpu.dma_semaphore, #tpu.memory_space<semaphore_mem>>) attributes {dimension_semantics = [#tpu.dimension_semantics<parallel>, #tpu.dimension_semantics<parallel>], iteration_bounds = array<i64: 2, 2>, scalar_prefetch = 0 : i64, scratch_operands = 2 : i64, tpu.core_type = #tpu.core_type<tc>, window_params = [{}, {pipeline_mode = #tpu.pipeline_mode<synchronous>, transform_indices = @transform_1, window_bounds = array<i64: 1152, 128>}, {pipeline_mode = #tpu.pipeline_mode<synchronous>, transform_indices = @transform_2, window_bounds = array<i64: 1, 128>}, {transform_indices = @transform_3, window_bounds = array<i64: 1, 4, 8, 128>}, {transform_indices = @transform_4, window_bounds = array<i64: 1, 1, 2, 128>}]} {
    %c4_i32 = arith.constant 4 : i32
    %0 = arith.muli %arg1, %c4_i32 : i32
    %c0_i32 = arith.constant 0 : i32
    %c0_i32_0 = arith.constant 0 : i32
    %c0_i32_1 = arith.constant 0 : i32
    %1 = tpu.memref_slice %arg2[%arg0, %0, %c0_i32_0, %c0_i32_1] : memref<2x10x10x128xf32, #tpu.memory_space<any>> -> memref<1x6x10x128xf32, #tpu.memory_space<any>>
    %2 = tpu.memref_squeeze %1 : memref<1x6x10x128xf32, #tpu.memory_space<any>> -> memref<6x10x128xf32, #tpu.memory_space<any>>
    %3 = tpu.memref_slice %arg8[%c0_i32] : memref<1x!tpu.dma_semaphore, #tpu.memory_space<semaphore_mem>> -> memref<1x!tpu.dma_semaphore, #tpu.memory_space<semaphore_mem>>
    %4 = tpu.memref_squeeze %3 : memref<1x!tpu.dma_semaphore, #tpu.memory_space<semaphore_mem>> -> memref<!tpu.dma_semaphore, #tpu.memory_space<semaphore_mem>>
    tpu.enqueue_dma source(%2 : memref<6x10x128xf32, #tpu.memory_space<any>>) target(%arg7 : memref<6x10x128xf32, #tpu.memory_space<vmem>>) target_semaphore(%4 : memref<!tpu.dma_semaphore, #tpu.memory_space<semaphore_mem>>)
    %c0_i32_2 = arith.constant 0 : i32
    %c0_i32_3 = arith.constant 0 : i32
    %c0_i32_4 = arith.constant 0 : i32
    %5 = tpu.memref_slice %arg2[%arg0, %0, %c0_i32_3, %c0_i32_4] : memref<2x10x10x128xf32, #tpu.memory_space<any>> -> memref<1x6x10x128xf32, #tpu.memory_space<any>>
    %6 = tpu.memref_squeeze %5 : memref<1x6x10x128xf32, #tpu.memory_space<any>> -> memref<6x10x128xf32, #tpu.memory_space<any>>
    %7 = tpu.memref_slice %arg8[%c0_i32_2] : memref<1x!tpu.dma_semaphore, #tpu.memory_space<semaphore_mem>> -> memref<1x!tpu.dma_semaphore, #tpu.memory_space<semaphore_mem>>
    %8 = tpu.memref_squeeze %7 : memref<1x!tpu.dma_semaphore, #tpu.memory_space<semaphore_mem>> -> memref<!tpu.dma_semaphore, #tpu.memory_space<semaphore_mem>>
    tpu.wait_dma2 semaphore(%8 : memref<!tpu.dma_semaphore, #tpu.memory_space<semaphore_mem>>) src(%6 : memref<6x10x128xf32, #tpu.memory_space<any>>) dst(%arg7 : memref<6x10x128xf32, #tpu.memory_space<vmem>>)
    %c0 = arith.constant 0 : index
    %c0_5 = arith.constant 0 : index
    %c0_6 = arith.constant 0 : index
    %9 = vector.load %arg7[%c0, %c0_5, %c0_6] : memref<6x10x128xf32, #tpu.memory_space<vmem>>, vector<6x10x128xf32>
    %cst = arith.constant 0.000000e+00 : f32
    %10 = vector.broadcast %cst : f32 to vector<32x128xf32>
    %11 = vector.extract_strided_slice %9 {offsets = [0, 0, 0], sizes = [4, 8, 128], strides = [1, 1, 1]} : vector<6x10x128xf32> to vector<4x8x128xf32>
    %12 = vector.extract_strided_slice %9 {offsets = [0, 1, 0], sizes = [4, 8, 128], strides = [1, 1, 1]} : vector<6x10x128xf32> to vector<4x8x128xf32>
    %13 = vector.extract_strided_slice %9 {offsets = [0, 2, 0], sizes = [4, 8, 128], strides = [1, 1, 1]} : vector<6x10x128xf32> to vector<4x8x128xf32>
    %14 = tpu.concatenate %11, %12, %13 in 2 : vector<4x8x128xf32>, vector<4x8x128xf32>, vector<4x8x128xf32> -> vector<4x8x384xf32>
    %15 = vector.shape_cast %14 : vector<4x8x384xf32> to vector<32x384xf32>
    %c0_7 = arith.constant 0 : index
    %c0_8 = arith.constant 0 : index
    %16 = vector.load %arg3[%c0_7, %c0_8] : memref<1152x128xf32, #tpu.memory_space<vmem>>, vector<384x128xf32>
    %cst_9 = arith.constant dense<0.000000e+00> : vector<32x128xf32>
    %17 = tpu.matmul %15, %16, %cst_9 {dimension_numbers = #tpu.dot_dimension_numbers<[1], [0], [0], [1], [0, 0, 1, 1], [], []>} : vector<32x384xf32>, vector<384x128xf32>, vector<32x128xf32> -> vector<32x128xf32>
    %18 = arith.addf %10, %17 : vector<32x128xf32>
    %19 = vector.extract_strided_slice %9 {offsets = [1, 0, 0], sizes = [4, 8, 128], strides = [1, 1, 1]} : vector<6x10x128xf32> to vector<4x8x128xf32>
    %20 = vector.extract_strided_slice %9 {offsets = [1, 1, 0], sizes = [4, 8, 128], strides = [1, 1, 1]} : vector<6x10x128xf32> to vector<4x8x128xf32>
    %21 = vector.extract_strided_slice %9 {offsets = [1, 2, 0], sizes = [4, 8, 128], strides = [1, 1, 1]} : vector<6x10x128xf32> to vector<4x8x128xf32>
    %22 = tpu.concatenate %19, %20, %21 in 2 : vector<4x8x128xf32>, vector<4x8x128xf32>, vector<4x8x128xf32> -> vector<4x8x384xf32>
    %23 = vector.shape_cast %22 : vector<4x8x384xf32> to vector<32x384xf32>
    %c384 = arith.constant 384 : index
    %c0_10 = arith.constant 0 : index
    %24 = vector.load %arg3[%c384, %c0_10] : memref<1152x128xf32, #tpu.memory_space<vmem>>, vector<384x128xf32>
    %cst_11 = arith.constant dense<0.000000e+00> : vector<32x128xf32>
    %25 = tpu.matmul %23, %24, %cst_11 {dimension_numbers = #tpu.dot_dimension_numbers<[1], [0], [0], [1], [0, 0, 1, 1], [], []>} : vector<32x384xf32>, vector<384x128xf32>, vector<32x128xf32> -> vector<32x128xf32>
    %26 = arith.addf %18, %25 : vector<32x128xf32>
    %27 = vector.extract_strided_slice %9 {offsets = [2, 0, 0], sizes = [4, 8, 128], strides = [1, 1, 1]} : vector<6x10x128xf32> to vector<4x8x128xf32>
    %28 = vector.extract_strided_slice %9 {offsets = [2, 1, 0], sizes = [4, 8, 128], strides = [1, 1, 1]} : vector<6x10x128xf32> to vector<4x8x128xf32>
    %29 = vector.extract_strided_slice %9 {offsets = [2, 2, 0], sizes = [4, 8, 128], strides = [1, 1, 1]} : vector<6x10x128xf32> to vector<4x8x128xf32>
    %30 = tpu.concatenate %27, %28, %29 in 2 : vector<4x8x128xf32>, vector<4x8x128xf32>, vector<4x8x128xf32> -> vector<4x8x384xf32>
    %31 = vector.shape_cast %30 : vector<4x8x384xf32> to vector<32x384xf32>
    %c768 = arith.constant 768 : index
    %c0_12 = arith.constant 0 : index
    %32 = vector.load %arg3[%c768, %c0_12] : memref<1152x128xf32, #tpu.memory_space<vmem>>, vector<384x128xf32>
    %cst_13 = arith.constant dense<0.000000e+00> : vector<32x128xf32>
    %33 = tpu.matmul %31, %32, %cst_13 {dimension_numbers = #tpu.dot_dimension_numbers<[1], [0], [0], [1], [0, 0, 1, 1], [], []>} : vector<32x384xf32>, vector<384x128xf32>, vector<32x128xf32> -> vector<32x128xf32>
    %34 = arith.addf %26, %33 : vector<32x128xf32>
    %c0_14 = arith.constant 0 : index
    %c0_15 = arith.constant 0 : index
    %35 = vector.load %arg4[%c0_14, %c0_15] : memref<1x128xf32, #tpu.memory_space<vmem>>, vector<1x128xf32>
    %36 = vector.broadcast %35 : vector<1x128xf32> to vector<32x128xf32>
    %37 = arith.addf %34, %36 : vector<32x128xf32>
    %cst_16 = arith.constant dense<0.000000e+00> : vector<128xf32>
    %38 = vector.multi_reduction <add>, %37, %cst_16 [0] : vector<32x128xf32> to vector<128xf32>
    %39 = vector.shape_cast %38 : vector<128xf32> to vector<1x128xf32>
    %c0_17 = arith.constant 0 : index
    %c0_18 = arith.constant 0 : index
    %c0_19 = arith.constant 0 : index
    %c0_20 = arith.constant 0 : index
    %40 = vector.load %arg6[%c0_17, %c0_18, %c0_19, %c0_20] : memref<1x1x2x128xf32, #tpu.memory_space<vmem>>, vector<1x1x1x128xf32>
    %41 = vector.shape_cast %40 : vector<1x1x1x128xf32> to vector<1x128xf32>
    %42 = vector.shape_cast %39 : vector<1x128xf32> to vector<1x1x1x128xf32>
    tpu.vector_store %arg6[%c0_17, %c0_18, %c0_19, %c0_20], %42 {strides = array<i32>} : memref<1x1x2x128xf32, #tpu.memory_space<vmem>>, vector<1x1x1x128xf32>,
    %43 = arith.mulf %37, %37 : vector<32x128xf32>
    %cst_21 = arith.constant dense<0.000000e+00> : vector<128xf32>
    %44 = vector.multi_reduction <add>, %43, %cst_21 [0] : vector<32x128xf32> to vector<128xf32>
    %45 = vector.shape_cast %44 : vector<128xf32> to vector<1x128xf32>
    %c0_22 = arith.constant 0 : index
    %c0_23 = arith.constant 0 : index
    %c1 = arith.constant 1 : index
    %c0_24 = arith.constant 0 : index
    %46 = vector.load %arg6[%c0_22, %c0_23, %c1, %c0_24] : memref<1x1x2x128xf32, #tpu.memory_space<vmem>>, vector<1x1x1x128xf32>
    %47 = vector.shape_cast %46 : vector<1x1x1x128xf32> to vector<1x128xf32>
    %48 = vector.shape_cast %45 : vector<1x128xf32> to vector<1x1x1x128xf32>
    tpu.vector_store %arg6[%c0_22, %c0_23, %c1, %c0_24], %48 {strides = array<i32>} : memref<1x1x2x128xf32, #tpu.memory_space<vmem>>, vector<1x1x1x128xf32>,
    %49 = vector.shape_cast %37 : vector<32x128xf32> to vector<4x8x128xf32>
    %c0_25 = arith.constant 0 : index
    %c0_26 = arith.constant 0 : index
    %c0_27 = arith.constant 0 : index
    %c0_28 = arith.constant 0 : index
    %50 = vector.load %arg5[%c0_25, %c0_26, %c0_27, %c0_28] : memref<1x4x8x128xf32, #tpu.memory_space<vmem>>, vector<1x4x8x128xf32>
    %51 = vector.shape_cast %50 : vector<1x4x8x128xf32> to vector<4x8x128xf32>
    %52 = vector.shape_cast %49 : vector<4x8x128xf32> to vector<1x4x8x128xf32>
    tpu.vector_store %arg5[%c0_25, %c0_26, %c0_27, %c0_28], %52 {strides = array<i32>} : memref<1x4x8x128xf32, #tpu.memory_space<vmem>>, vector<1x4x8x128xf32>,
    return
  }
  func.func @transform_1(%arg0: i32, %arg1: i32) -> (i32, i32) {
    %c0_i32 = arith.constant 0 : i32
    %c0_i32_0 = arith.constant 0 : i32
    %c0_i32_1 = arith.constant 0 : i32
    return %c0_i32, %c0_i32_0 : i32, i32
  }
  func.func @transform_2(%arg0: i32, %arg1: i32) -> (i32, i32) {
    %c0_i32 = arith.constant 0 : i32
    %c0_i32_0 = arith.constant 0 : i32
    %c0_i32_1 = arith.constant 0 : i32
    return %c0_i32, %c0_i32_0 : i32, i32
  }
  func.func @transform_3(%arg0: i32, %arg1: i32) -> (i32, i32, i32, i32) {
    %c0_i32 = arith.constant 0 : i32
    %c0_i32_0 = arith.constant 0 : i32
    %c0_i32_1 = arith.constant 0 : i32
    return %arg0, %arg1, %c0_i32, %c0_i32_0 : i32, i32, i32, i32
  }
  func.func @transform_4(%arg0: i32, %arg1: i32) -> (i32, i32, i32, i32) {
    %c0_i32 = arith.constant 0 : i32
    %c0_i32_0 = arith.constant 0 : i32
    %c0_i32_1 = arith.constant 0 : i32
    return %arg0, %arg1, %c0_i32, %c0_i32_0 : i32, i32, i32, i32
  }
}

module attributes {stable_mosaic.version = 11 : i64} {
  func.func @_conv3x3_kernel(%arg0: i32, %arg1: i32, %arg2: memref<2x10x10x128xf32, #tpu.memory_space<any>>, %arg3: memref<1152x128xf32, #tpu.memory_space<vmem>>, %arg4: memref<1x128xf32, #tpu.memory_space<vmem>>, %arg5: memref<1x128xf32, #tpu.memory_space<vmem>>, %arg6: memref<1x128xf32, #tpu.memory_space<vmem>>, %arg7: memref<1x4x8x128xf32, #tpu.memory_space<vmem>>, %arg8: memref<1x1x2x128xf32, #tpu.memory_space<vmem>>, %arg9: memref<6x10x128xf32, #tpu.memory_space<vmem>>, %arg10: memref<1x!tpu.dma_semaphore, #tpu.memory_space<semaphore_mem>>) attributes {dimension_semantics = [#tpu.dimension_semantics<parallel>, #tpu.dimension_semantics<parallel>], iteration_bounds = array<i64: 2, 2>, scalar_prefetch = 0 : i64, scratch_operands = 2 : i64, tpu.core_type = #tpu.core_type<tc>, window_params = [{}, {pipeline_mode = #tpu.pipeline_mode<synchronous>, transform_indices = @transform_1, window_bounds = array<i64: 1152, 128>}, {pipeline_mode = #tpu.pipeline_mode<synchronous>, transform_indices = @transform_2, window_bounds = array<i64: 1, 128>}, {pipeline_mode = #tpu.pipeline_mode<synchronous>, transform_indices = @transform_3, window_bounds = array<i64: 1, 128>}, {pipeline_mode = #tpu.pipeline_mode<synchronous>, transform_indices = @transform_4, window_bounds = array<i64: 1, 128>}, {transform_indices = @transform_5, window_bounds = array<i64: 1, 4, 8, 128>}, {transform_indices = @transform_6, window_bounds = array<i64: 1, 1, 2, 128>}]} {
    %c4_i32 = arith.constant 4 : i32
    %0 = arith.muli %arg1, %c4_i32 : i32
    %c0_i32 = arith.constant 0 : i32
    %c0_i32_0 = arith.constant 0 : i32
    %c0_i32_1 = arith.constant 0 : i32
    %1 = tpu.memref_slice %arg2[%arg0, %0, %c0_i32_0, %c0_i32_1] : memref<2x10x10x128xf32, #tpu.memory_space<any>> -> memref<1x6x10x128xf32, #tpu.memory_space<any>>
    %2 = tpu.memref_squeeze %1 : memref<1x6x10x128xf32, #tpu.memory_space<any>> -> memref<6x10x128xf32, #tpu.memory_space<any>>
    %3 = tpu.memref_slice %arg10[%c0_i32] : memref<1x!tpu.dma_semaphore, #tpu.memory_space<semaphore_mem>> -> memref<1x!tpu.dma_semaphore, #tpu.memory_space<semaphore_mem>>
    %4 = tpu.memref_squeeze %3 : memref<1x!tpu.dma_semaphore, #tpu.memory_space<semaphore_mem>> -> memref<!tpu.dma_semaphore, #tpu.memory_space<semaphore_mem>>
    tpu.enqueue_dma source(%2 : memref<6x10x128xf32, #tpu.memory_space<any>>) target(%arg9 : memref<6x10x128xf32, #tpu.memory_space<vmem>>) target_semaphore(%4 : memref<!tpu.dma_semaphore, #tpu.memory_space<semaphore_mem>>)
    %c0_i32_2 = arith.constant 0 : i32
    %c0_i32_3 = arith.constant 0 : i32
    %c0_i32_4 = arith.constant 0 : i32
    %5 = tpu.memref_slice %arg2[%arg0, %0, %c0_i32_3, %c0_i32_4] : memref<2x10x10x128xf32, #tpu.memory_space<any>> -> memref<1x6x10x128xf32, #tpu.memory_space<any>>
    %6 = tpu.memref_squeeze %5 : memref<1x6x10x128xf32, #tpu.memory_space<any>> -> memref<6x10x128xf32, #tpu.memory_space<any>>
    %7 = tpu.memref_slice %arg10[%c0_i32_2] : memref<1x!tpu.dma_semaphore, #tpu.memory_space<semaphore_mem>> -> memref<1x!tpu.dma_semaphore, #tpu.memory_space<semaphore_mem>>
    %8 = tpu.memref_squeeze %7 : memref<1x!tpu.dma_semaphore, #tpu.memory_space<semaphore_mem>> -> memref<!tpu.dma_semaphore, #tpu.memory_space<semaphore_mem>>
    tpu.wait_dma2 semaphore(%8 : memref<!tpu.dma_semaphore, #tpu.memory_space<semaphore_mem>>) src(%6 : memref<6x10x128xf32, #tpu.memory_space<any>>) dst(%arg9 : memref<6x10x128xf32, #tpu.memory_space<vmem>>)
    %c0 = arith.constant 0 : index
    %c0_5 = arith.constant 0 : index
    %c0_6 = arith.constant 0 : index
    %9 = vector.load %arg9[%c0, %c0_5, %c0_6] : memref<6x10x128xf32, #tpu.memory_space<vmem>>, vector<6x10x128xf32>
    %c0_7 = arith.constant 0 : index
    %c0_8 = arith.constant 0 : index
    %10 = vector.load %arg5[%c0_7, %c0_8] : memref<1x128xf32, #tpu.memory_space<vmem>>, vector<1x128xf32>
    %11 = vector.shape_cast %10 : vector<1x128xf32> to vector<1x1x128xf32>
    %12 = vector.broadcast %11 : vector<1x1x128xf32> to vector<6x10x128xf32>
    %13 = arith.mulf %9, %12 : vector<6x10x128xf32>
    %c0_9 = arith.constant 0 : index
    %c0_10 = arith.constant 0 : index
    %14 = vector.load %arg6[%c0_9, %c0_10] : memref<1x128xf32, #tpu.memory_space<vmem>>, vector<1x128xf32>
    %15 = vector.shape_cast %14 : vector<1x128xf32> to vector<1x1x128xf32>
    %16 = vector.broadcast %15 : vector<1x1x128xf32> to vector<6x10x128xf32>
    %17 = arith.addf %13, %16 : vector<6x10x128xf32>
    %cst = arith.constant 0.000000e+00 : f32
    %18 = vector.broadcast %cst : f32 to vector<6x10x128xf32>
    %19 = arith.maximumf %17, %18 : vector<6x10x128xf32>
    %c0_11 = arith.constant 0 : index
    %c0_12 = arith.constant 0 : index
    %c0_13 = arith.constant 0 : index
    %20 = vector.load %arg9[%c0_11, %c0_12, %c0_13] : memref<6x10x128xf32, #tpu.memory_space<vmem>>, vector<6x10x128xf32>
    tpu.vector_store %arg9[%c0_11, %c0_12, %c0_13], %19 {strides = array<i32>} : memref<6x10x128xf32, #tpu.memory_space<vmem>>, vector<6x10x128xf32>,
    %cst_14 = arith.constant 0.000000e+00 : f32
    %21 = vector.broadcast %cst_14 : f32 to vector<6x128xf32>
    %c0_15 = arith.constant 0 : index
    %c0_16 = arith.constant 0 : index
    %c0_17 = arith.constant 0 : index
    %22 = vector.load %arg9[%c0_15, %c0_16, %c0_17] : memref<6x10x128xf32, #tpu.memory_space<vmem>>, vector<6x1x128xf32>
    %23 = vector.shape_cast %22 : vector<6x1x128xf32> to vector<6x128xf32>
    %24 = vector.shape_cast %21 : vector<6x128xf32> to vector<6x1x128xf32>
    tpu.vector_store %arg9[%c0_15, %c0_16, %c0_17], %24 {strides = array<i32>} : memref<6x10x128xf32, #tpu.memory_space<vmem>>, vector<6x1x128xf32>,
    %c0_18 = arith.constant 0 : index
    %c9 = arith.constant 9 : index
    %c0_19 = arith.constant 0 : index
    %25 = vector.load %arg9[%c0_18, %c9, %c0_19] : memref<6x10x128xf32, #tpu.memory_space<vmem>>, vector<6x1x128xf32>
    %26 = vector.shape_cast %25 : vector<6x1x128xf32> to vector<6x128xf32>
    %27 = vector.shape_cast %21 : vector<6x128xf32> to vector<6x1x128xf32>
    tpu.vector_store %arg9[%c0_18, %c9, %c0_19], %27 {strides = array<i32>} : memref<6x10x128xf32, #tpu.memory_space<vmem>>, vector<6x1x128xf32>,
    %cst_20 = arith.constant 0.000000e+00 : f32
    %28 = vector.broadcast %cst_20 : f32 to vector<10x128xf32>
    %c0_i32_21 = arith.constant 0 : i32
    %29 = arith.cmpi eq, %arg1, %c0_i32_21 : i32
    %30 = arith.extui %29 : i1 to i32
    %c0_i32_22 = arith.constant 0 : i32
    %31 = arith.cmpi ne, %30, %c0_i32_22 : i32
    scf.if %31 {
      %c0_50 = arith.constant 0 : index
      %c0_51 = arith.constant 0 : index
      %c0_52 = arith.constant 0 : index
      %79 = vector.load %arg9[%c0_50, %c0_51, %c0_52] : memref<6x10x128xf32, #tpu.memory_space<vmem>>, vector<1x10x128xf32>
      %80 = vector.shape_cast %79 : vector<1x10x128xf32> to vector<10x128xf32>
      %81 = vector.shape_cast %28 : vector<10x128xf32> to vector<1x10x128xf32>
      tpu.vector_store %arg9[%c0_50, %c0_51, %c0_52], %81 {strides = array<i32>} : memref<6x10x128xf32, #tpu.memory_space<vmem>>, vector<1x10x128xf32>,
    } else {
    }
    %c1_i32 = arith.constant 1 : i32
    %32 = arith.cmpi eq, %arg1, %c1_i32 : i32
    %33 = arith.extui %32 : i1 to i32
    %c0_i32_23 = arith.constant 0 : i32
    %34 = arith.cmpi ne, %33, %c0_i32_23 : i32
    scf.if %34 {
      %c5 = arith.constant 5 : index
      %c0_50 = arith.constant 0 : index
      %c0_51 = arith.constant 0 : index
      %79 = vector.load %arg9[%c5, %c0_50, %c0_51] : memref<6x10x128xf32, #tpu.memory_space<vmem>>, vector<1x10x128xf32>
      %80 = vector.shape_cast %79 : vector<1x10x128xf32> to vector<10x128xf32>
      %81 = vector.shape_cast %28 : vector<10x128xf32> to vector<1x10x128xf32>
      tpu.vector_store %arg9[%c5, %c0_50, %c0_51], %81 {strides = array<i32>} : memref<6x10x128xf32, #tpu.memory_space<vmem>>, vector<1x10x128xf32>,
    } else {
    }
    %c0_24 = arith.constant 0 : index
    %c0_25 = arith.constant 0 : index
    %c0_26 = arith.constant 0 : index
    %35 = vector.load %arg9[%c0_24, %c0_25, %c0_26] : memref<6x10x128xf32, #tpu.memory_space<vmem>>, vector<6x10x128xf32>
    %cst_27 = arith.constant 0.000000e+00 : f32
    %36 = vector.broadcast %cst_27 : f32 to vector<32x128xf32>
    %37 = vector.extract_strided_slice %35 {offsets = [0, 0, 0], sizes = [4, 8, 128], strides = [1, 1, 1]} : vector<6x10x128xf32> to vector<4x8x128xf32>
    %38 = vector.extract_strided_slice %35 {offsets = [0, 1, 0], sizes = [4, 8, 128], strides = [1, 1, 1]} : vector<6x10x128xf32> to vector<4x8x128xf32>
    %39 = vector.extract_strided_slice %35 {offsets = [0, 2, 0], sizes = [4, 8, 128], strides = [1, 1, 1]} : vector<6x10x128xf32> to vector<4x8x128xf32>
    %40 = tpu.concatenate %37, %38, %39 in 2 : vector<4x8x128xf32>, vector<4x8x128xf32>, vector<4x8x128xf32> -> vector<4x8x384xf32>
    %41 = vector.shape_cast %40 : vector<4x8x384xf32> to vector<32x384xf32>
    %c0_28 = arith.constant 0 : index
    %c0_29 = arith.constant 0 : index
    %42 = vector.load %arg3[%c0_28, %c0_29] : memref<1152x128xf32, #tpu.memory_space<vmem>>, vector<384x128xf32>
    %cst_30 = arith.constant dense<0.000000e+00> : vector<32x128xf32>
    %43 = tpu.matmul %41, %42, %cst_30 {dimension_numbers = #tpu.dot_dimension_numbers<[1], [0], [0], [1], [0, 0, 1, 1], [], []>} : vector<32x384xf32>, vector<384x128xf32>, vector<32x128xf32> -> vector<32x128xf32>
    %44 = arith.addf %36, %43 : vector<32x128xf32>
    %45 = vector.extract_strided_slice %35 {offsets = [1, 0, 0], sizes = [4, 8, 128], strides = [1, 1, 1]} : vector<6x10x128xf32> to vector<4x8x128xf32>
    %46 = vector.extract_strided_slice %35 {offsets = [1, 1, 0], sizes = [4, 8, 128], strides = [1, 1, 1]} : vector<6x10x128xf32> to vector<4x8x128xf32>
    %47 = vector.extract_strided_slice %35 {offsets = [1, 2, 0], sizes = [4, 8, 128], strides = [1, 1, 1]} : vector<6x10x128xf32> to vector<4x8x128xf32>
    %48 = tpu.concatenate %45, %46, %47 in 2 : vector<4x8x128xf32>, vector<4x8x128xf32>, vector<4x8x128xf32> -> vector<4x8x384xf32>
    %49 = vector.shape_cast %48 : vector<4x8x384xf32> to vector<32x384xf32>
    %c384 = arith.constant 384 : index
    %c0_31 = arith.constant 0 : index
    %50 = vector.load %arg3[%c384, %c0_31] : memref<1152x128xf32, #tpu.memory_space<vmem>>, vector<384x128xf32>
    %cst_32 = arith.constant dense<0.000000e+00> : vector<32x128xf32>
    %51 = tpu.matmul %49, %50, %cst_32 {dimension_numbers = #tpu.dot_dimension_numbers<[1], [0], [0], [1], [0, 0, 1, 1], [], []>} : vector<32x384xf32>, vector<384x128xf32>, vector<32x128xf32> -> vector<32x128xf32>
    %52 = arith.addf %44, %51 : vector<32x128xf32>
    %53 = vector.extract_strided_slice %35 {offsets = [2, 0, 0], sizes = [4, 8, 128], strides = [1, 1, 1]} : vector<6x10x128xf32> to vector<4x8x128xf32>
    %54 = vector.extract_strided_slice %35 {offsets = [2, 1, 0], sizes = [4, 8, 128], strides = [1, 1, 1]} : vector<6x10x128xf32> to vector<4x8x128xf32>
    %55 = vector.extract_strided_slice %35 {offsets = [2, 2, 0], sizes = [4, 8, 128], strides = [1, 1, 1]} : vector<6x10x128xf32> to vector<4x8x128xf32>
    %56 = tpu.concatenate %53, %54, %55 in 2 : vector<4x8x128xf32>, vector<4x8x128xf32>, vector<4x8x128xf32> -> vector<4x8x384xf32>
    %57 = vector.shape_cast %56 : vector<4x8x384xf32> to vector<32x384xf32>
    %c768 = arith.constant 768 : index
    %c0_33 = arith.constant 0 : index
    %58 = vector.load %arg3[%c768, %c0_33] : memref<1152x128xf32, #tpu.memory_space<vmem>>, vector<384x128xf32>
    %cst_34 = arith.constant dense<0.000000e+00> : vector<32x128xf32>
    %59 = tpu.matmul %57, %58, %cst_34 {dimension_numbers = #tpu.dot_dimension_numbers<[1], [0], [0], [1], [0, 0, 1, 1], [], []>} : vector<32x384xf32>, vector<384x128xf32>, vector<32x128xf32> -> vector<32x128xf32>
    %60 = arith.addf %52, %59 : vector<32x128xf32>
    %c0_35 = arith.constant 0 : index
    %c0_36 = arith.constant 0 : index
    %61 = vector.load %arg4[%c0_35, %c0_36] : memref<1x128xf32, #tpu.memory_space<vmem>>, vector<1x128xf32>
    %62 = vector.broadcast %61 : vector<1x128xf32> to vector<32x128xf32>
    %63 = arith.addf %60, %62 : vector<32x128xf32>
    %cst_37 = arith.constant dense<0.000000e+00> : vector<128xf32>
    %64 = vector.multi_reduction <add>, %63, %cst_37 [0] : vector<32x128xf32> to vector<128xf32>
    %65 = vector.shape_cast %64 : vector<128xf32> to vector<1x128xf32>
    %c0_38 = arith.constant 0 : index
    %c0_39 = arith.constant 0 : index
    %c0_40 = arith.constant 0 : index
    %c0_41 = arith.constant 0 : index
    %66 = vector.load %arg8[%c0_38, %c0_39, %c0_40, %c0_41] : memref<1x1x2x128xf32, #tpu.memory_space<vmem>>, vector<1x1x1x128xf32>
    %67 = vector.shape_cast %66 : vector<1x1x1x128xf32> to vector<1x128xf32>
    %68 = vector.shape_cast %65 : vector<1x128xf32> to vector<1x1x1x128xf32>
    tpu.vector_store %arg8[%c0_38, %c0_39, %c0_40, %c0_41], %68 {strides = array<i32>} : memref<1x1x2x128xf32, #tpu.memory_space<vmem>>, vector<1x1x1x128xf32>,
    %69 = arith.mulf %63, %63 : vector<32x128xf32>
    %cst_42 = arith.constant dense<0.000000e+00> : vector<128xf32>
    %70 = vector.multi_reduction <add>, %69, %cst_42 [0] : vector<32x128xf32> to vector<128xf32>
    %71 = vector.shape_cast %70 : vector<128xf32> to vector<1x128xf32>
    %c0_43 = arith.constant 0 : index
    %c0_44 = arith.constant 0 : index
    %c1 = arith.constant 1 : index
    %c0_45 = arith.constant 0 : index
    %72 = vector.load %arg8[%c0_43, %c0_44, %c1, %c0_45] : memref<1x1x2x128xf32, #tpu.memory_space<vmem>>, vector<1x1x1x128xf32>
    %73 = vector.shape_cast %72 : vector<1x1x1x128xf32> to vector<1x128xf32>
    %74 = vector.shape_cast %71 : vector<1x128xf32> to vector<1x1x1x128xf32>
    tpu.vector_store %arg8[%c0_43, %c0_44, %c1, %c0_45], %74 {strides = array<i32>} : memref<1x1x2x128xf32, #tpu.memory_space<vmem>>, vector<1x1x1x128xf32>,
    %75 = vector.shape_cast %63 : vector<32x128xf32> to vector<4x8x128xf32>
    %c0_46 = arith.constant 0 : index
    %c0_47 = arith.constant 0 : index
    %c0_48 = arith.constant 0 : index
    %c0_49 = arith.constant 0 : index
    %76 = vector.load %arg7[%c0_46, %c0_47, %c0_48, %c0_49] : memref<1x4x8x128xf32, #tpu.memory_space<vmem>>, vector<1x4x8x128xf32>
    %77 = vector.shape_cast %76 : vector<1x4x8x128xf32> to vector<4x8x128xf32>
    %78 = vector.shape_cast %75 : vector<4x8x128xf32> to vector<1x4x8x128xf32>
    tpu.vector_store %arg7[%c0_46, %c0_47, %c0_48, %c0_49], %78 {strides = array<i32>} : memref<1x4x8x128xf32, #tpu.memory_space<vmem>>, vector<1x4x8x128xf32>,
    return
  }
  func.func @transform_1(%arg0: i32, %arg1: i32) -> (i32, i32) {
    %c0_i32 = arith.constant 0 : i32
    %c0_i32_0 = arith.constant 0 : i32
    %c0_i32_1 = arith.constant 0 : i32
    return %c0_i32, %c0_i32_0 : i32, i32
  }
  func.func @transform_2(%arg0: i32, %arg1: i32) -> (i32, i32) {
    %c0_i32 = arith.constant 0 : i32
    %c0_i32_0 = arith.constant 0 : i32
    %c0_i32_1 = arith.constant 0 : i32
    return %c0_i32, %c0_i32_0 : i32, i32
  }
  func.func @transform_3(%arg0: i32, %arg1: i32) -> (i32, i32) {
    %c0_i32 = arith.constant 0 : i32
    %c0_i32_0 = arith.constant 0 : i32
    %c0_i32_1 = arith.constant 0 : i32
    return %c0_i32, %c0_i32_0 : i32, i32
  }
  func.func @transform_4(%arg0: i32, %arg1: i32) -> (i32, i32) {
    %c0_i32 = arith.constant 0 : i32
    %c0_i32_0 = arith.constant 0 : i32
    %c0_i32_1 = arith.constant 0 : i32
    return %c0_i32, %c0_i32_0 : i32, i32
  }
  func.func @transform_5(%arg0: i32, %arg1: i32) -> (i32, i32, i32, i32) {
    %c0_i32 = arith.constant 0 : i32
    %c0_i32_0 = arith.constant 0 : i32
    %c0_i32_1 = arith.constant 0 : i32
    return %arg0, %arg1, %c0_i32, %c0_i32_0 : i32, i32, i32, i32
  }
  func.func @transform_6(%arg0: i32, %arg1: i32) -> (i32, i32, i32, i32) {
    %c0_i32 = arith.constant 0 : i32
    %c0_i32_0 = arith.constant 0 : i32
    %c0_i32_1 = arith.constant 0 : i32
    return %arg0, %arg1, %c0_i32, %c0_i32_0 : i32, i32, i32, i32
  }
}

module attributes {stable_mosaic.version = 11 : i64} {
  func.func @_bn_relu_res_kernel(%arg0: i32, %arg1: i32, %arg2: memref<1x4x8x128xf32, #tpu.memory_space<vmem>>, %arg3: memref<1x128xf32, #tpu.memory_space<vmem>>, %arg4: memref<1x128xf32, #tpu.memory_space<vmem>>, %arg5: memref<1x4x8x128xf32, #tpu.memory_space<vmem>>, %arg6: memref<1x4x8x128xf32, #tpu.memory_space<vmem>>) attributes {dimension_semantics = [#tpu.dimension_semantics<parallel>, #tpu.dimension_semantics<parallel>], iteration_bounds = array<i64: 2, 2>, scalar_prefetch = 0 : i64, scratch_operands = 0 : i64, tpu.core_type = #tpu.core_type<tc>, window_params = [{transform_indices = @transform_0, window_bounds = array<i64: 1, 4, 8, 128>}, {pipeline_mode = #tpu.pipeline_mode<synchronous>, transform_indices = @transform_1, window_bounds = array<i64: 1, 128>}, {pipeline_mode = #tpu.pipeline_mode<synchronous>, transform_indices = @transform_2, window_bounds = array<i64: 1, 128>}, {transform_indices = @transform_3, window_bounds = array<i64: 1, 4, 8, 128>}, {transform_indices = @transform_4, window_bounds = array<i64: 1, 4, 8, 128>}]} {
    %c0 = arith.constant 0 : index
    %c0_0 = arith.constant 0 : index
    %c0_1 = arith.constant 0 : index
    %c0_2 = arith.constant 0 : index
    %0 = vector.load %arg5[%c0, %c0_0, %c0_1, %c0_2] : memref<1x4x8x128xf32, #tpu.memory_space<vmem>>, vector<1x4x8x128xf32>
    %c0_3 = arith.constant 0 : index
    %c0_4 = arith.constant 0 : index
    %c0_5 = arith.constant 0 : index
    %c0_6 = arith.constant 0 : index
    %1 = vector.load %arg2[%c0_3, %c0_4, %c0_5, %c0_6] : memref<1x4x8x128xf32, #tpu.memory_space<vmem>>, vector<1x4x8x128xf32>
    %c0_7 = arith.constant 0 : index
    %c0_8 = arith.constant 0 : index
    %2 = vector.load %arg3[%c0_7, %c0_8] : memref<1x128xf32, #tpu.memory_space<vmem>>, vector<1x128xf32>
    %3 = vector.shape_cast %2 : vector<1x128xf32> to vector<1x1x1x128xf32>
    %4 = vector.broadcast %3 : vector<1x1x1x128xf32> to vector<1x4x8x128xf32>
    %5 = arith.mulf %1, %4 : vector<1x4x8x128xf32>
    %c0_9 = arith.constant 0 : index
    %c0_10 = arith.constant 0 : index
    %6 = vector.load %arg4[%c0_9, %c0_10] : memref<1x128xf32, #tpu.memory_space<vmem>>, vector<1x128xf32>
    %7 = vector.shape_cast %6 : vector<1x128xf32> to vector<1x1x1x128xf32>
    %8 = vector.broadcast %7 : vector<1x1x1x128xf32> to vector<1x4x8x128xf32>
    %9 = arith.addf %5, %8 : vector<1x4x8x128xf32>
    %cst = arith.constant 0.000000e+00 : f32
    %10 = vector.broadcast %cst : f32 to vector<1x4x8x128xf32>
    %11 = arith.maximumf %9, %10 : vector<1x4x8x128xf32>
    %12 = arith.addf %0, %11 : vector<1x4x8x128xf32>
    %c0_11 = arith.constant 0 : index
    %c0_12 = arith.constant 0 : index
    %c0_13 = arith.constant 0 : index
    %c0_14 = arith.constant 0 : index
    %13 = vector.load %arg6[%c0_11, %c0_12, %c0_13, %c0_14] : memref<1x4x8x128xf32, #tpu.memory_space<vmem>>, vector<1x4x8x128xf32>
    tpu.vector_store %arg6[%c0_11, %c0_12, %c0_13, %c0_14], %12 {strides = array<i32>} : memref<1x4x8x128xf32, #tpu.memory_space<vmem>>, vector<1x4x8x128xf32>,
    return
  }
  func.func @transform_0(%arg0: i32, %arg1: i32) -> (i32, i32, i32, i32) {
    %c0_i32 = arith.constant 0 : i32
    %c0_i32_0 = arith.constant 0 : i32
    %c0_i32_1 = arith.constant 0 : i32
    return %arg0, %arg1, %c0_i32, %c0_i32_0 : i32, i32, i32, i32
  }
  func.func @transform_1(%arg0: i32, %arg1: i32) -> (i32, i32) {
    %c0_i32 = arith.constant 0 : i32
    %c0_i32_0 = arith.constant 0 : i32
    %c0_i32_1 = arith.constant 0 : i32
    return %c0_i32, %c0_i32_0 : i32, i32
  }
  func.func @transform_2(%arg0: i32, %arg1: i32) -> (i32, i32) {
    %c0_i32 = arith.constant 0 : i32
    %c0_i32_0 = arith.constant 0 : i32
    %c0_i32_1 = arith.constant 0 : i32
    return %c0_i32, %c0_i32_0 : i32, i32
  }
  func.func @transform_3(%arg0: i32, %arg1: i32) -> (i32, i32, i32, i32) {
    %c0_i32 = arith.constant 0 : i32
    %c0_i32_0 = arith.constant 0 : i32
    %c0_i32_1 = arith.constant 0 : i32
    return %arg0, %arg1, %c0_i32, %c0_i32_0 : i32, i32, i32, i32
  }
  func.func @transform_4(%arg0: i32, %arg1: i32) -> (i32, i32, i32, i32) {
    %c0_i32 = arith.constant 0 : i32
    %c0_i32_0 = arith.constant 0 : i32
    %c0_i32_1 = arith.constant 0 : i32
    return %arg0, %arg1, %c0_i32, %c0_i32_0 : i32, i32, i32, i32
  }
}

</mosaic_0001>

<bundles_post_ra>
// kernel: unet_forward.11
= control target key start
LH: loop header
LB: loop body
LE: loop exit
PB: predicated region body
PF: predicated region fallthrough
CT: control target
= control target key end

     0   :  { %s525_s12 = smov 0   ;;  %s527_s13 = smov 0   ;;  %s654_s0 = inlined_call_operand.vmem [shape: f32[2,16,16,128], index: 0, kind: input, shape index: {}]   ;;  %s655_s1 = inlined_call_operand.vmem [shape: f32[1,128], index: 1, kind: input, shape index: {}]   ;;  %s656_s2 = inlined_call_operand.vmem [shape: f32[1,128], index: 2, kind: input, shape index: {}]   ;;  %s657_s3 = inlined_call_operand.vmem [shape: f32[2,16,16,128], index: 3, kind: output, shape index: {}]  }
   0x1   :  { %s529_s14 = smov 0   ;;  %s531_s15 = smov 0  }
   0x2   :  { %s533_s16 = smov 0  }
   0x3 LB: > { %s22_s17 = sadd.s32 1, %s495_s14  ;;  %s25_s18 = sadd.s32 1, %s499_s15  ;;  %s503_s16 = sphi %s533_s16, %s13_s16   ;;  %s499_s15 = sphi %s531_s15, %s661_s15   ;;  %s495_s14 = sphi %s529_s14, %s660_s14   ;;  %s491_s13 = sphi %s527_s13, %s659_s13   ;;  %s487_s12 = sphi %s525_s12, %s658_s12  }
   0x4   : > { %p23_p0 = scmp.ge.s32.totalorder %s22_s17, 2  ;;  %p412_p1 = scmp.ge.s32.totalorder %s503_s16, 1 }
   0x5   : > { %p159_p2 = scmp.lt.s32.totalorder %s503_s16, 5 }
   0x6   : > { %s663_s17 = smov (%p23_p0, %s22_s17), 0  ;;  %s665_s18 = smov (!%p23_p0, %s25_s18), %s499_s15 }
   0x7   : > { %p160_p3 = pnand %p412_p1, %p159_p2  ;;  %p27_p4 = scmp.ge.s32.totalorder %s665_s18, 2 }
   0x8   : > { %s413_s19 = sshll.u32 (!%p160_p3), %s487_s12, 3  ;;  %p194_p5 = scmp.lt.s32.totalorder (!%p160_p3), %s491_s13, 1 }
   0x9   : > { %s667_s18 = smov (%p27_p4, %s665_s18), 0  ;;  %163 = sbr.rel (%p160_p3) target bundleno = 37 (0x25), region = 32 }
   0xa   : > { %p196_p6 = scmp.lt.s32.totalorder (!%p160_p3), %s413_s19, 15 }
   0xe   : > { %s669_s13 = smov (!%p194_p5, %s491_s13), 1  ;;  %s671_s19 = smov (!%p196_p6, %s413_s19), 15  ;;  %v558_v0 = vld [vmem:[%s655_s1] ss:$0 sm:$0xff] }
   0xf   : > { %s415_s20 = sshll.u32 %s669_s13, 5  ;;  %s414_s21 = sshll.u32 %s671_s19, 1  ;;  %v568_v1 = vld [vmem:[%s656_s2] ss:$0 sm:$0xff] }
  0x10   : > { %s200_s22 = sadd.s32 %s415_s20, %s414_s21 }
  0x11   : > { %s416_s23 = sshll.u32 %s200_s22, 3 }
  0x12   : > { %s563_s28 = scalar_lea.vmem %s654_s0, %s416_s23  ;;  %s591_s6 = scalar_lea.vmem %s657_s3, %s416_s23 }
  0x13   : > { %v215_v2 = vld [vmem:[%s563_s28] sm:$0xff]  ;;  %v216_v3 = vld [vmem:[%s563_s28 + $0x8] sm:$0xff]  ;;  %v217_v4 = vld [vmem:[%s563_s28 + $0x10] sm:$0xff] }
  0x14   : > { %v238_v5 = vmul.f32 %v558_v0, %v215_v2  ;;  %v239_v6 = vmul.f32 %v558_v0, %v216_v3  ;;  %v240_v7 = vmul.f32 %v558_v0, %v217_v4  ;;  %v218_v8 = vld [vmem:[%s563_s28 + $0x18] sm:$0xff]  ;;  %v219_v9 = vld [vmem:[%s563_s28 + $0x20] sm:$0xff]  ;;  %v220_v10 = vld [vmem:[%s563_s28 + $0x28] sm:$0xff] }
  0x15   : > { %v241_v11 = vmul.f32 %v558_v0, %v218_v8  ;;  %v242_v12 = vmul.f32 %v558_v0, %v219_v9  ;;  %v243_v13 = vmul.f32 %v558_v0, %v220_v10  ;;  %v221_v14 = vld [vmem:[%s563_s28 + $0x30] sm:$0xff]  ;;  %v222_v15 = vld [vmem:[%s563_s28 + $0x38] sm:$0xff]  ;;  %v223_v24 = vld [vmem:[%s563_s28 + $0x40] sm:$0xff] }
  0x16   : > { %v261_v16 = vadd.f32 %v568_v1, %v238_v5  ;;  %v262_v17 = vadd.f32 %v568_v1, %v239_v6  ;;  %v263_v18 = vadd.f32 %v568_v1, %v240_v7  ;;  %v244_v19 = vmul.f32 %v558_v0, %v221_v14  ;;  %v224_v25 = vld [vmem:[%s563_s28 + $0x48] sm:$0xff]  ;;  %v225_v26 = vld [vmem:[%s563_s28 + $0x50] sm:$0xff]  ;;  %v226_v31 = vld [vmem:[%s563_s28 + $0x58] sm:$0xff] }
  0x17   : > { %v264_v20 = vadd.f32 %v568_v1, %v241_v11  ;;  %v265_v21 = vadd.f32 %v568_v1, %v242_v12  ;;  %v266_v22 = vadd.f32 %v568_v1, %v243_v13  ;;  %v245_v23 = vmul.f32 %v558_v0, %v222_v15  ;;  %v227_v32 = vld [vmem:[%s563_s28 + $0x60] sm:$0xff]  ;;  %v228_v33 = vld [vmem:[%s563_s28 + $0x68] sm:$0xff]  ;;  %v229_v38 = vld [vmem:[%s563_s28 + $0x70] sm:$0xff] }
  0x18   : > { %v277_v27 = vmax.f32 %v261_v16, 0.0  ;;  %v278_v28 = vmax.f32 %v262_v17, 0.0  ;;  %v279_v29 = vmax.f32 %v263_v18, 0.0  ;;  %v267_v30 = vadd.f32 %v568_v1, %v244_v19  ;;  %v230_v43 = vld [vmem:[%s563_s28 + $0x78] sm:$0xff] }
  0x19   : > { %v280_v34 = vmax.f32 %v264_v20, 0.0  ;;  %v281_v35 = vmax.f32 %v265_v21, 0.0  ;;  %v282_v36 = vmax.f32 %v266_v22, 0.0  ;;  %v268_v37 = vadd.f32 %v568_v1, %v245_v23 }
  0x1a   : > { %293 = vst [vmem:[%s591_s6] sm:$0xff] %v277_v27  ;;  %294 = vst [vmem:[%s591_s6 + $0x8] sm:$0xff] %v278_v28  ;;  %v283_v39 = vmax.f32 %v267_v30, 0.0  ;;  %v246_v40 = vmul.f32 %v558_v0, %v223_v24  ;;  %v247_v41 = vmul.f32 %v558_v0, %v224_v25  ;;  %v248_v42 = vmul.f32 %v558_v0, %v225_v26 }
  0x1b   : > { %295 = vst [vmem:[%s591_s6 + $0x10] sm:$0xff] %v279_v29  ;;  %296 = vst [vmem:[%s591_s6 + $0x18] sm:$0xff] %v280_v34  ;;  %v284_v44 = vmax.f32 %v268_v37, 0.0  ;;  %v249_v45 = vmul.f32 %v558_v0, %v226_v31  ;;  %v250_v46 = vmul.f32 %v558_v0, %v227_v32  ;;  %v251_v47 = vmul.f32 %v558_v0, %v228_v33 }
  0x1c   : > { %297 = vst [vmem:[%s591_s6 + $0x20] sm:$0xff] %v281_v35  ;;  %298 = vst [vmem:[%s591_s6 + $0x28] sm:$0xff] %v282_v36  ;;  %v269_v48 = vadd.f32 %v568_v1, %v246_v40  ;;  %v270_v49 = vadd.f32 %v568_v1, %v247_v41  ;;  %v271_v50 = vadd.f32 %v568_v1, %v248_v42 }
  0x1d   : > { %299 = vst [vmem:[%s591_s6 + $0x30] sm:$0xff] %v283_v39  ;;  %v252_v51 = vmul.f32 %v558_v0, %v229_v38  ;;  %300 = vst [vmem:[%s591_s6 + $0x38] sm:$0xff] %v284_v44  ;;  %v272_v52 = vadd.f32 %v568_v1, %v249_v45  ;;  %v273_v53 = vadd.f32 %v568_v1, %v250_v46 }
  0x1e   : > { %v274_v54 = vadd.f32 %v568_v1, %v251_v47  ;;  %v253_v55 = vmul.f32 %v558_v0, %v230_v43  ;;  %v285_v56 = vmax.f32 %v269_v48, 0.0  ;;  %v286_v57 = vmax.f32 %v270_v49, 0.0 }
  0x1f   : > { %v287_v58 = vmax.f32 %v271_v50, 0.0  ;;  %v275_v59 = vadd.f32 %v568_v1, %v252_v51  ;;  %v288_v60 = vmax.f32 %v272_v52, 0.0  ;;  %v289_v61 = vmax.f32 %v273_v53, 0.0 }
  0x20   : > { %v290_v62 = vmax.f32 %v274_v54, 0.0  ;;  %v276_v63 = vadd.f32 %v568_v1, %v253_v55  ;;  %301 = vst [vmem:[%s591_s6 + $0x40] sm:$0xff] %v285_v56  ;;  %302 = vst [vmem:[%s591_s6 + $0x48] sm:$0xff] %v286_v57 }
  0x21   : > { %303 = vst [vmem:[%s591_s6 + $0x50] sm:$0xff] %v287_v58  ;;  %v291_v2 = vmax.f32 %v275_v59, 0.0  ;;  %304 = vst [vmem:[%s591_s6 + $0x58] sm:$0xff] %v288_v60 }
  0x22   : > { %305 = vst [vmem:[%s591_s6 + $0x60] sm:$0xff] %v289_v61  ;;  %306 = vst [vmem:[%s591_s6 + $0x68] sm:$0xff] %v290_v62  ;;  %v292_v0 = vmax.f32 %v276_v63, 0.0 }
  0x23   : > { %307 = vst [vmem:[%s591_s6 + $0x70] sm:$0xff] %v291_v2 }
  0x24   : > { %308 = vst [vmem:[%s591_s6 + $0x78] sm:$0xff] %v292_v0 }
  0x25 PF: > { %s13_s16 = sadd.s32 1, %s503_s16   ;;  %s658_s12 = smov %s495_s14 }
  0x26   : > { %p10_p7 = scmp.ge.s32.totalorder %s13_s16, 6   ;;  %s659_s13 = smov %s499_s15 }
  0x27   : > { %s660_s14 = smov %s663_s17  ;;  %s661_s15 = smov %s667_s18 }
  0x28   :  { %12 = sbr.rel (!%p10_p7) target bundleno = 3 (0x3), region = 62 }

// kernel: unet_forward.9
= control target key start
LH: loop header
LB: loop body
LE: loop exit
PB: predicated region body
PF: predicated region fallthrough
CT: control target
= control target key end

     0   :  { %s2454_s15 = smov 0   ;;  %s2456_s16 = smov 0   ;;  %s3533_s0 = inlined_call_operand.vmem [shape: f32[2,18,18,128], index: 0, kind: input, shape index: {}]   ;;  %s3534_s1 = inlined_call_operand.vmem [shape: f32[1152,128], index: 1, kind: input, shape index: {}]   ;;  %s3535_s2 = inlined_call_operand.vmem [shape: f32[1,128], index: 2, kind: input, shape index: {}]   ;;  %s3536_s3 = inlined_call_operand.vmem [shape: f32[2,16,16,128], index: 3, kind: output, shape index: {0}]   ;;  %s3537_s4 = inlined_call_operand.vmem [shape: f32[2,2,2,128], index: 4, kind: output, shape index: {1}]  }
   0x1   :  { %s2458_s17 = smov 0   ;;  %s2460_s18 = smov 0  }
   0x2   :  { %s2462_s19 = smov 0  }
   0x3 LB: > { %s24_s20 = sadd.s32 1, %s2419_s17  ;;  %s27_s21 = sadd.s32 1, %s2423_s18  ;;  %s2427_s19 = sphi %s2462_s19, %s15_s19   ;;  %s2423_s18 = sphi %s2460_s18, %s3563_s18   ;;  %s2419_s17 = sphi %s2458_s17, %s3562_s17   ;;  %s2415_s16 = sphi %s2456_s16, %s3561_s16   ;;  %s2411_s15 = sphi %s2454_s15, %s3560_s15  }
   0x4   : > { %p25_p0 = scmp.ge.s32.totalorder %s24_s20, 2  ;;  %p1820_p1 = scmp.ge.s32.totalorder %s2427_s19, 1 }
   0x5   : > { %p147_p2 = scmp.lt.s32.totalorder %s2427_s19, 5 }
   0x6   : > { %s3565_s20 = smov (%p25_p0, %s24_s20), 0  ;;  %s3567_s21 = smov (!%p25_p0, %s27_s21), %s2423_s18 }
   0x7   : > { %p148_p3 = pnand %p1820_p1, %p147_p2  ;;  %p29_p4 = scmp.ge.s32.totalorder %s3567_s21, 2 }
   0x9   : > { %s3569_s21 = smov (%p29_p4, %s3567_s21), 0  ;;  %151 = sbr.rel (%p148_p3) target bundleno = 468 (0x1d4), region = 28 }
   0xe   : > { %s1821_s22 = sshll.u32 %s2411_s15, 3  ;;  %p180_p5 = scmp.lt.s32.totalorder %s2415_s16, 1 }
   0xf   : > { %p182_p6 = scmp.lt.s32.totalorder %s1821_s22, 15  ;;  %p192_p7 = scmp.lt.s32.totalorder %s2411_s15, 1 }
  0x10   : > { %s181_s23 = scalar_select %p180_p5, %s2415_s16, 1 }
  0x11   : > { %s3571_s22 = smov (!%p182_p6, %s1821_s22), 15  ;;  %s1828_s26 = smul.u32 192, %s2411_s15 }
  0x12   : > { %s1823_s24 = sshll.u32 %s181_s23, 5  ;;  %s1822_s25 = sshll.u32 %s3571_s22, 1 }
  0x13   : > { %s186_s27 = sadd.s32 %s1823_s24, %s1822_s25  ;;  %s200_s28 = smul.u32 432, %s2415_s16 }
  0x14   : > { %s1824_s29 = sshll.u32 %s186_s27, 3  ;;  %s1825_s30 = sshll.u32 %s181_s23, 1 }
  0x15   : > { %s2497_s7 = scalar_lea.vmem %s3536_s3, %s1824_s29  ;;  %s201_s8 = sadd.s32 %s1828_s26, %s200_s28 }
  0x16   : > { %s3573_s15 = smov (!%p192_p7, %s2411_s15), 1  ;;  %s2503_s11 = scalar_lea.vmem %s3533_s0, %s201_s8 }
  0x17   : > { %s195_s12 = sadd.s32 %s1825_s30, %s3573_s15  ;;  %v259_v0 = vld [vmem:[%s2503_s11] sm:$0xff]  ;;  %v261_v1 = vld [vmem:[%s2503_s11 + $0x8] sm:$0xff]  ;;  %v263_v2 = vld [vmem:[%s2503_s11 + $0x18] sm:$0xff] }
  0x18   : > { %s1826_s13 = sshll.u32 %s195_s12, 1  ;;  %260 = vst [vmem:[#allocation2 + $0x40] sm:$0xff] %v259_v0  ;;  %262 = vst [vmem:[#allocation2] sm:$0xff] %v261_v1  ;;  %v265_v3 = vld [vmem:[%s2503_s11 + $0x20] sm:$0xff]  ;;  %v267_v4 = vld [vmem:[%s2503_s11 + $0x30] sm:$0xff] }
  0x19   : > { %264 = vst [vmem:[#allocation2 + $0xb8] sm:$0xff] %v263_v2  ;;  %v269_v5 = vld [vmem:[%s2503_s11 + $0x38] sm:$0xff]  ;;  %s2514_s22 = scalar_lea.vmem %s3537_s4, %s1826_s13  ;;  %266 = vst [vmem:[#allocation2 + $0x20] sm:$0xff] %v265_v3  ;;  %v271_v6 = vld [vmem:[%s2503_s11 + $0x48] sm:$0xff] }
  0x1a   : > { %268 = vst [vmem:[#allocation2 + $0x78] sm:$0xff] %v267_v4  ;;  %270 = vst [vmem:[#allocation2 + $0x98] sm:$0xff] %v269_v5  ;;  %v273_v7 = vld [vmem:[%s2503_s11 + $0x50] sm:$0xff]  ;;  %v275_v8 = vld [vmem:[%s2503_s11 + $0x60] sm:$0xff] }
  0x1b   : > { %272 = vst [vmem:[#allocation2 + $0x48] sm:$0xff] %v271_v6  ;;  %274 = vst [vmem:[#allocation2 + $0x68] sm:$0xff] %v273_v7  ;;  %v277_v9 = vld [vmem:[%s2503_s11 + $0x68] sm:$0xff]  ;;  %v279_v10 = vld [vmem:[%s2503_s11 + $0x78] sm:$0xff] }
  0x1c   : > { %276 = vst [vmem:[#allocation2 + $0xc0] sm:$0xff] %v275_v8  ;;  %v281_v11 = vld [vmem:[%s2503_s11 + $0x80] sm:$0xff]  ;;  %278 = vst [vmem:[#allocation2 + $0xc8] sm:$0xff] %v277_v9  ;;  %v283_v12 = vld [vmem:[%s2503_s11 + $0x90] sm:$0xff] }
  0x1d   : > { %280 = vst [vmem:[#allocation2 + $0xe8] sm:$0xff] %v279_v10  ;;  %282 = vst [vmem:[#allocation2 + $0x58] sm:$0xff] %v281_v11  ;;  %v285_v13 = vld [vmem:[%s2503_s11 + $0x98] sm:$0xff]  ;;  %v287_v14 = vld [vmem:[%s2503_s11 + $0xa8] sm:$0xff] }
  0x1e   : > { %284 = vst [vmem:[#allocation2 + $0x90] sm:$0xff] %v283_v12  ;;  %286 = vst [vmem:[#allocation2 + $0x28] sm:$0xff] %v285_v13  ;;  %v289_v15 = vld [vmem:[%s2503_s11 + $0xb0] sm:$0xff]  ;;  %v291_v16 = vld [vmem:[%s2503_s11 + $0xc0] sm:$0xff] }
  0x1f   : > { %288 = vst [vmem:[#allocation2 + $0xa8] sm:$0xff] %v287_v14  ;;  %v293_v17 = vld [vmem:[%s2503_s11 + $0xc8] sm:$0xff]  ;;  %290 = vst [vmem:[#allocation2 + $0x60] sm:$0xff] %v289_v15  ;;  %v295_v18 = vld [vmem:[%s2503_s11 + $0xd8] sm:$0xff] }
  0x20   : > { %292 = vst [vmem:[#allocation2 + $0x8] sm:$0xff] %v291_v16  ;;  %294 = vst [vmem:[#allocation2 + $0xb0] sm:$0xff] %v293_v17  ;;  %v297_v19 = vld [vmem:[%s2503_s11 + $0xe0] sm:$0xff]  ;;  %v1829_v20 = vld [vmem:[%s2503_s11 + $0x10] sm:$0x3] }
  0x21   : > { %296 = vst [vmem:[#allocation2 + $0x70] sm:$0xff] %v295_v18  ;;  %298 = vst [vmem:[#allocation2 + $0x18] sm:$0xff] %v297_v19  ;;  %v1830_v21 = vld [vmem:[%s2503_s11 + $0x28] sm:$0x3]  ;;  %v1831_v22 = vld [vmem:[%s2503_s11 + $0x40] sm:$0x3] }
  0x22   : > { %310 = vst [vmem:[#allocation2 + $0x50] sm:$0x3] %v1829_v20  ;;  %v1832_v23 = vld [vmem:[%s2503_s11 + $0x58] sm:$0x3]  ;;  %312 = vst [vmem:[#allocation2 + $0x38] sm:$0x3] %v1830_v21 }
  0x23   : > { %314 = vst [vmem:[#allocation2 + $0xd8] sm:$0x3] %v1831_v22  ;;  %316 = vst [vmem:[#allocation2 + $0x10] sm:$0x3] %v1832_v23  ;;  %v1833_v24 = vld [vmem:[%s2503_s11 + $0x70] sm:$0x3] }
  0x24   : > { %v1834_v25 = vld [vmem:[%s2503_s11 + $0x88] sm:$0x3]  ;;  %v1835_v26 = vld [vmem:[%s2503_s11 + $0xa0] sm:$0x3]  ;;  %318 = vst [vmem:[#allocation2 + $0x80] sm:$0x3] %v1833_v24 }
  0x25   : > { %320 = vst [vmem:[#allocation2 + $0xa0] sm:$0x3] %v1834_v25  ;;  %322 = vst [vmem:[#allocation2 + $0xe0] sm:$0x3] %v1835_v26  ;;  %v1836_v27 = vld [vmem:[%s2503_s11 + $0xb8] sm:$0x3] }
  0x26   : > { %v1837_v28 = vld [vmem:[%s2503_s11 + $0xd0] sm:$0x3]  ;;  %v1838_v29 = vld [vmem:[%s2503_s11 + $0xe8] sm:$0x3]  ;;  %324 = vst [vmem:[#allocation2 + $0x88] sm:$0x3] %v1836_v27 }
  0x27   : > { %326 = vst [vmem:[#allocation2 + $0xd0] sm:$0x3] %v1837_v28  ;;  %328 = vst [vmem:[#allocation2 + $0x30] sm:$0x3] %v1838_v29 }
  0x28   : > { %332 = vsyncadd [#allocation3], 2880 }
  0x29   : > { %2407 = dma.done.wait [#allocation3], 2880 }
  0x2a   : > { %2408 = vsyncadd [#allocation3], 4294964416  ;;  %v601_v30 = vld [vmem:[%s3534_s1 + $0x278] sm:$0xff]  ;;  %v600_v33 = vld [vmem:[%s3534_s1 + $0x270] sm:$0xff]  ;;  %vm391_vm0 = vcmask 1046528   ;;  %vm448_vm1 = vcmask 1045504  }
  0x2b   : > { %v617_v31 = vld [vmem:[%s3534_s1 + $0x2f8] sm:$0xff]  ;;  %1843 = vmatprep.subr.mxu0 %v601_v30  ;;  %v616_v34 = vld [vmem:[%s3534_s1 + $0x2f0] sm:$0xff]  ;;  %v599_v36 = vld [vmem:[%s3534_s1 + $0x268] sm:$0xff] }
  0x2c   : > { %v585_v32 = vld [vmem:[%s3534_s1 + $0x1f8] sm:$0xff]  ;;  %2179 = vmatprep.subr.mxu1 %v617_v31  ;;  %v584_v35 = vld [vmem:[%s3534_s1 + $0x1f0] sm:$0xff]  ;;  %v615_v37 = vld [vmem:[%s3534_s1 + $0x2e8] sm:$0xff] }
  0x2d   : > { %1844 = vmatpush3.msra.mxu0 %v585_v32  ;;  %2180 = vmatpush3.msra.mxu1 %v617_v31  ;;  %v583_v38 = vld [vmem:[%s3534_s1 + $0x1e8] sm:$0xff]  ;;  %v598_v39 = vld [vmem:[%s3534_s1 + $0x260] sm:$0xff]  ;;  %v597_v42 = vld [vmem:[%s3534_s1 + $0x258] sm:$0xff] }
  0x2e   : > { %1845 = vmatprep.subr.mxu0 %v600_v33  ;;  %2181 = vmatprep.subr.mxu1 %v616_v34  ;;  %v614_v40 = vld [vmem:[%s3534_s1 + $0x2e0] sm:$0xff]  ;;  %v613_v43 = vld [vmem:[%s3534_s1 + $0x2d8] sm:$0xff]  ;;  %v596_v45 = vld [vmem:[%s3534_s1 + $0x250] sm:$0xff] }
  0x2f   : > { %1846 = vmatpush3.msra.mxu0 %v584_v35  ;;  %2182 = vmatpush3.msra.mxu1 %v616_v34  ;;  %v582_v41 = vld [vmem:[%s3534_s1 + $0x1e0] sm:$0xff]  ;;  %v581_v44 = vld [vmem:[%s3534_s1 + $0x1d8] sm:$0xff]  ;;  %v612_v46 = vld [vmem:[%s3534_s1 + $0x2d0] sm:$0xff] }
  0x30   : > { %1847 = vmatprep.subr.mxu0 %v599_v36  ;;  %2183 = vmatprep.subr.mxu1 %v615_v37  ;;  %v580_v47 = vld [vmem:[%s3534_s1 + $0x1d0] sm:$0xff]  ;;  %v595_v48 = vld [vmem:[%s3534_s1 + $0x248] sm:$0xff]  ;;  %v594_v51 = vld [vmem:[%s3534_s1 + $0x240] sm:$0xff] }
  0x31   : > { %1848 = vmatpush3.msra.mxu0 %v583_v38  ;;  %2184 = vmatpush3.msra.mxu1 %v615_v37  ;;  %v611_v49 = vld [vmem:[%s3534_s1 + $0x2c8] sm:$0xff]  ;;  %v610_v52 = vld [vmem:[%s3534_s1 + $0x2c0] sm:$0xff]  ;;  %v593_v54 = vld [vmem:[%s3534_s1 + $0x238] sm:$0xff] }
  0x32   : > { %1849 = vmatprep.subr.mxu0 %v598_v39  ;;  %2185 = vmatprep.subr.mxu1 %v614_v40  ;;  %v579_v50 = vld [vmem:[%s3534_s1 + $0x1c8] sm:$0xff]  ;;  %v578_v53 = vld [vmem:[%s3534_s1 + $0x1c0] sm:$0xff]  ;;  %v609_v55 = vld [vmem:[%s3534_s1 + $0x2b8] sm:$0xff] }
  0x33   : > { %1850 = vmatpush3.msra.mxu0 %v582_v41  ;;  %2186 = vmatpush3.msra.mxu1 %v614_v40  ;;  %v577_v56 = vld [vmem:[%s3534_s1 + $0x1b8] sm:$0xff]  ;;  %v592_v57 = vld [vmem:[%s3534_s1 + $0x230] sm:$0xff]  ;;  %v591_v60 = vld [vmem:[%s3534_s1 + $0x228] sm:$0xff] }
  0x34   : > { %1851 = vmatprep.subr.mxu0 %v597_v42  ;;  %2187 = vmatprep.subr.mxu1 %v613_v43  ;;  %v608_v58 = vld [vmem:[%s3534_s1 + $0x2b0] sm:$0xff]  ;;  %v607_v61 = vld [vmem:[%s3534_s1 + $0x2a8] sm:$0xff]  ;;  %v590_v63 = vld [vmem:[%s3534_s1 + $0x220] sm:$0xff] }
  0x35   : > { %1852 = vmatpush3.msra.mxu0 %v581_v44  ;;  %2188 = vmatpush3.msra.mxu1 %v613_v43  ;;  %v576_v59 = vld [vmem:[%s3534_s1 + $0x1b0] sm:$0xff]  ;;  %v575_v62 = vld [vmem:[%s3534_s1 + $0x1a8] sm:$0xff]  ;;  %v606_v0 = vld [vmem:[%s3534_s1 + $0x2a0] sm:$0xff] }
  0x36   : > { %1853 = vmatprep.subr.mxu0 %v596_v45  ;;  %2189 = vmatprep.subr.mxu1 %v612_v46  ;;  %v574_v1 = vld [vmem:[%s3534_s1 + $0x1a0] sm:$0xff]  ;;  %v589_v2 = vld [vmem:[%s3534_s1 + $0x218] sm:$0xff]  ;;  %v588_v7 = vld [vmem:[%s3534_s1 + $0x210] sm:$0xff] }
  0x37   : > { %1854 = vmatpush3.msra.mxu0 %v580_v47  ;;  %2190 = vmatpush3.msra.mxu1 %v612_v46  ;;  %v605_v3 = vld [vmem:[%s3534_s1 + $0x298] sm:$0xff]  ;;  %v2656_v5 = vld [vmem:[#allocation2 + $0x20] sm:$0xff]  ;;  %v604_v8 = vld [vmem:[%s3534_s1 + $0x290] sm:$0xff] }
  0x38   : > { %1855 = vmatprep.subr.mxu0 %v595_v48  ;;  %2191 = vmatprep.subr.mxu1 %v611_v49  ;;  %v2654_v4 = vld [vmem:[#allocation2 + $0xb8] sm:$0xff]  ;;  %v572_v10 = vld [vmem:[%s3534_s1 + $0x190] sm:$0xff]  ;;  %v398_v12 = vrot.slane %v2656_v5, 1  ;;  %v587_v13 = vld [vmem:[%s3534_s1 + $0x208] sm:$0xff]  ;;  %v455_v16 = vrot.slane %v2656_v5, 2 }
  0x39   : > { %1856 = vmatpush3.msra.mxu0 %v579_v50  ;;  %2192 = vmatpush3.msra.mxu1 %v611_v49  ;;  %v573_v6 = vld [vmem:[%s3534_s1 + $0x198] sm:$0xff]  ;;  %v397_v11 = vrot.slane %v2654_v4, 1  ;;  %v603_v14 = vld [vmem:[%s3534_s1 + $0x288] sm:$0xff]  ;;  %v454_v15 = vrot.slane %v2654_v4, 2  ;;  %v586_v18 = vld [vmem:[%s3534_s1 + $0x200] sm:$0xff] }
  0x3a   : > { %1857 = vmatprep.subr.mxu0 %v594_v51  ;;  %2193 = vmatprep.subr.mxu1 %v610_v52  ;;  %v342_v9 = vld [vmem:[#allocation2 + $0x38] sm:$0x3]  ;;  %v571_v17 = vld [vmem:[%s3534_s1 + $0x188] sm:$0xff]  ;;  %v602_v20 = vld [vmem:[%s3534_s1 + $0x280] sm:$0xff] }
  0x3b   : > { %1858 = vmatpush3.msra.mxu0 %v578_v53  ;;  %2194 = vmatpush3.msra.mxu1 %v610_v52  ;;  %v457_v19 = vrot.slane %v342_v9, 2  ;;  %v2689_v21 = vld [vmem:[#allocation2 + $0x78] sm:$0xff]  ;;  %v570_v23 = vld [vmem:[%s3534_s1 + $0x180] sm:$0xff]  ;;  %v2697_v24 = vsel %vm391_vm0, %v397_v11, %v398_v12  ;;  %v2702_v26 = vsel %vm448_vm1, %v454_v15, %v455_v16  ;;  %v400_v27 = vrot.slane %v342_v9, 1  ;;  %v2721_v35 = vld [vmem:[#allocation2 + $0x48] sm:$0xff] }
  0x3c   : > { %1859 = vmatprep.subr.mxu0 %v593_v54  ;;  %2195 = vmatprep.subr.mxu1 %v609_v55  ;;  %v2691_v22 = vld [vmem:[#allocation2 + $0x98] sm:$0xff]  ;;  %v459_v29 = vrot.slane %v2689_v21, 2  ;;  %v2723_v36 = vld [vmem:[#allocation2 + $0x68] sm:$0xff]  ;;  %v535_v37 = vld [vmem:[%s3534_s1 + $0xf0] sm:$0xff]  ;;  %v402_v42 = vrot.slane %v2689_v21, 1  ;;  %v464_v45 = vrot.slane %v2721_v35, 2 }
  0x3d   : > { %1860 = vmatpush3.msra.mxu0 %v577_v56  ;;  %2196 = vmatpush3.msra.mxu1 %v609_v55  ;;  %v2699_v25 = vld [vmem:[#allocation2 + $0xd8] sm:$0x3]  ;;  %v2705_v28 = vsel %vm448_vm1, %v455_v16, %v457_v19  ;;  %v460_v30 = vrot.slane %v2691_v22, 2  ;;  %v2731_v38 = vsel %vm391_vm0, %v398_v12, %v400_v27  ;;  %v2733_v39 = vld [vmem:[#allocation2 + $0x10] sm:$0x3]  ;;  %v403_v43 = vrot.slane %v2691_v22, 1 }
  0x3e   : > { %1861 = vmatprep.subr.mxu0 %v592_v57  ;;  %2197 = vmatprep.subr.mxu1 %v608_v58  ;;  %v536_v31 = vld [vmem:[%s3534_s1 + $0xf8] sm:$0xff]  ;;  %v462_v33 = vrot.slane %v2699_v25, 2  ;;  %v519_v41 = vld [vmem:[%s3534_s1 + $0x70] sm:$0xff]  ;;  %v465_v46 = vrot.slane %v2723_v36, 2  ;;  %v534_v47 = vld [vmem:[%s3534_s1 + $0xe8] sm:$0xff]  ;;  %v467_v49 = vrot.slane %v2733_v39, 2 }
  0x3f   : > { %1862 = vmatpush3.msra.mxu0 %v576_v59  ;;  %2198 = vmatpush3.msra.mxu1 %v608_v58  ;;  %v552_v32 = vld [vmem:[%s3534_s1 + $0x178] sm:$0xff]  ;;  %v2736_v40 = vsel %vm448_vm1, %v459_v29, %v460_v30  ;;  %v551_v48 = vld [vmem:[%s3534_s1 + $0x170] sm:$0xff]  ;;  %v518_v50 = vld [vmem:[%s3534_s1 + $0x68] sm:$0xff]  ;;  %v2770_v54 = vsel %vm391_vm0, %v402_v42, %v403_v43  ;;  %v405_v58 = vrot.slane %v2699_v25, 1  ;;  %v407_v11 = vrot.slane %v2721_v35, 1 }
  0x40   : > { %1863 = vmatprep.subr.mxu0 %v591_v60  ;;  %2199 = vmatprep.subr.mxu1 %v607_v61  ;;  %v520_v34 = vld [vmem:[%s3534_s1 + $0x78] sm:$0xff]  ;;  %v2744_v44 = vsel %vm448_vm1, %v460_v30, %v462_v33  ;;  %v2760_v51 = vld [vmem:[#allocation2 + $0xc0] sm:$0xff]  ;;  %v2762_v52 = vld [vmem:[#allocation2 + $0xc8] sm:$0xff]  ;;  %v2775_v56 = vsel %vm448_vm1, %v464_v45, %v465_v46  ;;  %v2782_v59 = vsel %vm448_vm1, %v465_v46, %v467_v49  ;;  %v408_v12 = vrot.slane %v2723_v36, 1 }
  0x41   : > { %1864 = vmatpush3.msra.mxu0 %v575_v62  ;;  %2200 = vmatpush3.msra.mxu1 %v607_v61  ;;  %v533_v53 = vld [vmem:[%s3534_s1 + $0xe0] sm:$0xff]  ;;  %v469_v60 = vrot.slane %v2760_v51, 2  ;;  %v470_v61 = vrot.slane %v2762_v52, 2  ;;  %v532_v62 = vld [vmem:[%s3534_s1 + $0xd8] sm:$0xff]  ;;  %v530_v16 = vld [vmem:[%s3534_s1 + $0xc8] sm:$0xff] }
  0x42   : > { %1865 = vmatprep.subr.mxu0 %v590_v63  ;;  %2201 = vmatprep.subr.mxu1 %v606_v0  ;;  %v2772_v55 = vld [vmem:[#allocation2 + $0x80] sm:$0x3]  ;;  %v550_v63 = vld [vmem:[%s3534_s1 + $0x168] sm:$0xff]  ;;  %v2847_v27 = vsel %vm391_vm0, %v407_v11, %v408_v12  ;;  %v2916_v11 = vld [vmem:[#allocation2 + $0xb0] sm:$0xff] }
  0x43   : > { %1866 = vmatpush3.msra.mxu0 %v574_v1  ;;  %2202 = vmatpush3.msra.mxu1 %v606_v0  ;;  %v517_v57 = vld [vmem:[%s3534_s1 + $0x60] sm:$0xff]  ;;  %v472_v0 = vrot.slane %v2772_v55, 2  ;;  %v516_v1 = vld [vmem:[%s3534_s1 + $0x58] sm:$0xff]  ;;  %v2813_v9 = vsel %vm448_vm1, %v469_v60, %v470_v61  ;;  %v514_v19 = vld [vmem:[%s3534_s1 + $0x48] sm:$0xff] }
  0x44   : > { %1867 = vmatprep.subr.mxu0 %v589_v2  ;;  %2203 = vmatprep.subr.mxu1 %v605_v3  ;;  %v2798_v2 = vld [vmem:[#allocation2 + $0xe8] sm:$0xff]  ;;  %v529_v25 = vld [vmem:[%s3534_s1 + $0xc0] sm:$0xff] }
  0x45   : > { %1868 = vmatpush3.msra.mxu0 %v573_v6  ;;  %2204 = vmatpush3.msra.mxu1 %v605_v3  ;;  %v2800_v3 = vld [vmem:[#allocation2 + $0x58] sm:$0xff]  ;;  %v531_v6 = vld [vmem:[%s3534_s1 + $0xd0] sm:$0xff]  ;;  %v2849_v29 = vld [vmem:[#allocation2 + $0xe0] sm:$0x3] }
  0x46   : > { %1869 = vmatprep.subr.mxu0 %v588_v7  ;;  %2205 = vmatprep.subr.mxu1 %v604_v8  ;;  %v2808_v7 = vsel %vm391_vm0, %v403_v43, %v405_v58  ;;  %v475_v15 = vrot.slane %v2800_v3, 2  ;;  %v482_v42 = vrot.slane %v2849_v29, 2  ;;  %v512_v43 = vld [vmem:[%s3534_s1 + $0x38] sm:$0xff]  ;;  %v2875_v45 = vld [vmem:[#allocation2 + $0xa8] sm:$0xff]  ;;  %v2877_v46 = vld [vmem:[#allocation2 + $0x60] sm:$0xff]  ;;  %v413_v58 = vrot.slane %v2762_v52, 1 }
  0x47   : > { %1870 = vmatpush3.msra.mxu0 %v572_v10  ;;  %2206 = vmatpush3.msra.mxu1 %v604_v8  ;;  %v2810_v8 = vld [vmem:[#allocation2 + $0xa0] sm:$0x3]  ;;  %v515_v10 = vld [vmem:[%s3534_s1 + $0x50] sm:$0xff]  ;;  %v2887_v49 = vld [vmem:[#allocation2 + $0x88] sm:$0x3] }
  0x48   : > { %1871 = vmatprep.subr.mxu0 %v587_v13  ;;  %2207 = vmatprep.subr.mxu1 %v603_v14  ;;  %v2821_v13 = vsel %vm448_vm1, %v470_v61, %v472_v0  ;;  %v484_v61 = vrot.slane %v2875_v45, 2  ;;  %v547_v0 = vld [vmem:[%s3534_s1 + $0x150] sm:$0xff] }
  0x49   : > { %1872 = vmatpush3.msra.mxu0 %v571_v17  ;;  %2208 = vmatpush3.msra.mxu1 %v603_v14  ;;  %v474_v14 = vrot.slane %v2798_v2, 2  ;;  %v549_v17 = vld [vmem:[%s3534_s1 + $0x160] sm:$0xff] }
  0x4a   : > { %1873 = vmatprep.subr.mxu0 %v586_v18  ;;  %2209 = vmatprep.subr.mxu1 %v602_v20  ;;  %v477_v18 = vrot.slane %v2810_v8, 2 }
  0x4b   : > { %1874 = vmatpush3.msra.mxu0 %v570_v23  ;;  %682 = vmatprep.mubr.f32.mxu0 %v2697_v24  ;;  %v2839_v23 = vld [vmem:[#allocation2 + $0x28] sm:$0xff]  ;;  %v2852_v30 = vsel %vm448_vm1, %v474_v14, %v475_v15 }
  0x4c   : > { %2210 = vmatpush3.msra.mxu1 %v602_v20  ;;  %2211 = vmatprep.mubr.f32.mxu1 %v2702_v26  ;;  %v2837_v20 = vld [vmem:[#allocation2 + $0x90] sm:$0xff]  ;;  %v2859_v33 = vsel %vm448_vm1, %v475_v15, %v477_v18  ;;  %v415_v18 = vrot.slane %v2772_v55, 1  ;;  %v546_v55 = vld [vmem:[%s3534_s1 + $0x148] sm:$0xff] }
  0x4d   : > { %683 = vmatmul.mubr.f32.vlgmr.msra.gmra.mxu0 %v2654_v4  ;;  %2212 = vmatmul.mubr.f32.vlgmr.msra.gmra.mxu1 %v2705_v28  ;;  %v2926_v15 = vld [vmem:[#allocation2 + $0xd0] sm:$0x3] }
  0x4e   : > { %1955 = vmatprep.subr.mxu1 %v536_v31  ;;  %2235 = vmatprep.subr.mxu0 %v552_v32  ;;  %v513_v31 = vld [vmem:[%s3534_s1 + $0x40] sm:$0xff] }
  0x4f   : > { %1956 = vmatpush3.msra.mxu1 %v520_v34  ;;  %2236 = vmatpush3.msra.mxu0 %v552_v32  ;;  %v410_v32 = vrot.slane %v2733_v39, 1  ;;  %v479_v34 = vrot.slane %v2837_v20, 2  ;;  %v548_v39 = vld [vmem:[%s3534_s1 + $0x158] sm:$0xff] }
  0x50   : > { %1957 = vmatprep.subr.mxu1 %v535_v37  ;;  %687 = vmatprep.mubr.f32.mxu0 %v2731_v38  ;;  %v480_v37 = vrot.slane %v2839_v23, 2 }
  0x51   : > { %2214 = vmatprep.mubr.f32.mxu1 %v2736_v40  ;;  %1958 = vmatpush3.msra.mxu1 %v519_v41  ;;  %v528_v41 = vld [vmem:[%s3534_s1 + $0xb8] sm:$0xff] }
  0x52   : > { %688 = vmatmul.mubr.f32.gmra.mxu0 %v2656_v5  ;;  %2215 = vmatmul.mubr.f32.gmra.mxu1 %v2744_v44  ;;  %v2898_v60 = vsel %vm448_vm1, %v480_v37, %v482_v42  ;;  %v523_v42 = vld [vmem:[%s3534_s1 + $0x90] sm:$0xff] }
  0x53   : > { %1959 = vmatprep.subr.mxu1 %v534_v47  ;;  %2237 = vmatprep.subr.mxu0 %v551_v48  ;;  %v527_v47 = vld [vmem:[%s3534_s1 + $0xb0] sm:$0xff] }
  0x54   : > { %1960 = vmatpush3.msra.mxu1 %v518_v50  ;;  %2238 = vmatpush3.msra.mxu0 %v551_v48  ;;  %v2885_v48 = vsel %vm391_vm0, %v408_v12, %v410_v32  ;;  %v2890_v50 = vsel %vm448_vm1, %v479_v34, %v480_v37  ;;  %v525_v12 = vld [vmem:[%s3534_s1 + $0xa0] sm:$0xff]  ;;  %v524_v32 = vld [vmem:[%s3534_s1 + $0x98] sm:$0xff]  ;;  %v566_v34 = vrot.slane %v2926_v15, 2 }
  0x55   : > { %1961 = vmatprep.subr.mxu1 %v533_v53  ;;  %692 = vmatprep.mubr.f32.mxu0 %v2770_v54  ;;  %v511_v53 = vld [vmem:[%s3534_s1 + $0x30] sm:$0xff]  ;;  %v508_v37 = vld [vmem:[%s3534_s1 + $0x18] sm:$0xff] }
  0x56   : > { %2217 = vmatprep.mubr.f32.mxu1 %v2775_v56  ;;  %1962 = vmatpush3.msra.mxu1 %v517_v57  ;;  %v412_v57 = vrot.slane %v2760_v51, 1 }
  0x57   : > { %693 = vmatmul.mubr.f32.gmra.mxu0 %v2689_v21  ;;  %2218 = vmatmul.mubr.f32.gmra.mxu1 %v2782_v59 }
  0x58   : > { %1963 = vmatprep.subr.mxu1 %v532_v62  ;;  %2239 = vmatprep.subr.mxu0 %v550_v63  ;;  %v485_v62 = vrot.slane %v2877_v46, 2  ;;  %v2924_v14 = vsel %vm391_vm0, %v412_v57, %v413_v58  ;;  %v417_v57 = vrot.slane %v2798_v2, 1 }
  0x59   : > { %1964 = vmatpush3.msra.mxu1 %v516_v1  ;;  %2240 = vmatpush3.msra.mxu0 %v550_v63  ;;  %v526_v63 = vld [vmem:[%s3534_s1 + $0xa8] sm:$0xff]  ;;  %v487_v1 = vrot.slane %v2887_v49, 2 }
  0x5a   : > { %1965 = vmatprep.subr.mxu1 %v531_v6  ;;  %697 = vmatprep.mubr.f32.mxu0 %v2808_v7  ;;  %v510_v6 = vld [vmem:[%s3534_s1 + $0x28] sm:$0xff] }
  0x5b   : > { %2220 = vmatprep.mubr.f32.mxu1 %v2813_v9  ;;  %1966 = vmatpush3.msra.mxu1 %v515_v10  ;;  %v2914_v10 = vld [vmem:[#allocation2 + $0x8] sm:$0xff] }
  0x5c   : > { %698 = vmatmul.mubr.f32.gmra.mxu0 %v2691_v22  ;;  %2221 = vmatmul.mubr.f32.gmra.mxu1 %v2821_v13 }
  0x5d   : > { %1967 = vmatprep.subr.mxu1 %v530_v16  ;;  %2241 = vmatprep.subr.mxu0 %v549_v17  ;;  %v2929_v16 = vsel %vm448_vm1, %v484_v61, %v485_v62  ;;  %v418_v61 = vrot.slane %v2800_v3, 1 }
  0x5e   : > { %1968 = vmatpush3.msra.mxu1 %v514_v19  ;;  %2242 = vmatpush3.msra.mxu0 %v549_v17  ;;  %v509_v17 = vld [vmem:[%s3534_s1 + $0x20] sm:$0xff]  ;;  %v2936_v19 = vsel %vm448_vm1, %v485_v62, %v487_v1  ;;  %v522_v1 = vld [vmem:[%s3534_s1 + $0x88] sm:$0xff] }
  0x5f   : > { %1969 = vmatprep.subr.mxu1 %v529_v25  ;;  %702 = vmatprep.mubr.f32.mxu0 %v2847_v27  ;;  %v563_v25 = vrot.slane %v2914_v10, 2 }
  0x60   : > { %2223 = vmatprep.mubr.f32.mxu1 %v2852_v30  ;;  %1970 = vmatpush3.msra.mxu1 %v513_v31  ;;  %v564_v31 = vrot.slane %v2916_v11, 2 }
  0x61   : > { %703 = vmatmul.mubr.f32.gmra.mxu0 %v2721_v35  ;;  %2224 = vmatmul.mubr.f32.gmra.mxu1 %v2859_v33 }
  0x62   : > { %1971 = vmatprep.subr.mxu1 %v528_v41  ;;  %2243 = vmatprep.subr.mxu0 %v548_v39  ;;  %v2952_v41 = vld [vmem:[#allocation2 + $0x40] sm:$0xff]  ;;  %v2973_v62 = vsel %vm448_vm1, %v564_v31, %v566_v34 }
  0x63   : > { %1972 = vmatpush3.msra.mxu1 %v512_v43  ;;  %2244 = vmatpush3.msra.mxu0 %v548_v39  ;;  %v2954_v39 = vld [vmem:[#allocation2] sm:$0xff]  ;;  %v2962_v43 = vsel %vm391_vm0, %v413_v58, %v415_v18  ;;  %v392_v58 = vrot.slane %v2952_v41, 1 }
  0x64   : > { %1973 = vmatprep.subr.mxu1 %v527_v47  ;;  %707 = vmatprep.mubr.f32.mxu0 %v2885_v48  ;;  %v2965_v47 = vsel %vm448_vm1, %v563_v25, %v564_v31  ;;  %v521_v18 = vld [vmem:[%s3534_s1 + $0x80] sm:$0xff]  ;;  %v2997_v25 = vsel %vm391_vm0, %v417_v57, %v418_v61  ;;  %v543_v57 = vld [vmem:[%s3534_s1 + $0x130] sm:$0xff] }
  0x65   : > { %2226 = vmatprep.mubr.f32.mxu1 %v2890_v50  ;;  %1974 = vmatpush3.msra.mxu1 %v511_v53  ;;  %v507_v53 = vld [vmem:[%s3534_s1 + $0x10] sm:$0xff] }
  0x66   : > { %708 = vmatmul.mubr.f32.gmra.mxu0 %v2723_v36  ;;  %2227 = vmatmul.mubr.f32.gmra.mxu1 %v2898_v60 }
  0x67   : > { %1975 = vmatprep.subr.mxu1 %v526_v63  ;;  %2245 = vmatprep.subr.mxu0 %v547_v0  ;;  %v393_v63 = vrot.slane %v2954_v39, 1 }
  0x68   : > { %1976 = vmatpush3.msra.mxu1 %v510_v6  ;;  %2246 = vmatpush3.msra.mxu0 %v547_v0  ;;  %v2977_v0 = vld [vmem:[#allocation2 + $0x50] sm:$0x3]  ;;  %v545_v6 = vld [vmem:[%s3534_s1 + $0x140] sm:$0xff] }
  0x69   : > { %1977 = vmatprep.subr.mxu1 %v525_v12  ;;  %712 = vmatprep.mubr.f32.mxu0 %v2924_v14  ;;  %v506_v12 = vld [vmem:[%s3534_s1 + $0x8] sm:$0xff]  ;;  %v395_v31 = vrot.slane %v2977_v0, 1 }
  0x6a   : > { %2229 = vmatprep.mubr.f32.mxu1 %v2929_v16  ;;  %1978 = vmatpush3.msra.mxu1 %v509_v17  ;;  %v420_v17 = vrot.slane %v2810_v8, 1  ;;  %v394_v8 = vsel %vm391_vm0, %v392_v58, %v393_v63 }
  0x6b   : > { %713 = vmatmul.mubr.f32.gmra.mxu0 %v2760_v51  ;;  %2230 = vmatmul.mubr.f32.gmra.mxu1 %v2936_v19 }
  0x6c   : > { %1979 = vmatprep.subr.mxu1 %v524_v32  ;;  %2247 = vmatprep.subr.mxu0 %v546_v55  ;;  %v505_v32 = vld [vmem:[%s3534_s1] sm:$0xff]  ;;  %v3009_v34 = vsel %vm391_vm0, %v418_v61, %v420_v17  ;;  %v1262_v61 = vld [vmem:[%s3534_s1 + $0x478] sm:$0xff] }
  0x6d   : > { %1980 = vmatpush3.msra.mxu1 %v508_v37  ;;  %2248 = vmatpush3.msra.mxu0 %v546_v55  ;;  %v544_v55 = vld [vmem:[%s3534_s1 + $0x138] sm:$0xff]  ;;  %v422_v37 = vrot.slane %v2837_v20, 1  ;;  %v541_v17 = vld [vmem:[%s3534_s1 + $0x120] sm:$0xff] }
  0x6e   : > { %1981 = vmatprep.subr.mxu1 %v523_v42  ;;  %717 = vmatprep.mubr.f32.mxu0 %v2962_v43  ;;  %v423_v42 = vrot.slane %v2839_v23, 1 }
  0x6f   : > { %2232 = vmatprep.mubr.f32.mxu1 %v2965_v47  ;;  %1982 = vmatpush3.msra.mxu1 %v507_v53  ;;  %v396_v53 = vsel %vm391_vm0, %v393_v63, %v395_v31  ;;  %v425_v63 = vrot.slane %v2849_v29, 1  ;;  %v427_v29 = vrot.slane %v2875_v45, 1  ;;  %v430_v31 = vrot.slane %v2887_v49, 1 }
  0x70   : > { %718 = vmatmul.mubr.f32.gmra.mxu0 %v2762_v52  ;;  %2233 = vmatmul.mubr.f32.gmra.mxu1 %v2973_v62  ;;  %v3024_v58 = vsel %vm391_vm0, %v422_v37, %v423_v42  ;;  %v556_v49 = vrot.slane %v2914_v10, 1 }
  0x71   : > { %1983 = vmatprep.subr.mxu1 %v522_v1  ;;  %2249 = vmatprep.subr.mxu0 %v545_v6  ;;  %v542_v1 = vld [vmem:[%s3534_s1 + $0x128] sm:$0xff] }
  0x72   : > { %1984 = vmatpush3.msra.mxu1 %v506_v12  ;;  %2250 = vmatpush3.msra.mxu0 %v545_v6  ;;  %v3035_v6 = vsel %vm391_vm0, %v423_v42, %v425_v63  ;;  %v428_v12 = vrot.slane %v2877_v46, 1  ;;  %v559_v42 = vrot.slane %v2926_v15, 1  ;;  %v450_v63 = vrot.slane %v2954_v39, 2 }
  0x73   : > { %1985 = vmatprep.subr.mxu1 %v521_v18  ;;  %722 = vmatprep.mubr.f32.mxu0 %v2997_v25  ;;  %v1261_v18 = vld [vmem:[%s3534_s1 + $0x470] sm:$0xff] }
  0x74   : > { %1986 = vmatpush3.msra.mxu1 %v505_v32  ;;  %972 = vmatprep.mubr.f32.mxu1 %v394_v8  ;;  %v540_v32 = vld [vmem:[%s3534_s1 + $0x118] sm:$0xff]  ;;  %v557_v8 = vrot.slane %v2916_v11, 1 }
  0x75   : > { %723 = vmatmul.mubr.f32.gmra.mxu0 %v2798_v2  ;;  %973 = vmatmul.mubr.f32.vlgmr.msra.gmra.mxu1 %v2952_v41 }
  0x76   : > { %2251 = vmatprep.subr.mxu0 %v544_v55  ;;  %727 = vmatprep.mubr.f32.mxu0 %v3009_v34  ;;  %v3079_v37 = vsel %vm391_vm0, %v556_v49, %v557_v8  ;;  %v3093_v15 = vsel %vm391_vm0, %v557_v8, %v559_v42  ;;  %v1244_v49 = vld [vmem:[%s3534_s1 + $0x3e8] sm:$0xff]  ;;  %v1241_v42 = vld [vmem:[%s3534_s1 + $0x3d0] sm:$0xff] }
  0x77   : > { %2252 = vmatpush3.msra.mxu0 %v544_v55  ;;  %977 = vmatprep.mubr.f32.mxu1 %v396_v53  ;;  %v539_v55 = vld [vmem:[%s3534_s1 + $0x110] sm:$0xff]  ;;  %v538_v53 = vld [vmem:[%s3534_s1 + $0x108] sm:$0xff] }
  0x78   : > { %2253 = vmatprep.subr.mxu0 %v543_v57  ;;  %2291 = vmatprep.subr.mxu1 %v1262_v61  ;;  %v1228_v8 = vld [vmem:[%s3534_s1 + $0x368] sm:$0xff] }
  0x79   : > { %728 = vmatmul.mubr.f32.gmra.mxu0 %v2800_v3  ;;  %978 = vmatmul.mubr.f32.gmra.mxu1 %v2954_v39  ;;  %v1246_v39 = vld [vmem:[%s3534_s1 + $0x3f8] sm:$0xff] }
  0x7a   : > { %2254 = vmatpush3.msra.mxu0 %v543_v57  ;;  %732 = vmatprep.mubr.f32.mxu0 %v3024_v58  ;;  %v1258_v57 = vld [vmem:[%s3534_s1 + $0x458] sm:$0xff] }
  0x7b   : > { %982 = vmatprep.mubr.f32.mxu1 %v2697_v24  ;;  %2255 = vmatprep.subr.mxu0 %v542_v1  ;;  %v3050_v24 = vsel %vm391_vm0, %v427_v29, %v428_v12  ;;  %v1257_v29 = vld [vmem:[%s3534_s1 + $0x450] sm:$0xff] }
  0x7c   : > { %2256 = vmatpush3.msra.mxu0 %v542_v1  ;;  %2292 = vmatpush3.msra.mxu1 %v1262_v61  ;;  %v449_v61 = vrot.slane %v2952_v41, 2  ;;  %v537_v1 = vld [vmem:[%s3534_s1 + $0x100] sm:$0xff] }
  0x7d   : > { %733 = vmatmul.mubr.f32.gmra.mxu0 %v2837_v20  ;;  %983 = vmatmul.mubr.f32.gmra.mxu1 %v2654_v4  ;;  %v1260_v4 = vld [vmem:[%s3534_s1 + $0x468] sm:$0xff] }
  0x7e   : > { %737 = vmatprep.mubr.f32.mxu0 %v3035_v6  ;;  %987 = vmatprep.mubr.f32.mxu1 %v2731_v38  ;;  %v3064_v38 = vsel %vm391_vm0, %v428_v12, %v430_v31  ;;  %v452_v12 = vrot.slane %v2977_v0, 2  ;;  %v451_v41 = vsel %vm448_vm1, %v449_v61, %v450_v63  ;;  %v1245_v31 = vld [vmem:[%s3534_s1 + $0x3f0] sm:$0xff]  ;;  %v1224_v61 = vld [vmem:[%s3534_s1 + $0x348] sm:$0xff] }
  0x7f   : > { %2257 = vmatprep.subr.mxu0 %v541_v17  ;;  %2293 = vmatprep.subr.mxu1 %v1261_v18 }
  0x80   : > { %2258 = vmatpush3.msra.mxu0 %v541_v17  ;;  %2294 = vmatpush3.msra.mxu1 %v1261_v18  ;;  %v1256_v17 = vld [vmem:[%s3534_s1 + $0x448] sm:$0xff]  ;;  %v453_v0 = vsel %vm448_vm1, %v450_v63, %v452_v12  ;;  %v1230_v18 = vld [vmem:[%s3534_s1 + $0x378] sm:$0xff]  ;;  %v1239_v63 = vld [vmem:[%s3534_s1 + $0x3c0] sm:$0xff] }
  0x81   : > { %738 = vmatmul.mubr.f32.gmra.mxu0 %v2839_v23  ;;  %988 = vmatmul.mubr.f32.gmra.mxu1 %v2656_v5  ;;  %v1259_v5 = vld [vmem:[%s3534_s1 + $0x460] sm:$0xff]  ;;  %v1222_v12 = vld [vmem:[%s3534_s1 + $0x338] sm:$0xff] }
  0x82   : > { %742 = vmatprep.mubr.f32.mxu0 %v3050_v24  ;;  %992 = vmatprep.mubr.f32.mxu1 %v2770_v54 }
  0x83   : > { %2259 = vmatprep.subr.mxu0 %v540_v32  ;;  %2295 = vmatprep.subr.mxu1 %v1260_v4 }
  0x84   : > { %2260 = vmatpush3.msra.mxu0 %v540_v32  ;;  %2296 = vmatpush3.msra.mxu1 %v1260_v4  ;;  %v1229_v32 = vld [vmem:[%s3534_s1 + $0x370] sm:$0xff]  ;;  %v1255_v4 = vld [vmem:[%s3534_s1 + $0x440] sm:$0xff] }
  0x85   : > { %743 = vmatmul.mubr.f32.gmra.mxu0 %v2875_v45  ;;  %993 = vmatmul.mubr.f32.gmra.mxu1 %v2689_v21 }
  0x86   : > { %747 = vmatprep.mubr.f32.mxu0 %v3064_v38  ;;  %997 = vmatprep.mubr.f32.mxu1 %v2808_v7 }
  0x87   : > { %2261 = vmatprep.subr.mxu0 %v539_v55  ;;  %2297 = vmatprep.subr.mxu1 %v1259_v5 }
  0x88   : > { %2262 = vmatpush3.msra.mxu0 %v539_v55  ;;  %2298 = vmatpush3.msra.mxu1 %v1259_v5  ;;  %v1243_v55 = vld [vmem:[%s3534_s1 + $0x3e0] sm:$0xff]  ;;  %v1242_v5 = vld [vmem:[%s3534_s1 + $0x3d8] sm:$0xff] }
  0x89   : > { %748 = vmatmul.mubr.f32.gmra.mxu0 %v2877_v46  ;;  %998 = vmatmul.mubr.f32.gmra.mxu1 %v2691_v22 }
  0x8a   : > { %752 = vmatprep.mubr.f32.mxu0 %v3079_v37  ;;  %1002 = vmatprep.mubr.f32.mxu1 %v2847_v27 }
  0x8b   : > { %2263 = vmatprep.subr.mxu0 %v538_v53  ;;  %2299 = vmatprep.subr.mxu1 %v1258_v57 }
  0x8c   : > { %2264 = vmatpush3.msra.mxu0 %v538_v53  ;;  %2300 = vmatpush3.msra.mxu1 %v1258_v57  ;;  %v1225_v53 = vld [vmem:[%s3534_s1 + $0x350] sm:$0xff]  ;;  %v1240_v57 = vld [vmem:[%s3534_s1 + $0x3c8] sm:$0xff] }
  0x8d   : > { %753 = vmatmul.mubr.f32.gmra.mxu0 %v2914_v10  ;;  %1003 = vmatmul.mubr.f32.gmra.mxu1 %v2721_v35 }
  0x8e   : > { %757 = vmatprep.mubr.f32.mxu0 %v3093_v15  ;;  %1007 = vmatprep.mubr.f32.mxu1 %v2885_v48 }
  0x8f   : > { %2265 = vmatprep.subr.mxu0 %v537_v1  ;;  %2301 = vmatprep.subr.mxu1 %v1257_v29 }
  0x90   : > { %2266 = vmatpush3.msra.mxu0 %v537_v1  ;;  %2302 = vmatpush3.msra.mxu1 %v1257_v29  ;;  %v1223_v1 = vld [vmem:[%s3534_s1 + $0x340] sm:$0xff]  ;;  %v1238_v29 = vld [vmem:[%s3534_s1 + $0x3b8] sm:$0xff] }
  0x91   : > { %758 = vmatmul.mubr.f32.gmra.mxu0 %v2916_v11  ;;  %1008 = vmatmul.mubr.f32.gmra.mxu1 %v2723_v36 }
  0x92   : > { %1012 = vmatprep.mubr.f32.mxu1 %v2924_v14  ;;  %2267 = vmatprep.mubr.f32.mxu0 %v451_v41  ;;  %v1254_v41 = vld [vmem:[%s3534_s1 + $0x438] sm:$0xff] }
  0x93   : > { %2067 = vmatprep.subr.mxu0 %v1246_v39  ;;  %2303 = vmatprep.subr.mxu1 %v1256_v17  ;;  %v1237_v39 = vld [vmem:[%s3534_s1 + $0x3b0] sm:$0xff] }
  0x94   : > { %2304 = vmatpush3.msra.mxu1 %v1256_v17  ;;  %v1221_v17 = vld [vmem:[%s3534_s1 + $0x330] sm:$0xff] }
  0x95   : > { %1013 = vmatmul.mubr.f32.gmra.mxu1 %v2760_v51  ;;  %2268 = vmatmul.mubr.f32.vlgmr.msra.gmra.mxu0 %v453_v0  ;;  %v1236_v0 = vld [vmem:[%s3534_s1 + $0x3a8] sm:$0xff] }
  0x96   : > { %2068 = vmatpush3.msra.mxu0 %v1230_v18  ;;  %1017 = vmatprep.mubr.f32.mxu1 %v2962_v43  ;;  %v1253_v18 = vld [vmem:[%s3534_s1 + $0x430] sm:$0xff] }
  0x97   : > { %2069 = vmatprep.subr.mxu0 %v1245_v31  ;;  %2270 = vmatprep.mubr.f32.mxu0 %v2702_v26  ;;  %v1227_v26 = vld [vmem:[%s3534_s1 + $0x360] sm:$0xff]  ;;  %v1220_v31 = vld [vmem:[%s3534_s1 + $0x328] sm:$0xff] }
  0x98   : > { %2070 = vmatpush3.msra.mxu0 %v1229_v32  ;;  %2305 = vmatprep.subr.mxu1 %v1255_v4  ;;  %v1235_v32 = vld [vmem:[%s3534_s1 + $0x3a0] sm:$0xff] }
  0x99   : > { %1018 = vmatmul.mubr.f32.gmra.mxu1 %v2762_v52  ;;  %2271 = vmatmul.mubr.f32.gmra.mxu0 %v2705_v28  ;;  %v1226_v28 = vld [vmem:[%s3534_s1 + $0x358] sm:$0xff] }
  0x9a   : > { %2071 = vmatprep.subr.mxu0 %v1244_v49  ;;  %1022 = vmatprep.mubr.f32.mxu1 %v2997_v25  ;;  %v1219_v49 = vld [vmem:[%s3534_s1 + $0x320] sm:$0xff] }
  0x9b   : > { %2072 = vmatpush3.msra.mxu0 %v1228_v8  ;;  %2273 = vmatprep.mubr.f32.mxu0 %v2736_v40  ;;  %v1234_v8 = vld [vmem:[%s3534_s1 + $0x398] sm:$0xff] }
  0x9c   : > { %2073 = vmatprep.subr.mxu0 %v1243_v55  ;;  %2306 = vmatpush3.msra.mxu1 %v1255_v4  ;;  %v1252_v4 = vld [vmem:[%s3534_s1 + $0x428] sm:$0xff]  ;;  %v1251_v55 = vld [vmem:[%s3534_s1 + $0x420] sm:$0xff] }
  0x9d   : > { %2074 = vmatpush3.msra.mxu0 %v1227_v26  ;;  %1023 = vmatmul.mubr.f32.gmra.mxu1 %v2798_v2  ;;  %v1218_v26 = vld [vmem:[%s3534_s1 + $0x318] sm:$0xff] }
  0x9e   : > { %2274 = vmatmul.mubr.f32.gmra.mxu0 %v2744_v44  ;;  %2075 = vmatprep.subr.mxu0 %v1242_v5  ;;  %v1233_v5 = vld [vmem:[%s3534_s1 + $0x390] sm:$0xff] }
  0x9f   : > { %2076 = vmatpush3.msra.mxu0 %v1226_v28  ;;  %1027 = vmatprep.mubr.f32.mxu1 %v3009_v34  ;;  %v1250_v28 = vld [vmem:[%s3534_s1 + $0x418] sm:$0xff] }
  0xa0   : > { %2077 = vmatprep.subr.mxu0 %v1241_v42  ;;  %2276 = vmatprep.mubr.f32.mxu0 %v2775_v56  ;;  %v1217_v42 = vld [vmem:[%s3534_s1 + $0x310] sm:$0xff] }
  0xa1   : > { %2078 = vmatpush3.msra.mxu0 %v1225_v53  ;;  %1028 = vmatmul.mubr.f32.gmra.mxu1 %v2800_v3  ;;  %v1232_v53 = vld [vmem:[%s3534_s1 + $0x388] sm:$0xff] }
  0xa2   : > { %2277 = vmatmul.mubr.f32.gmra.mxu0 %v2782_v59  ;;  %2079 = vmatprep.subr.mxu0 %v1240_v57  ;;  %v1249_v57 = vld [vmem:[%s3534_s1 + $0x410] sm:$0xff] }
  0xa3   : > { %2080 = vmatpush3.msra.mxu0 %v1224_v61  ;;  %1032 = vmatprep.mubr.f32.mxu1 %v3024_v58  ;;  %v1216_v61 = vld [vmem:[%s3534_s1 + $0x308] sm:$0xff] }
  0xa4   : > { %2081 = vmatprep.subr.mxu0 %v1239_v63  ;;  %2279 = vmatprep.mubr.f32.mxu0 %v2813_v9  ;;  %v1231_v63 = vld [vmem:[%s3534_s1 + $0x380] sm:$0xff] }
  0xa5   : > { %2082 = vmatpush3.msra.mxu0 %v1223_v1  ;;  %1033 = vmatmul.mubr.f32.gmra.mxu1 %v2837_v20  ;;  %v1248_v1 = vld [vmem:[%s3534_s1 + $0x408] sm:$0xff] }
  0xa6   : > { %2280 = vmatmul.mubr.f32.gmra.mxu0 %v2821_v13  ;;  %2083 = vmatprep.subr.mxu0 %v1238_v29  ;;  %v1215_v29 = vld [vmem:[%s3534_s1 + $0x300] sm:$0xff] }
  0xa7   : > { %2084 = vmatpush3.msra.mxu0 %v1222_v12  ;;  %2307 = vmatprep.subr.mxu1 %v1254_v41  ;;  %v1247_v12 = vld [vmem:[%s3534_s1 + $0x400] sm:$0xff] }
  0xa8   : > { %2085 = vmatprep.subr.mxu0 %v1237_v39  ;;  %1037 = vmatprep.mubr.f32.mxu1 %v3035_v6 }
  0xa9   : > { %2282 = vmatprep.mubr.f32.mxu0 %v2852_v30  ;;  %2086 = vmatpush3.msra.mxu0 %v1221_v17 }
  0xaa   : > { %2308 = vmatpush3.msra.mxu1 %v1254_v41  ;;  %2283 = vmatmul.mubr.f32.gmra.mxu0 %v2859_v33 }
  0xab   : > { %1038 = vmatmul.mubr.f32.gmra.mxu1 %v2839_v23  ;;  %2087 = vmatprep.subr.mxu0 %v1236_v0 }
  0xac   : > { %2309 = vmatprep.subr.mxu1 %v1253_v18  ;;  %2088 = vmatpush3.msra.mxu0 %v1220_v31 }
  0xad   : > { %2310 = vmatpush3.msra.mxu1 %v1253_v18  ;;  %2089 = vmatprep.subr.mxu0 %v1235_v32 }
  0xae   : > { %2311 = vmatprep.subr.mxu1 %v1252_v4  ;;  %1042 = vmatprep.mubr.f32.mxu1 %v3050_v24 }
  0xaf   : > { %2285 = vmatprep.mubr.f32.mxu0 %v2890_v50  ;;  %2090 = vmatpush3.msra.mxu0 %v1219_v49 }
  0xb0   : > { %2312 = vmatpush3.msra.mxu1 %v1252_v4  ;;  %2286 = vmatmul.mubr.f32.gmra.mxu0 %v2898_v60 }
  0xb1   : > { %1043 = vmatmul.mubr.f32.gmra.mxu1 %v2875_v45  ;;  %2091 = vmatprep.subr.mxu0 %v1234_v8 }
  0xb2   : > { %2313 = vmatprep.subr.mxu1 %v1251_v55  ;;  %2092 = vmatpush3.msra.mxu0 %v1218_v26 }
  0xb3   : > { %2314 = vmatpush3.msra.mxu1 %v1251_v55  ;;  %2093 = vmatprep.subr.mxu0 %v1233_v5 }
  0xb4   : > { %2315 = vmatprep.subr.mxu1 %v1250_v28  ;;  %1047 = vmatprep.mubr.f32.mxu1 %v3064_v38 }
  0xb5   : > { %2288 = vmatprep.mubr.f32.mxu0 %v2929_v16  ;;  %2094 = vmatpush3.msra.mxu0 %v1217_v42 }
  0xb6   : > { %2316 = vmatpush3.msra.mxu1 %v1250_v28  ;;  %2289 = vmatmul.mubr.f32.gmra.mxu0 %v2936_v19 }
  0xb7   : > { %1048 = vmatmul.mubr.f32.gmra.mxu1 %v2877_v46  ;;  %2095 = vmatprep.subr.mxu0 %v1232_v53 }
  0xb8   : > { %2317 = vmatprep.subr.mxu1 %v1249_v57  ;;  %2096 = vmatpush3.msra.mxu0 %v1216_v61 }
  0xb9   : > { %2318 = vmatpush3.msra.mxu1 %v1249_v57  ;;  %2097 = vmatprep.subr.mxu0 %v1231_v63 }
  0xba   : > { %2319 = vmatprep.subr.mxu1 %v1248_v1  ;;  %2098 = vmatpush3.msra.mxu0 %v1215_v29 }
  0xbb   : > { %1327 = vmatprep.mubr.f32.mxu0 %v2770_v54  ;;  %2320 = vmatpush3.msra.mxu1 %v1248_v1 }
  0xbc   : > { %1328 = vmatmul.mubr.f32.vlgmr.msra.gmra.mxu0 %v2689_v21  ;;  %2321 = vmatprep.subr.mxu1 %v1247_v12  ;;  %v364_v21 = vld [vmem:[#allocation2 + $0x70] sm:$0xff] }
  0xbd   : > { %2322 = vmatpush3.msra.mxu1 %v1247_v12  ;;  %2323 = vmatprep.mubr.f32.mxu1 %v2736_v40  ;;  %v366_v40 = vld [vmem:[#allocation2 + $0x30] sm:$0x3]  ;;  %v1201_v54 = vrot.slane %v364_v21, 1 }
  0xbe   : > { %2324 = vmatmul.mubr.f32.vlgmr.msra.gmra.mxu1 %v2744_v44  ;;  %1332 = vmatprep.mubr.f32.mxu0 %v2808_v7  ;;  %v1211_v44 = vrot.slane %v366_v40, 2 }
  0xbf   : > { %2326 = vmatprep.mubr.f32.mxu1 %v2775_v56 }
  0xc0   : > { %1333 = vmatmul.mubr.f32.gmra.mxu0 %v2691_v22  ;;  %v365_v22 = vld [vmem:[#allocation2 + $0x18] sm:$0xff] }
  0xc1   : > { %1337 = vmatprep.mubr.f32.mxu0 %v2847_v27  ;;  %v1202_v56 = vrot.slane %v365_v22, 1 }
  0xc2   : > { %2327 = vmatmul.mubr.f32.gmra.mxu1 %v2782_v59 }
  0xc3   : > { %2329 = vmatprep.mubr.f32.mxu1 %v2813_v9  ;;  %v1203_v59 = vsel %vm391_vm0, %v1201_v54, %v1202_v56 }
  0xc4   : > { %1338 = vmatmul.mubr.f32.gmra.mxu0 %v2721_v35  ;;  %v1208_v35 = vrot.slane %v364_v21, 2 }
  0xc5   : > { %1342 = vmatprep.mubr.f32.mxu0 %v2885_v48 }
  0xc6   : > { %2330 = vmatmul.mubr.f32.gmra.mxu1 %v2821_v13 }
  0xc7   : > { %2332 = vmatprep.mubr.f32.mxu1 %v2852_v30 }
  0xc8   : > { %1343 = vmatmul.mubr.f32.gmra.mxu0 %v2723_v36  ;;  %v1209_v36 = vrot.slane %v365_v22, 2 }
  0xc9   : > { %1347 = vmatprep.mubr.f32.mxu0 %v2924_v14 }
  0xca   : > { %2333 = vmatmul.mubr.f32.gmra.mxu1 %v2859_v33 }
  0xcb   : > { %2335 = vmatprep.mubr.f32.mxu1 %v2890_v50 }
  0xcc   : > { %1348 = vmatmul.mubr.f32.gmra.mxu0 %v2760_v51  ;;  %v1210_v51 = vsel %vm448_vm1, %v1208_v35, %v1209_v36 }
  0xcd   : > { %1352 = vmatprep.mubr.f32.mxu0 %v2962_v43 }
  0xce   : > { %2336 = vmatmul.mubr.f32.gmra.mxu1 %v2898_v60 }
  0xcf   : > { %2338 = vmatprep.mubr.f32.mxu1 %v2929_v16 }
  0xd0   : > { %1353 = vmatmul.mubr.f32.gmra.mxu0 %v2762_v52  ;;  %v1212_v52 = vsel %vm448_vm1, %v1209_v36, %v1211_v44 }
  0xd1   : > { %1357 = vmatprep.mubr.f32.mxu0 %v2997_v25 }
  0xd2   : > { %2339 = vmatmul.mubr.f32.gmra.mxu1 %v2936_v19 }
  0xd3   : > { %2341 = vmatprep.mubr.f32.mxu1 %v2965_v47 }
  0xd4   : > { %1358 = vmatmul.mubr.f32.gmra.mxu0 %v2798_v2  ;;  %v1204_v2 = vrot.slane %v366_v40, 1 }
  0xd5   : > { %1362 = vmatprep.mubr.f32.mxu0 %v3009_v34 }
  0xd6   : > { %2342 = vmatmul.mubr.f32.gmra.mxu1 %v2973_v62 }
  0xd7   : > { %2344 = vmatprep.mubr.f32.mxu1 %v1210_v51 }
  0xd8   : > { %1363 = vmatmul.mubr.f32.gmra.mxu0 %v2800_v3  ;;  %v1205_v3 = vsel %vm391_vm0, %v1202_v56, %v1204_v2 }
  0xd9   : > { %1367 = vmatprep.mubr.f32.mxu0 %v3024_v58 }
  0xda   : > { %2345 = vmatmul.mubr.f32.gmra.mxu1 %v1212_v52 }
  0xdc   : > { %1368 = vmatmul.mubr.f32.gmra.mxu0 %v2837_v20 }
  0xdd   : > { %1372 = vmatprep.mubr.f32.mxu0 %v3035_v6 }
  0xe0   : > { %1373 = vmatmul.mubr.f32.gmra.mxu0 %v2839_v23 }
  0xe1   : > { %1377 = vmatprep.mubr.f32.mxu0 %v3050_v24 }
  0xe4   : > { %1378 = vmatmul.mubr.f32.gmra.mxu0 %v2875_v45 }
  0xe5   : > { %1382 = vmatprep.mubr.f32.mxu0 %v3064_v38 }
  0xe8   : > { %1383 = vmatmul.mubr.f32.gmra.mxu0 %v2877_v46 }
  0xe9   : > { %1387 = vmatprep.mubr.f32.mxu0 %v3079_v37 }
  0xec   : > { %1388 = vmatmul.mubr.f32.gmra.mxu0 %v2914_v10 }
  0xed   : > { %1392 = vmatprep.mubr.f32.mxu0 %v3093_v15 }
  0xf0   : > { %1393 = vmatmul.mubr.f32.gmra.mxu0 %v2916_v11 }
  0xf1   : > { %1397 = vmatprep.mubr.f32.mxu0 %v1203_v59 }
  0xf4   : > { %1398 = vmatmul.mubr.f32.gmra.mxu0 %v364_v21 }
  0xf5   : > { %1402 = vmatprep.mubr.f32.mxu0 %v1205_v3 }
  0xf8   : > { %1403 = vmatmul.mubr.f32.gmra.mxu0 %v365_v22 }
 0x10d   : > { %v1875_v7 = vpop.f32.mrf.mxu0  ;;  %v2213_v9 = vpop.f32.mrf.mxu1 }
 0x10f   : > { %v1876_v13 = vpop.f32.mrf.mxu0  ;;  %v829_v20 = vpop.f32.mrf.mxu1 }
 0x110   : > { %v1877_v23 = vadd.f32 %v1876_v13, %v1875_v7 }
 0x112   : > { %v3314_v27 = vadd.f32 %v1877_v23, %v829_v20  ;;  %v1878_v30 = vpop.f32.mrf.mxu0  ;;  %v2216_v33 = vpop.f32.mrf.mxu1 }
 0x114   : > { %v1879_v45 = vpop.f32.mrf.mxu0  ;;  %v839_v46 = vpop.f32.mrf.mxu1 }
 0x115   : > { %v1880_v48 = vadd.f32 %v1879_v45, %v1878_v30 }
 0x117   : > { %v3316_v50 = vadd.f32 %v2213_v9, %v1880_v48  ;;  %v1881_v60 = vpop.f32.mrf.mxu0  ;;  %v2219_v10 = vpop.f32.mrf.mxu1 }
 0x119   : > { %v1882_v11 = vpop.f32.mrf.mxu0  ;;  %v849_v14 = vpop.f32.mrf.mxu1 }
 0x11a   : > { %v1883_v16 = vadd.f32 %v1882_v11, %v1881_v60 }
 0x11c   : > { %v3318_v19 = vadd.f32 %v1883_v16, %v839_v46  ;;  %v1884_v43 = vpop.f32.mrf.mxu0  ;;  %v2222_v47 = vpop.f32.mrf.mxu1 }
 0x11e   : > { %v1885_v62 = vpop.f32.mrf.mxu0  ;;  %v859_v25 = vpop.f32.mrf.mxu1 }
 0x11f   : > { %v1886_v34 = vadd.f32 %v1885_v62, %v1884_v43 }
 0x121   : > { %v3320_v58 = vadd.f32 %v2216_v33, %v1886_v34  ;;  %v1887_v6 = vpop.f32.mrf.mxu0  ;;  %v2225_v24 = vpop.f32.mrf.mxu1 }
 0x123   : > { %v1888_v38 = vpop.f32.mrf.mxu0  ;;  %v869_v37 = vpop.f32.mrf.mxu1 }
 0x124   : > { %v1889_v15 = vadd.f32 %v1888_v38, %v1887_v6 }
 0x126   : > { %v3322_v41 = vadd.f32 %v1889_v15, %v849_v14  ;;  %v1890_v39 = vpop.f32.mrf.mxu0  ;;  %v2228_v17 = vpop.f32.mrf.mxu1 }
 0x128   : > { %v1891_v0 = vpop.f32.mrf.mxu0  ;;  %v879_v18 = vpop.f32.mrf.mxu1 }
 0x129   : > { %v1892_v31 = vadd.f32 %v1891_v0, %v1890_v39 }
 0x12b   : > { %v3324_v32 = vadd.f32 %v2219_v10, %v1892_v31  ;;  %v1893_v4 = vpop.f32.mrf.mxu0  ;;  %v2231_v49 = vpop.f32.mrf.mxu1 }
 0x12d   : > { %v1894_v8 = vpop.f32.mrf.mxu0  ;;  %v889_v55 = vpop.f32.mrf.mxu1 }
 0x12e   : > { %v1895_v26 = vadd.f32 %v1894_v8, %v1893_v4 }
 0x130   : > { %v3326_v5 = vadd.f32 %v1895_v26, %v859_v25  ;;  %v1896_v28 = vpop.f32.mrf.mxu0  ;;  %v2234_v42 = vpop.f32.mrf.mxu1 }
 0x132   : > { %v1897_v53 = vpop.f32.mrf.mxu0  ;;  %v899_v57 = vpop.f32.mrf.mxu1 }
 0x133   : > { %v1898_v61 = vadd.f32 %v1897_v53, %v1896_v28 }
 0x135   : > { %v3328_v63 = vadd.f32 %v2222_v47, %v1898_v61  ;;  %v1899_v1 = vpop.f32.mrf.mxu0  ;;  %v3330_v29 = vpop.f32.mrf.mxu1 }
 0x137   : > { %v1900_v12 = vpop.f32.mrf.mxu0  ;;  %v3332_v21 = vpop.f32.mrf.mxu1 }
 0x138   : > { %v1901_v22 = vadd.f32 %v1900_v12, %v1899_v1 }
 0x139   : > { %v1902_v35 = vpop.f32.mrf.mxu0  ;;  %v3334_v36 = vpop.f32.mrf.mxu1 }
 0x13a   : > { %v3336_v40 = vadd.f32 %v1901_v22, %v869_v37 }
 0x13b   : > { %v1903_v44 = vpop.f32.mrf.mxu0  ;;  %v3338_v51 = vpop.f32.mrf.mxu1 }
 0x13c   : > { %v1904_v52 = vadd.f32 %v1903_v44, %v1902_v35 }
 0x13d   : > { %v1905_v54 = vpop.f32.mrf.mxu0  ;;  %v3340_v56 = vpop.f32.mrf.mxu1 }
 0x13e   : > { %v3342_v59 = vadd.f32 %v2225_v24, %v1904_v52 }
 0x13f   : > { %v1906_v2 = vpop.f32.mrf.mxu0  ;;  %v3344_v3 = vpop.f32.mrf.mxu1 }
 0x140   : > { %v1907_v7 = vadd.f32 %v1906_v2, %v1905_v54 }
 0x141   : > { %v1908_v9 = vpop.f32.mrf.mxu0  ;;  %v3346_v13 = vpop.f32.mrf.mxu1 }
 0x142   : > { %v3348_v20 = vadd.f32 %v1907_v7, %v879_v18 }
 0x143   : > { %v1909_v23 = vpop.f32.mrf.mxu0  ;;  %v3350_v30 = vpop.f32.mrf.mxu1 }
 0x144   : > { %v1910_v33 = vadd.f32 %v1909_v23, %v1908_v9 }
 0x145   : > { %v1911_v45 = vpop.f32.mrf.mxu0  ;;  %v3352_v46 = vpop.f32.mrf.mxu1 }
 0x146   : > { %v3354_v48 = vadd.f32 %v2228_v17, %v1910_v33 }
 0x147   : > { %v1912_v60 = vpop.f32.mrf.mxu0  ;;  %v3356_v10 = vpop.f32.mrf.mxu1 }
 0x148   : > { %3538 = vst [vmem:[#allocation6_spill] sm:$0xff] %v3354_v48  ;;  %v1913_v11 = vadd.f32 %v1912_v60, %v1911_v45 }
 0x149   : > { %v1914_v14 = vpop.f32.mrf.mxu0  ;;  %v3358_v16 = vpop.f32.mrf.mxu1 }
 0x14a   : > { %v3360_v43 = vadd.f32 %v1913_v11, %v889_v55 }
 0x14b   : > { %v1915_v47 = vpop.f32.mrf.mxu0  ;;  %v3362_v62 = vpop.f32.mrf.mxu1 }
 0x14c   : > { %3539 = vst [vmem:[#allocation7_spill] sm:$0xff] %v3360_v43  ;;  %v1916_v25 = vadd.f32 %v1915_v47, %v1914_v14 }
 0x14d   : > { %v1917_v34 = vpop.f32.mrf.mxu0  ;;  %v3364_v6 = vpop.f32.mrf.mxu1 }
 0x14e   : > { %v895_v24 = vadd.f32 %v2231_v49, %v1916_v25 }
 0x14f   : > { %v1918_v38 = vpop.f32.mrf.mxu0  ;;  %v3366_v37 = vpop.f32.mrf.mxu1 }
 0x150   : > { %v1919_v15 = vadd.f32 %v1918_v38, %v1917_v34 }
 0x151   : > { %v1920_v39 = vpop.f32.mrf.mxu0  ;;  %v3368_v17 = vpop.f32.mrf.mxu1 }
 0x152   : > { %v3370_v0 = vadd.f32 %v1919_v15, %v899_v57 }
 0x153   : > { %v1921_v18 = vpop.f32.mrf.mxu0  ;;  %v3372_v31 = vpop.f32.mrf.mxu1 }
 0x154   : > { %3540 = vst [vmem:[#allocation8_spill] sm:$0xff] %v3370_v0  ;;  %v1922_v4 = vadd.f32 %v1921_v18, %v1920_v39 }
 0x155   : > { %v3374_v8 = vpop.f32.mrf.mxu1  ;;  %v2269_v55 = vpop.f32.mrf.mxu0 }
 0x156   : > { %v905_v26 = vadd.f32 %v2234_v42, %v1922_v4 }
 0x157   : > { %v3376_v28 = vpop.f32.mrf.mxu1  ;;  %v1119_v49 = vpop.f32.mrf.mxu0 }
 0x159   : > { %v3378_v53 = vpop.f32.mrf.mxu1  ;;  %v3380_v61 = vpop.f32.mrf.mxu0 }
 0x15b   : > { %v3382_v1 = vpop.f32.mrf.mxu1  ;;  %v1129_v12 = vpop.f32.mrf.mxu0 }
 0x15d   : > { %v3384_v57 = vpop.f32.mrf.mxu1 }
 0x15e   : > { %v3386_v22 = vpop.f32.mrf.mxu0 }
 0x15f   : > { %v3388_v35 = vpop.f32.mrf.mxu1 }
 0x160   : > { %v3390_v44 = vpop.f32.mrf.mxu0 }
 0x161   : > { %v3392_v52 = vpop.f32.mrf.mxu1 }
 0x162   : > { %v3394_v42 = vpop.f32.mrf.mxu0 }
 0x163   : > { %v3396_v54 = vpop.f32.mrf.mxu1 }
 0x164   : > { %v3398_v2 = vpop.f32.mrf.mxu0 }
 0x165   : > { %v3400_v7 = vpop.f32.mrf.mxu1 }
 0x166   : > { %3541 = vst [vmem:[#allocation9_spill] sm:$0xff] %v3400_v7  ;;  %v3402_v9 = vpop.f32.mrf.mxu0 }
 0x167   : > { %v3404_v23 = vpop.f32.mrf.mxu1 }
 0x168   : > { %3542 = vst [vmem:[#allocation10_spill] sm:$0xff] %v3404_v23  ;;  %v3406_v33 = vpop.f32.mrf.mxu0  ;;  %v1989_v23 = vadd.f32 %v3332_v21, %v3330_v29  ;;  %v3432_v29 = vld [vmem:[%s3535_s2] ss:$0 sm:$0xff] }
 0x16a   : > { %v3408_v45 = vpop.f32.mrf.mxu0 }
 0x16b   : > { %3543 = vst [vmem:[#allocation11_spill] sm:$0xff] %v3408_v45  ;;  %v2026_v60 = vpop.f32.mrf.mxu1 }
 0x16c   : > { %v3410_v11 = vpop.f32.mrf.mxu0 }
 0x16d   : > { %v2027_v14 = vpop.f32.mrf.mxu1 }
 0x16e   : > { %v2028_v47 = vadd.f32 %v2027_v14, %v2026_v60 }
 0x170   : > { %v1040_v25 = vadd.f32 %v2028_v47, %v895_v24  ;;  %v2287_v34 = vpop.f32.mrf.mxu0 }
 0x171   : > { %v3412_v38 = vpop.f32.mrf.mxu1 }
 0x172   : > { %3544 = vst [vmem:[#allocation12_spill] sm:$0xff] %v3412_v38  ;;  %v3414_v15 = vadd.f32 %v2287_v34, %v1040_v25  ;;  %v3416_v39 = vpop.f32.mrf.mxu0  ;;  %v1992_v34 = vadd.f32 %v3338_v51, %v3334_v36 }
 0x173   : > { %3546 = vst [vmem:[#allocation14_spill] sm:$0xff] %v3416_v39  ;;  %v3418_v18 = vpop.f32.mrf.mxu1 }
 0x174   : > { %3545 = vst [vmem:[#allocation13_spill] sm:$0xff] %v3414_v15  ;;  %3547 = vst [vmem:[#allocation15_spill] sm:$0xff] %v3418_v18  ;;  %v975_v15 = vadd.f32 %v1989_v23, %v3314_v27  ;;  %v980_v36 = vadd.f32 %v1992_v34, %v3316_v50 }
 0x176   : > { %v2290_v4 = vpop.f32.mrf.mxu0  ;;  %v1125_v23 = vadd.f32 %v2269_v55, %v980_v36  ;;  %v2001_v55 = vadd.f32 %v3356_v10, %v3352_v46  ;;  %v2004_v46 = vadd.f32 %v3362_v62, %v3358_v16  ;;  %v2007_v16 = vadd.f32 %v3366_v37, %v3364_v6 }
 0x177   : > { %v2032_v0 = vpop.f32.mrf.mxu1  ;;  %v2010_v6 = vadd.f32 %v3372_v31, %v3368_v17  ;;  %v2013_v17 = vadd.f32 %v3376_v28, %v3374_v8  ;;  %v2016_v8 = vadd.f32 %v3382_v1, %v3378_v53  ;;  %v2019_v53 = vadd.f32 %v3388_v35, %v3384_v57 }
 0x178   : > { %v3420_v43 = vpop.f32.mrf.mxu0  ;;  %v2022_v57 = vadd.f32 %v3396_v54, %v3392_v52  ;;  %v3551_v54 = vld [vmem:[#allocation6_spill] sm:$0xff] }
 0x179   : > { %3548 = vst [vmem:[#allocation16_spill] sm:$0xff] %v3420_v43  ;;  %v2033_v45 = vpop.f32.mrf.mxu1  ;;  %v1120_v43 = vadd.f32 %v1119_v49, %v975_v15  ;;  %v1998_v15 = vadd.f32 %v3350_v30, %v3346_v13 }
 0x17a   : > { %v2034_v48 = vadd.f32 %v2033_v45, %v2032_v0  ;;  %v1995_v0 = vadd.f32 %v3344_v3, %v3340_v56 }
 0x17c   : > { %v1050_v60 = vadd.f32 %v2034_v48, %v905_v26  ;;  %v2099_v24 = vpop.f32.mrf.mxu0 }
 0x17e   : > { %v3424_v14 = vadd.f32 %v2290_v4, %v1050_v60  ;;  %v2100_v47 = vpop.f32.mrf.mxu0  ;;  %v2325_v25 = vpop.f32.mrf.mxu1  ;;  %v985_v4 = vadd.f32 %v1995_v0, %v3318_v19 }
 0x17f   : > { %v2101_v18 = vadd.f32 %v2100_v47, %v2099_v24 }
 0x180   : > { %v2102_v38 = vpop.f32.mrf.mxu0  ;;  %v1474_v39 = vpop.f32.mrf.mxu1  ;;  %v1130_v50 = vadd.f32 %v1129_v12, %v985_v4 }
 0x181   : > { %v1475_v7 = vadd.f32 %v2101_v18, %v1474_v39 }
 0x182   : > { %v2103_v21 = vpop.f32.mrf.mxu0  ;;  %v2328_v48 = vpop.f32.mrf.mxu1 }
 0x183   : > { %v1553_v51 = vadd.f32 %v1475_v7, %v1120_v43  ;;  %v2104_v27 = vadd.f32 %v2103_v21, %v2102_v38  ;;  %v990_v38 = vadd.f32 %v1998_v15, %v3320_v58  ;;  %v995_v58 = vadd.f32 %v2001_v55, %v3322_v41 }
 0x184   : > { %v2105_v26 = vpop.f32.mrf.mxu0  ;;  %v1484_v18 = vpop.f32.mrf.mxu1  ;;  %v1000_v41 = vadd.f32 %v2004_v46, %v3324_v32  ;;  %v1005_v32 = vadd.f32 %v2007_v16, %v3326_v5  ;;  %v1010_v5 = vadd.f32 %v2010_v6, %v3328_v63  ;;  %v1015_v63 = vadd.f32 %v2013_v17, %v3336_v40 }
 0x185   : > { %v1576_v49 = vadd.f32 %v3432_v29, %v1553_v51  ;;  %v1480_v45 = vadd.f32 %v2325_v25, %v2104_v27  ;;  %v1135_v12 = vadd.f32 %v3380_v61, %v990_v38  ;;  %v1140_v61 = vadd.f32 %v3390_v44, %v995_v58 }
 0x186   : > { %v2106_v39 = vpop.f32.mrf.mxu0  ;;  %v2331_v30 = vpop.f32.mrf.mxu1  ;;  %v1145_v44 = vadd.f32 %v3386_v22, %v1000_v41  ;;  %v1150_v22 = vadd.f32 %v3398_v2, %v1005_v32  ;;  %v1155_v2 = vadd.f32 %v3394_v42, %v1010_v5  ;;  %v1160_v42 = vadd.f32 %v3406_v33, %v1015_v63 }
 0x187   : > { %1652 = vst [vmem:[%s2497_s7] sm:$0xff] %v1576_v49  ;;  %v1554_v60 = vadd.f32 %v1480_v45, %v1125_v23  ;;  %v2107_v56 = vadd.f32 %v2106_v39, %v2105_v26  ;;  %v1614_v24 = vmul.f32 %v1576_v49, %v1576_v49  ;;  %v1020_v40 = vadd.f32 %v2016_v8, %v3342_v59 }
 0x188   : > { %v2108_v3 = vpop.f32.mrf.mxu0  ;;  %v1494_v27 = vpop.f32.mrf.mxu1  ;;  %v1025_v59 = vadd.f32 %v2019_v53, %v3348_v20  ;;  %v1030_v20 = vadd.f32 %v2022_v57, %v3551_v54 }
 0x189   : > { %v1577_v43 = vadd.f32 %v3432_v29, %v1554_v60  ;;  %v1485_v7 = vadd.f32 %v2107_v56, %v1484_v18  ;;  %v1165_v33 = vadd.f32 %v3402_v9, %v1020_v40 }
 0x18a   : > { %v2109_v13 = vpop.f32.mrf.mxu0  ;;  %v2334_v4 = vpop.f32.mrf.mxu1  ;;  %v1170_v9 = vadd.f32 %v3410_v11, %v1025_v59  ;;  %v3558_v59 = vld [vmem:[#allocation13_spill] sm:$0xff] }
 0x18b   : > { %v1615_v47 = vmul.f32 %v1577_v43, %v1577_v43  ;;  %1653 = vst [vmem:[%s2497_s7 + $0x8] sm:$0xff] %v1577_v43  ;;  %v1555_v19 = vadd.f32 %v1485_v7, %v1130_v50  ;;  %v1592_v25 = vadd.f32 %v1577_v43, %v1576_v49  ;;  %v2110_v34 = vadd.f32 %v2109_v13, %v2108_v3 }
 0x18c   : > { %v2111_v21 = vpop.f32.mrf.mxu0 }
 0x18d   : > { %v1578_v0 = vadd.f32 %v3432_v29, %v1555_v19  ;;  %v1630_v36 = vadd.f32 %v1615_v47, %v1614_v24  ;;  %v1490_v51 = vadd.f32 %v2328_v48, %v2110_v34  ;;  %v1504_v24 = vpop.f32.mrf.mxu1 }
 0x18e   : > { %v2112_v10 = vpop.f32.mrf.mxu0 }
 0x18f   : > { %v1593_v26 = vadd.f32 %v1592_v25, %v1578_v0  ;;  %v1616_v23 = vmul.f32 %v1578_v0, %v1578_v0  ;;  %1654 = vst [vmem:[%s2497_s7 + $0x10] sm:$0xff] %v1578_v0  ;;  %v1556_v49 = vadd.f32 %v1490_v51, %v1135_v12  ;;  %v2113_v45 = vadd.f32 %v2112_v10, %v2111_v21  ;;  %v2337_v0 = vpop.f32.mrf.mxu1 }
 0x190   : > { %v2114_v15 = vpop.f32.mrf.mxu0 }
 0x191   : > { %v1631_v39 = vadd.f32 %v1630_v36, %v1616_v23  ;;  %v1579_v18 = vadd.f32 %v3432_v29, %v1556_v49  ;;  %v1495_v48 = vadd.f32 %v2113_v45, %v1494_v27  ;;  %v1514_v49 = vpop.f32.mrf.mxu1 }
 0x192   : > { %v2115_v62 = vpop.f32.mrf.mxu0 }
 0x193   : > { %v1617_v60 = vmul.f32 %v1579_v18, %v1579_v18  ;;  %1655 = vst [vmem:[%s2497_s7 + $0x18] sm:$0xff] %v1579_v18  ;;  %v1557_v56 = vadd.f32 %v1495_v48, %v1140_v61  ;;  %v1594_v3 = vadd.f32 %v1593_v26, %v1579_v18  ;;  %v2116_v50 = vadd.f32 %v2115_v62, %v2114_v15  ;;  %v2340_v62 = vpop.f32.mrf.mxu1 }
 0x194   : > { %v2117_v43 = vpop.f32.mrf.mxu0 }
 0x195   : > { %v1580_v7 = vadd.f32 %v3432_v29, %v1557_v56  ;;  %v1632_v55 = vadd.f32 %v1631_v39, %v1617_v60  ;;  %v1500_v38 = vadd.f32 %v2331_v30, %v2116_v50 }
 0x196   : > { %v2118_v37 = vpop.f32.mrf.mxu0 }
 0x197   : > { %v1595_v13 = vadd.f32 %v1594_v3, %v1580_v7  ;;  %v1618_v47 = vmul.f32 %v1580_v7, %v1580_v7  ;;  %1656 = vst [vmem:[%s2497_s7 + $0x20] sm:$0xff] %v1580_v7  ;;  %v1558_v19 = vadd.f32 %v1500_v38, %v1145_v44  ;;  %v2119_v25 = vadd.f32 %v2118_v37, %v2117_v43 }
 0x198   : > { %v2120_v34 = vpop.f32.mrf.mxu0 }
 0x199   : > { %v1633_v21 = vadd.f32 %v1632_v55, %v1618_v47  ;;  %v1581_v12 = vadd.f32 %v3432_v29, %v1558_v19  ;;  %v1505_v30 = vadd.f32 %v2119_v25, %v1504_v24  ;;  %v1524_v55 = vpop.f32.mrf.mxu1  ;;  %v3549_v25 = vld [vmem:[#allocation9_spill] sm:$0xff] }
 0x19a   : > { %v2121_v31 = vpop.f32.mrf.mxu0 }
 0x19b   : > { %v1619_v36 = vmul.f32 %v1581_v12, %v1581_v12  ;;  %1657 = vst [vmem:[%s2497_s7 + $0x28] sm:$0xff] %v1581_v12  ;;  %v1559_v51 = vadd.f32 %v1505_v30, %v1150_v22  ;;  %v1596_v46 = vadd.f32 %v1595_v13, %v1581_v12  ;;  %v2122_v58 = vadd.f32 %v2121_v31, %v2120_v34  ;;  %v3550_v34 = vld [vmem:[#allocation10_spill] sm:$0xff] }
 0x19c   : > { %v2123_v10 = vpop.f32.mrf.mxu0  ;;  %v2025_v52 = vadd.f32 %v3550_v34, %v3549_v25 }
 0x19d   : > { %v1582_v27 = vadd.f32 %v3432_v29, %v1559_v51  ;;  %v1634_v26 = vadd.f32 %v1633_v21, %v1619_v36  ;;  %v1510_v23 = vadd.f32 %v2334_v4, %v2122_v58  ;;  %v2343_v21 = vpop.f32.mrf.mxu1  ;;  %v3553_v58 = vld [vmem:[#allocation7_spill] sm:$0xff] }
 0x19e   : > { %v2124_v28 = vpop.f32.mrf.mxu0 }
 0x19f   : > { %v1597_v45 = vadd.f32 %v1596_v46, %v1582_v27  ;;  %v1620_v15 = vmul.f32 %v1582_v27, %v1582_v27  ;;  %1658 = vst [vmem:[%s2497_s7 + $0x30] sm:$0xff] %v1582_v27  ;;  %v1560_v61 = vadd.f32 %v1510_v23, %v1155_v2  ;;  %v2125_v39 = vadd.f32 %v2124_v28, %v2123_v10  ;;  %v1534_v27 = vpop.f32.mrf.mxu1  ;;  %v3554_v28 = vld [vmem:[#allocation14_spill] sm:$0xff] }
 0x1a0   : > { %v2126_v18 = vpop.f32.mrf.mxu0  ;;  %v1035_v10 = vadd.f32 %v2025_v52, %v3553_v58 }
 0x1a1   : > { %v1635_v48 = vadd.f32 %v1634_v26, %v1620_v15  ;;  %v1583_v16 = vadd.f32 %v3432_v29, %v1560_v61  ;;  %v1515_v41 = vadd.f32 %v2125_v39, %v1514_v49  ;;  %v3555_v15 = vld [vmem:[#allocation12_spill] sm:$0xff]  ;;  %v3556_v61 = vld [vmem:[#allocation15_spill] sm:$0xff] }
 0x1a2   : > { %v2127_v1 = vpop.f32.mrf.mxu0  ;;  %v1180_v49 = vadd.f32 %v3554_v28, %v1035_v10  ;;  %v2031_v39 = vadd.f32 %v3556_v61, %v3555_v15 }
 0x1a3   : > { %v1621_v4 = vmul.f32 %v1583_v16, %v1583_v16  ;;  %1659 = vst [vmem:[%s2497_s7 + $0x38] sm:$0xff] %v1583_v16  ;;  %v1561_v60 = vadd.f32 %v1515_v41, %v1160_v42  ;;  %v1598_v56 = vadd.f32 %v1597_v45, %v1583_v16  ;;  %v2128_v3 = vadd.f32 %v2127_v1, %v2126_v18  ;;  %v2346_v41 = vpop.f32.mrf.mxu1 }
 0x1a4   : > { %v2129_v50 = vpop.f32.mrf.mxu0 }
 0x1a5   : > { %v1584_v43 = vadd.f32 %v3432_v29, %v1561_v60  ;;  %v1636_v44 = vadd.f32 %v1635_v48, %v1621_v4  ;;  %v1520_v7 = vadd.f32 %v2337_v0, %v2128_v3  ;;  %v3552_v0 = vld [vmem:[#allocation11_spill] sm:$0xff]  ;;  %v3557_v60 = vld [vmem:[#allocation8_spill] sm:$0xff] }
 0x1a6   : > { %v2130_v35 = vpop.f32.mrf.mxu0  ;;  %v1175_v11 = vadd.f32 %v3552_v0, %v1030_v20 }
 0x1a7   : > { %v1599_v38 = vadd.f32 %v1598_v56, %v1584_v43  ;;  %v1622_v6 = vmul.f32 %v1584_v43, %v1584_v43  ;;  %1660 = vst [vmem:[%s2497_s7 + $0x40] sm:$0xff] %v1584_v43  ;;  %v1562_v32 = vadd.f32 %v1520_v7, %v1165_v33  ;;  %v2131_v37 = vadd.f32 %v2130_v35, %v2129_v50 }
 0x1a8   : > { %v2132_v24 = vpop.f32.mrf.mxu0  ;;  %v1045_v56 = vadd.f32 %v2031_v39, %v3557_v60 }
 0x1a9   : > { %v1637_v13 = vadd.f32 %v1636_v44, %v1622_v6  ;;  %v1585_v47 = vadd.f32 %v3432_v29, %v1562_v32  ;;  %v1525_v19 = vadd.f32 %v2131_v37, %v1524_v55  ;;  %v1544_v44 = vpop.f32.mrf.mxu1  ;;  %v3559_v6 = vld [vmem:[#allocation16_spill] sm:$0xff] }
 0x1aa   : > { %v2133_v22 = vpop.f32.mrf.mxu0  ;;  %v1190_v32 = vadd.f32 %v3559_v6, %v1045_v56 }
 0x1ab   : > { %v1623_v12 = vmul.f32 %v1585_v47, %v1585_v47  ;;  %1661 = vst [vmem:[%s2497_s7 + $0x48] sm:$0xff] %v1585_v47  ;;  %v1563_v30 = vadd.f32 %v1525_v19, %v1170_v9  ;;  %v1600_v17 = vadd.f32 %v1599_v38, %v1585_v47  ;;  %v2134_v5 = vadd.f32 %v2133_v22, %v2132_v24 }
 0x1ac   : > { %v2135_v31 = vpop.f32.mrf.mxu0 }
 0x1ad   : > { %v1586_v36 = vadd.f32 %v3432_v29, %v1563_v30  ;;  %v1638_v51 = vadd.f32 %v1637_v13, %v1623_v12  ;;  %v1530_v46 = vadd.f32 %v2340_v62, %v2134_v5 }
 0x1ae   : > { %v2136_v2 = vpop.f32.mrf.mxu0 }
 0x1af   : > { %v1601_v26 = vadd.f32 %v1600_v17, %v1586_v36  ;;  %v1624_v23 = vmul.f32 %v1586_v36, %v1586_v36  ;;  %1662 = vst [vmem:[%s2497_s7 + $0x50] sm:$0xff] %v1586_v36  ;;  %v1564_v8 = vadd.f32 %v1530_v46, %v1175_v11  ;;  %v2137_v63 = vadd.f32 %v2136_v2, %v2135_v31 }
 0x1b0   : > { %v2138_v45 = vpop.f32.mrf.mxu0 }
 0x1b1   : > { %v1639_v18 = vadd.f32 %v1638_v51, %v1624_v23  ;;  %v1587_v42 = vadd.f32 %v3432_v29, %v1564_v8  ;;  %v1535_v48 = vadd.f32 %v2137_v63, %v1534_v27 }
 0x1b2   : > { %v2139_v16 = vpop.f32.mrf.mxu0 }
 0x1b3   : > { %v1625_v53 = vmul.f32 %v1587_v42, %v1587_v42  ;;  %1663 = vst [vmem:[%s2497_s7 + $0x58] sm:$0xff] %v1587_v42  ;;  %v1565_v40 = vadd.f32 %v1535_v48, %v1180_v49  ;;  %v1602_v1 = vadd.f32 %v1601_v26, %v1587_v42  ;;  %v2140_v62 = vadd.f32 %v2139_v16, %v2138_v45 }
 0x1b4   : > { %v2141_v4 = vpop.f32.mrf.mxu0 }
 0x1b5   : > { %v1588_v3 = vadd.f32 %v3432_v29, %v1565_v40  ;;  %v1640_v50 = vadd.f32 %v1639_v18, %v1625_v53  ;;  %v1540_v33 = vadd.f32 %v2343_v21, %v2140_v62 }
 0x1b6   : > { %v2142_v43 = vpop.f32.mrf.mxu0 }
 0x1b7   : > { %v1603_v7 = vadd.f32 %v1602_v1, %v1588_v3  ;;  %v1626_v57 = vmul.f32 %v1588_v3, %v1588_v3  ;;  %1664 = vst [vmem:[%s2497_s7 + $0x60] sm:$0xff] %v1588_v3  ;;  %v1566_v35 = vadd.f32 %v1540_v33, %v3558_v59  ;;  %v2143_v55 = vadd.f32 %v2142_v43, %v2141_v4 }
 0x1b8   : > { %v2144_v38 = vpop.f32.mrf.mxu0 }
 0x1b9   : > { %v1641_v37 = vadd.f32 %v1640_v50, %v1626_v57  ;;  %v1589_v24 = vadd.f32 %v3432_v29, %v1566_v35  ;;  %v1545_v9 = vadd.f32 %v2143_v55, %v1544_v44 }
 0x1ba   : > { %v2145_v13 = vpop.f32.mrf.mxu0 }
 0x1bb   : > { %v1627_v47 = vmul.f32 %v1589_v24, %v1589_v24  ;;  %1665 = vst [vmem:[%s2497_s7 + $0x68] sm:$0xff] %v1589_v24  ;;  %v1567_v19 = vadd.f32 %v1545_v9, %v1190_v32  ;;  %v1604_v25 = vadd.f32 %v1603_v7, %v1589_v24  ;;  %v2146_v34 = vadd.f32 %v2145_v13, %v2144_v38 }
 0x1bd   : > { %v1590_v52 = vadd.f32 %v3432_v29, %v1567_v19  ;;  %v1642_v54 = vadd.f32 %v1641_v37, %v1627_v47  ;;  %v1550_v20 = vadd.f32 %v2346_v41, %v2146_v34 }
 0x1bf   : > { %v1605_v22 = vadd.f32 %v1604_v25, %v1590_v52  ;;  %v1628_v21 = vmul.f32 %v1590_v52, %v1590_v52  ;;  %1666 = vst [vmem:[%s2497_s7 + $0x70] sm:$0xff] %v1590_v52  ;;  %v1568_v12 = vadd.f32 %v1550_v20, %v3424_v14 }
 0x1c1   : > { %v1643_v30 = vadd.f32 %v1642_v54, %v1628_v21  ;;  %v1591_v17 = vadd.f32 %v3432_v29, %v1568_v12 }
 0x1c3   : > { %v1606_v5 = vadd.f32 %v1605_v22, %v1591_v17  ;;  %v1629_v31 = vmul.f32 %v1591_v17, %v1591_v17  ;;  %1667 = vst [vmem:[%s2497_s7 + $0x78] sm:$0xff] %v1591_v17 }
 0x1c5   : > { %v1607_v0 = vrot.slane %v1606_v5, 4  ;;  %v1644_v11 = vadd.f32 %v1643_v30, %v1629_v31 }
 0x1c7   : > { %v1608_v36 = vadd.f32 %v1607_v0, %v1606_v5  ;;  %v1645_v51 = vrot.slane %v1644_v11, 4 }
 0x1c9   : > { %v1609_v46 = vrot.slane %v1608_v36, 2  ;;  %v1646_v58 = vadd.f32 %v1645_v51, %v1644_v11 }
 0x1cb   : > { %v1610_v10 = vadd.f32 %v1609_v46, %v1608_v36  ;;  %v1647_v2 = vrot.slane %v1646_v58, 2 }
 0x1cd   : > { %v1611_v27 = vrot.slane %v1610_v10, 1  ;;  %v1648_v26 = vadd.f32 %v1647_v2, %v1646_v58 }
 0x1cf   : > { %v1612_v23 = vadd.f32 %v1611_v27, %v1610_v10  ;;  %v1649_v14 = vrot.slane %v1648_v26, 1 }
 0x1d1   : > { %1613 = vst [vmem:[%s2514_s22] sm:$0x1] %v1612_v23  ;;  %v1650_v8 = vadd.f32 %v1649_v14, %v1648_v26 }
 0x1d3   : > { %1651 = vst [vmem:[%s2514_s22 + $0x1] sm:$0x1] %v1650_v8 }
 0x1d4 PF: > { %s15_s19 = sadd.s32 1, %s2427_s19   ;;  %s3560_s15 = smov %s2419_s17 }
 0x1d5   : > { %p12_p8 = scmp.ge.s32.totalorder %s15_s19, 6   ;;  %s3561_s16 = smov %s2423_s18 }
 0x1d6   : > { %s3562_s17 = smov %s3565_s20  ;;  %s3563_s18 = smov %s3569_s21 }
 0x1d7   :  { %14 = sbr.rel (!%p12_p8) target bundleno = 3 (0x3), region = 119 }
 0x1dc   :  { %1722 = vsyncmov [#allocation3] }
 0x1df   :  { %s1723_s7 = vpop.sfrf %1722 }
 0x1e0   :  { %p1842_p9 = scmp.ne.s32.totalorder %s1723_s7, 0 }
 0x1e2   :  { %1727 = shalt.err (%p1842_p9)  }

// kernel: unet_forward.10
= control target key start
LH: loop header
LB: loop body
LE: loop exit
PB: predicated region body
PF: predicated region fallthrough
CT: control target
= control target key end

     0   :  { %s2727_s21 = smov 0   ;;  %s2729_s22 = smov 0   ;;  %s3898_s0 = inlined_call_operand.vmem [shape: f32[2,18,18,128], index: 0, kind: input, shape index: {}]   ;;  %s3899_s1 = inlined_call_operand.vmem [shape: f32[1152,128], index: 1, kind: input, shape index: {}]   ;;  %s3900_s2 = inlined_call_operand.vmem [shape: f32[1,128], index: 2, kind: input, shape index: {}]   ;;  %s3901_s3 = inlined_call_operand.vmem [shape: f32[1,128], index: 3, kind: input, shape index: {}]   ;;  %s3902_s4 = inlined_call_operand.vmem [shape: f32[1,128], index: 4, kind: input, shape index: {}]   ;;  %s3903_s5 = inlined_call_operand.vmem [shape: f32[2,16,16,128], index: 5, kind: output, shape index: {0}]   ;;  %s3904_s6 = inlined_call_operand.vmem [shape: f32[2,2,2,128], index: 6, kind: output, shape index: {1}]  }
   0x1   :  { %s2731_s23 = smov 0   ;;  %s2733_s24 = smov 0  }
   0x2   :  { %s2735_s25 = smov 0  }
   0x3 LB: > { %s26_s26 = sadd.s32 1, %s2679_s23  ;;  %s29_s27 = sadd.s32 1, %s2683_s24  ;;  %s2687_s25 = sphi %s2735_s25, %s17_s25   ;;  %s2683_s24 = sphi %s2733_s24, %s3930_s24   ;;  %s2679_s23 = sphi %s2731_s23, %s3929_s23   ;;  %s2675_s22 = sphi %s2729_s22, %s3928_s22   ;;  %s2671_s21 = sphi %s2727_s21, %s3927_s21  }
   0x4   : > { %p27_p0 = scmp.ge.s32.totalorder %s26_s26, 2  ;;  %p2073_p1 = scmp.ge.s32.totalorder %s2687_s25, 1 }
   0x5   : > { %p197_p2 = scmp.lt.s32.totalorder %s2687_s25, 5 }
   0x6   : > { %s3932_s26 = smov (%p27_p0, %s26_s26), 0  ;;  %s3934_s27 = smov (!%p27_p0, %s29_s27), %s2683_s24 }
   0x7   : > { %p198_p3 = pnand %p2073_p1, %p197_p2  ;;  %p31_p4 = scmp.ge.s32.totalorder %s3934_s27, 2 }
   0x9   : > { %s3936_s27 = smov (%p31_p4, %s3934_s27), 0  ;;  %201 = sbr.rel (%p198_p3) target bundleno = 515 (0x203), region = 36 }
   0xe   : > { %s2074_s28 = sshll.u32 %s2671_s21, 3  ;;  %p234_p5 = scmp.lt.s32.totalorder %s2675_s22, 1 }
   0xf   : > { %p236_p6 = scmp.lt.s32.totalorder %s2074_s28, 15  ;;  %p246_p7 = scmp.lt.s32.totalorder %s2671_s21, 1 }
  0x10   : > { %s235_s29 = scalar_select %p234_p5, %s2675_s22, 1 }
  0x11   : > { %s3938_s28 = smov (!%p236_p6, %s2074_s28), 15  ;;  %s2081_s8 = smul.u32 192, %s2671_s21 }
  0x12   : > { %s2076_s30 = sshll.u32 %s235_s29, 5  ;;  %s2075_s7 = sshll.u32 %s3938_s28, 1 }
  0x13   : > { %s240_s9 = sadd.s32 %s2076_s30, %s2075_s7  ;;  %s254_s10 = smul.u32 432, %s2675_s22 }
  0x14   : > { %s2077_s11 = sshll.u32 %s240_s9, 3  ;;  %s2078_s12 = sshll.u32 %s235_s29, 1 }
  0x15   : > { %s2770_s15 = scalar_lea.vmem %s3903_s5, %s2077_s11  ;;  %s255_s16 = sadd.s32 %s2081_s8, %s254_s10 }
  0x16   : > { %s247_s17 = scalar_select %p246_p7, %s2671_s21, 1 }
  0x17   : > { %s2776_s20 = scalar_lea.vmem %s3898_s0, %s255_s16 }
  0x18   : > { %s249_s22 = sadd.s32 %s2078_s12, %s247_s17  ;;  %v313_v0 = vld [vmem:[%s2776_s20] sm:$0xff]  ;;  %v315_v1 = vld [vmem:[%s2776_s20 + $0x8] sm:$0xff]  ;;  %v317_v2 = vld [vmem:[%s2776_s20 + $0x18] sm:$0xff] }
  0x19   : > { %s2079_s28 = sshll.u32 %s249_s22, 1  ;;  %314 = vst [vmem:[#allocation2] sm:$0xff] %v313_v0  ;;  %316 = vst [vmem:[#allocation2 + $0x8] sm:$0xff] %v315_v1  ;;  %v319_v3 = vld [vmem:[%s2776_s20 + $0x20] sm:$0xff]  ;;  %v321_v4 = vld [vmem:[%s2776_s20 + $0x30] sm:$0xff] }
  0x1a   : > { %318 = vst [vmem:[#allocation2 + $0x18] sm:$0xff] %v317_v2  ;;  %v323_v5 = vld [vmem:[%s2776_s20 + $0x38] sm:$0xff]  ;;  %s2787_s7 = scalar_lea.vmem %s3904_s6, %s2079_s28  ;;  %320 = vst [vmem:[#allocation2 + $0x20] sm:$0xff] %v319_v3  ;;  %v325_v6 = vld [vmem:[%s2776_s20 + $0x48] sm:$0xff] }
  0x1b   : > { %322 = vst [vmem:[#allocation2 + $0x30] sm:$0xff] %v321_v4  ;;  %324 = vst [vmem:[#allocation2 + $0x38] sm:$0xff] %v323_v5  ;;  %v327_v7 = vld [vmem:[%s2776_s20 + $0x50] sm:$0xff]  ;;  %v329_v8 = vld [vmem:[%s2776_s20 + $0x60] sm:$0xff] }
  0x1c   : > { %326 = vst [vmem:[#allocation2 + $0x48] sm:$0xff] %v325_v6  ;;  %328 = vst [vmem:[#allocation2 + $0x50] sm:$0xff] %v327_v7  ;;  %v331_v9 = vld [vmem:[%s2776_s20 + $0x68] sm:$0xff]  ;;  %v333_v10 = vld [vmem:[%s2776_s20 + $0x78] sm:$0xff] }
  0x1d   : > { %330 = vst [vmem:[#allocation2 + $0x60] sm:$0xff] %v329_v8  ;;  %v335_v11 = vld [vmem:[%s2776_s20 + $0x80] sm:$0xff]  ;;  %332 = vst [vmem:[#allocation2 + $0x68] sm:$0xff] %v331_v9  ;;  %v337_v12 = vld [vmem:[%s2776_s20 + $0x90] sm:$0xff] }
  0x1e   : > { %334 = vst [vmem:[#allocation2 + $0x78] sm:$0xff] %v333_v10  ;;  %336 = vst [vmem:[#allocation2 + $0x80] sm:$0xff] %v335_v11  ;;  %v339_v13 = vld [vmem:[%s2776_s20 + $0x98] sm:$0xff]  ;;  %v341_v14 = vld [vmem:[%s2776_s20 + $0xa8] sm:$0xff] }
  0x1f   : > { %338 = vst [vmem:[#allocation2 + $0x90] sm:$0xff] %v337_v12  ;;  %340 = vst [vmem:[#allocation2 + $0x98] sm:$0xff] %v339_v13  ;;  %v343_v15 = vld [vmem:[%s2776_s20 + $0xb0] sm:$0xff]  ;;  %v345_v16 = vld [vmem:[%s2776_s20 + $0xc0] sm:$0xff] }
  0x20   : > { %342 = vst [vmem:[#allocation2 + $0xa8] sm:$0xff] %v341_v14  ;;  %v347_v17 = vld [vmem:[%s2776_s20 + $0xc8] sm:$0xff]  ;;  %344 = vst [vmem:[#allocation2 + $0xb0] sm:$0xff] %v343_v15  ;;  %v349_v18 = vld [vmem:[%s2776_s20 + $0xd8] sm:$0xff] }
  0x21   : > { %346 = vst [vmem:[#allocation2 + $0xc0] sm:$0xff] %v345_v16  ;;  %348 = vst [vmem:[#allocation2 + $0xc8] sm:$0xff] %v347_v17  ;;  %v351_v19 = vld [vmem:[%s2776_s20 + $0xe0] sm:$0xff]  ;;  %v2082_v20 = vld [vmem:[%s2776_s20 + $0x10] sm:$0x3] }
  0x22   : > { %350 = vst [vmem:[#allocation2 + $0xd8] sm:$0xff] %v349_v18  ;;  %352 = vst [vmem:[#allocation2 + $0xe0] sm:$0xff] %v351_v19  ;;  %v2083_v21 = vld [vmem:[%s2776_s20 + $0x28] sm:$0x3]  ;;  %v2084_v22 = vld [vmem:[%s2776_s20 + $0x40] sm:$0x3] }
  0x23   : > { %364 = vst [vmem:[#allocation2 + $0x10] sm:$0x3] %v2082_v20  ;;  %v2085_v23 = vld [vmem:[%s2776_s20 + $0x58] sm:$0x3]  ;;  %366 = vst [vmem:[#allocation2 + $0x28] sm:$0x3] %v2083_v21 }
  0x24   : > { %368 = vst [vmem:[#allocation2 + $0x40] sm:$0x3] %v2084_v22  ;;  %370 = vst [vmem:[#allocation2 + $0x58] sm:$0x3] %v2085_v23  ;;  %v2086_v24 = vld [vmem:[%s2776_s20 + $0x70] sm:$0x3] }
  0x25   : > { %v2087_v25 = vld [vmem:[%s2776_s20 + $0x88] sm:$0x3]  ;;  %v2088_v26 = vld [vmem:[%s2776_s20 + $0xa0] sm:$0x3]  ;;  %372 = vst [vmem:[#allocation2 + $0x70] sm:$0x3] %v2086_v24 }
  0x26   : > { %374 = vst [vmem:[#allocation2 + $0x88] sm:$0x3] %v2087_v25  ;;  %376 = vst [vmem:[#allocation2 + $0xa0] sm:$0x3] %v2088_v26  ;;  %v2089_v27 = vld [vmem:[%s2776_s20 + $0xb8] sm:$0x3] }
  0x27   : > { %v2090_v28 = vld [vmem:[%s2776_s20 + $0xd0] sm:$0x3]  ;;  %v2091_v29 = vld [vmem:[%s2776_s20 + $0xe8] sm:$0x3]  ;;  %378 = vst [vmem:[#allocation2 + $0xb8] sm:$0x3] %v2089_v27 }
  0x28   : > { %380 = vst [vmem:[#allocation2 + $0xd0] sm:$0x3] %v2090_v28  ;;  %382 = vst [vmem:[#allocation2 + $0xe8] sm:$0x3] %v2091_v29 }
  0x29   : > { %386 = vsyncadd [#allocation3], 2880 }
  0x2a   : > { %2667 = dma.done.wait [#allocation3], 2880 }
  0x2b   : > { %2668 = vsyncadd [#allocation3], 4294964416  ;;  %v391_v30 = vld [vmem:[#allocation2] sm:$0xff]  ;;  %v393_v34 = vld [vmem:[#allocation2 + $0x10] sm:$0x3]  ;;  %v2689_v12 = vmov 0.0  }
  0x2c   : > { %v2816_v31 = vld [vmem:[%s3901_s3] ss:$0 sm:$0xff]  ;;  %v394_v35 = vld [vmem:[#allocation2 + $0x18] sm:$0xff]  ;;  %v396_v36 = vld [vmem:[#allocation2 + $0x28] sm:$0x3]  ;;  %p2094_p8 = scmp.ne.s32.totalorder %s2671_s21, 0 }
  0x2d   : > { %v2821_v32 = vld [vmem:[%s3902_s4] ss:$0 sm:$0xff]  ;;  %v428_v33 = vmul.f32 %v2816_v31, %v391_v30  ;;  %v430_v37 = vmul.f32 %v2816_v31, %v393_v34  ;;  %v431_v38 = vmul.f32 %v2816_v31, %v394_v35  ;;  %v433_v39 = vmul.f32 %v2816_v31, %v396_v36  ;;  %v397_v40 = vld [vmem:[#allocation2 + $0x30] sm:$0xff]  ;;  %v400_v42 = vld [vmem:[#allocation2 + $0x48] sm:$0xff] }
  0x2e   : > { %v399_v41 = vld [vmem:[#allocation2 + $0x40] sm:$0x3]  ;;  %v434_v44 = vmul.f32 %v2816_v31, %v397_v40  ;;  %v437_v46 = vmul.f32 %v2816_v31, %v400_v42  ;;  %v402_v47 = vld [vmem:[#allocation2 + $0x58] sm:$0x3]  ;;  %v405_v53 = vld [vmem:[#allocation2 + $0x70] sm:$0x3] }
  0x2f   : > { %v465_v43 = vadd.f32 %v2821_v32, %v428_v33  ;;  %v436_v45 = vmul.f32 %v2816_v31, %v399_v41  ;;  %v467_v48 = vadd.f32 %v2821_v32, %v430_v37  ;;  %v468_v49 = vadd.f32 %v2821_v32, %v431_v38  ;;  %v403_v52 = vld [vmem:[#allocation2 + $0x60] sm:$0xff]  ;;  %v406_v58 = vld [vmem:[#allocation2 + $0x78] sm:$0xff]  ;;  %v408_v59 = vld [vmem:[#allocation2 + $0x88] sm:$0x3] }
  0x30   : > { %v470_v50 = vadd.f32 %v2821_v32, %v433_v39  ;;  %v439_v51 = vmul.f32 %v2816_v31, %v402_v47  ;;  %v471_v55 = vadd.f32 %v2821_v32, %v434_v44  ;;  %v474_v57 = vadd.f32 %v2821_v32, %v437_v46  ;;  %v409_v60 = vld [vmem:[#allocation2 + $0x90] sm:$0xff]  ;;  %v411_v1 = vld [vmem:[#allocation2 + $0xa0] sm:$0x3]  ;;  %v412_v2 = vld [vmem:[#allocation2 + $0xa8] sm:$0xff] }
  0x31   : > { %v495_v54 = vmax.f32 %v465_v43, 0.0  ;;  %v473_v56 = vadd.f32 %v2821_v32, %v436_v45  ;;  %v497_v61 = vmax.f32 %v467_v48, 0.0  ;;  %v498_v62 = vmax.f32 %v468_v49, 0.0  ;;  %v414_v7 = vld [vmem:[#allocation2 + $0xb8] sm:$0x3]  ;;  %v415_v21 = vld [vmem:[#allocation2 + $0xc0] sm:$0xff] }
  0x32   : > { %v500_v63 = vmax.f32 %v470_v50, 0.0  ;;  %v476_v0 = vadd.f32 %v2821_v32, %v439_v51  ;;  %v501_v3 = vmax.f32 %v471_v55, 0.0  ;;  %v504_v5 = vmax.f32 %v474_v57, 0.0  ;;  %v417_v26 = vld [vmem:[#allocation2 + $0xd0] sm:$0x3]  ;;  %v418_v27 = vld [vmem:[#allocation2 + $0xd8] sm:$0xff] }
  0x33   : > { %525 = vst [vmem:[#allocation2] sm:$0xff] %v495_v54  ;;  %v503_v4 = vmax.f32 %v473_v56, 0.0  ;;  %v440_v6 = vmul.f32 %v2816_v31, %v403_v52  ;;  %527 = vst [vmem:[#allocation2 + $0x10] sm:$0x3] %v497_v61  ;;  %v442_v9 = vmul.f32 %v2816_v31, %v405_v53  ;;  %v443_v10 = vmul.f32 %v2816_v31, %v406_v58  ;;  %v420_v28 = vld [vmem:[#allocation2 + $0xe8] sm:$0x3] }
  0x34   : > { %528 = vst [vmem:[#allocation2 + $0x18] sm:$0xff] %v498_v62  ;;  %530 = vst [vmem:[#allocation2 + $0x28] sm:$0x3] %v500_v63  ;;  %v506_v8 = vmax.f32 %v476_v0, 0.0  ;;  %v445_v11 = vmul.f32 %v2816_v31, %v408_v59  ;;  %v446_v14 = vmul.f32 %v2816_v31, %v409_v60  ;;  %v448_v15 = vmul.f32 %v2816_v31, %v411_v1  ;;  %v392_v35 = vld [vmem:[#allocation2 + $0x8] sm:$0xff]  ;;  %v395_v36 = vld [vmem:[#allocation2 + $0x20] sm:$0xff] }
  0x35   : > { %555 = vst [vmem:[#allocation2] sm:$0x1] %v2689_v12  ;;  %531 = vst [vmem:[#allocation2 + $0x30] sm:$0xff] %v501_v3  ;;  %v477_v13 = vadd.f32 %v2821_v32, %v440_v6  ;;  %v449_v16 = vmul.f32 %v2816_v31, %v412_v2  ;;  %v479_v17 = vadd.f32 %v2821_v32, %v442_v9  ;;  %v398_v37 = vld [vmem:[#allocation2 + $0x38] sm:$0xff]  ;;  %v401_v42 = vld [vmem:[#allocation2 + $0x50] sm:$0xff] }
  0x36   : > { %533 = vst [vmem:[#allocation2 + $0x40] sm:$0x3] %v503_v4  ;;  %534 = vst [vmem:[#allocation2 + $0x48] sm:$0xff] %v504_v5  ;;  %v480_v18 = vadd.f32 %v2821_v32, %v443_v10  ;;  %v482_v19 = vadd.f32 %v2821_v32, %v445_v11  ;;  %v451_v20 = vmul.f32 %v2816_v31, %v414_v7  ;;  %v404_v55 = vld [vmem:[#allocation2 + $0x68] sm:$0xff]  ;;  %v407_v60 = vld [vmem:[#allocation2 + $0x80] sm:$0xff] }
  0x37   : > { %556 = vst [vmem:[#allocation2 + $0x18] sm:$0x1] %v2689_v12  ;;  %565 = vst [vmem:[#allocation2 + $0x11] sm:$0x1] %v2689_v12  ;;  %v507_v22 = vmax.f32 %v477_v13, 0.0  ;;  %v483_v23 = vadd.f32 %v2821_v32, %v446_v14  ;;  %v485_v24 = vadd.f32 %v2821_v32, %v448_v15  ;;  %v486_v25 = vadd.f32 %v2821_v32, %v449_v16  ;;  %v410_v61 = vld [vmem:[#allocation2 + $0x98] sm:$0xff] }
  0x38   : > { %566 = vst [vmem:[#allocation2 + $0x29] sm:$0x1] %v2689_v12  ;;  %536 = vst [vmem:[#allocation2 + $0x58] sm:$0x3] %v506_v8  ;;  %v509_v29 = vmax.f32 %v479_v17, 0.0  ;;  %v510_v30 = vmax.f32 %v480_v18, 0.0  ;;  %v488_v34 = vadd.f32 %v2821_v32, %v451_v20  ;;  %v452_v41 = vmul.f32 %v2816_v31, %v415_v21 }
  0x39   : > { %557 = vst [vmem:[#allocation2 + $0x30] sm:$0x1] %v2689_v12  ;;  %558 = vst [vmem:[#allocation2 + $0x48] sm:$0x1] %v2689_v12  ;;  %v512_v33 = vmax.f32 %v482_v19, 0.0  ;;  %v513_v38 = vmax.f32 %v483_v23, 0.0  ;;  %v454_v44 = vmul.f32 %v2816_v31, %v417_v26  ;;  %v455_v45 = vmul.f32 %v2816_v31, %v418_v27 }
  0x3a   : > { %567 = vst [vmem:[#allocation2 + $0x41] sm:$0x1] %v2689_v12  ;;  %568 = vst [vmem:[#allocation2 + $0x59] sm:$0x1] %v2689_v12  ;;  %v515_v39 = vmax.f32 %v485_v24, 0.0  ;;  %v516_v40 = vmax.f32 %v486_v25, 0.0  ;;  %v457_v46 = vmul.f32 %v2816_v31, %v420_v28  ;;  %v489_v47 = vadd.f32 %v2821_v32, %v452_v41 }
  0x3b   : > { %537 = vst [vmem:[#allocation2 + $0x60] sm:$0xff] %v507_v22  ;;  %539 = vst [vmem:[#allocation2 + $0x70] sm:$0x3] %v509_v29  ;;  %v518_v43 = vmax.f32 %v488_v34, 0.0  ;;  %v429_v48 = vmul.f32 %v2816_v31, %v392_v35  ;;  %v432_v49 = vmul.f32 %v2816_v31, %v395_v36  ;;  %v435_v50 = vmul.f32 %v2816_v31, %v398_v37  ;;  %v413_v62 = vld [vmem:[#allocation2 + $0xb0] sm:$0xff]  ;;  %v416_v3 = vld [vmem:[#allocation2 + $0xc8] sm:$0xff] }
  0x3c   : > { %540 = vst [vmem:[#allocation2 + $0x78] sm:$0xff] %v510_v30  ;;  %542 = vst [vmem:[#allocation2 + $0x88] sm:$0x3] %v512_v33  ;;  %v491_v51 = vadd.f32 %v2821_v32, %v454_v44  ;;  %v492_v52 = vadd.f32 %v2821_v32, %v455_v45  ;;  %v494_v53 = vadd.f32 %v2821_v32, %v457_v46  ;;  %v519_v56 = vmax.f32 %v489_v47, 0.0  ;;  %v419_v4 = vld [vmem:[#allocation2 + $0xe0] sm:$0xff] }
  0x3d   : > { %559 = vst [vmem:[#allocation2 + $0x60] sm:$0x1] %v2689_v12  ;;  %543 = vst [vmem:[#allocation2 + $0x90] sm:$0xff] %v513_v38  ;;  %v438_v54 = vmul.f32 %v2816_v31, %v401_v42  ;;  %v466_v57 = vadd.f32 %v2821_v32, %v429_v48  ;;  %v469_v58 = vadd.f32 %v2821_v32, %v432_v49 }
  0x3e   : > { %545 = vst [vmem:[#allocation2 + $0xa0] sm:$0x3] %v515_v39  ;;  %546 = vst [vmem:[#allocation2 + $0xa8] sm:$0xff] %v516_v40  ;;  %v472_v59 = vadd.f32 %v2821_v32, %v435_v50  ;;  %v521_v63 = vmax.f32 %v491_v51, 0.0  ;;  %v522_v0 = vmax.f32 %v492_v52, 0.0  ;;  %v524_v1 = vmax.f32 %v494_v53, 0.0 }
  0x3f   : > { %560 = vst [vmem:[#allocation2 + $0x78] sm:$0x1] %v2689_v12  ;;  %569 = vst [vmem:[#allocation2 + $0x71] sm:$0x1] %v2689_v12  ;;  %v475_v2 = vadd.f32 %v2821_v32, %v438_v54  ;;  %v496_v5 = vmax.f32 %v466_v57, 0.0  ;;  %v499_v6 = vmax.f32 %v469_v58, 0.0  ;;  %v441_v8 = vmul.f32 %v2816_v31, %v404_v55 }
  0x40   : > { %570 = vst [vmem:[#allocation2 + $0x89] sm:$0x1] %v2689_v12  ;;  %548 = vst [vmem:[#allocation2 + $0xb8] sm:$0x3] %v518_v43  ;;  %v502_v7 = vmax.f32 %v472_v59, 0.0  ;;  %v444_v10 = vmul.f32 %v2816_v31, %v407_v60  ;;  %v447_v11 = vmul.f32 %v2816_v31, %v410_v61  ;;  %v450_v13 = vmul.f32 %v2816_v31, %v413_v62 }
  0x41   : > { %561 = vst [vmem:[#allocation2 + $0x90] sm:$0x1] %v2689_v12  ;;  %562 = vst [vmem:[#allocation2 + $0xa8] sm:$0x1] %v2689_v12  ;;  %v505_v9 = vmax.f32 %v475_v2, 0.0  ;;  %v478_v14 = vadd.f32 %v2821_v32, %v441_v8  ;;  %v453_v15 = vmul.f32 %v2816_v31, %v416_v3  ;;  %v456_v16 = vmul.f32 %v2816_v31, %v419_v4 }
  0x42   : > { %571 = vst [vmem:[#allocation2 + $0xa1] sm:$0x1] %v2689_v12  ;;  %572 = vst [vmem:[#allocation2 + $0xb9] sm:$0x1] %v2689_v12  ;;  %v481_v17 = vadd.f32 %v2821_v32, %v444_v10  ;;  %v484_v18 = vadd.f32 %v2821_v32, %v447_v11  ;;  %v487_v19 = vadd.f32 %v2821_v32, %v450_v13 }
  0x43   : > { %549 = vst [vmem:[#allocation2 + $0xc0] sm:$0xff] %v519_v56  ;;  %551 = vst [vmem:[#allocation2 + $0xd0] sm:$0x3] %v521_v63  ;;  %v508_v20 = vmax.f32 %v478_v14, 0.0  ;;  %v490_v21 = vadd.f32 %v2821_v32, %v453_v15  ;;  %v493_v22 = vadd.f32 %v2821_v32, %v456_v16 }
  0x44   : > { %552 = vst [vmem:[#allocation2 + $0xd8] sm:$0xff] %v522_v0  ;;  %554 = vst [vmem:[#allocation2 + $0xe8] sm:$0x3] %v524_v1  ;;  %v511_v23 = vmax.f32 %v481_v17, 0.0  ;;  %v514_v31 = vmax.f32 %v484_v18, 0.0  ;;  %v517_v24 = vmax.f32 %v487_v19, 0.0 }
  0x45   : > { %563 = vst [vmem:[#allocation2 + $0xc0] sm:$0x1] %v2689_v12  ;;  %526 = vst [vmem:[#allocation2 + $0x8] sm:$0xff] %v496_v5  ;;  %v520_v25 = vmax.f32 %v490_v21, 0.0  ;;  %v523_v26 = vmax.f32 %v493_v22, 0.0 }
  0x46   : > { %529 = vst [vmem:[#allocation2 + $0x20] sm:$0xff] %v499_v6  ;;  %532 = vst [vmem:[#allocation2 + $0x38] sm:$0xff] %v502_v7 }
  0x47   : > { %564 = vst [vmem:[#allocation2 + $0xd8] sm:$0x1] %v2689_v12  ;;  %573 = vst [vmem:[#allocation2 + $0xd1] sm:$0x1] %v2689_v12  ;;  %578 = sbr.rel (%p2094_p8) target bundleno = 79 (0x4f), region = 77 }
  0x48   : > { %574 = vst [vmem:[#allocation2 + $0xe9] sm:$0x1] %v2689_v12  ;;  %535 = vst [vmem:[#allocation2 + $0x50] sm:$0xff] %v505_v9 }
  0x49   : > { %538 = vst [vmem:[#allocation2 + $0x68] sm:$0xff] %v508_v20  ;;  %541 = vst [vmem:[#allocation2 + $0x80] sm:$0xff] %v511_v23 }
  0x4a   : > { %544 = vst [vmem:[#allocation2 + $0x98] sm:$0xff] %v514_v31  ;;  %547 = vst [vmem:[#allocation2 + $0xb0] sm:$0xff] %v517_v24 }
  0x4b   : > { %550 = vst [vmem:[#allocation2 + $0xc8] sm:$0xff] %v520_v25  ;;  %553 = vst [vmem:[#allocation2 + $0xe0] sm:$0xff] %v523_v26 }
  0x4c   : > { %v2690_v12 = vmov 0.0  }
  0x4d   : > { %579 = vst [vmem:[#allocation2] sm:$0xff] %v2690_v12  ;;  %580 = vst [vmem:[#allocation2 + $0x8] sm:$0xff] %v2690_v12 }
  0x4e   : > { %581 = vst [vmem:[#allocation2 + $0x10] sm:$0x3] %v2690_v12 }
  0x4f PF: > { %p2095_p9 = scmp.ne.s32.totalorder %s2671_s21, 1 }
  0x51   : > { %585 = sbr.rel (%p2095_p9) target bundleno = 89 (0x59), region = 81 }
  0x56   : > { %v2691_v32 = vmov 0.0  }
  0x57   : > { %587 = vst [vmem:[#allocation2 + $0xd8] sm:$0xff] %v2691_v32  ;;  %588 = vst [vmem:[#allocation2 + $0xe0] sm:$0xff] %v2691_v32 }
  0x58   : > { %589 = vst [vmem:[#allocation2 + $0xe8] sm:$0x3] %v2691_v32 }
  0x59 PF: > { %v854_v27 = vld [vmem:[%s3899_s1 + $0x278] sm:$0xff]  ;;  %v853_v30 = vld [vmem:[%s3899_s1 + $0x270] sm:$0xff]  ;;  %v852_v35 = vld [vmem:[%s3899_s1 + $0x268] sm:$0xff]  ;;  %vm644_vm0 = vcmask 1046528   ;;  %vm701_vm1 = vcmask 1045504  }
  0x5a   : > { %v870_v28 = vld [vmem:[%s3899_s1 + $0x2f8] sm:$0xff]  ;;  %2100 = vmatprep.subr.mxu0 %v854_v27  ;;  %v869_v33 = vld [vmem:[%s3899_s1 + $0x2f0] sm:$0xff]  ;;  %v868_v36 = vld [vmem:[%s3899_s1 + $0x2e8] sm:$0xff] }
  0x5b   : > { %v838_v29 = vld [vmem:[%s3899_s1 + $0x1f8] sm:$0xff]  ;;  %2436 = vmatprep.subr.mxu1 %v870_v28  ;;  %v837_v34 = vld [vmem:[%s3899_s1 + $0x1f0] sm:$0xff]  ;;  %v836_v37 = vld [vmem:[%s3899_s1 + $0x1e8] sm:$0xff] }
  0x5c   : > { %2101 = vmatpush3.msra.mxu0 %v838_v29  ;;  %2437 = vmatpush3.msra.mxu1 %v870_v28  ;;  %v851_v38 = vld [vmem:[%s3899_s1 + $0x260] sm:$0xff]  ;;  %v850_v41 = vld [vmem:[%s3899_s1 + $0x258] sm:$0xff]  ;;  %v849_v44 = vld [vmem:[%s3899_s1 + $0x250] sm:$0xff] }
  0x5d   : > { %2102 = vmatprep.subr.mxu0 %v853_v30  ;;  %2438 = vmatprep.subr.mxu1 %v869_v33  ;;  %v867_v39 = vld [vmem:[%s3899_s1 + $0x2e0] sm:$0xff]  ;;  %v866_v42 = vld [vmem:[%s3899_s1 + $0x2d8] sm:$0xff]  ;;  %v865_v45 = vld [vmem:[%s3899_s1 + $0x2d0] sm:$0xff] }
  0x5e   : > { %2103 = vmatpush3.msra.mxu0 %v837_v34  ;;  %2439 = vmatpush3.msra.mxu1 %v869_v33  ;;  %v835_v40 = vld [vmem:[%s3899_s1 + $0x1e0] sm:$0xff]  ;;  %v834_v43 = vld [vmem:[%s3899_s1 + $0x1d8] sm:$0xff]  ;;  %v833_v46 = vld [vmem:[%s3899_s1 + $0x1d0] sm:$0xff] }
  0x5f   : > { %2104 = vmatprep.subr.mxu0 %v852_v35  ;;  %2440 = vmatprep.subr.mxu1 %v868_v36  ;;  %v848_v47 = vld [vmem:[%s3899_s1 + $0x248] sm:$0xff]  ;;  %v847_v50 = vld [vmem:[%s3899_s1 + $0x240] sm:$0xff]  ;;  %v846_v53 = vld [vmem:[%s3899_s1 + $0x238] sm:$0xff] }
  0x60   : > { %2105 = vmatpush3.msra.mxu0 %v836_v37  ;;  %2441 = vmatpush3.msra.mxu1 %v868_v36  ;;  %v864_v48 = vld [vmem:[%s3899_s1 + $0x2c8] sm:$0xff]  ;;  %v863_v51 = vld [vmem:[%s3899_s1 + $0x2c0] sm:$0xff]  ;;  %v862_v54 = vld [vmem:[%s3899_s1 + $0x2b8] sm:$0xff] }
  0x61   : > { %2106 = vmatprep.subr.mxu0 %v851_v38  ;;  %2442 = vmatprep.subr.mxu1 %v867_v39  ;;  %v832_v49 = vld [vmem:[%s3899_s1 + $0x1c8] sm:$0xff]  ;;  %v831_v52 = vld [vmem:[%s3899_s1 + $0x1c0] sm:$0xff]  ;;  %v830_v55 = vld [vmem:[%s3899_s1 + $0x1b8] sm:$0xff] }
  0x62   : > { %2107 = vmatpush3.msra.mxu0 %v835_v40  ;;  %2443 = vmatpush3.msra.mxu1 %v867_v39  ;;  %v845_v56 = vld [vmem:[%s3899_s1 + $0x230] sm:$0xff]  ;;  %v844_v59 = vld [vmem:[%s3899_s1 + $0x228] sm:$0xff]  ;;  %v843_v62 = vld [vmem:[%s3899_s1 + $0x220] sm:$0xff] }
  0x63   : > { %2108 = vmatprep.subr.mxu0 %v850_v41  ;;  %2444 = vmatprep.subr.mxu1 %v866_v42  ;;  %v861_v57 = vld [vmem:[%s3899_s1 + $0x2b0] sm:$0xff]  ;;  %v860_v60 = vld [vmem:[%s3899_s1 + $0x2a8] sm:$0xff]  ;;  %v859_v63 = vld [vmem:[%s3899_s1 + $0x2a0] sm:$0xff] }
  0x64   : > { %2109 = vmatpush3.msra.mxu0 %v834_v43  ;;  %2445 = vmatpush3.msra.mxu1 %v866_v42  ;;  %v829_v58 = vld [vmem:[%s3899_s1 + $0x1b0] sm:$0xff]  ;;  %v828_v61 = vld [vmem:[%s3899_s1 + $0x1a8] sm:$0xff]  ;;  %v827_v0 = vld [vmem:[%s3899_s1 + $0x1a0] sm:$0xff] }
  0x65   : > { %2110 = vmatprep.subr.mxu0 %v849_v44  ;;  %2446 = vmatprep.subr.mxu1 %v865_v45  ;;  %v842_v1 = vld [vmem:[%s3899_s1 + $0x218] sm:$0xff]  ;;  %v3021_v4 = vld [vmem:[#allocation2 + $0x20] sm:$0xff]  ;;  %v841_v6 = vld [vmem:[%s3899_s1 + $0x210] sm:$0xff] }
  0x66   : > { %2111 = vmatpush3.msra.mxu0 %v833_v46  ;;  %2447 = vmatpush3.msra.mxu1 %v865_v45  ;;  %v858_v2 = vld [vmem:[%s3899_s1 + $0x298] sm:$0xff]  ;;  %v857_v7 = vld [vmem:[%s3899_s1 + $0x290] sm:$0xff]  ;;  %v595_v8 = vld [vmem:[#allocation2 + $0x28] sm:$0x3]  ;;  %v651_v11 = vrot.slane %v3021_v4, 1  ;;  %v708_v16 = vrot.slane %v3021_v4, 2 }
  0x67   : > { %2112 = vmatprep.subr.mxu0 %v848_v47  ;;  %2448 = vmatprep.subr.mxu1 %v864_v48  ;;  %v3019_v3 = vld [vmem:[#allocation2 + $0x18] sm:$0xff]  ;;  %v825_v9 = vld [vmem:[%s3899_s1 + $0x190] sm:$0xff]  ;;  %v840_v13 = vld [vmem:[%s3899_s1 + $0x208] sm:$0xff]  ;;  %v710_v19 = vrot.slane %v595_v8, 2  ;;  %v653_v26 = vrot.slane %v595_v8, 1 }
  0x68   : > { %2113 = vmatpush3.msra.mxu0 %v832_v49  ;;  %2449 = vmatpush3.msra.mxu1 %v864_v48  ;;  %v826_v5 = vld [vmem:[%s3899_s1 + $0x198] sm:$0xff]  ;;  %v650_v10 = vrot.slane %v3019_v3, 1  ;;  %v856_v14 = vld [vmem:[%s3899_s1 + $0x288] sm:$0xff]  ;;  %v707_v15 = vrot.slane %v3019_v3, 2  ;;  %v839_v18 = vld [vmem:[%s3899_s1 + $0x200] sm:$0xff] }
  0x69   : > { %2114 = vmatprep.subr.mxu0 %v847_v50  ;;  %2450 = vmatprep.subr.mxu1 %v863_v51  ;;  %v824_v17 = vld [vmem:[%s3899_s1 + $0x188] sm:$0xff]  ;;  %v855_v20 = vld [vmem:[%s3899_s1 + $0x280] sm:$0xff]  ;;  %v3054_v21 = vld [vmem:[#allocation2 + $0x30] sm:$0xff]  ;;  %v3070_v12 = vsel %vm701_vm1, %v708_v16, %v710_v19  ;;  %v3096_v37 = vsel %vm644_vm0, %v651_v11, %v653_v26 }
  0x6a   : > { %2115 = vmatpush3.msra.mxu0 %v831_v52  ;;  %2451 = vmatpush3.msra.mxu1 %v863_v51  ;;  %v3056_v22 = vld [vmem:[#allocation2 + $0x38] sm:$0xff]  ;;  %v823_v23 = vld [vmem:[%s3899_s1 + $0x180] sm:$0xff]  ;;  %v3062_v31 = vsel %vm644_vm0, %v650_v10, %v651_v11  ;;  %v3067_v25 = vsel %vm701_vm1, %v707_v15, %v708_v16  ;;  %v712_v32 = vrot.slane %v3054_v21, 2  ;;  %v3086_v34 = vld [vmem:[#allocation2 + $0x48] sm:$0xff]  ;;  %v655_v41 = vrot.slane %v3054_v21, 1 }
  0x6b   : > { %2116 = vmatprep.subr.mxu0 %v846_v53  ;;  %2452 = vmatprep.subr.mxu1 %v862_v54  ;;  %v3064_v24 = vld [vmem:[#allocation2 + $0x40] sm:$0x3]  ;;  %v713_v27 = vrot.slane %v3056_v22, 2  ;;  %v789_v28 = vld [vmem:[%s3899_s1 + $0xf8] sm:$0xff]  ;;  %v3088_v35 = vld [vmem:[#allocation2 + $0x50] sm:$0xff]  ;;  %v656_v42 = vrot.slane %v3056_v22, 1 }
  0x6c   : > { %2117 = vmatpush3.msra.mxu0 %v830_v55  ;;  %2453 = vmatpush3.msra.mxu1 %v862_v54  ;;  %v805_v29 = vld [vmem:[%s3899_s1 + $0x178] sm:$0xff]  ;;  %v715_v30 = vrot.slane %v3064_v24, 2  ;;  %v788_v36 = vld [vmem:[%s3899_s1 + $0xf0] sm:$0xff]  ;;  %v717_v44 = vrot.slane %v3086_v34, 2  ;;  %v718_v45 = vrot.slane %v3088_v35, 2  ;;  %v787_v46 = vld [vmem:[%s3899_s1 + $0xe8] sm:$0xff] }
  0x6d   : > { %2118 = vmatprep.subr.mxu0 %v845_v56  ;;  %2454 = vmatprep.subr.mxu1 %v861_v57  ;;  %v773_v33 = vld [vmem:[%s3899_s1 + $0x78] sm:$0xff]  ;;  %v3101_v39 = vsel %vm701_vm1, %v712_v32, %v713_v27  ;;  %v772_v40 = vld [vmem:[%s3899_s1 + $0x70] sm:$0xff]  ;;  %v771_v49 = vld [vmem:[%s3899_s1 + $0x68] sm:$0xff]  ;;  %v3135_v53 = vsel %vm644_vm0, %v655_v41, %v656_v42  ;;  %v660_v10 = vrot.slane %v3086_v34, 1  ;;  %v661_v11 = vrot.slane %v3088_v35, 1 }
  0x6e   : > { %2119 = vmatpush3.msra.mxu0 %v829_v58  ;;  %2455 = vmatpush3.msra.mxu1 %v861_v57  ;;  %v3098_v38 = vld [vmem:[#allocation2 + $0x58] sm:$0x3]  ;;  %v3109_v43 = vsel %vm701_vm1, %v713_v27, %v715_v30  ;;  %v804_v47 = vld [vmem:[%s3899_s1 + $0x170] sm:$0xff]  ;;  %v3125_v50 = vld [vmem:[#allocation2 + $0x60] sm:$0xff]  ;;  %v3140_v55 = vsel %vm701_vm1, %v717_v44, %v718_v45  ;;  %v658_v57 = vrot.slane %v3064_v24, 1 }
  0x6f   : > { %2120 = vmatprep.subr.mxu0 %v844_v59  ;;  %2456 = vmatprep.subr.mxu1 %v860_v60  ;;  %v720_v48 = vrot.slane %v3098_v38, 2  ;;  %v3127_v51 = vld [vmem:[#allocation2 + $0x68] sm:$0xff]  ;;  %v786_v52 = vld [vmem:[%s3899_s1 + $0xe0] sm:$0xff]  ;;  %v3137_v54 = vld [vmem:[#allocation2 + $0x70] sm:$0x3]  ;;  %v722_v59 = vrot.slane %v3125_v50, 2  ;;  %v3212_v26 = vsel %vm644_vm0, %v660_v10, %v661_v11 }
  0x70   : > { %2121 = vmatpush3.msra.mxu0 %v828_v61  ;;  %2457 = vmatpush3.msra.mxu1 %v860_v60  ;;  %v770_v56 = vld [vmem:[%s3899_s1 + $0x60] sm:$0xff]  ;;  %v723_v60 = vrot.slane %v3127_v51, 2  ;;  %v785_v61 = vld [vmem:[%s3899_s1 + $0xd8] sm:$0xff]  ;;  %v783_v16 = vld [vmem:[%s3899_s1 + $0xc8] sm:$0xff] }
  0x71   : > { %2122 = vmatprep.subr.mxu0 %v843_v62  ;;  %2458 = vmatprep.subr.mxu1 %v859_v63  ;;  %v3147_v58 = vsel %vm701_vm1, %v718_v45, %v720_v48  ;;  %v803_v62 = vld [vmem:[%s3899_s1 + $0x168] sm:$0xff]  ;;  %v782_v24 = vld [vmem:[%s3899_s1 + $0xc0] sm:$0xff]  ;;  %v3242_v45 = vld [vmem:[#allocation2 + $0xb0] sm:$0xff] }
  0x72   : > { %2123 = vmatpush3.msra.mxu0 %v827_v0  ;;  %2459 = vmatpush3.msra.mxu1 %v859_v63  ;;  %v725_v63 = vrot.slane %v3137_v54, 2  ;;  %v769_v0 = vld [vmem:[%s3899_s1 + $0x58] sm:$0xff]  ;;  %v3178_v8 = vsel %vm701_vm1, %v722_v59, %v723_v60  ;;  %v767_v19 = vld [vmem:[%s3899_s1 + $0x48] sm:$0xff]  ;;  %v3214_v32 = vld [vmem:[#allocation2 + $0xa0] sm:$0x3] }
  0x73   : > { %2124 = vmatprep.subr.mxu0 %v842_v1  ;;  %2460 = vmatprep.subr.mxu1 %v858_v2  ;;  %v3163_v1 = vld [vmem:[#allocation2 + $0x78] sm:$0xff]  ;;  %v735_v41 = vrot.slane %v3214_v32, 2  ;;  %v3240_v44 = vld [vmem:[#allocation2 + $0xa8] sm:$0xff] }
  0x74   : > { %2125 = vmatpush3.msra.mxu0 %v826_v5  ;;  %2461 = vmatpush3.msra.mxu1 %v858_v2  ;;  %v3165_v2 = vld [vmem:[#allocation2 + $0x80] sm:$0xff]  ;;  %v784_v5 = vld [vmem:[%s3899_s1 + $0xd0] sm:$0xff]  ;;  %v3252_v48 = vld [vmem:[#allocation2 + $0xb8] sm:$0x3] }
  0x75   : > { %2126 = vmatprep.subr.mxu0 %v841_v6  ;;  %2462 = vmatprep.subr.mxu1 %v857_v7  ;;  %v3173_v6 = vsel %vm644_vm0, %v656_v42, %v658_v57  ;;  %v728_v15 = vrot.slane %v3165_v2, 2  ;;  %v765_v42 = vld [vmem:[%s3899_s1 + $0x38] sm:$0xff]  ;;  %v666_v57 = vrot.slane %v3127_v51, 1  ;;  %v3281_v10 = vld [vmem:[#allocation2 + $0xc8] sm:$0xff] }
  0x76   : > { %2127 = vmatpush3.msra.mxu0 %v825_v9  ;;  %2463 = vmatpush3.msra.mxu1 %v857_v7  ;;  %v3175_v7 = vld [vmem:[#allocation2 + $0x88] sm:$0x3]  ;;  %v768_v9 = vld [vmem:[%s3899_s1 + $0x50] sm:$0xff] }
  0x77   : > { %2128 = vmatprep.subr.mxu0 %v840_v13  ;;  %2464 = vmatprep.subr.mxu1 %v856_v14  ;;  %v3186_v13 = vsel %vm701_vm1, %v723_v60, %v725_v63  ;;  %v737_v60 = vrot.slane %v3240_v44, 2  ;;  %v800_v63 = vld [vmem:[%s3899_s1 + $0x150] sm:$0xff] }
  0x78   : > { %2129 = vmatpush3.msra.mxu0 %v824_v17  ;;  %2465 = vmatpush3.msra.mxu1 %v856_v14  ;;  %v727_v14 = vrot.slane %v3163_v1, 2  ;;  %v802_v17 = vld [vmem:[%s3899_s1 + $0x160] sm:$0xff] }
  0x79   : > { %2130 = vmatprep.subr.mxu0 %v839_v18  ;;  %2466 = vmatprep.subr.mxu1 %v855_v20  ;;  %v730_v18 = vrot.slane %v3175_v7, 2 }
  0x7a   : > { %2131 = vmatpush3.msra.mxu0 %v823_v23  ;;  %935 = vmatprep.mubr.f32.mxu0 %v3062_v31  ;;  %v3204_v23 = vld [vmem:[#allocation2 + $0x98] sm:$0xff]  ;;  %v3217_v27 = vsel %vm701_vm1, %v727_v14, %v728_v15 }
  0x7b   : > { %2467 = vmatpush3.msra.mxu1 %v855_v20  ;;  %2468 = vmatprep.mubr.f32.mxu1 %v3067_v25  ;;  %v3202_v20 = vld [vmem:[#allocation2 + $0x90] sm:$0xff]  ;;  %v3224_v30 = vsel %vm701_vm1, %v728_v15, %v730_v18  ;;  %v668_v18 = vrot.slane %v3137_v54, 1  ;;  %v799_v54 = vld [vmem:[%s3899_s1 + $0x148] sm:$0xff] }
  0x7c   : > { %936 = vmatmul.mubr.f32.vlgmr.msra.gmra.mxu0 %v3019_v3  ;;  %2469 = vmatmul.mubr.f32.vlgmr.msra.gmra.mxu1 %v3070_v12  ;;  %v3291_v15 = vld [vmem:[#allocation2 + $0xd0] sm:$0x3] }
  0x7d   : > { %2212 = vmatprep.subr.mxu1 %v789_v28  ;;  %2492 = vmatprep.subr.mxu0 %v805_v29  ;;  %v766_v28 = vld [vmem:[%s3899_s1 + $0x40] sm:$0xff] }
  0x7e   : > { %2213 = vmatpush3.msra.mxu1 %v773_v33  ;;  %2493 = vmatpush3.msra.mxu0 %v805_v29  ;;  %v663_v29 = vrot.slane %v3098_v38, 1  ;;  %v732_v33 = vrot.slane %v3202_v20, 2  ;;  %v801_v38 = vld [vmem:[%s3899_s1 + $0x158] sm:$0xff] }
  0x7f   : > { %2214 = vmatprep.subr.mxu1 %v788_v36  ;;  %940 = vmatprep.mubr.f32.mxu0 %v3096_v37  ;;  %v733_v36 = vrot.slane %v3204_v23, 2 }
  0x80   : > { %2471 = vmatprep.mubr.f32.mxu1 %v3101_v39  ;;  %2215 = vmatpush3.msra.mxu1 %v772_v40  ;;  %v781_v40 = vld [vmem:[%s3899_s1 + $0xb8] sm:$0xff] }
  0x81   : > { %941 = vmatmul.mubr.f32.gmra.mxu0 %v3021_v4  ;;  %2472 = vmatmul.mubr.f32.gmra.mxu1 %v3109_v43  ;;  %v3263_v59 = vsel %vm701_vm1, %v733_v36, %v735_v41  ;;  %v776_v41 = vld [vmem:[%s3899_s1 + $0x90] sm:$0xff] }
  0x82   : > { %2216 = vmatprep.subr.mxu1 %v787_v46  ;;  %2494 = vmatprep.subr.mxu0 %v804_v47  ;;  %v780_v46 = vld [vmem:[%s3899_s1 + $0xb0] sm:$0xff] }
  0x83   : > { %2217 = vmatpush3.msra.mxu1 %v771_v49  ;;  %2495 = vmatpush3.msra.mxu0 %v804_v47  ;;  %v3250_v47 = vsel %vm644_vm0, %v661_v11, %v663_v29  ;;  %v3255_v49 = vsel %vm701_vm1, %v732_v33, %v733_v36  ;;  %v778_v11 = vld [vmem:[%s3899_s1 + $0xa0] sm:$0xff]  ;;  %v777_v29 = vld [vmem:[%s3899_s1 + $0x98] sm:$0xff]  ;;  %v819_v33 = vrot.slane %v3291_v15, 2 }
  0x84   : > { %2218 = vmatprep.subr.mxu1 %v786_v52  ;;  %945 = vmatprep.mubr.f32.mxu0 %v3135_v53  ;;  %v764_v52 = vld [vmem:[%s3899_s1 + $0x30] sm:$0xff]  ;;  %v761_v36 = vld [vmem:[%s3899_s1 + $0x18] sm:$0xff] }
  0x85   : > { %2474 = vmatprep.mubr.f32.mxu1 %v3140_v55  ;;  %2219 = vmatpush3.msra.mxu1 %v770_v56  ;;  %v665_v56 = vrot.slane %v3125_v50, 1 }
  0x86   : > { %946 = vmatmul.mubr.f32.gmra.mxu0 %v3054_v21  ;;  %2475 = vmatmul.mubr.f32.gmra.mxu1 %v3147_v58 }
  0x87   : > { %2220 = vmatprep.subr.mxu1 %v785_v61  ;;  %2496 = vmatprep.subr.mxu0 %v803_v62  ;;  %v738_v61 = vrot.slane %v3242_v45, 2  ;;  %v3289_v14 = vsel %vm644_vm0, %v665_v56, %v666_v57  ;;  %v670_v56 = vrot.slane %v3163_v1, 1 }
  0x88   : > { %2221 = vmatpush3.msra.mxu1 %v769_v0  ;;  %2497 = vmatpush3.msra.mxu0 %v803_v62  ;;  %v779_v62 = vld [vmem:[%s3899_s1 + $0xa8] sm:$0xff]  ;;  %v740_v0 = vrot.slane %v3252_v48, 2 }
  0x89   : > { %2222 = vmatprep.subr.mxu1 %v784_v5  ;;  %950 = vmatprep.mubr.f32.mxu0 %v3173_v6  ;;  %v763_v5 = vld [vmem:[%s3899_s1 + $0x28] sm:$0xff] }
  0x8a   : > { %2477 = vmatprep.mubr.f32.mxu1 %v3178_v8  ;;  %2223 = vmatpush3.msra.mxu1 %v768_v9  ;;  %v3279_v9 = vld [vmem:[#allocation2 + $0xc0] sm:$0xff] }
  0x8b   : > { %951 = vmatmul.mubr.f32.gmra.mxu0 %v3056_v22  ;;  %2478 = vmatmul.mubr.f32.gmra.mxu1 %v3186_v13 }
  0x8c   : > { %2224 = vmatprep.subr.mxu1 %v783_v16  ;;  %2498 = vmatprep.subr.mxu0 %v802_v17  ;;  %v3294_v16 = vsel %vm701_vm1, %v737_v60, %v738_v61  ;;  %v671_v60 = vrot.slane %v3165_v2, 1 }
  0x8d   : > { %2225 = vmatpush3.msra.mxu1 %v767_v19  ;;  %2499 = vmatpush3.msra.mxu0 %v802_v17  ;;  %v762_v17 = vld [vmem:[%s3899_s1 + $0x20] sm:$0xff]  ;;  %v3301_v19 = vsel %vm701_vm1, %v738_v61, %v740_v0  ;;  %v775_v0 = vld [vmem:[%s3899_s1 + $0x88] sm:$0xff] }
  0x8e   : > { %2226 = vmatprep.subr.mxu1 %v782_v24  ;;  %955 = vmatprep.mubr.f32.mxu0 %v3212_v26  ;;  %v816_v24 = vrot.slane %v3279_v9, 2 }
  0x8f   : > { %2480 = vmatprep.mubr.f32.mxu1 %v3217_v27  ;;  %2227 = vmatpush3.msra.mxu1 %v766_v28  ;;  %v817_v28 = vrot.slane %v3281_v10, 2 }
  0x90   : > { %956 = vmatmul.mubr.f32.gmra.mxu0 %v3086_v34  ;;  %2481 = vmatmul.mubr.f32.gmra.mxu1 %v3224_v30 }
  0x91   : > { %2228 = vmatprep.subr.mxu1 %v781_v40  ;;  %2500 = vmatprep.subr.mxu0 %v801_v38  ;;  %v3317_v40 = vld [vmem:[#allocation2] sm:$0xff]  ;;  %v3338_v61 = vsel %vm701_vm1, %v817_v28, %v819_v33 }
  0x92   : > { %2229 = vmatpush3.msra.mxu1 %v765_v42  ;;  %2501 = vmatpush3.msra.mxu0 %v801_v38  ;;  %v3319_v38 = vld [vmem:[#allocation2 + $0x8] sm:$0xff]  ;;  %v3327_v42 = vsel %vm644_vm0, %v666_v57, %v668_v18  ;;  %v645_v57 = vrot.slane %v3317_v40, 1  ;;  %v774_v18 = vld [vmem:[%s3899_s1 + $0x80] sm:$0xff] }
  0x93   : > { %2230 = vmatprep.subr.mxu1 %v780_v46  ;;  %960 = vmatprep.mubr.f32.mxu0 %v3250_v47  ;;  %v3330_v46 = vsel %vm701_vm1, %v816_v24, %v817_v28  ;;  %v3362_v24 = vsel %vm644_vm0, %v670_v56, %v671_v60  ;;  %v796_v56 = vld [vmem:[%s3899_s1 + $0x130] sm:$0xff] }
  0x94   : > { %2483 = vmatprep.mubr.f32.mxu1 %v3255_v49  ;;  %2231 = vmatpush3.msra.mxu1 %v764_v52  ;;  %v760_v52 = vld [vmem:[%s3899_s1 + $0x10] sm:$0xff] }
  0x95   : > { %961 = vmatmul.mubr.f32.gmra.mxu0 %v3088_v35  ;;  %2484 = vmatmul.mubr.f32.gmra.mxu1 %v3263_v59 }
  0x96   : > { %2232 = vmatprep.subr.mxu1 %v779_v62  ;;  %2502 = vmatprep.subr.mxu0 %v800_v63  ;;  %v646_v62 = vrot.slane %v3319_v38, 1 }
  0x97   : > { %2233 = vmatpush3.msra.mxu1 %v763_v5  ;;  %2503 = vmatpush3.msra.mxu0 %v800_v63  ;;  %v3342_v63 = vld [vmem:[#allocation2 + $0x10] sm:$0x3]  ;;  %v798_v5 = vld [vmem:[%s3899_s1 + $0x140] sm:$0xff] }
  0x98   : > { %2234 = vmatprep.subr.mxu1 %v778_v11  ;;  %965 = vmatprep.mubr.f32.mxu0 %v3289_v14  ;;  %v759_v11 = vld [vmem:[%s3899_s1 + $0x8] sm:$0xff]  ;;  %v648_v28 = vrot.slane %v3342_v63, 1 }
  0x99   : > { %2486 = vmatprep.mubr.f32.mxu1 %v3294_v16  ;;  %2235 = vmatpush3.msra.mxu1 %v762_v17  ;;  %v673_v17 = vrot.slane %v3175_v7, 1  ;;  %v647_v7 = vsel %vm644_vm0, %v645_v57, %v646_v62 }
  0x9a   : > { %966 = vmatmul.mubr.f32.gmra.mxu0 %v3125_v50  ;;  %2487 = vmatmul.mubr.f32.gmra.mxu1 %v3301_v19 }
  0x9b   : > { %2236 = vmatprep.subr.mxu1 %v777_v29  ;;  %2504 = vmatprep.subr.mxu0 %v799_v54  ;;  %v758_v29 = vld [vmem:[%s3899_s1] sm:$0xff]  ;;  %v3374_v33 = vsel %vm644_vm0, %v671_v60, %v673_v17  ;;  %v1515_v60 = vld [vmem:[%s3899_s1 + $0x478] sm:$0xff] }
  0x9c   : > { %2237 = vmatpush3.msra.mxu1 %v761_v36  ;;  %2505 = vmatpush3.msra.mxu0 %v799_v54  ;;  %v797_v54 = vld [vmem:[%s3899_s1 + $0x138] sm:$0xff]  ;;  %v675_v36 = vrot.slane %v3202_v20, 1  ;;  %v794_v17 = vld [vmem:[%s3899_s1 + $0x120] sm:$0xff] }
  0x9d   : > { %2238 = vmatprep.subr.mxu1 %v776_v41  ;;  %970 = vmatprep.mubr.f32.mxu0 %v3327_v42  ;;  %v676_v41 = vrot.slane %v3204_v23, 1 }
  0x9e   : > { %2489 = vmatprep.mubr.f32.mxu1 %v3330_v46  ;;  %2239 = vmatpush3.msra.mxu1 %v760_v52  ;;  %v649_v52 = vsel %vm644_vm0, %v646_v62, %v648_v28  ;;  %v678_v62 = vrot.slane %v3214_v32, 1  ;;  %v680_v32 = vrot.slane %v3240_v44, 1  ;;  %v683_v28 = vrot.slane %v3252_v48, 1 }
  0x9f   : > { %971 = vmatmul.mubr.f32.gmra.mxu0 %v3127_v51  ;;  %2490 = vmatmul.mubr.f32.gmra.mxu1 %v3338_v61  ;;  %v3389_v57 = vsel %vm644_vm0, %v675_v36, %v676_v41  ;;  %v809_v48 = vrot.slane %v3279_v9, 1 }
  0xa0   : > { %2240 = vmatprep.subr.mxu1 %v775_v0  ;;  %2506 = vmatprep.subr.mxu0 %v798_v5  ;;  %v795_v0 = vld [vmem:[%s3899_s1 + $0x128] sm:$0xff] }
  0xa1   : > { %2241 = vmatpush3.msra.mxu1 %v759_v11  ;;  %2507 = vmatpush3.msra.mxu0 %v798_v5  ;;  %v3400_v5 = vsel %vm644_vm0, %v676_v41, %v678_v62  ;;  %v681_v11 = vrot.slane %v3242_v45, 1  ;;  %v812_v41 = vrot.slane %v3291_v15, 1  ;;  %v703_v62 = vrot.slane %v3319_v38, 2 }
  0xa2   : > { %2242 = vmatprep.subr.mxu1 %v774_v18  ;;  %975 = vmatprep.mubr.f32.mxu0 %v3362_v24  ;;  %v1514_v18 = vld [vmem:[%s3899_s1 + $0x470] sm:$0xff] }
  0xa3   : > { %2243 = vmatpush3.msra.mxu1 %v758_v29  ;;  %1225 = vmatprep.mubr.f32.mxu1 %v647_v7  ;;  %v793_v29 = vld [vmem:[%s3899_s1 + $0x118] sm:$0xff]  ;;  %v810_v7 = vrot.slane %v3281_v10, 1 }
  0xa4   : > { %976 = vmatmul.mubr.f32.gmra.mxu0 %v3163_v1  ;;  %1226 = vmatmul.mubr.f32.vlgmr.msra.gmra.mxu1 %v3317_v40 }
  0xa5   : > { %2508 = vmatprep.subr.mxu0 %v797_v54  ;;  %980 = vmatprep.mubr.f32.mxu0 %v3374_v33  ;;  %v3444_v36 = vsel %vm644_vm0, %v809_v48, %v810_v7  ;;  %v3458_v15 = vsel %vm644_vm0, %v810_v7, %v812_v41  ;;  %v1497_v48 = vld [vmem:[%s3899_s1 + $0x3e8] sm:$0xff]  ;;  %v1494_v41 = vld [vmem:[%s3899_s1 + $0x3d0] sm:$0xff] }
  0xa6   : > { %2509 = vmatpush3.msra.mxu0 %v797_v54  ;;  %1230 = vmatprep.mubr.f32.mxu1 %v649_v52  ;;  %v792_v54 = vld [vmem:[%s3899_s1 + $0x110] sm:$0xff]  ;;  %v791_v52 = vld [vmem:[%s3899_s1 + $0x108] sm:$0xff] }
  0xa7   : > { %2510 = vmatprep.subr.mxu0 %v796_v56  ;;  %2548 = vmatprep.subr.mxu1 %v1515_v60  ;;  %v1481_v7 = vld [vmem:[%s3899_s1 + $0x368] sm:$0xff] }
  0xa8   : > { %981 = vmatmul.mubr.f32.gmra.mxu0 %v3165_v2  ;;  %1231 = vmatmul.mubr.f32.gmra.mxu1 %v3319_v38  ;;  %v1499_v38 = vld [vmem:[%s3899_s1 + $0x3f8] sm:$0xff] }
  0xa9   : > { %2511 = vmatpush3.msra.mxu0 %v796_v56  ;;  %985 = vmatprep.mubr.f32.mxu0 %v3389_v57  ;;  %v1511_v56 = vld [vmem:[%s3899_s1 + $0x458] sm:$0xff] }
  0xaa   : > { %1235 = vmatprep.mubr.f32.mxu1 %v3062_v31  ;;  %2512 = vmatprep.subr.mxu0 %v795_v0  ;;  %v3415_v31 = vsel %vm644_vm0, %v680_v32, %v681_v11  ;;  %v1510_v32 = vld [vmem:[%s3899_s1 + $0x450] sm:$0xff] }
  0xab   : > { %2513 = vmatpush3.msra.mxu0 %v795_v0  ;;  %2549 = vmatpush3.msra.mxu1 %v1515_v60  ;;  %v702_v60 = vrot.slane %v3317_v40, 2  ;;  %v790_v0 = vld [vmem:[%s3899_s1 + $0x100] sm:$0xff] }
  0xac   : > { %986 = vmatmul.mubr.f32.gmra.mxu0 %v3202_v20  ;;  %1236 = vmatmul.mubr.f32.gmra.mxu1 %v3019_v3  ;;  %v1513_v3 = vld [vmem:[%s3899_s1 + $0x468] sm:$0xff] }
  0xad   : > { %990 = vmatprep.mubr.f32.mxu0 %v3400_v5  ;;  %1240 = vmatprep.mubr.f32.mxu1 %v3096_v37  ;;  %v3429_v37 = vsel %vm644_vm0, %v681_v11, %v683_v28  ;;  %v705_v11 = vrot.slane %v3342_v63, 2  ;;  %v704_v40 = vsel %vm701_vm1, %v702_v60, %v703_v62  ;;  %v1498_v28 = vld [vmem:[%s3899_s1 + $0x3f0] sm:$0xff]  ;;  %v1477_v60 = vld [vmem:[%s3899_s1 + $0x348] sm:$0xff] }
  0xae   : > { %2514 = vmatprep.subr.mxu0 %v794_v17  ;;  %2550 = vmatprep.subr.mxu1 %v1514_v18 }
  0xaf   : > { %2515 = vmatpush3.msra.mxu0 %v794_v17  ;;  %2551 = vmatpush3.msra.mxu1 %v1514_v18  ;;  %v1509_v17 = vld [vmem:[%s3899_s1 + $0x448] sm:$0xff]  ;;  %v706_v63 = vsel %vm701_vm1, %v703_v62, %v705_v11  ;;  %v1483_v18 = vld [vmem:[%s3899_s1 + $0x378] sm:$0xff]  ;;  %v1492_v62 = vld [vmem:[%s3899_s1 + $0x3c0] sm:$0xff] }
  0xb0   : > { %991 = vmatmul.mubr.f32.gmra.mxu0 %v3204_v23  ;;  %1241 = vmatmul.mubr.f32.gmra.mxu1 %v3021_v4  ;;  %v1512_v4 = vld [vmem:[%s3899_s1 + $0x460] sm:$0xff]  ;;  %v1475_v11 = vld [vmem:[%s3899_s1 + $0x338] sm:$0xff] }
  0xb1   : > { %995 = vmatprep.mubr.f32.mxu0 %v3415_v31  ;;  %1245 = vmatprep.mubr.f32.mxu1 %v3135_v53 }
  0xb2   : > { %2516 = vmatprep.subr.mxu0 %v793_v29  ;;  %2552 = vmatprep.subr.mxu1 %v1513_v3 }
  0xb3   : > { %2517 = vmatpush3.msra.mxu0 %v793_v29  ;;  %2553 = vmatpush3.msra.mxu1 %v1513_v3  ;;  %v1482_v29 = vld [vmem:[%s3899_s1 + $0x370] sm:$0xff]  ;;  %v1508_v3 = vld [vmem:[%s3899_s1 + $0x440] sm:$0xff] }
  0xb4   : > { %996 = vmatmul.mubr.f32.gmra.mxu0 %v3240_v44  ;;  %1246 = vmatmul.mubr.f32.gmra.mxu1 %v3054_v21 }
  0xb5   : > { %1000 = vmatprep.mubr.f32.mxu0 %v3429_v37  ;;  %1250 = vmatprep.mubr.f32.mxu1 %v3173_v6 }
  0xb6   : > { %2518 = vmatprep.subr.mxu0 %v792_v54  ;;  %2554 = vmatprep.subr.mxu1 %v1512_v4 }
  0xb7   : > { %2519 = vmatpush3.msra.mxu0 %v792_v54  ;;  %2555 = vmatpush3.msra.mxu1 %v1512_v4  ;;  %v1496_v54 = vld [vmem:[%s3899_s1 + $0x3e0] sm:$0xff]  ;;  %v1495_v4 = vld [vmem:[%s3899_s1 + $0x3d8] sm:$0xff] }
  0xb8   : > { %1001 = vmatmul.mubr.f32.gmra.mxu0 %v3242_v45  ;;  %1251 = vmatmul.mubr.f32.gmra.mxu1 %v3056_v22 }
  0xb9   : > { %1005 = vmatprep.mubr.f32.mxu0 %v3444_v36  ;;  %1255 = vmatprep.mubr.f32.mxu1 %v3212_v26 }
  0xba   : > { %2520 = vmatprep.subr.mxu0 %v791_v52  ;;  %2556 = vmatprep.subr.mxu1 %v1511_v56 }
  0xbb   : > { %2521 = vmatpush3.msra.mxu0 %v791_v52  ;;  %2557 = vmatpush3.msra.mxu1 %v1511_v56  ;;  %v1478_v52 = vld [vmem:[%s3899_s1 + $0x350] sm:$0xff]  ;;  %v1493_v56 = vld [vmem:[%s3899_s1 + $0x3c8] sm:$0xff] }
  0xbc   : > { %1006 = vmatmul.mubr.f32.gmra.mxu0 %v3279_v9  ;;  %1256 = vmatmul.mubr.f32.gmra.mxu1 %v3086_v34 }
  0xbd   : > { %1010 = vmatprep.mubr.f32.mxu0 %v3458_v15  ;;  %1260 = vmatprep.mubr.f32.mxu1 %v3250_v47 }
  0xbe   : > { %2522 = vmatprep.subr.mxu0 %v790_v0  ;;  %2558 = vmatprep.subr.mxu1 %v1510_v32 }
  0xbf   : > { %2523 = vmatpush3.msra.mxu0 %v790_v0  ;;  %2559 = vmatpush3.msra.mxu1 %v1510_v32  ;;  %v1476_v0 = vld [vmem:[%s3899_s1 + $0x340] sm:$0xff]  ;;  %v1491_v32 = vld [vmem:[%s3899_s1 + $0x3b8] sm:$0xff] }
  0xc0   : > { %1011 = vmatmul.mubr.f32.gmra.mxu0 %v3281_v10  ;;  %1261 = vmatmul.mubr.f32.gmra.mxu1 %v3088_v35 }
  0xc1   : > { %1265 = vmatprep.mubr.f32.mxu1 %v3289_v14  ;;  %2524 = vmatprep.mubr.f32.mxu0 %v704_v40  ;;  %v1507_v40 = vld [vmem:[%s3899_s1 + $0x438] sm:$0xff] }
  0xc2   : > { %2324 = vmatprep.subr.mxu0 %v1499_v38  ;;  %2560 = vmatprep.subr.mxu1 %v1509_v17  ;;  %v1490_v38 = vld [vmem:[%s3899_s1 + $0x3b0] sm:$0xff] }
  0xc3   : > { %2561 = vmatpush3.msra.mxu1 %v1509_v17  ;;  %v1474_v17 = vld [vmem:[%s3899_s1 + $0x330] sm:$0xff] }
  0xc4   : > { %1266 = vmatmul.mubr.f32.gmra.mxu1 %v3125_v50  ;;  %2525 = vmatmul.mubr.f32.vlgmr.msra.gmra.mxu0 %v706_v63  ;;  %v1489_v63 = vld [vmem:[%s3899_s1 + $0x3a8] sm:$0xff] }
  0xc5   : > { %2325 = vmatpush3.msra.mxu0 %v1483_v18  ;;  %1270 = vmatprep.mubr.f32.mxu1 %v3327_v42  ;;  %v1506_v18 = vld [vmem:[%s3899_s1 + $0x430] sm:$0xff] }
  0xc6   : > { %2326 = vmatprep.subr.mxu0 %v1498_v28  ;;  %2527 = vmatprep.mubr.f32.mxu0 %v3067_v25  ;;  %v1480_v25 = vld [vmem:[%s3899_s1 + $0x360] sm:$0xff]  ;;  %v1473_v28 = vld [vmem:[%s3899_s1 + $0x328] sm:$0xff] }
  0xc7   : > { %2327 = vmatpush3.msra.mxu0 %v1482_v29  ;;  %2562 = vmatprep.subr.mxu1 %v1508_v3  ;;  %v1488_v29 = vld [vmem:[%s3899_s1 + $0x3a0] sm:$0xff] }
  0xc8   : > { %1271 = vmatmul.mubr.f32.gmra.mxu1 %v3127_v51  ;;  %2528 = vmatmul.mubr.f32.gmra.mxu0 %v3070_v12  ;;  %v1479_v12 = vld [vmem:[%s3899_s1 + $0x358] sm:$0xff] }
  0xc9   : > { %2328 = vmatprep.subr.mxu0 %v1497_v48  ;;  %1275 = vmatprep.mubr.f32.mxu1 %v3362_v24  ;;  %v1472_v48 = vld [vmem:[%s3899_s1 + $0x320] sm:$0xff] }
  0xca   : > { %2329 = vmatpush3.msra.mxu0 %v1481_v7  ;;  %2530 = vmatprep.mubr.f32.mxu0 %v3101_v39  ;;  %v1487_v7 = vld [vmem:[%s3899_s1 + $0x398] sm:$0xff] }
  0xcb   : > { %2330 = vmatprep.subr.mxu0 %v1496_v54  ;;  %2563 = vmatpush3.msra.mxu1 %v1508_v3  ;;  %v1505_v3 = vld [vmem:[%s3899_s1 + $0x428] sm:$0xff]  ;;  %v1504_v54 = vld [vmem:[%s3899_s1 + $0x420] sm:$0xff] }
  0xcc   : > { %2331 = vmatpush3.msra.mxu0 %v1480_v25  ;;  %1276 = vmatmul.mubr.f32.gmra.mxu1 %v3163_v1  ;;  %v1471_v25 = vld [vmem:[%s3899_s1 + $0x318] sm:$0xff] }
  0xcd   : > { %2531 = vmatmul.mubr.f32.gmra.mxu0 %v3109_v43  ;;  %2332 = vmatprep.subr.mxu0 %v1495_v4  ;;  %v1486_v4 = vld [vmem:[%s3899_s1 + $0x390] sm:$0xff] }
  0xce   : > { %2333 = vmatpush3.msra.mxu0 %v1479_v12  ;;  %1280 = vmatprep.mubr.f32.mxu1 %v3374_v33  ;;  %v1503_v12 = vld [vmem:[%s3899_s1 + $0x418] sm:$0xff] }
  0xcf   : > { %2334 = vmatprep.subr.mxu0 %v1494_v41  ;;  %2533 = vmatprep.mubr.f32.mxu0 %v3140_v55  ;;  %v1470_v41 = vld [vmem:[%s3899_s1 + $0x310] sm:$0xff] }
  0xd0   : > { %2335 = vmatpush3.msra.mxu0 %v1478_v52  ;;  %1281 = vmatmul.mubr.f32.gmra.mxu1 %v3165_v2  ;;  %v1485_v52 = vld [vmem:[%s3899_s1 + $0x388] sm:$0xff] }
  0xd1   : > { %2534 = vmatmul.mubr.f32.gmra.mxu0 %v3147_v58  ;;  %2336 = vmatprep.subr.mxu0 %v1493_v56  ;;  %v1502_v56 = vld [vmem:[%s3899_s1 + $0x410] sm:$0xff] }
  0xd2   : > { %2337 = vmatpush3.msra.mxu0 %v1477_v60  ;;  %1285 = vmatprep.mubr.f32.mxu1 %v3389_v57  ;;  %v1469_v60 = vld [vmem:[%s3899_s1 + $0x308] sm:$0xff] }
  0xd3   : > { %2338 = vmatprep.subr.mxu0 %v1492_v62  ;;  %2536 = vmatprep.mubr.f32.mxu0 %v3178_v8  ;;  %v1484_v62 = vld [vmem:[%s3899_s1 + $0x380] sm:$0xff] }
  0xd4   : > { %2339 = vmatpush3.msra.mxu0 %v1476_v0  ;;  %1286 = vmatmul.mubr.f32.gmra.mxu1 %v3202_v20  ;;  %v1501_v0 = vld [vmem:[%s3899_s1 + $0x408] sm:$0xff] }
  0xd5   : > { %2537 = vmatmul.mubr.f32.gmra.mxu0 %v3186_v13  ;;  %2340 = vmatprep.subr.mxu0 %v1491_v32  ;;  %v1468_v32 = vld [vmem:[%s3899_s1 + $0x300] sm:$0xff] }
  0xd6   : > { %2341 = vmatpush3.msra.mxu0 %v1475_v11  ;;  %2564 = vmatprep.subr.mxu1 %v1507_v40  ;;  %v1500_v11 = vld [vmem:[%s3899_s1 + $0x400] sm:$0xff] }
  0xd7   : > { %2342 = vmatprep.subr.mxu0 %v1490_v38  ;;  %1290 = vmatprep.mubr.f32.mxu1 %v3400_v5 }
  0xd8   : > { %2539 = vmatprep.mubr.f32.mxu0 %v3217_v27  ;;  %2343 = vmatpush3.msra.mxu0 %v1474_v17 }
  0xd9   : > { %2565 = vmatpush3.msra.mxu1 %v1507_v40  ;;  %2540 = vmatmul.mubr.f32.gmra.mxu0 %v3224_v30 }
  0xda   : > { %1291 = vmatmul.mubr.f32.gmra.mxu1 %v3204_v23  ;;  %2344 = vmatprep.subr.mxu0 %v1489_v63 }
  0xdb   : > { %2566 = vmatprep.subr.mxu1 %v1506_v18  ;;  %2345 = vmatpush3.msra.mxu0 %v1473_v28 }
  0xdc   : > { %2567 = vmatpush3.msra.mxu1 %v1506_v18  ;;  %2346 = vmatprep.subr.mxu0 %v1488_v29 }
  0xdd   : > { %2568 = vmatprep.subr.mxu1 %v1505_v3  ;;  %1295 = vmatprep.mubr.f32.mxu1 %v3415_v31 }
  0xde   : > { %2542 = vmatprep.mubr.f32.mxu0 %v3255_v49  ;;  %2347 = vmatpush3.msra.mxu0 %v1472_v48 }
  0xdf   : > { %2569 = vmatpush3.msra.mxu1 %v1505_v3  ;;  %2543 = vmatmul.mubr.f32.gmra.mxu0 %v3263_v59 }
  0xe0   : > { %1296 = vmatmul.mubr.f32.gmra.mxu1 %v3240_v44  ;;  %2348 = vmatprep.subr.mxu0 %v1487_v7 }
  0xe1   : > { %2570 = vmatprep.subr.mxu1 %v1504_v54  ;;  %2349 = vmatpush3.msra.mxu0 %v1471_v25 }
  0xe2   : > { %2571 = vmatpush3.msra.mxu1 %v1504_v54  ;;  %2350 = vmatprep.subr.mxu0 %v1486_v4 }
  0xe3   : > { %2572 = vmatprep.subr.mxu1 %v1503_v12  ;;  %1300 = vmatprep.mubr.f32.mxu1 %v3429_v37 }
  0xe4   : > { %2545 = vmatprep.mubr.f32.mxu0 %v3294_v16  ;;  %2351 = vmatpush3.msra.mxu0 %v1470_v41 }
  0xe5   : > { %2573 = vmatpush3.msra.mxu1 %v1503_v12  ;;  %2546 = vmatmul.mubr.f32.gmra.mxu0 %v3301_v19 }
  0xe6   : > { %1301 = vmatmul.mubr.f32.gmra.mxu1 %v3242_v45  ;;  %2352 = vmatprep.subr.mxu0 %v1485_v52 }
  0xe7   : > { %2574 = vmatprep.subr.mxu1 %v1502_v56  ;;  %2353 = vmatpush3.msra.mxu0 %v1469_v60 }
  0xe8   : > { %2575 = vmatpush3.msra.mxu1 %v1502_v56  ;;  %2354 = vmatprep.subr.mxu0 %v1484_v62 }
  0xe9   : > { %2576 = vmatprep.subr.mxu1 %v1501_v0  ;;  %2355 = vmatpush3.msra.mxu0 %v1468_v32 }
  0xea   : > { %1580 = vmatprep.mubr.f32.mxu0 %v3135_v53  ;;  %2577 = vmatpush3.msra.mxu1 %v1501_v0 }
  0xeb   : > { %1581 = vmatmul.mubr.f32.vlgmr.msra.gmra.mxu0 %v3054_v21  ;;  %2578 = vmatprep.subr.mxu1 %v1500_v11  ;;  %v617_v21 = vld [vmem:[#allocation2 + $0xd8] sm:$0xff] }
  0xec   : > { %2579 = vmatpush3.msra.mxu1 %v1500_v11  ;;  %2580 = vmatprep.mubr.f32.mxu1 %v3101_v39  ;;  %v619_v39 = vld [vmem:[#allocation2 + $0xe8] sm:$0x3]  ;;  %v1454_v53 = vrot.slane %v617_v21, 1 }
  0xed   : > { %2581 = vmatmul.mubr.f32.vlgmr.msra.gmra.mxu1 %v3109_v43  ;;  %1585 = vmatprep.mubr.f32.mxu0 %v3173_v6  ;;  %v1464_v43 = vrot.slane %v619_v39, 2 }
  0xee   : > { %2583 = vmatprep.mubr.f32.mxu1 %v3140_v55 }
  0xef   : > { %1586 = vmatmul.mubr.f32.gmra.mxu0 %v3056_v22  ;;  %v618_v22 = vld [vmem:[#allocation2 + $0xe0] sm:$0xff] }
  0xf0   : > { %1590 = vmatprep.mubr.f32.mxu0 %v3212_v26  ;;  %v1455_v55 = vrot.slane %v618_v22, 1 }
  0xf1   : > { %2584 = vmatmul.mubr.f32.gmra.mxu1 %v3147_v58 }
  0xf2   : > { %2586 = vmatprep.mubr.f32.mxu1 %v3178_v8  ;;  %v1456_v58 = vsel %vm644_vm0, %v1454_v53, %v1455_v55 }
  0xf3   : > { %1591 = vmatmul.mubr.f32.gmra.mxu0 %v3086_v34  ;;  %v1461_v34 = vrot.slane %v617_v21, 2 }
  0xf4   : > { %1595 = vmatprep.mubr.f32.mxu0 %v3250_v47 }
  0xf5   : > { %2587 = vmatmul.mubr.f32.gmra.mxu1 %v3186_v13 }
  0xf6   : > { %2589 = vmatprep.mubr.f32.mxu1 %v3217_v27 }
  0xf7   : > { %1596 = vmatmul.mubr.f32.gmra.mxu0 %v3088_v35  ;;  %v1462_v35 = vrot.slane %v618_v22, 2 }
  0xf8   : > { %1600 = vmatprep.mubr.f32.mxu0 %v3289_v14 }
  0xf9   : > { %2590 = vmatmul.mubr.f32.gmra.mxu1 %v3224_v30 }
  0xfa   : > { %2592 = vmatprep.mubr.f32.mxu1 %v3255_v49 }
  0xfb   : > { %1601 = vmatmul.mubr.f32.gmra.mxu0 %v3125_v50  ;;  %v1463_v50 = vsel %vm701_vm1, %v1461_v34, %v1462_v35 }
  0xfc   : > { %1605 = vmatprep.mubr.f32.mxu0 %v3327_v42 }
  0xfd   : > { %2593 = vmatmul.mubr.f32.gmra.mxu1 %v3263_v59 }
  0xfe   : > { %2595 = vmatprep.mubr.f32.mxu1 %v3294_v16 }
  0xff   : > { %1606 = vmatmul.mubr.f32.gmra.mxu0 %v3127_v51  ;;  %v1465_v51 = vsel %vm701_vm1, %v1462_v35, %v1464_v43 }
 0x100   : > { %1610 = vmatprep.mubr.f32.mxu0 %v3362_v24 }
 0x101   : > { %2596 = vmatmul.mubr.f32.gmra.mxu1 %v3301_v19 }
 0x102   : > { %2598 = vmatprep.mubr.f32.mxu1 %v3330_v46 }
 0x103   : > { %1611 = vmatmul.mubr.f32.gmra.mxu0 %v3163_v1  ;;  %v1457_v1 = vrot.slane %v619_v39, 1 }
 0x104   : > { %1615 = vmatprep.mubr.f32.mxu0 %v3374_v33 }
 0x105   : > { %2599 = vmatmul.mubr.f32.gmra.mxu1 %v3338_v61 }
 0x106   : > { %2601 = vmatprep.mubr.f32.mxu1 %v1463_v50 }
 0x107   : > { %1616 = vmatmul.mubr.f32.gmra.mxu0 %v3165_v2  ;;  %v1458_v2 = vsel %vm644_vm0, %v1455_v55, %v1457_v1 }
 0x108   : > { %1620 = vmatprep.mubr.f32.mxu0 %v3389_v57 }
 0x109   : > { %2602 = vmatmul.mubr.f32.gmra.mxu1 %v1465_v51 }
 0x10b   : > { %1621 = vmatmul.mubr.f32.gmra.mxu0 %v3202_v20 }
 0x10c   : > { %1625 = vmatprep.mubr.f32.mxu0 %v3400_v5 }
 0x10f   : > { %1626 = vmatmul.mubr.f32.gmra.mxu0 %v3204_v23 }
 0x110   : > { %1630 = vmatprep.mubr.f32.mxu0 %v3415_v31 }
 0x113   : > { %1631 = vmatmul.mubr.f32.gmra.mxu0 %v3240_v44 }
 0x114   : > { %1635 = vmatprep.mubr.f32.mxu0 %v3429_v37 }
 0x117   : > { %1636 = vmatmul.mubr.f32.gmra.mxu0 %v3242_v45 }
 0x118   : > { %1640 = vmatprep.mubr.f32.mxu0 %v3444_v36 }
 0x11b   : > { %1641 = vmatmul.mubr.f32.gmra.mxu0 %v3279_v9 }
 0x11c   : > { %1645 = vmatprep.mubr.f32.mxu0 %v3458_v15 }
 0x11f   : > { %1646 = vmatmul.mubr.f32.gmra.mxu0 %v3281_v10 }
 0x120   : > { %1650 = vmatprep.mubr.f32.mxu0 %v1456_v58 }
 0x123   : > { %1651 = vmatmul.mubr.f32.gmra.mxu0 %v617_v21 }
 0x124   : > { %1655 = vmatprep.mubr.f32.mxu0 %v1458_v2 }
 0x127   : > { %1656 = vmatmul.mubr.f32.gmra.mxu0 %v618_v22 }
 0x13c   : > { %v2132_v6 = vpop.f32.mrf.mxu0  ;;  %v2470_v8 = vpop.f32.mrf.mxu1 }
 0x13e   : > { %v2133_v13 = vpop.f32.mrf.mxu0  ;;  %v1082_v20 = vpop.f32.mrf.mxu1 }
 0x13f   : > { %v2134_v23 = vadd.f32 %v2133_v13, %v2132_v6 }
 0x141   : > { %v3679_v26 = vadd.f32 %v2134_v23, %v1082_v20  ;;  %v2135_v27 = vpop.f32.mrf.mxu0  ;;  %v2473_v30 = vpop.f32.mrf.mxu1 }
 0x143   : > { %v2136_v44 = vpop.f32.mrf.mxu0  ;;  %v1092_v45 = vpop.f32.mrf.mxu1 }
 0x144   : > { %v2137_v47 = vadd.f32 %v2136_v44, %v2135_v27 }
 0x146   : > { %v3681_v49 = vadd.f32 %v2470_v8, %v2137_v47  ;;  %v2138_v59 = vpop.f32.mrf.mxu0  ;;  %v2476_v9 = vpop.f32.mrf.mxu1 }
 0x148   : > { %v2139_v10 = vpop.f32.mrf.mxu0  ;;  %v1102_v14 = vpop.f32.mrf.mxu1 }
 0x149   : > { %v2140_v16 = vadd.f32 %v2139_v10, %v2138_v59 }
 0x14b   : > { %v3683_v19 = vadd.f32 %v2140_v16, %v1092_v45  ;;  %v2141_v42 = vpop.f32.mrf.mxu0  ;;  %v2479_v46 = vpop.f32.mrf.mxu1 }
 0x14d   : > { %v2142_v61 = vpop.f32.mrf.mxu0  ;;  %v1112_v24 = vpop.f32.mrf.mxu1 }
 0x14e   : > { %v2143_v33 = vadd.f32 %v2142_v61, %v2141_v42 }
 0x150   : > { %v3685_v57 = vadd.f32 %v2473_v30, %v2143_v33  ;;  %v2144_v5 = vpop.f32.mrf.mxu0  ;;  %v2482_v31 = vpop.f32.mrf.mxu1 }
 0x152   : > { %v2145_v37 = vpop.f32.mrf.mxu0  ;;  %v1122_v36 = vpop.f32.mrf.mxu1 }
 0x153   : > { %v2146_v15 = vadd.f32 %v2145_v37, %v2144_v5 }
 0x155   : > { %v3687_v40 = vadd.f32 %v2146_v15, %v1102_v14  ;;  %v2147_v38 = vpop.f32.mrf.mxu0  ;;  %v2485_v17 = vpop.f32.mrf.mxu1 }
 0x157   : > { %v2148_v63 = vpop.f32.mrf.mxu0  ;;  %v1132_v18 = vpop.f32.mrf.mxu1 }
 0x158   : > { %v2149_v28 = vadd.f32 %v2148_v63, %v2147_v38 }
 0x15a   : > { %v3689_v29 = vadd.f32 %v2476_v9, %v2149_v28  ;;  %v2150_v3 = vpop.f32.mrf.mxu0  ;;  %v2488_v48 = vpop.f32.mrf.mxu1 }
 0x15c   : > { %v2151_v7 = vpop.f32.mrf.mxu0  ;;  %v1142_v54 = vpop.f32.mrf.mxu1 }
 0x15d   : > { %v2152_v25 = vadd.f32 %v2151_v7, %v2150_v3 }
 0x15f   : > { %v3691_v4 = vadd.f32 %v2152_v25, %v1112_v24  ;;  %v2153_v12 = vpop.f32.mrf.mxu0  ;;  %v2491_v41 = vpop.f32.mrf.mxu1 }
 0x161   : > { %v2154_v52 = vpop.f32.mrf.mxu0  ;;  %v1152_v56 = vpop.f32.mrf.mxu1 }
 0x162   : > { %v2155_v60 = vadd.f32 %v2154_v52, %v2153_v12 }
 0x164   : > { %v3693_v62 = vadd.f32 %v2479_v46, %v2155_v60  ;;  %v2156_v0 = vpop.f32.mrf.mxu0  ;;  %v3695_v32 = vpop.f32.mrf.mxu1 }
 0x166   : > { %v2157_v11 = vpop.f32.mrf.mxu0  ;;  %v3697_v21 = vpop.f32.mrf.mxu1 }
 0x167   : > { %v2158_v22 = vadd.f32 %v2157_v11, %v2156_v0 }
 0x168   : > { %v2159_v34 = vpop.f32.mrf.mxu0  ;;  %v3699_v35 = vpop.f32.mrf.mxu1 }
 0x169   : > { %v3701_v39 = vadd.f32 %v2158_v22, %v1122_v36 }
 0x16a   : > { %v2160_v43 = vpop.f32.mrf.mxu0  ;;  %v3703_v50 = vpop.f32.mrf.mxu1 }
 0x16b   : > { %v2161_v51 = vadd.f32 %v2160_v43, %v2159_v34 }
 0x16c   : > { %v2162_v53 = vpop.f32.mrf.mxu0  ;;  %v3705_v55 = vpop.f32.mrf.mxu1 }
 0x16d   : > { %v3707_v58 = vadd.f32 %v2482_v31, %v2161_v51 }
 0x16e   : > { %v2163_v1 = vpop.f32.mrf.mxu0  ;;  %v3709_v2 = vpop.f32.mrf.mxu1 }
 0x16f   : > { %v2164_v6 = vadd.f32 %v2163_v1, %v2162_v53 }
 0x170   : > { %v2165_v8 = vpop.f32.mrf.mxu0  ;;  %v3711_v13 = vpop.f32.mrf.mxu1 }
 0x171   : > { %v3713_v20 = vadd.f32 %v2164_v6, %v1132_v18 }
 0x172   : > { %v2166_v23 = vpop.f32.mrf.mxu0  ;;  %v3715_v27 = vpop.f32.mrf.mxu1 }
 0x173   : > { %v2167_v30 = vadd.f32 %v2166_v23, %v2165_v8 }
 0x174   : > { %v2168_v44 = vpop.f32.mrf.mxu0  ;;  %v3717_v45 = vpop.f32.mrf.mxu1 }
 0x175   : > { %v3719_v47 = vadd.f32 %v2485_v17, %v2167_v30 }
 0x176   : > { %v2169_v59 = vpop.f32.mrf.mxu0  ;;  %v3721_v9 = vpop.f32.mrf.mxu1 }
 0x177   : > { %3905 = vst [vmem:[#allocation6_spill] sm:$0xff] %v3719_v47  ;;  %v2170_v10 = vadd.f32 %v2169_v59, %v2168_v44 }
 0x178   : > { %v2171_v14 = vpop.f32.mrf.mxu0  ;;  %v3723_v16 = vpop.f32.mrf.mxu1 }
 0x179   : > { %v3725_v42 = vadd.f32 %v2170_v10, %v1142_v54 }
 0x17a   : > { %v2172_v46 = vpop.f32.mrf.mxu0  ;;  %v3727_v61 = vpop.f32.mrf.mxu1 }
 0x17b   : > { %3906 = vst [vmem:[#allocation7_spill] sm:$0xff] %v3725_v42  ;;  %v2173_v24 = vadd.f32 %v2172_v46, %v2171_v14 }
 0x17c   : > { %v2174_v33 = vpop.f32.mrf.mxu0  ;;  %v3729_v5 = vpop.f32.mrf.mxu1 }
 0x17d   : > { %v1148_v31 = vadd.f32 %v2488_v48, %v2173_v24 }
 0x17e   : > { %v2175_v37 = vpop.f32.mrf.mxu0  ;;  %v3731_v36 = vpop.f32.mrf.mxu1 }
 0x17f   : > { %v2176_v15 = vadd.f32 %v2175_v37, %v2174_v33 }
 0x180   : > { %v2177_v38 = vpop.f32.mrf.mxu0  ;;  %v3733_v17 = vpop.f32.mrf.mxu1 }
 0x181   : > { %v3735_v63 = vadd.f32 %v2176_v15, %v1152_v56 }
 0x182   : > { %v2178_v18 = vpop.f32.mrf.mxu0  ;;  %v3737_v28 = vpop.f32.mrf.mxu1 }
 0x183   : > { %3907 = vst [vmem:[#allocation8_spill] sm:$0xff] %v3735_v63  ;;  %v2179_v3 = vadd.f32 %v2178_v18, %v2177_v38 }
 0x184   : > { %v3739_v7 = vpop.f32.mrf.mxu1  ;;  %v2526_v54 = vpop.f32.mrf.mxu0 }
 0x185   : > { %v1158_v25 = vadd.f32 %v2491_v41, %v2179_v3 }
 0x186   : > { %v3741_v12 = vpop.f32.mrf.mxu1  ;;  %v1372_v48 = vpop.f32.mrf.mxu0 }
 0x188   : > { %v3743_v52 = vpop.f32.mrf.mxu1  ;;  %v3745_v60 = vpop.f32.mrf.mxu0 }
 0x18a   : > { %v3747_v0 = vpop.f32.mrf.mxu1  ;;  %v1382_v11 = vpop.f32.mrf.mxu0 }
 0x18c   : > { %v3749_v56 = vpop.f32.mrf.mxu1 }
 0x18d   : > { %v3751_v22 = vpop.f32.mrf.mxu0 }
 0x18e   : > { %v3753_v34 = vpop.f32.mrf.mxu1 }
 0x18f   : > { %v3755_v43 = vpop.f32.mrf.mxu0 }
 0x190   : > { %v3757_v51 = vpop.f32.mrf.mxu1 }
 0x191   : > { %v3759_v41 = vpop.f32.mrf.mxu0 }
 0x192   : > { %v3761_v53 = vpop.f32.mrf.mxu1 }
 0x193   : > { %v3763_v1 = vpop.f32.mrf.mxu0 }
 0x194   : > { %v3765_v6 = vpop.f32.mrf.mxu1 }
 0x195   : > { %3908 = vst [vmem:[#allocation9_spill] sm:$0xff] %v3765_v6  ;;  %v3767_v8 = vpop.f32.mrf.mxu0 }
 0x196   : > { %v3769_v23 = vpop.f32.mrf.mxu1 }
 0x197   : > { %3909 = vst [vmem:[#allocation10_spill] sm:$0xff] %v3769_v23  ;;  %v3771_v30 = vpop.f32.mrf.mxu0  ;;  %v2246_v23 = vadd.f32 %v3697_v21, %v3695_v32  ;;  %v3797_v32 = vld [vmem:[%s3900_s2] ss:$0 sm:$0xff] }
 0x199   : > { %v3773_v44 = vpop.f32.mrf.mxu0 }
 0x19a   : > { %3910 = vst [vmem:[#allocation11_spill] sm:$0xff] %v3773_v44  ;;  %v2283_v59 = vpop.f32.mrf.mxu1 }
 0x19b   : > { %v3775_v10 = vpop.f32.mrf.mxu0 }
 0x19c   : > { %v2284_v14 = vpop.f32.mrf.mxu1 }
 0x19d   : > { %v2285_v46 = vadd.f32 %v2284_v14, %v2283_v59 }
 0x19f   : > { %v1293_v24 = vadd.f32 %v2285_v46, %v1148_v31  ;;  %v2544_v33 = vpop.f32.mrf.mxu0 }
 0x1a0   : > { %v3777_v37 = vpop.f32.mrf.mxu1 }
 0x1a1   : > { %3911 = vst [vmem:[#allocation12_spill] sm:$0xff] %v3777_v37  ;;  %v3779_v15 = vadd.f32 %v2544_v33, %v1293_v24  ;;  %v3781_v38 = vpop.f32.mrf.mxu0  ;;  %v2249_v33 = vadd.f32 %v3703_v50, %v3699_v35 }
 0x1a2   : > { %3913 = vst [vmem:[#allocation14_spill] sm:$0xff] %v3781_v38  ;;  %v3783_v18 = vpop.f32.mrf.mxu1 }
 0x1a3   : > { %3912 = vst [vmem:[#allocation13_spill] sm:$0xff] %v3779_v15  ;;  %3914 = vst [vmem:[#allocation15_spill] sm:$0xff] %v3783_v18  ;;  %v1228_v15 = vadd.f32 %v2246_v23, %v3679_v26  ;;  %v1233_v35 = vadd.f32 %v2249_v33, %v3681_v49 }
 0x1a5   : > { %v2547_v3 = vpop.f32.mrf.mxu0  ;;  %v1378_v23 = vadd.f32 %v2526_v54, %v1233_v35  ;;  %v2258_v54 = vadd.f32 %v3721_v9, %v3717_v45  ;;  %v2261_v45 = vadd.f32 %v3727_v61, %v3723_v16  ;;  %v2264_v16 = vadd.f32 %v3731_v36, %v3729_v5 }
 0x1a6   : > { %v2289_v63 = vpop.f32.mrf.mxu1  ;;  %v2267_v5 = vadd.f32 %v3737_v28, %v3733_v17  ;;  %v2270_v17 = vadd.f32 %v3741_v12, %v3739_v7  ;;  %v2273_v7 = vadd.f32 %v3747_v0, %v3743_v52  ;;  %v2276_v52 = vadd.f32 %v3753_v34, %v3749_v56 }
 0x1a7   : > { %v3785_v42 = vpop.f32.mrf.mxu0  ;;  %v2279_v56 = vadd.f32 %v3761_v53, %v3757_v51  ;;  %v3918_v53 = vld [vmem:[#allocation6_spill] sm:$0xff] }
 0x1a8   : > { %3915 = vst [vmem:[#allocation16_spill] sm:$0xff] %v3785_v42  ;;  %v2290_v44 = vpop.f32.mrf.mxu1  ;;  %v1373_v42 = vadd.f32 %v1372_v48, %v1228_v15  ;;  %v2255_v15 = vadd.f32 %v3715_v27, %v3711_v13 }
 0x1a9   : > { %v2291_v47 = vadd.f32 %v2290_v44, %v2289_v63  ;;  %v2252_v63 = vadd.f32 %v3709_v2, %v3705_v55 }
 0x1ab   : > { %v1303_v59 = vadd.f32 %v2291_v47, %v1158_v25  ;;  %v2356_v31 = vpop.f32.mrf.mxu0 }
 0x1ad   : > { %v3789_v14 = vadd.f32 %v2547_v3, %v1303_v59  ;;  %v2357_v46 = vpop.f32.mrf.mxu0  ;;  %v2582_v24 = vpop.f32.mrf.mxu1  ;;  %v1238_v3 = vadd.f32 %v2252_v63, %v3683_v19 }
 0x1ae   : > { %v2358_v18 = vadd.f32 %v2357_v46, %v2356_v31 }
 0x1af   : > { %v2359_v37 = vpop.f32.mrf.mxu0  ;;  %v1727_v38 = vpop.f32.mrf.mxu1  ;;  %v1383_v49 = vadd.f32 %v1382_v11, %v1238_v3 }
 0x1b0   : > { %v1728_v6 = vadd.f32 %v2358_v18, %v1727_v38 }
 0x1b1   : > { %v2360_v21 = vpop.f32.mrf.mxu0  ;;  %v2585_v47 = vpop.f32.mrf.mxu1 }
 0x1b2   : > { %v1806_v50 = vadd.f32 %v1728_v6, %v1373_v42  ;;  %v2361_v26 = vadd.f32 %v2360_v21, %v2359_v37  ;;  %v1243_v37 = vadd.f32 %v2255_v15, %v3685_v57  ;;  %v1248_v57 = vadd.f32 %v2258_v54, %v3687_v40 }
 0x1b3   : > { %v2362_v25 = vpop.f32.mrf.mxu0  ;;  %v1737_v18 = vpop.f32.mrf.mxu1  ;;  %v1253_v40 = vadd.f32 %v2261_v45, %v3689_v29  ;;  %v1258_v29 = vadd.f32 %v2264_v16, %v3691_v4  ;;  %v1263_v4 = vadd.f32 %v2267_v5, %v3693_v62  ;;  %v1268_v62 = vadd.f32 %v2270_v17, %v3701_v39 }
 0x1b4   : > { %v1829_v48 = vadd.f32 %v3797_v32, %v1806_v50  ;;  %v1733_v44 = vadd.f32 %v2582_v24, %v2361_v26  ;;  %v1388_v11 = vadd.f32 %v3745_v60, %v1243_v37  ;;  %v1393_v60 = vadd.f32 %v3755_v43, %v1248_v57 }
 0x1b5   : > { %v2363_v38 = vpop.f32.mrf.mxu0  ;;  %v2588_v27 = vpop.f32.mrf.mxu1  ;;  %v1398_v43 = vadd.f32 %v3751_v22, %v1253_v40  ;;  %v1403_v22 = vadd.f32 %v3763_v1, %v1258_v29  ;;  %v1408_v1 = vadd.f32 %v3759_v41, %v1263_v4  ;;  %v1413_v41 = vadd.f32 %v3771_v30, %v1268_v62 }
 0x1b6   : > { %1905 = vst [vmem:[%s2770_s15] sm:$0xff] %v1829_v48  ;;  %v1807_v59 = vadd.f32 %v1733_v44, %v1378_v23  ;;  %v2364_v55 = vadd.f32 %v2363_v38, %v2362_v25  ;;  %v1867_v31 = vmul.f32 %v1829_v48, %v1829_v48  ;;  %v1273_v39 = vadd.f32 %v2273_v7, %v3707_v58 }
 0x1b7   : > { %v2365_v2 = vpop.f32.mrf.mxu0  ;;  %v1747_v26 = vpop.f32.mrf.mxu1  ;;  %v1278_v58 = vadd.f32 %v2276_v52, %v3713_v20  ;;  %v1283_v20 = vadd.f32 %v2279_v56, %v3918_v53 }
 0x1b8   : > { %v1830_v42 = vadd.f32 %v3797_v32, %v1807_v59  ;;  %v1738_v6 = vadd.f32 %v2364_v55, %v1737_v18  ;;  %v1418_v30 = vadd.f32 %v3767_v8, %v1273_v39 }
 0x1b9   : > { %v2366_v13 = vpop.f32.mrf.mxu0  ;;  %v2591_v3 = vpop.f32.mrf.mxu1  ;;  %v1423_v8 = vadd.f32 %v3775_v10, %v1278_v58  ;;  %v3925_v58 = vld [vmem:[#allocation13_spill] sm:$0xff] }
 0x1ba   : > { %v1868_v46 = vmul.f32 %v1830_v42, %v1830_v42  ;;  %1906 = vst [vmem:[%s2770_s15 + $0x8] sm:$0xff] %v1830_v42  ;;  %v1808_v19 = vadd.f32 %v1738_v6, %v1383_v49  ;;  %v1845_v24 = vadd.f32 %v1830_v42, %v1829_v48  ;;  %v2367_v33 = vadd.f32 %v2366_v13, %v2365_v2 }
 0x1bb   : > { %v2368_v21 = vpop.f32.mrf.mxu0 }
 0x1bc   : > { %v1831_v63 = vadd.f32 %v3797_v32, %v1808_v19  ;;  %v1883_v35 = vadd.f32 %v1868_v46, %v1867_v31  ;;  %v1743_v50 = vadd.f32 %v2585_v47, %v2367_v33  ;;  %v1757_v31 = vpop.f32.mrf.mxu1 }
 0x1bd   : > { %v2369_v9 = vpop.f32.mrf.mxu0 }
 0x1be   : > { %v1846_v25 = vadd.f32 %v1845_v24, %v1831_v63  ;;  %v1869_v23 = vmul.f32 %v1831_v63, %v1831_v63  ;;  %1907 = vst [vmem:[%s2770_s15 + $0x10] sm:$0xff] %v1831_v63  ;;  %v1809_v48 = vadd.f32 %v1743_v50, %v1388_v11  ;;  %v2370_v44 = vadd.f32 %v2369_v9, %v2368_v21  ;;  %v2594_v63 = vpop.f32.mrf.mxu1 }
 0x1bf   : > { %v2371_v15 = vpop.f32.mrf.mxu0 }
 0x1c0   : > { %v1884_v38 = vadd.f32 %v1883_v35, %v1869_v23  ;;  %v1832_v18 = vadd.f32 %v3797_v32, %v1809_v48  ;;  %v1748_v47 = vadd.f32 %v2370_v44, %v1747_v26  ;;  %v1767_v48 = vpop.f32.mrf.mxu1 }
 0x1c1   : > { %v2372_v61 = vpop.f32.mrf.mxu0 }
 0x1c2   : > { %v1870_v59 = vmul.f32 %v1832_v18, %v1832_v18  ;;  %1908 = vst [vmem:[%s2770_s15 + $0x18] sm:$0xff] %v1832_v18  ;;  %v1810_v55 = vadd.f32 %v1748_v47, %v1393_v60  ;;  %v1847_v2 = vadd.f32 %v1846_v25, %v1832_v18  ;;  %v2373_v49 = vadd.f32 %v2372_v61, %v2371_v15  ;;  %v2597_v61 = vpop.f32.mrf.mxu1 }
 0x1c3   : > { %v2374_v42 = vpop.f32.mrf.mxu0 }
 0x1c4   : > { %v1833_v6 = vadd.f32 %v3797_v32, %v1810_v55  ;;  %v1885_v54 = vadd.f32 %v1884_v38, %v1870_v59  ;;  %v1753_v37 = vadd.f32 %v2588_v27, %v2373_v49 }
 0x1c5   : > { %v2375_v36 = vpop.f32.mrf.mxu0 }
 0x1c6   : > { %v1848_v13 = vadd.f32 %v1847_v2, %v1833_v6  ;;  %v1871_v46 = vmul.f32 %v1833_v6, %v1833_v6  ;;  %1909 = vst [vmem:[%s2770_s15 + $0x20] sm:$0xff] %v1833_v6  ;;  %v1811_v19 = vadd.f32 %v1753_v37, %v1398_v43  ;;  %v2376_v24 = vadd.f32 %v2375_v36, %v2374_v42 }
 0x1c7   : > { %v2377_v33 = vpop.f32.mrf.mxu0 }
 0x1c8   : > { %v1886_v21 = vadd.f32 %v1885_v54, %v1871_v46  ;;  %v1834_v11 = vadd.f32 %v3797_v32, %v1811_v19  ;;  %v1758_v27 = vadd.f32 %v2376_v24, %v1757_v31  ;;  %v1777_v54 = vpop.f32.mrf.mxu1  ;;  %v3916_v24 = vld [vmem:[#allocation9_spill] sm:$0xff] }
 0x1c9   : > { %v2378_v28 = vpop.f32.mrf.mxu0 }
 0x1ca   : > { %v1872_v35 = vmul.f32 %v1834_v11, %v1834_v11  ;;  %1910 = vst [vmem:[%s2770_s15 + $0x28] sm:$0xff] %v1834_v11  ;;  %v1812_v50 = vadd.f32 %v1758_v27, %v1403_v22  ;;  %v1849_v45 = vadd.f32 %v1848_v13, %v1834_v11  ;;  %v2379_v57 = vadd.f32 %v2378_v28, %v2377_v33  ;;  %v3917_v33 = vld [vmem:[#allocation10_spill] sm:$0xff] }
 0x1cb   : > { %v2380_v9 = vpop.f32.mrf.mxu0  ;;  %v2282_v51 = vadd.f32 %v3917_v33, %v3916_v24 }
 0x1cc   : > { %v1835_v26 = vadd.f32 %v3797_v32, %v1812_v50  ;;  %v1887_v25 = vadd.f32 %v1886_v21, %v1872_v35  ;;  %v1763_v23 = vadd.f32 %v2591_v3, %v2379_v57  ;;  %v2600_v21 = vpop.f32.mrf.mxu1  ;;  %v3920_v57 = vld [vmem:[#allocation7_spill] sm:$0xff] }
 0x1cd   : > { %v2381_v12 = vpop.f32.mrf.mxu0 }
 0x1ce   : > { %v1850_v44 = vadd.f32 %v1849_v45, %v1835_v26  ;;  %v1873_v15 = vmul.f32 %v1835_v26, %v1835_v26  ;;  %1911 = vst [vmem:[%s2770_s15 + $0x30] sm:$0xff] %v1835_v26  ;;  %v1813_v60 = vadd.f32 %v1763_v23, %v1408_v1  ;;  %v2382_v38 = vadd.f32 %v2381_v12, %v2380_v9  ;;  %v1787_v26 = vpop.f32.mrf.mxu1  ;;  %v3921_v12 = vld [vmem:[#allocation14_spill] sm:$0xff] }
 0x1cf   : > { %v2383_v18 = vpop.f32.mrf.mxu0  ;;  %v1288_v9 = vadd.f32 %v2282_v51, %v3920_v57 }
 0x1d0   : > { %v1888_v47 = vadd.f32 %v1887_v25, %v1873_v15  ;;  %v1836_v16 = vadd.f32 %v3797_v32, %v1813_v60  ;;  %v1768_v40 = vadd.f32 %v2382_v38, %v1767_v48  ;;  %v3922_v15 = vld [vmem:[#allocation12_spill] sm:$0xff]  ;;  %v3923_v60 = vld [vmem:[#allocation15_spill] sm:$0xff] }
 0x1d1   : > { %v2384_v0 = vpop.f32.mrf.mxu0  ;;  %v1433_v48 = vadd.f32 %v3921_v12, %v1288_v9  ;;  %v2288_v38 = vadd.f32 %v3923_v60, %v3922_v15 }
 0x1d2   : > { %v1874_v3 = vmul.f32 %v1836_v16, %v1836_v16  ;;  %1912 = vst [vmem:[%s2770_s15 + $0x38] sm:$0xff] %v1836_v16  ;;  %v1814_v59 = vadd.f32 %v1768_v40, %v1413_v41  ;;  %v1851_v55 = vadd.f32 %v1850_v44, %v1836_v16  ;;  %v2385_v2 = vadd.f32 %v2384_v0, %v2383_v18  ;;  %v2603_v40 = vpop.f32.mrf.mxu1 }
 0x1d3   : > { %v2386_v49 = vpop.f32.mrf.mxu0 }
 0x1d4   : > { %v1837_v42 = vadd.f32 %v3797_v32, %v1814_v59  ;;  %v1889_v43 = vadd.f32 %v1888_v47, %v1874_v3  ;;  %v1773_v6 = vadd.f32 %v2594_v63, %v2385_v2  ;;  %v3919_v63 = vld [vmem:[#allocation11_spill] sm:$0xff]  ;;  %v3924_v59 = vld [vmem:[#allocation8_spill] sm:$0xff] }
 0x1d5   : > { %v2387_v34 = vpop.f32.mrf.mxu0  ;;  %v1428_v10 = vadd.f32 %v3919_v63, %v1283_v20 }
 0x1d6   : > { %v1852_v37 = vadd.f32 %v1851_v55, %v1837_v42  ;;  %v1875_v5 = vmul.f32 %v1837_v42, %v1837_v42  ;;  %1913 = vst [vmem:[%s2770_s15 + $0x40] sm:$0xff] %v1837_v42  ;;  %v1815_v29 = vadd.f32 %v1773_v6, %v1418_v30  ;;  %v2388_v36 = vadd.f32 %v2387_v34, %v2386_v49 }
 0x1d7   : > { %v2389_v31 = vpop.f32.mrf.mxu0  ;;  %v1298_v55 = vadd.f32 %v2288_v38, %v3924_v59 }
 0x1d8   : > { %v1890_v13 = vadd.f32 %v1889_v43, %v1875_v5  ;;  %v1838_v46 = vadd.f32 %v3797_v32, %v1815_v29  ;;  %v1778_v19 = vadd.f32 %v2388_v36, %v1777_v54  ;;  %v1797_v43 = vpop.f32.mrf.mxu1  ;;  %v3926_v5 = vld [vmem:[#allocation16_spill] sm:$0xff] }
 0x1d9   : > { %v2390_v22 = vpop.f32.mrf.mxu0  ;;  %v1443_v29 = vadd.f32 %v3926_v5, %v1298_v55 }
 0x1da   : > { %v1876_v11 = vmul.f32 %v1838_v46, %v1838_v46  ;;  %1914 = vst [vmem:[%s2770_s15 + $0x48] sm:$0xff] %v1838_v46  ;;  %v1816_v27 = vadd.f32 %v1778_v19, %v1423_v8  ;;  %v1853_v17 = vadd.f32 %v1852_v37, %v1838_v46  ;;  %v2391_v4 = vadd.f32 %v2390_v22, %v2389_v31 }
 0x1db   : > { %v2392_v28 = vpop.f32.mrf.mxu0 }
 0x1dc   : > { %v1839_v35 = vadd.f32 %v3797_v32, %v1816_v27  ;;  %v1891_v50 = vadd.f32 %v1890_v13, %v1876_v11  ;;  %v1783_v45 = vadd.f32 %v2597_v61, %v2391_v4 }
 0x1dd   : > { %v2393_v1 = vpop.f32.mrf.mxu0 }
 0x1de   : > { %v1854_v25 = vadd.f32 %v1853_v17, %v1839_v35  ;;  %v1877_v23 = vmul.f32 %v1839_v35, %v1839_v35  ;;  %1915 = vst [vmem:[%s2770_s15 + $0x50] sm:$0xff] %v1839_v35  ;;  %v1817_v7 = vadd.f32 %v1783_v45, %v1428_v10  ;;  %v2394_v62 = vadd.f32 %v2393_v1, %v2392_v28 }
 0x1df   : > { %v2395_v44 = vpop.f32.mrf.mxu0 }
 0x1e0   : > { %v1892_v18 = vadd.f32 %v1891_v50, %v1877_v23  ;;  %v1840_v41 = vadd.f32 %v3797_v32, %v1817_v7  ;;  %v1788_v47 = vadd.f32 %v2394_v62, %v1787_v26 }
 0x1e1   : > { %v2396_v16 = vpop.f32.mrf.mxu0 }
 0x1e2   : > { %v1878_v52 = vmul.f32 %v1840_v41, %v1840_v41  ;;  %1916 = vst [vmem:[%s2770_s15 + $0x58] sm:$0xff] %v1840_v41  ;;  %v1818_v39 = vadd.f32 %v1788_v47, %v1433_v48  ;;  %v1855_v0 = vadd.f32 %v1854_v25, %v1840_v41  ;;  %v2397_v61 = vadd.f32 %v2396_v16, %v2395_v44 }
 0x1e3   : > { %v2398_v3 = vpop.f32.mrf.mxu0 }
 0x1e4   : > { %v1841_v2 = vadd.f32 %v3797_v32, %v1818_v39  ;;  %v1893_v49 = vadd.f32 %v1892_v18, %v1878_v52  ;;  %v1793_v30 = vadd.f32 %v2600_v21, %v2397_v61 }
 0x1e5   : > { %v2399_v42 = vpop.f32.mrf.mxu0 }
 0x1e6   : > { %v1856_v6 = vadd.f32 %v1855_v0, %v1841_v2  ;;  %v1879_v56 = vmul.f32 %v1841_v2, %v1841_v2  ;;  %1917 = vst [vmem:[%s2770_s15 + $0x60] sm:$0xff] %v1841_v2  ;;  %v1819_v34 = vadd.f32 %v1793_v30, %v3925_v58  ;;  %v2400_v54 = vadd.f32 %v2399_v42, %v2398_v3 }
 0x1e7   : > { %v2401_v37 = vpop.f32.mrf.mxu0 }
 0x1e8   : > { %v1894_v36 = vadd.f32 %v1893_v49, %v1879_v56  ;;  %v1842_v31 = vadd.f32 %v3797_v32, %v1819_v34  ;;  %v1798_v8 = vadd.f32 %v2400_v54, %v1797_v43 }
 0x1e9   : > { %v2402_v13 = vpop.f32.mrf.mxu0 }
 0x1ea   : > { %v1880_v46 = vmul.f32 %v1842_v31, %v1842_v31  ;;  %1918 = vst [vmem:[%s2770_s15 + $0x68] sm:$0xff] %v1842_v31  ;;  %v1820_v19 = vadd.f32 %v1798_v8, %v1443_v29  ;;  %v1857_v24 = vadd.f32 %v1856_v6, %v1842_v31  ;;  %v2403_v33 = vadd.f32 %v2402_v13, %v2401_v37 }
 0x1ec   : > { %v1843_v51 = vadd.f32 %v3797_v32, %v1820_v19  ;;  %v1895_v53 = vadd.f32 %v1894_v36, %v1880_v46  ;;  %v1803_v20 = vadd.f32 %v2603_v40, %v2403_v33 }
 0x1ee   : > { %v1858_v22 = vadd.f32 %v1857_v24, %v1843_v51  ;;  %v1881_v21 = vmul.f32 %v1843_v51, %v1843_v51  ;;  %1919 = vst [vmem:[%s2770_s15 + $0x70] sm:$0xff] %v1843_v51  ;;  %v1821_v11 = vadd.f32 %v1803_v20, %v3789_v14 }
 0x1f0   : > { %v1896_v27 = vadd.f32 %v1895_v53, %v1881_v21  ;;  %v1844_v17 = vadd.f32 %v3797_v32, %v1821_v11 }
 0x1f2   : > { %v1859_v4 = vadd.f32 %v1858_v22, %v1844_v17  ;;  %v1882_v28 = vmul.f32 %v1844_v17, %v1844_v17  ;;  %1920 = vst [vmem:[%s2770_s15 + $0x78] sm:$0xff] %v1844_v17 }
 0x1f4   : > { %v1860_v63 = vrot.slane %v1859_v4, 4  ;;  %v1897_v10 = vadd.f32 %v1896_v27, %v1882_v28 }
 0x1f6   : > { %v1861_v35 = vadd.f32 %v1860_v63, %v1859_v4  ;;  %v1898_v50 = vrot.slane %v1897_v10, 4 }
 0x1f8   : > { %v1862_v45 = vrot.slane %v1861_v35, 2  ;;  %v1899_v57 = vadd.f32 %v1898_v50, %v1897_v10 }
 0x1fa   : > { %v1863_v9 = vadd.f32 %v1862_v45, %v1861_v35  ;;  %v1900_v1 = vrot.slane %v1899_v57, 2 }
 0x1fc   : > { %v1864_v26 = vrot.slane %v1863_v9, 1  ;;  %v1901_v25 = vadd.f32 %v1900_v1, %v1899_v57 }
 0x1fe   : > { %v1865_v23 = vadd.f32 %v1864_v26, %v1863_v9  ;;  %v1902_v14 = vrot.slane %v1901_v25, 1 }
 0x200   : > { %1866 = vst [vmem:[%s2787_s7] sm:$0x1] %v1865_v23  ;;  %v1903_v7 = vadd.f32 %v1902_v14, %v1901_v25 }
 0x202   : > { %1904 = vst [vmem:[%s2787_s7 + $0x1] sm:$0x1] %v1903_v7 }
 0x203 PF: > { %s17_s25 = sadd.s32 1, %s2687_s25   ;;  %s3927_s21 = smov %s2679_s23 }
 0x204   : > { %p14_p10 = scmp.ge.s32.totalorder %s17_s25, 6   ;;  %s3928_s22 = smov %s2683_s24 }
 0x205   : > { %s3929_s23 = smov %s3932_s26  ;;  %s3930_s24 = smov %s3936_s27 }
 0x206   :  { %16 = sbr.rel (!%p14_p10) target bundleno = 3 (0x3), region = 136 }
 0x20b   :  { %1975 = vsyncmov [#allocation3] }
 0x20e   :  { %s1976_s15 = vpop.sfrf %1975 }
 0x20f   :  { %p2099_p11 = scmp.ne.s32.totalorder %s1976_s15, 0 }
 0x211   :  { %1980 = shalt.err (%p2099_p11)  }

// kernel: unet_forward.14
= control target key start
LH: loop header
LB: loop body
LE: loop exit
PB: predicated region body
PF: predicated region fallthrough
CT: control target
= control target key end

     0   :  { %s546_s15 = smov 0   ;;  %s548_s16 = smov 0   ;;  %s606_s0 = inlined_call_operand.vmem [shape: f32[2,8,8,128], index: 0, kind: input, shape index: {}]   ;;  %s607_s1 = inlined_call_operand.vmem [shape: f32[1,128], index: 1, kind: input, shape index: {}]   ;;  %s608_s2 = inlined_call_operand.vmem [shape: f32[1,128], index: 2, kind: input, shape index: {}]   ;;  %s609_s3 = inlined_call_operand.vmem [shape: f32[2,8,8,128], index: 3, kind: input, shape index: {}]   ;;  %s610_s4 = inlined_call_operand.vmem [shape: f32[2,8,8,128], index: 4, kind: output, shape index: {}]  }
   0x1   :  { %s550_s17 = smov 0   ;;  %s552_s18 = smov 0  }
   0x2   :  { %s554_s19 = smov 0  }
   0x3 LB: > { %s23_s20 = sadd.s32 1, %s511_s17  ;;  %s26_s21 = sadd.s32 1, %s515_s18  ;;  %s519_s19 = sphi %s554_s19, %s14_s19   ;;  %s515_s18 = sphi %s552_s18, %s614_s18   ;;  %s511_s17 = sphi %s550_s17, %s613_s17   ;;  %s507_s16 = sphi %s548_s16, %s612_s16   ;;  %s503_s15 = sphi %s546_s15, %s611_s15  }
   0x4   : > { %p24_p0 = scmp.ge.s32.totalorder %s23_s20, 2  ;;  %p427_p1 = scmp.ge.s32.totalorder %s519_s19, 1 }
   0x5   : > { %p200_p2 = scmp.lt.s32.totalorder %s519_s19, 5 }
   0x6   : > { %s616_s20 = smov (%p24_p0, %s23_s20), 0  ;;  %s618_s21 = smov (!%p24_p0, %s26_s21), %s515_s18 }
   0x7   : > { %p201_p3 = pnand %p427_p1, %p200_p2  ;;  %p28_p4 = scmp.ge.s32.totalorder %s618_s21, 2 }
   0x8   : > { %s428_s22 = sshll.u32 (!%p201_p3), %s503_s15, 2  ;;  %p244_p5 = scmp.lt.s32.totalorder (!%p201_p3), %s507_s16, 1 }
   0x9   : > { %s620_s21 = smov (%p28_p4, %s618_s21), 0  ;;  %204 = sbr.rel (%p201_p3) target bundleno = 30 (0x1e), region = 36 }
   0xa   : > { %p246_p6 = scmp.lt.s32.totalorder (!%p201_p3), %s428_s22, 7 }
   0xe   : > { %s622_s16 = smov (!%p244_p5, %s507_s16), 1  ;;  %s624_s22 = smov (!%p246_p6, %s428_s22), 7  ;;  %v437_v0 = vld [vmem:[%s607_s1] ss:$0 sm:$0xff] }
   0xf   : > { %s429_s23 = sshll.u32 %s622_s16, 3  ;;  %v438_v2 = vld [vmem:[%s608_s2] ss:$0 sm:$0xff] }
  0x10   : > { %s249_s24 = sadd.s32 %s429_s23, %s624_s22 }
  0x11   : > { %s430_s25 = sshll.u32 %s249_s24, 3 }
  0x12   : > { %s251_s30 = scalar_lea.vmem %s606_s0, %s430_s25  ;;  %s261_s9 = scalar_lea.vmem %s609_s3, %s430_s25 }
  0x13   : > { %v277_v1 = vld [vmem:[%s251_s30] sm:$0xff]  ;;  %v278_v4 = vld [vmem:[%s251_s30 + $0x8] sm:$0xff]  ;;  %v279_v5 = vld [vmem:[%s251_s30 + $0x10] sm:$0xff]  ;;  %s271_s12 = scalar_lea.vmem %s610_s4, %s430_s25 }
  0x14   : > { %v288_v3 = vmul.f32 %v437_v0, %v277_v1  ;;  %v289_v6 = vmul.f32 %v437_v0, %v278_v4  ;;  %v290_v7 = vmul.f32 %v437_v0, %v279_v5  ;;  %v280_v8 = vld [vmem:[%s251_s30 + $0x18] sm:$0xff]  ;;  %v273_v11 = vld [vmem:[%s261_s9] sm:$0xff]  ;;  %v274_v15 = vld [vmem:[%s261_s9 + $0x8] sm:$0xff] }
  0x15   : > { %v291_v10 = vmul.f32 %v437_v0, %v280_v8  ;;  %v275_v16 = vld [vmem:[%s261_s9 + $0x10] sm:$0xff]  ;;  %v276_v20 = vld [vmem:[%s261_s9 + $0x18] sm:$0xff] }
  0x16   : > { %v299_v9 = vadd.f32 %v438_v2, %v288_v3  ;;  %v300_v12 = vadd.f32 %v438_v2, %v289_v6  ;;  %v301_v13 = vadd.f32 %v438_v2, %v290_v7 }
  0x17   : > { %v302_v17 = vadd.f32 %v438_v2, %v291_v10 }
  0x18   : > { %v303_v14 = vmax.f32 %v299_v9, 0.0  ;;  %v304_v18 = vmax.f32 %v300_v12, 0.0  ;;  %v305_v19 = vmax.f32 %v301_v13, 0.0 }
  0x19   : > { %v306_v22 = vmax.f32 %v302_v17, 0.0 }
  0x1a   : > { %v307_v21 = vadd.f32 %v303_v14, %v273_v11  ;;  %v308_v23 = vadd.f32 %v304_v18, %v274_v15  ;;  %v309_v24 = vadd.f32 %v305_v19, %v275_v16 }
  0x1b   : > { %v310_v25 = vadd.f32 %v306_v22, %v276_v20 }
  0x1c   : > { %311 = vst [vmem:[%s271_s12] sm:$0xff] %v307_v21  ;;  %312 = vst [vmem:[%s271_s12 + $0x8] sm:$0xff] %v308_v23 }
  0x1d   : > { %313 = vst [vmem:[%s271_s12 + $0x10] sm:$0xff] %v309_v24  ;;  %314 = vst [vmem:[%s271_s12 + $0x18] sm:$0xff] %v310_v25 }
  0x1e PF: > { %s14_s19 = sadd.s32 1, %s519_s19   ;;  %s611_s15 = smov %s511_s17 }
  0x1f   : > { %p11_p7 = scmp.ge.s32.totalorder %s14_s19, 6   ;;  %s612_s16 = smov %s515_s18 }
  0x20   : > { %s613_s17 = smov %s616_s20  ;;  %s614_s18 = smov %s620_s21 }
  0x21   :  { %13 = sbr.rel (!%p11_p7) target bundleno = 3 (0x3), region = 69 }

// kernel: unet_forward.12
= control target key start
LH: loop header
LB: loop body
LE: loop exit
PB: predicated region body
PF: predicated region fallthrough
CT: control target
= control target key end

     0   :  { %s1640_s15 = smov 0   ;;  %s1642_s16 = smov 0   ;;  %s2224_s0 = inlined_call_operand.vmem [shape: f32[2,10,10,128], index: 0, kind: input, shape index: {}]   ;;  %s2225_s1 = inlined_call_operand.vmem [shape: f32[1152,128], index: 1, kind: input, shape index: {}]   ;;  %s2226_s2 = inlined_call_operand.vmem [shape: f32[1,128], index: 2, kind: input, shape index: {}]   ;;  %s2227_s3 = inlined_call_operand.vmem [shape: f32[2,8,8,128], index: 3, kind: output, shape index: {0}]   ;;  %s2228_s4 = inlined_call_operand.vmem [shape: f32[2,2,2,128], index: 4, kind: output, shape index: {1}]  }
   0x1   :  { %s1644_s17 = smov 0   ;;  %s1646_s18 = smov 0  }
   0x2   :  { %s1648_s19 = smov 0  }
   0x3 LB: > { %s24_s20 = sadd.s32 1, %s1605_s17  ;;  %s27_s21 = sadd.s32 1, %s1609_s18  ;;  %s1613_s19 = sphi %s1648_s19, %s15_s19   ;;  %s1609_s18 = sphi %s1646_s18, %s2232_s18   ;;  %s1605_s17 = sphi %s1644_s17, %s2231_s17   ;;  %s1601_s16 = sphi %s1642_s16, %s2230_s16   ;;  %s1597_s15 = sphi %s1640_s15, %s2229_s15  }
   0x4   : > { %p25_p0 = scmp.ge.s32.totalorder %s24_s20, 2  ;;  %p1208_p1 = scmp.ge.s32.totalorder %s1613_s19, 1 }
   0x5   : > { %p147_p2 = scmp.lt.s32.totalorder %s1613_s19, 5 }
   0x6   : > { %s2234_s20 = smov (%p25_p0, %s24_s20), 0  ;;  %s2236_s21 = smov (!%p25_p0, %s27_s21), %s1609_s18 }
   0x7   : > { %p148_p3 = pnand %p1208_p1, %p147_p2  ;;  %p29_p4 = scmp.ge.s32.totalorder %s2236_s21, 2 }
   0x8   : > { %s1209_s22 = sshll.u32 (!%p148_p3), %s1597_s15, 2  ;;  %p179_p5 = scmp.lt.s32.totalorder (!%p148_p3), %s1601_s16, 1 }
   0x9   : > { %s2238_s21 = smov (%p29_p4, %s2236_s21), 0  ;;  %151 = sbr.rel (%p148_p3) target bundleno = 370 (0x172), region = 28 }
   0xa   : > { %p181_p6 = scmp.lt.s32.totalorder (!%p148_p3), %s1209_s22, 7  ;;  %p190_p7 = scmp.lt.s32.totalorder (!%p148_p3), %s1597_s15, 1 }
   0xb   : > { %s1226_s26 = sshll.u32 (!%p148_p3), %s1597_s15, 6  ;;  %s198_s28 = smul.u32 (!%p148_p3), 160, %s1601_s16 }
   0xd   : > { %s199_s7 = sadd.s32 (!%p148_p3), %s1226_s26, %s198_s28 }
   0xe   : > { %s180_s23 = scalar_select %p179_p5, %s1601_s16, 1 }
   0xf   : > { %s2240_s22 = smov (!%p181_p6, %s1209_s22), 7  ;;  %s2242_s15 = smov (!%p190_p7, %s1597_s15), 1 }
  0x10   : > { %s1210_s24 = sshll.u32 %s180_s23, 3  ;;  %s1212_s6 = sshll.u32 %s180_s23, 1 }
  0x11   : > { %s184_s25 = sadd.s32 %s1210_s24, %s2240_s22  ;;  %s193_s8 = sadd.s32 %s1212_s6, %s2242_s15 }
  0x12   : > { %s1211_s27 = sshll.u32 %s184_s25, 3  ;;  %s200_s11 = scalar_lea.vmem %s2224_s0, %s199_s7 }
  0x13   : > { %s1683_s5 = scalar_lea.vmem %s2227_s3, %s1211_s27  ;;  %s1213_s12 = sshll.u32 %s193_s8, 1  ;;  %v249_v0 = vld [vmem:[%s200_s11] sm:$0xff]  ;;  %v251_v1 = vld [vmem:[%s200_s11 + $0x10] sm:$0xff]  ;;  %v1216_v6 = vld [vmem:[%s200_s11 + $0x8] sm:$0x3] }
  0x14   : > { %v253_v2 = vld [vmem:[%s200_s11 + $0x20] sm:$0xff]  ;;  %s1692_s16 = scalar_lea.vmem %s2228_s4, %s1213_s12  ;;  %250 = vst [vmem:[#allocation2 + $0x8] sm:$0xff] %v249_v0  ;;  %252 = vst [vmem:[#allocation2] sm:$0xff] %v251_v1  ;;  %v255_v3 = vld [vmem:[%s200_s11 + $0x30] sm:$0xff] }
  0x15   : > { %254 = vst [vmem:[#allocation2 + $0x58] sm:$0xff] %v253_v2  ;;  %v257_v4 = vld [vmem:[%s200_s11 + $0x40] sm:$0xff]  ;;  %v259_v5 = vld [vmem:[%s200_s11 + $0x50] sm:$0xff]  ;;  %256 = vst [vmem:[#allocation2 + $0x30] sm:$0xff] %v255_v3 }
  0x16   : > { %258 = vst [vmem:[#allocation2 + $0x48] sm:$0xff] %v257_v4  ;;  %260 = vst [vmem:[#allocation2 + $0x40] sm:$0xff] %v259_v5  ;;  %v1217_v7 = vld [vmem:[%s200_s11 + $0x18] sm:$0x3]  ;;  %v1218_v8 = vld [vmem:[%s200_s11 + $0x28] sm:$0x3] }
  0x17   : > { %272 = vst [vmem:[#allocation2 + $0x10] sm:$0x3] %v1216_v6  ;;  %274 = vst [vmem:[#allocation2 + $0x18] sm:$0x3] %v1217_v7  ;;  %v1219_v9 = vld [vmem:[%s200_s11 + $0x38] sm:$0x3] }
  0x18   : > { %276 = vst [vmem:[#allocation2 + $0x50] sm:$0x3] %v1218_v8  ;;  %v1220_v10 = vld [vmem:[%s200_s11 + $0x48] sm:$0x3]  ;;  %v1221_v11 = vld [vmem:[%s200_s11 + $0x58] sm:$0x3] }
  0x19   : > { %278 = vst [vmem:[#allocation2 + $0x38] sm:$0x3] %v1219_v9  ;;  %280 = vst [vmem:[#allocation2 + $0x20] sm:$0x3] %v1220_v10 }
  0x1a   : > { %282 = vst [vmem:[#allocation2 + $0x28] sm:$0x3] %v1221_v11 }
  0x1b   : > { %286 = vsyncadd [#allocation3], 960 }
  0x1c   : > { %1593 = dma.done.wait [#allocation3], 960 }
  0x1d   : > { %1594 = vsyncadd [#allocation3], 4294966336  ;;  %v434_v12 = vld [vmem:[%s2225_s1 + $0x278] sm:$0xff]  ;;  %v433_v14 = vld [vmem:[%s2225_s1 + $0x270] sm:$0xff]  ;;  %vm311_vm0 = vcmask 1046528   ;;  %vm328_vm1 = vcmask 1045504  }
  0x1e   : > { %v418_v13 = vld [vmem:[%s2225_s1 + $0x1f8] sm:$0xff]  ;;  %1227 = vmatprep.subr.mxu0 %v434_v12  ;;  %v417_v16 = vld [vmem:[%s2225_s1 + $0x1f0] sm:$0xff]  ;;  %v432_v17 = vld [vmem:[%s2225_s1 + $0x268] sm:$0xff] }
  0x1f   : > { %v450_v15 = vld [vmem:[%s2225_s1 + $0x2f8] sm:$0xff]  ;;  %1228 = vmatpush3.msra.mxu0 %v418_v13  ;;  %v449_v18 = vld [vmem:[%s2225_s1 + $0x2f0] sm:$0xff]  ;;  %v416_v19 = vld [vmem:[%s2225_s1 + $0x1e8] sm:$0xff] }
  0x20   : > { %1419 = vmatprep.subr.mxu1 %v450_v15  ;;  %1229 = vmatprep.subr.mxu0 %v433_v14  ;;  %v448_v20 = vld [vmem:[%s2225_s1 + $0x2e8] sm:$0xff]  ;;  %v431_v21 = vld [vmem:[%s2225_s1 + $0x260] sm:$0xff]  ;;  %v430_v24 = vld [vmem:[%s2225_s1 + $0x258] sm:$0xff] }
  0x21   : > { %1420 = vmatpush3.msra.mxu1 %v450_v15  ;;  %1230 = vmatpush3.msra.mxu0 %v417_v16  ;;  %v415_v22 = vld [vmem:[%s2225_s1 + $0x1e0] sm:$0xff]  ;;  %v414_v25 = vld [vmem:[%s2225_s1 + $0x1d8] sm:$0xff]  ;;  %v429_v27 = vld [vmem:[%s2225_s1 + $0x250] sm:$0xff] }
  0x22   : > { %1421 = vmatprep.subr.mxu1 %v449_v18  ;;  %1231 = vmatprep.subr.mxu0 %v432_v17  ;;  %v447_v23 = vld [vmem:[%s2225_s1 + $0x2e0] sm:$0xff]  ;;  %v446_v26 = vld [vmem:[%s2225_s1 + $0x2d8] sm:$0xff]  ;;  %v413_v28 = vld [vmem:[%s2225_s1 + $0x1d0] sm:$0xff] }
  0x23   : > { %1422 = vmatpush3.msra.mxu1 %v449_v18  ;;  %1232 = vmatpush3.msra.mxu0 %v416_v19  ;;  %v445_v29 = vld [vmem:[%s2225_s1 + $0x2d0] sm:$0xff]  ;;  %v428_v30 = vld [vmem:[%s2225_s1 + $0x248] sm:$0xff]  ;;  %v427_v33 = vld [vmem:[%s2225_s1 + $0x240] sm:$0xff] }
  0x24   : > { %1423 = vmatprep.subr.mxu1 %v448_v20  ;;  %1233 = vmatprep.subr.mxu0 %v431_v21  ;;  %v412_v31 = vld [vmem:[%s2225_s1 + $0x1c8] sm:$0xff]  ;;  %v411_v34 = vld [vmem:[%s2225_s1 + $0x1c0] sm:$0xff]  ;;  %v426_v36 = vld [vmem:[%s2225_s1 + $0x238] sm:$0xff] }
  0x25   : > { %1424 = vmatpush3.msra.mxu1 %v448_v20  ;;  %1234 = vmatpush3.msra.mxu0 %v415_v22  ;;  %v444_v32 = vld [vmem:[%s2225_s1 + $0x2c8] sm:$0xff]  ;;  %v443_v35 = vld [vmem:[%s2225_s1 + $0x2c0] sm:$0xff]  ;;  %v410_v37 = vld [vmem:[%s2225_s1 + $0x1b8] sm:$0xff] }
  0x26   : > { %1425 = vmatprep.subr.mxu1 %v447_v23  ;;  %1235 = vmatprep.subr.mxu0 %v430_v24  ;;  %v442_v38 = vld [vmem:[%s2225_s1 + $0x2b8] sm:$0xff]  ;;  %v425_v39 = vld [vmem:[%s2225_s1 + $0x230] sm:$0xff]  ;;  %v424_v42 = vld [vmem:[%s2225_s1 + $0x228] sm:$0xff] }
  0x27   : > { %1426 = vmatpush3.msra.mxu1 %v447_v23  ;;  %1236 = vmatpush3.msra.mxu0 %v414_v25  ;;  %v409_v40 = vld [vmem:[%s2225_s1 + $0x1b0] sm:$0xff]  ;;  %v408_v43 = vld [vmem:[%s2225_s1 + $0x1a8] sm:$0xff]  ;;  %v423_v45 = vld [vmem:[%s2225_s1 + $0x220] sm:$0xff] }
  0x28   : > { %1427 = vmatprep.subr.mxu1 %v446_v26  ;;  %1237 = vmatprep.subr.mxu0 %v429_v27  ;;  %v441_v41 = vld [vmem:[%s2225_s1 + $0x2b0] sm:$0xff]  ;;  %v440_v44 = vld [vmem:[%s2225_s1 + $0x2a8] sm:$0xff]  ;;  %v407_v46 = vld [vmem:[%s2225_s1 + $0x1a0] sm:$0xff] }
  0x29   : > { %1428 = vmatpush3.msra.mxu1 %v446_v26  ;;  %1238 = vmatpush3.msra.mxu0 %v413_v28  ;;  %v439_v47 = vld [vmem:[%s2225_s1 + $0x2a0] sm:$0xff]  ;;  %v294_v49 = vld [vmem:[#allocation2 + $0x18] sm:$0x3]  ;;  %v421_v53 = vld [vmem:[%s2225_s1 + $0x210] sm:$0xff] }
  0x2a   : > { %1429 = vmatprep.subr.mxu1 %v445_v29  ;;  %1239 = vmatprep.subr.mxu0 %v428_v30  ;;  %v1802_v48 = vld [vmem:[#allocation2] sm:$0xff]  ;;  %v422_v50 = vld [vmem:[%s2225_s1 + $0x218] sm:$0xff]  ;;  %v316_v55 = vrot.slane %v294_v49, 1  ;;  %v405_v56 = vld [vmem:[%s2225_s1 + $0x190] sm:$0xff]  ;;  %v333_v2 = vrot.slane %v294_v49, 2 }
  0x2b   : > { %1430 = vmatpush3.msra.mxu1 %v445_v29  ;;  %1240 = vmatpush3.msra.mxu0 %v412_v31  ;;  %v406_v51 = vld [vmem:[%s2225_s1 + $0x198] sm:$0xff]  ;;  %v315_v54 = vrot.slane %v1802_v48, 1  ;;  %v437_v57 = vld [vmem:[%s2225_s1 + $0x290] sm:$0xff]  ;;  %v420_v58 = vld [vmem:[%s2225_s1 + $0x208] sm:$0xff]  ;;  %v332_v1 = vrot.slane %v1802_v48, 2 }
  0x2c   : > { %1431 = vmatprep.subr.mxu1 %v444_v32  ;;  %1241 = vmatprep.subr.mxu0 %v427_v33  ;;  %v438_v52 = vld [vmem:[%s2225_s1 + $0x298] sm:$0xff]  ;;  %v296_v60 = vld [vmem:[#allocation2 + $0x50] sm:$0x3]  ;;  %v404_v61 = vld [vmem:[%s2225_s1 + $0x188] sm:$0xff] }
  0x2d   : > { %1432 = vmatpush3.msra.mxu1 %v444_v32  ;;  %1242 = vmatpush3.msra.mxu0 %v411_v34  ;;  %v1826_v59 = vld [vmem:[#allocation2 + $0x58] sm:$0xff]  ;;  %v436_v62 = vld [vmem:[%s2225_s1 + $0x288] sm:$0xff]  ;;  %v419_v63 = vld [vmem:[%s2225_s1 + $0x200] sm:$0xff]  ;;  %v1838_v0 = vsel %vm311_vm0, %v315_v54, %v316_v55  ;;  %v336_v5 = vrot.slane %v296_v60, 2  ;;  %v319_v9 = vrot.slane %v296_v60, 1  ;;  %v1854_v10 = vsel %vm328_vm1, %v332_v1, %v333_v2 }
  0x2e   : > { %1433 = vmatprep.subr.mxu1 %v443_v35  ;;  %1243 = vmatprep.subr.mxu0 %v426_v36  ;;  %v403_v3 = vld [vmem:[%s2225_s1 + $0x180] sm:$0xff]  ;;  %v335_v4 = vrot.slane %v1826_v59, 2  ;;  %v376_v7 = vld [vmem:[%s2225_s1 + $0xf8] sm:$0xff]  ;;  %v318_v8 = vrot.slane %v1826_v59, 1  ;;  %v375_v13 = vld [vmem:[%s2225_s1 + $0xf0] sm:$0xff] }
  0x2f   : > { %1434 = vmatpush3.msra.mxu1 %v443_v35  ;;  %1244 = vmatpush3.msra.mxu0 %v410_v37  ;;  %v435_v6 = vld [vmem:[%s2225_s1 + $0x280] sm:$0xff]  ;;  %v360_v11 = vld [vmem:[%s2225_s1 + $0x78] sm:$0xff]  ;;  %v359_v15 = vld [vmem:[%s2225_s1 + $0x70] sm:$0xff] }
  0x30   : > { %1435 = vmatprep.subr.mxu1 %v442_v38  ;;  %1245 = vmatprep.subr.mxu0 %v425_v39  ;;  %v1861_v12 = vsel %vm328_vm1, %v335_v4, %v336_v5  ;;  %v392_v14 = vld [vmem:[%s2225_s1 + $0x178] sm:$0xff]  ;;  %v1874_v16 = vsel %vm311_vm0, %v318_v8, %v319_v9  ;;  %v374_v17 = vld [vmem:[%s2225_s1 + $0xe8] sm:$0xff]  ;;  %v391_v18 = vld [vmem:[%s2225_s1 + $0x170] sm:$0xff] }
  0x31   : > { %1436 = vmatpush3.msra.mxu1 %v442_v38  ;;  %1246 = vmatpush3.msra.mxu0 %v409_v40  ;;  %v358_v19 = vld [vmem:[%s2225_s1 + $0x68] sm:$0xff]  ;;  %v373_v21 = vld [vmem:[%s2225_s1 + $0xe0] sm:$0xff]  ;;  %v372_v24 = vld [vmem:[%s2225_s1 + $0xd8] sm:$0xff] }
  0x32   : > { %1437 = vmatprep.subr.mxu1 %v441_v41  ;;  %1247 = vmatprep.subr.mxu0 %v424_v42  ;;  %v390_v20 = vld [vmem:[%s2225_s1 + $0x168] sm:$0xff]  ;;  %v357_v22 = vld [vmem:[%s2225_s1 + $0x60] sm:$0xff]  ;;  %v356_v25 = vld [vmem:[%s2225_s1 + $0x58] sm:$0xff] }
  0x33   : > { %1438 = vmatpush3.msra.mxu1 %v441_v41  ;;  %1248 = vmatpush3.msra.mxu0 %v408_v43  ;;  %v389_v23 = vld [vmem:[%s2225_s1 + $0x160] sm:$0xff]  ;;  %v388_v26 = vld [vmem:[%s2225_s1 + $0x158] sm:$0xff]  ;;  %v371_v27 = vld [vmem:[%s2225_s1 + $0xd0] sm:$0xff] }
  0x34   : > { %1439 = vmatprep.subr.mxu1 %v440_v44  ;;  %1249 = vmatprep.subr.mxu0 %v423_v45  ;;  %v355_v28 = vld [vmem:[%s2225_s1 + $0x50] sm:$0xff]  ;;  %v370_v30 = vld [vmem:[%s2225_s1 + $0xc8] sm:$0xff]  ;;  %v369_v33 = vld [vmem:[%s2225_s1 + $0xc0] sm:$0xff] }
  0x35   : > { %1440 = vmatpush3.msra.mxu1 %v440_v44  ;;  %1250 = vmatpush3.msra.mxu0 %v407_v46  ;;  %v387_v29 = vld [vmem:[%s2225_s1 + $0x150] sm:$0xff]  ;;  %v354_v31 = vld [vmem:[%s2225_s1 + $0x48] sm:$0xff]  ;;  %v298_v35 = vld [vmem:[#allocation2 + $0x38] sm:$0x3] }
  0x36   : > { %1441 = vmatprep.subr.mxu1 %v439_v47  ;;  %1251 = vmatprep.subr.mxu0 %v422_v50  ;;  %v386_v32 = vld [vmem:[%s2225_s1 + $0x148] sm:$0xff]  ;;  %v1930_v34 = vld [vmem:[#allocation2 + $0x30] sm:$0xff]  ;;  %v353_v36 = vld [vmem:[%s2225_s1 + $0x40] sm:$0xff]  ;;  %v322_v42 = vrot.slane %v298_v35, 1 }
  0x37   : > { %1442 = vmatpush3.msra.mxu1 %v439_v47  ;;  %1252 = vmatpush3.msra.mxu0 %v406_v51  ;;  %v385_v37 = vld [vmem:[%s2225_s1 + $0x140] sm:$0xff]  ;;  %v368_v38 = vld [vmem:[%s2225_s1 + $0xb8] sm:$0xff]  ;;  %v321_v41 = vrot.slane %v1930_v34, 1  ;;  %v367_v43 = vld [vmem:[%s2225_s1 + $0xb0] sm:$0xff]  ;;  %v338_v50 = vrot.slane %v1930_v34, 2  ;;  %v339_v51 = vrot.slane %v298_v35, 2 }
  0x38   : > { %1443 = vmatprep.subr.mxu1 %v438_v52  ;;  %1253 = vmatprep.subr.mxu0 %v421_v53  ;;  %v352_v39 = vld [vmem:[%s2225_s1 + $0x38] sm:$0xff]  ;;  %v351_v44 = vld [vmem:[%s2225_s1 + $0x30] sm:$0xff]  ;;  %v1957_v46 = vld [vmem:[#allocation2 + $0x48] sm:$0xff] }
  0x39   : > { %1444 = vmatpush3.msra.mxu1 %v438_v52  ;;  %1254 = vmatpush3.msra.mxu0 %v405_v56  ;;  %v384_v40 = vld [vmem:[%s2225_s1 + $0x138] sm:$0xff]  ;;  %v383_v45 = vld [vmem:[%s2225_s1 + $0x130] sm:$0xff]  ;;  %v300_v47 = vld [vmem:[#allocation2 + $0x20] sm:$0x3]  ;;  %v1967_v53 = vsel %vm311_vm0, %v321_v41, %v322_v42  ;;  %v399_v56 = vrot.slane %v1957_v46, 2 }
  0x3a   : > { %1445 = vmatprep.subr.mxu1 %v437_v57  ;;  %1255 = vmatprep.subr.mxu0 %v420_v58  ;;  %v366_v49 = vld [vmem:[%s2225_s1 + $0xa8] sm:$0xff]  ;;  %v365_v54 = vld [vmem:[%s2225_s1 + $0xa0] sm:$0xff]  ;;  %v395_v58 = vrot.slane %v1957_v46, 1  ;;  %v396_v60 = vrot.slane %v300_v47, 1  ;;  %v292_v5 = vld [vmem:[#allocation2 + $0x10] sm:$0x3] }
  0x3b   : > { %1446 = vmatpush3.msra.mxu1 %v437_v57  ;;  %1256 = vmatpush3.msra.mxu0 %v404_v61  ;;  %v350_v52 = vld [vmem:[%s2225_s1 + $0x28] sm:$0xff]  ;;  %v400_v57 = vrot.slane %v300_v47, 2  ;;  %v349_v61 = vld [vmem:[%s2225_s1 + $0x20] sm:$0xff]  ;;  %v380_v8 = vld [vmem:[%s2225_s1 + $0x118] sm:$0xff] }
  0x3c   : > { %1447 = vmatprep.subr.mxu1 %v436_v62  ;;  %1257 = vmatprep.subr.mxu0 %v419_v63  ;;  %v382_v55 = vld [vmem:[%s2225_s1 + $0x128] sm:$0xff]  ;;  %v364_v63 = vld [vmem:[%s2225_s1 + $0x98] sm:$0xff]  ;;  %v381_v1 = vld [vmem:[%s2225_s1 + $0x120] sm:$0xff] }
  0x3d   : > { %515 = vmatprep.mubr.f32.mxu0 %v1838_v0  ;;  %1258 = vmatpush3.msra.mxu0 %v403_v3  ;;  %v1992_v2 = vsel %vm328_vm1, %v399_v56, %v400_v57  ;;  %v348_v3 = vld [vmem:[%s2225_s1 + $0x18] sm:$0xff]  ;;  %v291_v4 = vld [vmem:[#allocation2 + $0x8] sm:$0xff]  ;;  %v829_v35 = vld [vmem:[%s2225_s1 + $0x3e0] sm:$0xff] }
  0x3e   : > { %1448 = vmatpush3.msra.mxu1 %v436_v62  ;;  %516 = vmatmul.mubr.f32.vlgmr.msra.gmra.mxu0 %v1802_v48  ;;  %v1982_v62 = vsel %vm328_vm1, %v338_v50, %v339_v51  ;;  %v312_v9 = vrot.slane %v291_v4, 1  ;;  %v826_v41 = vld [vmem:[%s2225_s1 + $0x3c8] sm:$0xff]  ;;  %v843_v42 = vld [vmem:[%s2225_s1 + $0x450] sm:$0xff]  ;;  %v809_v47 = vld [vmem:[%s2225_s1 + $0x340] sm:$0xff] }
  0x3f   : > { %1449 = vmatprep.subr.mxu1 %v435_v6  ;;  %1291 = vmatprep.subr.mxu0 %v376_v7  ;;  %v363_v7 = vld [vmem:[%s2225_s1 + $0x90] sm:$0xff]  ;;  %v841_v50 = vld [vmem:[%s2225_s1 + $0x440] sm:$0xff]  ;;  %v808_v51 = vld [vmem:[%s2225_s1 + $0x338] sm:$0xff] }
  0x40   : > { %1450 = vmatpush3.msra.mxu1 %v435_v6  ;;  %1451 = vmatprep.mubr.f32.mxu1 %v1854_v10  ;;  %v1999_v6 = vsel %vm311_vm0, %v395_v58, %v396_v60  ;;  %v822_v56 = vld [vmem:[%s2225_s1 + $0x3a8] sm:$0xff]  ;;  %v839_v57 = vld [vmem:[%s2225_s1 + $0x430] sm:$0xff]  ;;  %v821_v60 = vld [vmem:[%s2225_s1 + $0x3a0] sm:$0xff] }
  0x41   : > { %1292 = vmatpush3.msra.mxu0 %v360_v11  ;;  %1452 = vmatmul.mubr.f32.vlgmr.msra.gmra.mxu1 %v1861_v12  ;;  %v313_v11 = vrot.slane %v292_v5, 1  ;;  %v806_v58 = vld [vmem:[%s2225_s1 + $0x328] sm:$0xff] }
  0x42   : > { %1293 = vmatprep.subr.mxu0 %v375_v13  ;;  %1457 = vmatprep.subr.mxu1 %v392_v14  ;;  %v347_v13 = vld [vmem:[%s2225_s1 + $0x10] sm:$0xff] }
  0x43   : > { %1294 = vmatpush3.msra.mxu0 %v359_v15  ;;  %1458 = vmatpush3.msra.mxu1 %v392_v14  ;;  %v379_v14 = vld [vmem:[%s2225_s1 + $0x110] sm:$0xff]  ;;  %v362_v15 = vld [vmem:[%s2225_s1 + $0x88] sm:$0xff] }
  0x44   : > { %520 = vmatprep.mubr.f32.mxu0 %v1874_v16  ;;  %1295 = vmatprep.subr.mxu0 %v374_v17  ;;  %v346_v17 = vld [vmem:[%s2225_s1 + $0x8] sm:$0xff] }
  0x45   : > { %1459 = vmatprep.subr.mxu1 %v391_v18  ;;  %521 = vmatmul.mubr.f32.gmra.mxu0 %v1826_v59 }
  0x46   : > { %1460 = vmatpush3.msra.mxu1 %v391_v18  ;;  %1296 = vmatpush3.msra.mxu0 %v358_v19  ;;  %v378_v18 = vld [vmem:[%s2225_s1 + $0x108] sm:$0xff]  ;;  %v361_v19 = vld [vmem:[%s2225_s1 + $0x80] sm:$0xff] }
  0x47   : > { %1461 = vmatprep.subr.mxu1 %v390_v20  ;;  %1297 = vmatprep.subr.mxu0 %v373_v21  ;;  %v329_v21 = vrot.slane %v291_v4, 2 }
  0x48   : > { %1462 = vmatpush3.msra.mxu1 %v390_v20  ;;  %1298 = vmatpush3.msra.mxu0 %v357_v22  ;;  %v314_v20 = vsel %vm311_vm0, %v312_v9, %v313_v11  ;;  %v330_v22 = vrot.slane %v292_v5, 2  ;;  %v819_v5 = vld [vmem:[%s2225_s1 + $0x390] sm:$0xff]  ;;  %v818_v9 = vld [vmem:[%s2225_s1 + $0x388] sm:$0xff] }
  0x49   : > { %1463 = vmatprep.subr.mxu1 %v389_v23  ;;  %1299 = vmatprep.subr.mxu0 %v372_v24  ;;  %v377_v24 = vld [vmem:[%s2225_s1 + $0x100] sm:$0xff]  ;;  %v835_v11 = vld [vmem:[%s2225_s1 + $0x410] sm:$0xff] }
  0x4a   : > { %1464 = vmatpush3.msra.mxu1 %v389_v23  ;;  %1300 = vmatpush3.msra.mxu0 %v356_v25  ;;  %v345_v23 = vld [vmem:[%s2225_s1] sm:$0xff]  ;;  %v832_v25 = vld [vmem:[%s2225_s1 + $0x3f8] sm:$0xff] }
  0x4b   : > { %1465 = vmatprep.subr.mxu1 %v388_v26  ;;  %1301 = vmatprep.subr.mxu0 %v371_v27  ;;  %v331_v27 = vsel %vm328_vm1, %v329_v21, %v330_v22 }
  0x4c   : > { %1466 = vmatpush3.msra.mxu1 %v388_v26  ;;  %1302 = vmatpush3.msra.mxu0 %v355_v28  ;;  %v816_v26 = vld [vmem:[%s2225_s1 + $0x378] sm:$0xff]  ;;  %v831_v28 = vld [vmem:[%s2225_s1 + $0x3f0] sm:$0xff] }
  0x4d   : > { %1467 = vmatprep.subr.mxu1 %v387_v29  ;;  %1303 = vmatprep.subr.mxu0 %v370_v30  ;;  %v815_v30 = vld [vmem:[%s2225_s1 + $0x370] sm:$0xff] }
  0x4e   : > { %1468 = vmatpush3.msra.mxu1 %v387_v29  ;;  %1304 = vmatpush3.msra.mxu0 %v354_v31  ;;  %v848_v29 = vld [vmem:[%s2225_s1 + $0x478] sm:$0xff]  ;;  %v830_v31 = vld [vmem:[%s2225_s1 + $0x3e8] sm:$0xff] }
  0x4f   : > { %1469 = vmatprep.subr.mxu1 %v386_v32  ;;  %1305 = vmatprep.subr.mxu0 %v369_v33  ;;  %v814_v33 = vld [vmem:[%s2225_s1 + $0x368] sm:$0xff] }
  0x50   : > { %1470 = vmatpush3.msra.mxu1 %v386_v32  ;;  %1306 = vmatpush3.msra.mxu0 %v353_v36  ;;  %v847_v32 = vld [vmem:[%s2225_s1 + $0x470] sm:$0xff]  ;;  %v828_v36 = vld [vmem:[%s2225_s1 + $0x3d8] sm:$0xff] }
  0x51   : > { %1471 = vmatprep.subr.mxu1 %v385_v37  ;;  %1307 = vmatprep.subr.mxu0 %v368_v38  ;;  %v827_v38 = vld [vmem:[%s2225_s1 + $0x3d0] sm:$0xff] }
  0x52   : > { %1472 = vmatpush3.msra.mxu1 %v385_v37  ;;  %1308 = vmatpush3.msra.mxu0 %v352_v39  ;;  %v812_v37 = vld [vmem:[%s2225_s1 + $0x358] sm:$0xff] }
  0x53   : > { %1473 = vmatprep.subr.mxu1 %v384_v40  ;;  %1309 = vmatprep.subr.mxu0 %v367_v43  ;;  %v844_v39 = vld [vmem:[%s2225_s1 + $0x458] sm:$0xff]  ;;  %v810_v43 = vld [vmem:[%s2225_s1 + $0x348] sm:$0xff] }
  0x54   : > { %1474 = vmatpush3.msra.mxu1 %v384_v40  ;;  %1310 = vmatpush3.msra.mxu0 %v351_v44  ;;  %v811_v40 = vld [vmem:[%s2225_s1 + $0x350] sm:$0xff]  ;;  %v825_v44 = vld [vmem:[%s2225_s1 + $0x3c0] sm:$0xff] }
  0x55   : > { %1475 = vmatprep.subr.mxu1 %v383_v45  ;;  %1311 = vmatprep.subr.mxu0 %v366_v49  ;;  %v824_v49 = vld [vmem:[%s2225_s1 + $0x3b8] sm:$0xff] }
  0x56   : > { %1476 = vmatpush3.msra.mxu1 %v383_v45  ;;  %1312 = vmatpush3.msra.mxu0 %v350_v52  ;;  %v842_v45 = vld [vmem:[%s2225_s1 + $0x448] sm:$0xff]  ;;  %v823_v52 = vld [vmem:[%s2225_s1 + $0x3b0] sm:$0xff] }
  0x57   : > { %525 = vmatprep.mubr.f32.mxu0 %v1967_v53  ;;  %1313 = vmatprep.subr.mxu0 %v365_v54  ;;  %v840_v54 = vld [vmem:[%s2225_s1 + $0x438] sm:$0xff] }
  0x58   : > { %1477 = vmatprep.subr.mxu1 %v382_v55  ;;  %526 = vmatmul.mubr.f32.gmra.mxu0 %v1930_v34 }
  0x59   : > { %1478 = vmatpush3.msra.mxu1 %v382_v55  ;;  %1314 = vmatpush3.msra.mxu0 %v349_v61  ;;  %v807_v55 = vld [vmem:[%s2225_s1 + $0x330] sm:$0xff]  ;;  %v838_v61 = vld [vmem:[%s2225_s1 + $0x428] sm:$0xff] }
  0x5a   : > { %1454 = vmatprep.mubr.f32.mxu1 %v1982_v62  ;;  %1315 = vmatprep.subr.mxu0 %v364_v63  ;;  %v805_v63 = vld [vmem:[%s2225_s1 + $0x320] sm:$0xff] }
  0x5b   : > { %1479 = vmatprep.subr.mxu1 %v381_v1  ;;  %1455 = vmatmul.mubr.f32.gmra.mxu1 %v1992_v2 }
  0x5c   : > { %1316 = vmatpush3.msra.mxu0 %v348_v3  ;;  %1480 = vmatpush3.msra.mxu1 %v381_v1  ;;  %v820_v1 = vld [vmem:[%s2225_s1 + $0x398] sm:$0xff]  ;;  %v837_v3 = vld [vmem:[%s2225_s1 + $0x420] sm:$0xff] }
  0x5d   : > { %530 = vmatprep.mubr.f32.mxu0 %v1999_v6  ;;  %1317 = vmatprep.subr.mxu0 %v363_v7  ;;  %v836_v7 = vld [vmem:[%s2225_s1 + $0x418] sm:$0xff] }
  0x5e   : > { %1481 = vmatprep.subr.mxu1 %v380_v8  ;;  %531 = vmatmul.mubr.f32.gmra.mxu0 %v1957_v46 }
  0x5f   : > { %1482 = vmatpush3.msra.mxu1 %v380_v8  ;;  %1318 = vmatpush3.msra.mxu0 %v347_v13  ;;  %v803_v8 = vld [vmem:[%s2225_s1 + $0x310] sm:$0xff]  ;;  %v802_v13 = vld [vmem:[%s2225_s1 + $0x308] sm:$0xff] }
  0x60   : > { %1483 = vmatprep.subr.mxu1 %v379_v14  ;;  %1319 = vmatprep.subr.mxu0 %v362_v15  ;;  %v834_v15 = vld [vmem:[%s2225_s1 + $0x408] sm:$0xff] }
  0x61   : > { %1484 = vmatpush3.msra.mxu1 %v379_v14  ;;  %1320 = vmatpush3.msra.mxu0 %v346_v17  ;;  %v817_v14 = vld [vmem:[%s2225_s1 + $0x380] sm:$0xff] }
  0x62   : > { %1485 = vmatprep.subr.mxu1 %v378_v18  ;;  %1321 = vmatprep.subr.mxu0 %v361_v19  ;;  %v801_v17 = vld [vmem:[%s2225_s1 + $0x300] sm:$0xff]  ;;  %v302_v19 = vld [vmem:[#allocation2 + $0x28] sm:$0x3] }
  0x63   : > { %685 = vmatprep.mubr.f32.mxu0 %v314_v20  ;;  %1322 = vmatpush3.msra.mxu0 %v345_v23  ;;  %v833_v20 = vld [vmem:[%s2225_s1 + $0x400] sm:$0xff]  ;;  %v798_v22 = vrot.slane %v302_v19, 2 }
  0x64   : > { %1486 = vmatpush3.msra.mxu1 %v378_v18  ;;  %686 = vmatmul.mubr.f32.vlgmr.msra.gmra.mxu0 %v291_v4  ;;  %v804_v4 = vld [vmem:[%s2225_s1 + $0x318] sm:$0xff]  ;;  %v301_v18 = vld [vmem:[#allocation2 + $0x40] sm:$0xff] }
  0x65   : > { %1487 = vmatprep.subr.mxu1 %v377_v24  ;;  %1355 = vmatprep.subr.mxu0 %v832_v25  ;;  %v797_v21 = vrot.slane %v301_v18, 2  ;;  %v793_v23 = vrot.slane %v301_v18, 1 }
  0x66   : > { %1488 = vmatpush3.msra.mxu1 %v377_v24  ;;  %1356 = vmatpush3.msra.mxu0 %v816_v26  ;;  %v794_v24 = vrot.slane %v302_v19, 1 }
  0x67   : > { %1489 = vmatprep.mubr.f32.mxu1 %v331_v27  ;;  %1357 = vmatprep.subr.mxu0 %v831_v28  ;;  %v799_v25 = vsel %vm328_vm1, %v797_v21, %v798_v22 }
  0x68   : > { %1495 = vmatprep.subr.mxu1 %v848_v29  ;;  %690 = vmatprep.mubr.f32.mxu0 %v1838_v0  ;;  %v846_v0 = vld [vmem:[%s2225_s1 + $0x468] sm:$0xff] }
  0x69   : > { %1490 = vmatmul.mubr.f32.vlgmr.msra.gmra.mxu1 %v1854_v10  ;;  %1358 = vmatpush3.msra.mxu0 %v815_v30  ;;  %v813_v10 = vld [vmem:[%s2225_s1 + $0x360] sm:$0xff] }
  0x6a   : > { %1496 = vmatpush3.msra.mxu1 %v848_v29  ;;  %691 = vmatmul.mubr.f32.gmra.mxu0 %v1802_v48  ;;  %v845_v48 = vld [vmem:[%s2225_s1 + $0x460] sm:$0xff] }
  0x6b   : > { %1359 = vmatprep.subr.mxu0 %v830_v31  ;;  %1497 = vmatprep.subr.mxu1 %v847_v32 }
  0x6c   : > { %1360 = vmatpush3.msra.mxu0 %v814_v33  ;;  %1498 = vmatpush3.msra.mxu1 %v847_v32 }
  0x6d   : > { %1361 = vmatprep.subr.mxu0 %v829_v35  ;;  %1499 = vmatprep.subr.mxu1 %v846_v0 }
  0x6e   : > { %695 = vmatprep.mubr.f32.mxu0 %v1874_v16  ;;  %1362 = vmatpush3.msra.mxu0 %v813_v10 }
  0x6f   : > { %1500 = vmatpush3.msra.mxu1 %v846_v0  ;;  %696 = vmatmul.mubr.f32.gmra.mxu0 %v1826_v59 }
  0x70   : > { %1363 = vmatprep.subr.mxu0 %v828_v36  ;;  %1501 = vmatprep.subr.mxu1 %v845_v48 }
  0x71   : > { %1364 = vmatpush3.msra.mxu0 %v812_v37  ;;  %1502 = vmatpush3.msra.mxu1 %v845_v48 }
  0x72   : > { %1365 = vmatprep.subr.mxu0 %v827_v38  ;;  %1503 = vmatprep.subr.mxu1 %v844_v39 }
  0x73   : > { %700 = vmatprep.mubr.f32.mxu0 %v1967_v53  ;;  %1492 = vmatprep.mubr.f32.mxu1 %v1861_v12 }
  0x74   : > { %1366 = vmatpush3.msra.mxu0 %v811_v40  ;;  %1504 = vmatpush3.msra.mxu1 %v844_v39 }
  0x75   : > { %701 = vmatmul.mubr.f32.gmra.mxu0 %v1930_v34  ;;  %1493 = vmatmul.mubr.f32.gmra.mxu1 %v1982_v62 }
  0x76   : > { %1367 = vmatprep.subr.mxu0 %v826_v41  ;;  %1505 = vmatprep.subr.mxu1 %v843_v42 }
  0x77   : > { %1368 = vmatpush3.msra.mxu0 %v810_v43  ;;  %1506 = vmatpush3.msra.mxu1 %v843_v42 }
  0x78   : > { %1369 = vmatprep.subr.mxu0 %v825_v44  ;;  %1507 = vmatprep.subr.mxu1 %v842_v45 }
  0x79   : > { %1370 = vmatpush3.msra.mxu0 %v809_v47  ;;  %1508 = vmatpush3.msra.mxu1 %v842_v45 }
  0x7a   : > { %1371 = vmatprep.subr.mxu0 %v824_v49  ;;  %1509 = vmatprep.subr.mxu1 %v841_v50 }
  0x7b   : > { %1372 = vmatpush3.msra.mxu0 %v808_v51  ;;  %1510 = vmatpush3.msra.mxu1 %v841_v50 }
  0x7c   : > { %1373 = vmatprep.subr.mxu0 %v823_v52  ;;  %1511 = vmatprep.subr.mxu1 %v840_v54 }
  0x7d   : > { %1374 = vmatpush3.msra.mxu0 %v807_v55  ;;  %1512 = vmatpush3.msra.mxu1 %v840_v54 }
  0x7e   : > { %1375 = vmatprep.subr.mxu0 %v822_v56  ;;  %1513 = vmatprep.subr.mxu1 %v839_v57 }
  0x7f   : > { %1376 = vmatpush3.msra.mxu0 %v806_v58  ;;  %1514 = vmatpush3.msra.mxu1 %v839_v57 }
  0x80   : > { %1377 = vmatprep.subr.mxu0 %v821_v60  ;;  %1515 = vmatprep.subr.mxu1 %v838_v61 }
  0x81   : > { %1378 = vmatpush3.msra.mxu0 %v805_v63  ;;  %1516 = vmatpush3.msra.mxu1 %v838_v61  ;;  %v1222_v63 = vld [vmem:[%s2226_s2] ss:$0 sm:$0xff] }
  0x82   : > { %1379 = vmatprep.subr.mxu0 %v820_v1  ;;  %1517 = vmatprep.subr.mxu1 %v837_v3 }
  0x83   : > { %1380 = vmatpush3.msra.mxu0 %v804_v4  ;;  %1518 = vmatpush3.msra.mxu1 %v837_v3 }
  0x84   : > { %1381 = vmatprep.subr.mxu0 %v819_v5  ;;  %1519 = vmatprep.subr.mxu1 %v836_v7 }
  0x85   : > { %1382 = vmatpush3.msra.mxu0 %v803_v8  ;;  %1520 = vmatpush3.msra.mxu1 %v836_v7 }
  0x86   : > { %1383 = vmatprep.subr.mxu0 %v818_v9  ;;  %1521 = vmatprep.subr.mxu1 %v835_v11 }
  0x87   : > { %1384 = vmatpush3.msra.mxu0 %v802_v13  ;;  %1522 = vmatpush3.msra.mxu1 %v835_v11 }
  0x88   : > { %1385 = vmatprep.subr.mxu0 %v817_v14  ;;  %1523 = vmatprep.subr.mxu1 %v834_v15 }
  0x89   : > { %1386 = vmatpush3.msra.mxu0 %v801_v17  ;;  %913 = vmatprep.mubr.f32.mxu0 %v1874_v16 }
  0x8a   : > { %1524 = vmatpush3.msra.mxu1 %v834_v15  ;;  %914 = vmatmul.mubr.f32.vlgmr.msra.gmra.mxu0 %v1826_v59  ;;  %v795_v59 = vsel %vm311_vm0, %v793_v23, %v794_v24 }
  0x8b   : > { %1525 = vmatprep.subr.mxu1 %v833_v20  ;;  %1527 = vmatprep.mubr.f32.mxu1 %v1861_v12 }
  0x8c   : > { %1526 = vmatpush3.msra.mxu1 %v833_v20  ;;  %918 = vmatprep.mubr.f32.mxu0 %v1967_v53 }
  0x8d   : > { %1528 = vmatmul.mubr.f32.vlgmr.msra.gmra.mxu1 %v1982_v62 }
  0x8e   : > { %1530 = vmatprep.mubr.f32.mxu1 %v1992_v2  ;;  %919 = vmatmul.mubr.f32.gmra.mxu0 %v1930_v34 }
  0x8f   : > { %923 = vmatprep.mubr.f32.mxu0 %v1999_v6 }
  0x91   : > { %1531 = vmatmul.mubr.f32.gmra.mxu1 %v799_v25 }
  0x92   : > { %924 = vmatmul.mubr.f32.gmra.mxu0 %v1957_v46 }
  0x93   : > { %928 = vmatprep.mubr.f32.mxu0 %v795_v59 }
  0x96   : > { %929 = vmatmul.mubr.f32.gmra.mxu0 %v301_v18 }
  0xfe   : > { %v1259_v12 = vpop.f32.mrf.mxu0 }
 0x100   : > { %v1260_v16 = vpop.f32.mrf.mxu0 }
 0x101   : > { %v1453_v34 = vpop.f32.mrf.mxu1  ;;  %v1261_v37 = vadd.f32 %v1260_v16, %v1259_v12 }
 0x103   : > { %v602_v6 = vpop.f32.mrf.mxu1 }
 0x104   : > { %v603_v42 = vadd.f32 %v1261_v37, %v602_v6 }
 0x105   : > { %v1262_v53 = vpop.f32.mrf.mxu0 }
 0x107   : > { %v1263_v62 = vpop.f32.mrf.mxu0 }
 0x108   : > { %v1264_v40 = vadd.f32 %v1263_v62, %v1262_v53 }
 0x10a   : > { %v608_v49 = vadd.f32 %v1453_v34, %v1264_v40 }
 0x118   : > { %v1265_v26 = vpop.f32.mrf.mxu0 }
 0x11a   : > { %v1266_v27 = vpop.f32.mrf.mxu0 }
 0x11b   : > { %v1456_v33 = vpop.f32.mrf.mxu1  ;;  %v1267_v52 = vadd.f32 %v1266_v27, %v1265_v26 }
 0x11d   : > { %v612_v0 = vpop.f32.mrf.mxu1 }
 0x11e   : > { %v1268_v2 = vpop.f32.mrf.mxu0  ;;  %v613_v4 = vadd.f32 %v1267_v52, %v612_v0 }
 0x120   : > { %v1269_v28 = vpop.f32.mrf.mxu0 }
 0x121   : > { %v1270_v5 = vadd.f32 %v1269_v28, %v1268_v2 }
 0x123   : > { %v618_v20 = vadd.f32 %v1456_v33, %v1270_v5 }
 0x124   : > { %v1323_v29 = vpop.f32.mrf.mxu0 }
 0x126   : > { %v1324_v30 = vpop.f32.mrf.mxu0 }
 0x127   : > { %v1325_v39 = vadd.f32 %v1324_v30, %v1323_v29 }
 0x129   : > { %v1491_v46 = vpop.f32.mrf.mxu1  ;;  %v688_v47 = vadd.f32 %v1325_v39, %v603_v42 }
 0x12a   : > { %v1326_v31 = vpop.f32.mrf.mxu0 }
 0x12b   : > { %v772_v36 = vpop.f32.mrf.mxu1 }
 0x12c   : > { %v1327_v32 = vpop.f32.mrf.mxu0  ;;  %v773_v58 = vadd.f32 %v772_v36, %v688_v47 }
 0x12d   : > { %v1328_v43 = vadd.f32 %v1327_v32, %v1326_v31 }
 0x12f   : > { %v1329_v35 = vpop.f32.mrf.mxu0  ;;  %v693_v55 = vadd.f32 %v1328_v43, %v608_v49 }
 0x131   : > { %v1330_v10 = vpop.f32.mrf.mxu0  ;;  %v778_v9 = vadd.f32 %v1491_v46, %v693_v55 }
 0x132   : > { %v1331_v60 = vadd.f32 %v1330_v10, %v1329_v35 }
 0x134   : > { %v698_v14 = vadd.f32 %v1331_v60, %v613_v4 }
 0x135   : > { %v1332_v48 = vpop.f32.mrf.mxu0  ;;  %v1494_v38 = vpop.f32.mrf.mxu1 }
 0x137   : > { %v1333_v41 = vpop.f32.mrf.mxu0  ;;  %v782_v44 = vpop.f32.mrf.mxu1 }
 0x138   : > { %v1334_v13 = vadd.f32 %v1333_v41, %v1332_v48  ;;  %v783_v25 = vadd.f32 %v782_v44, %v698_v14 }
 0x13a   : > { %v703_v24 = vadd.f32 %v1334_v13, %v618_v20 }
 0x13c   : > { %v788_v26 = vadd.f32 %v1494_v38, %v703_v24 }
 0x14a   : > { %v1387_v45 = vpop.f32.mrf.mxu0 }
 0x14c   : > { %v1388_v50 = vpop.f32.mrf.mxu0 }
 0x14d   : > { %v1529_v51 = vpop.f32.mrf.mxu1  ;;  %v1389_v54 = vadd.f32 %v1388_v50, %v1387_v45 }
 0x14e   : > { %v1390_v56 = vpop.f32.mrf.mxu0 }
 0x14f   : > { %v1000_v57 = vpop.f32.mrf.mxu1 }
 0x150   : > { %v1001_v61 = vadd.f32 %v1389_v54, %v1000_v57  ;;  %v1391_v1 = vpop.f32.mrf.mxu0 }
 0x151   : > { %v1532_v3 = vpop.f32.mrf.mxu1  ;;  %v1392_v8 = vadd.f32 %v1391_v1, %v1390_v56 }
 0x152   : > { %v1019_v7 = vadd.f32 %v1001_v61, %v773_v58  ;;  %v1393_v11 = vpop.f32.mrf.mxu0 }
 0x153   : > { %v1006_v17 = vadd.f32 %v1529_v51, %v1392_v8  ;;  %v1010_v19 = vpop.f32.mrf.mxu1 }
 0x154   : > { %v1030_v15 = vadd.f32 %v1222_v63, %v1019_v7  ;;  %v1394_v18 = vpop.f32.mrf.mxu0 }
 0x155   : > { %v1020_v21 = vadd.f32 %v1006_v17, %v778_v9  ;;  %v1395_v22 = vadd.f32 %v1394_v18, %v1393_v11 }
 0x156   : > { %1058 = vst [vmem:[%s1683_s5] sm:$0xff] %v1030_v15  ;;  %v1396_v23 = vpop.f32.mrf.mxu0  ;;  %v1044_v29 = vmul.f32 %v1030_v15, %v1030_v15 }
 0x157   : > { %v1031_v59 = vadd.f32 %v1222_v63, %v1020_v21  ;;  %v1011_v12 = vadd.f32 %v1395_v22, %v1010_v19 }
 0x158   : > { %v1397_v16 = vpop.f32.mrf.mxu0 }
 0x159   : > { %1059 = vst [vmem:[%s1683_s5 + $0x8] sm:$0xff] %v1031_v59  ;;  %v1021_v53 = vadd.f32 %v1011_v12, %v783_v25  ;;  %v1398_v62 = vadd.f32 %v1397_v16, %v1396_v23  ;;  %v1045_v27 = vmul.f32 %v1031_v59, %v1031_v59  ;;  %v1034_v30 = vadd.f32 %v1031_v59, %v1030_v15 }
 0x15b   : > { %v1032_v2 = vadd.f32 %v1222_v63, %v1021_v53  ;;  %v1016_v28 = vadd.f32 %v1532_v3, %v1398_v62  ;;  %v1048_v32 = vadd.f32 %v1045_v27, %v1044_v29 }
 0x15d   : > { %v1046_v34 = vmul.f32 %v1032_v2, %v1032_v2  ;;  %1060 = vst [vmem:[%s1683_s5 + $0x10] sm:$0xff] %v1032_v2  ;;  %v1022_v31 = vadd.f32 %v1016_v28, %v788_v26  ;;  %v1035_v6 = vadd.f32 %v1034_v30, %v1032_v2 }
 0x15f   : > { %v1033_v33 = vadd.f32 %v1222_v63, %v1022_v31  ;;  %v1049_v35 = vadd.f32 %v1048_v32, %v1046_v34 }
 0x161   : > { %v1036_v0 = vadd.f32 %v1035_v6, %v1033_v33  ;;  %v1047_v46 = vmul.f32 %v1033_v33, %v1033_v33  ;;  %1061 = vst [vmem:[%s1683_s5 + $0x18] sm:$0xff] %v1033_v33 }
 0x163   : > { %v1037_v10 = vrot.slane %v1036_v0, 4  ;;  %v1050_v36 = vadd.f32 %v1049_v35, %v1047_v46 }
 0x165   : > { %v1038_v48 = vadd.f32 %v1037_v10, %v1036_v0  ;;  %v1051_v37 = vrot.slane %v1050_v36, 4 }
 0x167   : > { %v1039_v38 = vrot.slane %v1038_v48, 2  ;;  %v1052_v39 = vadd.f32 %v1051_v37, %v1050_v36 }
 0x169   : > { %v1040_v40 = vadd.f32 %v1039_v38, %v1038_v48  ;;  %v1053_v41 = vrot.slane %v1052_v39, 2 }
 0x16b   : > { %v1041_v42 = vrot.slane %v1040_v40, 1  ;;  %v1054_v43 = vadd.f32 %v1053_v41, %v1052_v39 }
 0x16d   : > { %v1042_v44 = vadd.f32 %v1041_v42, %v1040_v40  ;;  %v1055_v45 = vrot.slane %v1054_v43, 1 }
 0x16f   : > { %1043 = vst [vmem:[%s1692_s16] sm:$0x1] %v1042_v44  ;;  %v1056_v47 = vadd.f32 %v1055_v45, %v1054_v43 }
 0x171   : > { %1057 = vst [vmem:[%s1692_s16 + $0x1] sm:$0x1] %v1056_v47 }
 0x172 PF: > { %s15_s19 = sadd.s32 1, %s1613_s19   ;;  %s2229_s15 = smov %s1605_s17 }
 0x173   : > { %p12_p8 = scmp.ge.s32.totalorder %s15_s19, 6   ;;  %s2230_s16 = smov %s1609_s18 }
 0x174   : > { %s2231_s17 = smov %s2234_s20  ;;  %s2232_s18 = smov %s2238_s21 }
 0x175   :  { %14 = sbr.rel (!%p12_p8) target bundleno = 3 (0x3), region = 119 }
 0x17a   :  { %1114 = vsyncmov [#allocation3] }
 0x17d   :  { %s1115_s5 = vpop.sfrf %1114 }
 0x17e   :  { %p1225_p9 = scmp.ne.s32.totalorder %s1115_s5, 0 }
 0x180   :  { %1119 = shalt.err (%p1225_p9)  }

// kernel: unet_forward.13
= control target key start
LH: loop header
LB: loop body
LE: loop exit
PB: predicated region body
PF: predicated region fallthrough
CT: control target
= control target key end

     0   :  { %s1813_s21 = smov 0   ;;  %s1815_s22 = smov 0   ;;  %s2405_s0 = inlined_call_operand.vmem [shape: f32[2,10,10,128], index: 0, kind: input, shape index: {}]   ;;  %s2406_s1 = inlined_call_operand.vmem [shape: f32[1152,128], index: 1, kind: input, shape index: {}]   ;;  %s2407_s2 = inlined_call_operand.vmem [shape: f32[1,128], index: 2, kind: input, shape index: {}]   ;;  %s2408_s3 = inlined_call_operand.vmem [shape: f32[1,128], index: 3, kind: input, shape index: {}]   ;;  %s2409_s4 = inlined_call_operand.vmem [shape: f32[1,128], index: 4, kind: input, shape index: {}]   ;;  %s2410_s5 = inlined_call_operand.vmem [shape: f32[2,8,8,128], index: 5, kind: output, shape index: {0}]   ;;  %s2411_s6 = inlined_call_operand.vmem [shape: f32[2,2,2,128], index: 6, kind: output, shape index: {1}]  }
   0x1   :  { %s1817_s23 = smov 0   ;;  %s1819_s24 = smov 0  }
   0x2   :  { %s1821_s25 = smov 0  }
   0x3 LB: > { %s26_s26 = sadd.s32 1, %s1765_s23  ;;  %s29_s27 = sadd.s32 1, %s1769_s24  ;;  %s1773_s25 = sphi %s1821_s25, %s17_s25   ;;  %s1769_s24 = sphi %s1819_s24, %s2417_s24   ;;  %s1765_s23 = sphi %s1817_s23, %s2416_s23   ;;  %s1761_s22 = sphi %s1815_s22, %s2415_s22   ;;  %s1757_s21 = sphi %s1813_s21, %s2414_s21  }
   0x4   : > { %p27_p0 = scmp.ge.s32.totalorder %s26_s26, 2  ;;  %p1361_p1 = scmp.ge.s32.totalorder %s1773_s25, 1 }
   0x5   : > { %p197_p2 = scmp.lt.s32.totalorder %s1773_s25, 5 }
   0x6   : > { %s2419_s26 = smov (%p27_p0, %s26_s26), 0  ;;  %s2421_s27 = smov (!%p27_p0, %s29_s27), %s1769_s24 }
   0x7   : > { %p198_p3 = pnand %p1361_p1, %p197_p2  ;;  %p31_p4 = scmp.ge.s32.totalorder %s2421_s27, 2 }
   0x8   : > { %s1362_s28 = sshll.u32 (!%p198_p3), %s1757_s21, 2  ;;  %p233_p5 = scmp.lt.s32.totalorder (!%p198_p3), %s1761_s22, 1 }
   0x9   : > { %s2423_s27 = smov (%p31_p4, %s2421_s27), 0  ;;  %201 = sbr.rel (%p198_p3) target bundleno = 400 (0x190), region = 36 }
   0xa   : > { %2412 = sst [smem:[#allocation6_spill]] %s2423_s27  ;;  %p235_p6 = scmp.lt.s32.totalorder (!%p198_p3), %s1362_s28, 7 }
   0xb   : > { %p244_p7 = scmp.lt.s32.totalorder (!%p198_p3), %s1757_s21, 1  ;;  %s1383_s8 = sshll.u32 (!%p198_p3), %s1757_s21, 6 }
   0xc   : > { %s252_s10 = smul.u32 (!%p198_p3), 160, %s1761_s22 }
   0xe   : > { %s234_s29 = scalar_select %p233_p5, %s1761_s22, 1 }
   0xf   : > { %s2425_s28 = smov (!%p235_p6, %s1362_s28), 7  ;;  %s253_s16 = sadd.s32 %s1383_s8, %s252_s10 }
  0x10   : > { %s1363_s30 = sshll.u32 %s234_s29, 3  ;;  %s1365_s14 = sshll.u32 %s234_s29, 1 }
  0x11   : > { %s238_s7 = sadd.s32 %s1363_s30, %s2425_s28  ;;  %s254_s20 = scalar_lea.vmem %s2405_s0, %s253_s16 }
  0x12   : > { %s1364_s9 = sshll.u32 %s238_s7, 3  ;;  %v303_v0 = vld [vmem:[%s254_s20] sm:$0xff]  ;;  %v305_v1 = vld [vmem:[%s254_s20 + $0x10] sm:$0xff]  ;;  %v1369_v6 = vld [vmem:[%s254_s20 + $0x8] sm:$0x3] }
  0x13   : > { %s1856_s13 = scalar_lea.vmem %s2410_s5, %s1364_s9  ;;  %v307_v2 = vld [vmem:[%s254_s20 + $0x20] sm:$0xff]  ;;  %304 = vst [vmem:[#allocation2] sm:$0xff] %v303_v0  ;;  %306 = vst [vmem:[#allocation2 + $0x10] sm:$0xff] %v305_v1  ;;  %v309_v3 = vld [vmem:[%s254_s20 + $0x30] sm:$0xff] }
  0x14   : > { %s245_s15 = scalar_select %p244_p7, %s1757_s21, 1  ;;  %308 = vst [vmem:[#allocation2 + $0x20] sm:$0xff] %v307_v2  ;;  %v311_v4 = vld [vmem:[%s254_s20 + $0x40] sm:$0xff]  ;;  %v313_v5 = vld [vmem:[%s254_s20 + $0x50] sm:$0xff]  ;;  %310 = vst [vmem:[#allocation2 + $0x30] sm:$0xff] %v309_v3 }
  0x15   : > { %312 = vst [vmem:[#allocation2 + $0x40] sm:$0xff] %v311_v4  ;;  %314 = vst [vmem:[#allocation2 + $0x50] sm:$0xff] %v313_v5  ;;  %v1370_v7 = vld [vmem:[%s254_s20 + $0x18] sm:$0x3]  ;;  %v1371_v8 = vld [vmem:[%s254_s20 + $0x28] sm:$0x3] }
  0x16   : > { %s247_s17 = sadd.s32 %s1365_s14, %s245_s15  ;;  %326 = vst [vmem:[#allocation2 + $0x8] sm:$0x3] %v1369_v6  ;;  %328 = vst [vmem:[#allocation2 + $0x18] sm:$0x3] %v1370_v7  ;;  %v1372_v9 = vld [vmem:[%s254_s20 + $0x38] sm:$0x3] }
  0x17   : > { %s1366_s27 = sshll.u32 %s247_s17, 1  ;;  %330 = vst [vmem:[#allocation2 + $0x28] sm:$0x3] %v1371_v8  ;;  %v1373_v10 = vld [vmem:[%s254_s20 + $0x48] sm:$0x3] }
  0x18   : > { %s1865_s22 = scalar_lea.vmem %s2411_s6, %s1366_s27  ;;  %v1374_v11 = vld [vmem:[%s254_s20 + $0x58] sm:$0x3]  ;;  %332 = vst [vmem:[#allocation2 + $0x38] sm:$0x3] %v1372_v9  ;;  %334 = vst [vmem:[#allocation2 + $0x48] sm:$0x3] %v1373_v10 }
  0x19   : > { %336 = vst [vmem:[#allocation2 + $0x58] sm:$0x3] %v1374_v11 }
  0x1a   : > { %340 = vsyncadd [#allocation3], 960 }
  0x1b   : > { %1753 = dma.done.wait [#allocation3], 960 }
  0x1c   : > { %1754 = vsyncadd [#allocation3], 4294966336  ;;  %v345_v12 = vld [vmem:[#allocation2] sm:$0xff]  ;;  %v347_v17 = vld [vmem:[#allocation2 + $0x10] sm:$0xff]  ;;  %v1775_v54 = vmov 0.0   ;;  %p1377_p8 = scmp.ne.s32.totalorder %s1757_s21, 0 }
  0x1d   : > { %v1375_v13 = vld [vmem:[%s2408_s3] ss:$0 sm:$0xff]  ;;  %v346_v16 = vld [vmem:[#allocation2 + $0x8] sm:$0x3]  ;;  %v348_v18 = vld [vmem:[#allocation2 + $0x18] sm:$0x3] }
  0x1e   : > { %v1376_v14 = vld [vmem:[%s2409_s4] ss:$0 sm:$0xff]  ;;  %v364_v15 = vmul.f32 %v1375_v13, %v345_v12  ;;  %v365_v19 = vmul.f32 %v1375_v13, %v346_v16  ;;  %v366_v20 = vmul.f32 %v1375_v13, %v347_v17  ;;  %v367_v21 = vmul.f32 %v1375_v13, %v348_v18  ;;  %v350_v23 = vld [vmem:[#allocation2 + $0x28] sm:$0x3]  ;;  %v351_v24 = vld [vmem:[#allocation2 + $0x30] sm:$0xff] }
  0x1f   : > { %v349_v22 = vld [vmem:[#allocation2 + $0x20] sm:$0xff]  ;;  %v369_v27 = vmul.f32 %v1375_v13, %v350_v23  ;;  %v370_v28 = vmul.f32 %v1375_v13, %v351_v24  ;;  %v352_v29 = vld [vmem:[#allocation2 + $0x38] sm:$0x3]  ;;  %v354_v39 = vld [vmem:[#allocation2 + $0x48] sm:$0x3] }
  0x20   : > { %v383_v25 = vadd.f32 %v1376_v14, %v364_v15  ;;  %v368_v26 = vmul.f32 %v1375_v13, %v349_v22  ;;  %v384_v30 = vadd.f32 %v1376_v14, %v365_v19  ;;  %v385_v31 = vadd.f32 %v1376_v14, %v366_v20  ;;  %v353_v34 = vld [vmem:[#allocation2 + $0x40] sm:$0xff]  ;;  %v355_v40 = vld [vmem:[#allocation2 + $0x50] sm:$0xff]  ;;  %v356_v41 = vld [vmem:[#allocation2 + $0x58] sm:$0x3] }
  0x21   : > { %v386_v32 = vadd.f32 %v1376_v14, %v367_v21  ;;  %v371_v33 = vmul.f32 %v1375_v13, %v352_v29  ;;  %v388_v37 = vadd.f32 %v1376_v14, %v369_v27  ;;  %v389_v38 = vadd.f32 %v1376_v14, %v370_v28 }
  0x22   : > { %v395_v35 = vmax.f32 %v383_v25, 0.0  ;;  %v387_v36 = vadd.f32 %v1376_v14, %v368_v26  ;;  %v396_v42 = vmax.f32 %v384_v30, 0.0  ;;  %v397_v43 = vmax.f32 %v385_v31, 0.0 }
  0x23   : > { %v398_v44 = vmax.f32 %v386_v32, 0.0  ;;  %v390_v45 = vadd.f32 %v1376_v14, %v371_v33  ;;  %v400_v47 = vmax.f32 %v388_v37, 0.0  ;;  %v401_v48 = vmax.f32 %v389_v38, 0.0 }
  0x24   : > { %407 = vst [vmem:[#allocation2] sm:$0xff] %v395_v35  ;;  %v399_v46 = vmax.f32 %v387_v36, 0.0  ;;  %v372_v49 = vmul.f32 %v1375_v13, %v353_v34  ;;  %408 = vst [vmem:[#allocation2 + $0x8] sm:$0x3] %v396_v42  ;;  %v373_v51 = vmul.f32 %v1375_v13, %v354_v39  ;;  %v374_v52 = vmul.f32 %v1375_v13, %v355_v40 }
  0x25   : > { %409 = vst [vmem:[#allocation2 + $0x10] sm:$0xff] %v397_v43  ;;  %410 = vst [vmem:[#allocation2 + $0x18] sm:$0x3] %v398_v44  ;;  %v402_v50 = vmax.f32 %v390_v45, 0.0  ;;  %v375_v53 = vmul.f32 %v1375_v13, %v356_v41 }
  0x26   : > { %419 = vst [vmem:[#allocation2] sm:$0x1] %v1775_v54  ;;  %411 = vst [vmem:[#allocation2 + $0x20] sm:$0xff] %v399_v46  ;;  %v391_v55 = vadd.f32 %v1376_v14, %v372_v49  ;;  %v392_v56 = vadd.f32 %v1376_v14, %v373_v51  ;;  %v393_v57 = vadd.f32 %v1376_v14, %v374_v52 }
  0x27   : > { %412 = vst [vmem:[#allocation2 + $0x28] sm:$0x3] %v400_v47  ;;  %413 = vst [vmem:[#allocation2 + $0x30] sm:$0xff] %v401_v48  ;;  %v394_v58 = vadd.f32 %v1376_v14, %v375_v53 }
  0x28   : > { %420 = vst [vmem:[#allocation2 + $0x10] sm:$0x1] %v1775_v54  ;;  %425 = vst [vmem:[#allocation2 + $0x9] sm:$0x1] %v1775_v54  ;;  %v403_v59 = vmax.f32 %v391_v55, 0.0  ;;  %v404_v60 = vmax.f32 %v392_v56, 0.0 }
  0x29   : > { %426 = vst [vmem:[#allocation2 + $0x19] sm:$0x1] %v1775_v54  ;;  %414 = vst [vmem:[#allocation2 + $0x38] sm:$0x3] %v402_v50  ;;  %v405_v61 = vmax.f32 %v393_v57, 0.0  ;;  %v406_v62 = vmax.f32 %v394_v58, 0.0 }
  0x2a   : > { %421 = vst [vmem:[#allocation2 + $0x20] sm:$0x1] %v1775_v54  ;;  %422 = vst [vmem:[#allocation2 + $0x30] sm:$0x1] %v1775_v54 }
  0x2b   : > { %427 = vst [vmem:[#allocation2 + $0x29] sm:$0x1] %v1775_v54  ;;  %428 = vst [vmem:[#allocation2 + $0x39] sm:$0x1] %v1775_v54  ;;  %434 = sbr.rel (%p1377_p8) target bundleno = 50 (0x32), region = 77 }
  0x2c   : > { %415 = vst [vmem:[#allocation2 + $0x40] sm:$0xff] %v403_v59  ;;  %416 = vst [vmem:[#allocation2 + $0x48] sm:$0x3] %v404_v60 }
  0x2d   : > { %417 = vst [vmem:[#allocation2 + $0x50] sm:$0xff] %v405_v61  ;;  %418 = vst [vmem:[#allocation2 + $0x58] sm:$0x3] %v406_v62 }
  0x2e   : > { %423 = vst [vmem:[#allocation2 + $0x40] sm:$0x1] %v1775_v54  ;;  %424 = vst [vmem:[#allocation2 + $0x50] sm:$0x1] %v1775_v54 }
  0x2f   : > { %429 = vst [vmem:[#allocation2 + $0x49] sm:$0x1] %v1775_v54  ;;  %430 = vst [vmem:[#allocation2 + $0x59] sm:$0x1] %v1775_v54 }
  0x30   : > { %v1776_v63 = vmov 0.0  }
  0x31   : > { %435 = vst [vmem:[#allocation2] sm:$0xff] %v1776_v63  ;;  %436 = vst [vmem:[#allocation2 + $0x8] sm:$0x3] %v1776_v63 }
  0x32 PF: > { %p1378_p9 = scmp.ne.s32.totalorder %s1757_s21, 1 }
  0x34   : > { %440 = sbr.rel (%p1378_p9) target bundleno = 59 (0x3b), region = 81 }
  0x39   : > { %v1777_v0 = vmov 0.0  }
  0x3a   : > { %442 = vst [vmem:[#allocation2 + $0x50] sm:$0xff] %v1777_v0  ;;  %443 = vst [vmem:[#allocation2 + $0x58] sm:$0x3] %v1777_v0 }
  0x3b PF: > { %v587_v1 = vld [vmem:[%s2406_s1 + $0x278] sm:$0xff]  ;;  %v586_v3 = vld [vmem:[%s2406_s1 + $0x270] sm:$0xff]  ;;  %v585_v6 = vld [vmem:[%s2406_s1 + $0x268] sm:$0xff]  ;;  %vm464_vm0 = vcmask 1046528   ;;  %vm481_vm1 = vcmask 1045504  }
  0x3c   : > { %v571_v2 = vld [vmem:[%s2406_s1 + $0x1f8] sm:$0xff]  ;;  %1384 = vmatprep.subr.mxu0 %v587_v1  ;;  %v570_v5 = vld [vmem:[%s2406_s1 + $0x1f0] sm:$0xff]  ;;  %v569_v8 = vld [vmem:[%s2406_s1 + $0x1e8] sm:$0xff] }
  0x3d   : > { %v603_v4 = vld [vmem:[%s2406_s1 + $0x2f8] sm:$0xff]  ;;  %1385 = vmatpush3.msra.mxu0 %v571_v2  ;;  %v602_v7 = vld [vmem:[%s2406_s1 + $0x2f0] sm:$0xff]  ;;  %v601_v9 = vld [vmem:[%s2406_s1 + $0x2e8] sm:$0xff] }
  0x3e   : > { %1576 = vmatprep.subr.mxu1 %v603_v4  ;;  %1386 = vmatprep.subr.mxu0 %v586_v3  ;;  %v584_v10 = vld [vmem:[%s2406_s1 + $0x260] sm:$0xff]  ;;  %v583_v13 = vld [vmem:[%s2406_s1 + $0x258] sm:$0xff]  ;;  %v582_v16 = vld [vmem:[%s2406_s1 + $0x250] sm:$0xff] }
  0x3f   : > { %1577 = vmatpush3.msra.mxu1 %v603_v4  ;;  %1387 = vmatpush3.msra.mxu0 %v570_v5  ;;  %v568_v11 = vld [vmem:[%s2406_s1 + $0x1e0] sm:$0xff]  ;;  %v567_v14 = vld [vmem:[%s2406_s1 + $0x1d8] sm:$0xff]  ;;  %v566_v17 = vld [vmem:[%s2406_s1 + $0x1d0] sm:$0xff] }
  0x40   : > { %1578 = vmatprep.subr.mxu1 %v602_v7  ;;  %1388 = vmatprep.subr.mxu0 %v585_v6  ;;  %v600_v12 = vld [vmem:[%s2406_s1 + $0x2e0] sm:$0xff]  ;;  %v599_v15 = vld [vmem:[%s2406_s1 + $0x2d8] sm:$0xff]  ;;  %v598_v18 = vld [vmem:[%s2406_s1 + $0x2d0] sm:$0xff] }
  0x41   : > { %1579 = vmatpush3.msra.mxu1 %v602_v7  ;;  %1389 = vmatpush3.msra.mxu0 %v569_v8  ;;  %v581_v19 = vld [vmem:[%s2406_s1 + $0x248] sm:$0xff]  ;;  %v580_v22 = vld [vmem:[%s2406_s1 + $0x240] sm:$0xff]  ;;  %v579_v25 = vld [vmem:[%s2406_s1 + $0x238] sm:$0xff] }
  0x42   : > { %1580 = vmatprep.subr.mxu1 %v601_v9  ;;  %1390 = vmatprep.subr.mxu0 %v584_v10  ;;  %v565_v20 = vld [vmem:[%s2406_s1 + $0x1c8] sm:$0xff]  ;;  %v564_v23 = vld [vmem:[%s2406_s1 + $0x1c0] sm:$0xff]  ;;  %v563_v26 = vld [vmem:[%s2406_s1 + $0x1b8] sm:$0xff] }
  0x43   : > { %1581 = vmatpush3.msra.mxu1 %v601_v9  ;;  %1391 = vmatpush3.msra.mxu0 %v568_v11  ;;  %v597_v21 = vld [vmem:[%s2406_s1 + $0x2c8] sm:$0xff]  ;;  %v596_v24 = vld [vmem:[%s2406_s1 + $0x2c0] sm:$0xff]  ;;  %v595_v27 = vld [vmem:[%s2406_s1 + $0x2b8] sm:$0xff] }
  0x44   : > { %1582 = vmatprep.subr.mxu1 %v600_v12  ;;  %1392 = vmatprep.subr.mxu0 %v583_v13  ;;  %v578_v28 = vld [vmem:[%s2406_s1 + $0x230] sm:$0xff]  ;;  %v577_v31 = vld [vmem:[%s2406_s1 + $0x228] sm:$0xff]  ;;  %v576_v34 = vld [vmem:[%s2406_s1 + $0x220] sm:$0xff] }
  0x45   : > { %1583 = vmatpush3.msra.mxu1 %v600_v12  ;;  %1393 = vmatpush3.msra.mxu0 %v567_v14  ;;  %v562_v29 = vld [vmem:[%s2406_s1 + $0x1b0] sm:$0xff]  ;;  %v561_v32 = vld [vmem:[%s2406_s1 + $0x1a8] sm:$0xff]  ;;  %v560_v35 = vld [vmem:[%s2406_s1 + $0x1a0] sm:$0xff] }
  0x46   : > { %1584 = vmatprep.subr.mxu1 %v599_v15  ;;  %1394 = vmatprep.subr.mxu0 %v582_v16  ;;  %v594_v30 = vld [vmem:[%s2406_s1 + $0x2b0] sm:$0xff]  ;;  %v593_v33 = vld [vmem:[%s2406_s1 + $0x2a8] sm:$0xff]  ;;  %v592_v36 = vld [vmem:[%s2406_s1 + $0x2a0] sm:$0xff] }
  0x47   : > { %1585 = vmatpush3.msra.mxu1 %v599_v15  ;;  %1395 = vmatpush3.msra.mxu0 %v566_v17  ;;  %v1983_v37 = vld [vmem:[#allocation2 + $0x10] sm:$0xff]  ;;  %v447_v38 = vld [vmem:[#allocation2 + $0x18] sm:$0x3]  ;;  %v573_v47 = vld [vmem:[%s2406_s1 + $0x208] sm:$0xff] }
  0x48   : > { %1586 = vmatprep.subr.mxu1 %v598_v18  ;;  %1396 = vmatprep.subr.mxu0 %v581_v19  ;;  %v575_v39 = vld [vmem:[%s2406_s1 + $0x218] sm:$0xff]  ;;  %v574_v42 = vld [vmem:[%s2406_s1 + $0x210] sm:$0xff]  ;;  %v468_v43 = vrot.slane %v1983_v37, 1  ;;  %v469_v44 = vrot.slane %v447_v38, 1  ;;  %v2007_v48 = vld [vmem:[#allocation2 + $0x20] sm:$0xff]  ;;  %v485_v54 = vrot.slane %v1983_v37, 2 }
  0x49   : > { %1587 = vmatpush3.msra.mxu1 %v598_v18  ;;  %1397 = vmatpush3.msra.mxu0 %v565_v20  ;;  %v559_v40 = vld [vmem:[%s2406_s1 + $0x198] sm:$0xff]  ;;  %v558_v45 = vld [vmem:[%s2406_s1 + $0x190] sm:$0xff]  ;;  %v449_v49 = vld [vmem:[#allocation2 + $0x28] sm:$0x3]  ;;  %v486_v55 = vrot.slane %v447_v38, 2  ;;  %v488_v57 = vrot.slane %v2007_v48, 2 }
  0x4a   : > { %1588 = vmatprep.subr.mxu1 %v597_v21  ;;  %1398 = vmatprep.subr.mxu0 %v580_v22  ;;  %v591_v41 = vld [vmem:[%s2406_s1 + $0x298] sm:$0xff]  ;;  %v590_v46 = vld [vmem:[%s2406_s1 + $0x290] sm:$0xff]  ;;  %v557_v50 = vld [vmem:[%s2406_s1 + $0x188] sm:$0xff]  ;;  %v2019_v53 = vsel %vm464_vm0, %v468_v43, %v469_v44  ;;  %v489_v58 = vrot.slane %v449_v49, 2  ;;  %v471_v61 = vrot.slane %v2007_v48, 1  ;;  %v472_v62 = vrot.slane %v449_v49, 1 }
  0x4b   : > { %1589 = vmatpush3.msra.mxu1 %v597_v21  ;;  %1399 = vmatpush3.msra.mxu0 %v564_v23  ;;  %v589_v51 = vld [vmem:[%s2406_s1 + $0x288] sm:$0xff]  ;;  %v572_v52 = vld [vmem:[%s2406_s1 + $0x200] sm:$0xff]  ;;  %v529_v60 = vld [vmem:[%s2406_s1 + $0xf8] sm:$0xff]  ;;  %v2035_v63 = vsel %vm481_vm1, %v485_v54, %v486_v55 }
  0x4c   : > { %1590 = vmatprep.subr.mxu1 %v596_v24  ;;  %1400 = vmatprep.subr.mxu0 %v579_v25  ;;  %v556_v56 = vld [vmem:[%s2406_s1 + $0x180] sm:$0xff]  ;;  %v513_v0 = vld [vmem:[%s2406_s1 + $0x78] sm:$0xff]  ;;  %v2042_v1 = vsel %vm481_vm1, %v488_v57, %v489_v58  ;;  %v528_v2 = vld [vmem:[%s2406_s1 + $0xf0] sm:$0xff]  ;;  %v2055_v5 = vsel %vm464_vm0, %v471_v61, %v472_v62 }
  0x4d   : > { %1591 = vmatpush3.msra.mxu1 %v596_v24  ;;  %1401 = vmatpush3.msra.mxu0 %v563_v26  ;;  %v588_v59 = vld [vmem:[%s2406_s1 + $0x280] sm:$0xff]  ;;  %v545_v3 = vld [vmem:[%s2406_s1 + $0x178] sm:$0xff]  ;;  %v512_v4 = vld [vmem:[%s2406_s1 + $0x70] sm:$0xff] }
  0x4e   : > { %1592 = vmatprep.subr.mxu1 %v595_v27  ;;  %1402 = vmatprep.subr.mxu0 %v578_v28  ;;  %v527_v6 = vld [vmem:[%s2406_s1 + $0xe8] sm:$0xff]  ;;  %v544_v7 = vld [vmem:[%s2406_s1 + $0x170] sm:$0xff]  ;;  %v526_v10 = vld [vmem:[%s2406_s1 + $0xe0] sm:$0xff] }
  0x4f   : > { %1593 = vmatpush3.msra.mxu1 %v595_v27  ;;  %1403 = vmatpush3.msra.mxu0 %v562_v29  ;;  %v511_v8 = vld [vmem:[%s2406_s1 + $0x68] sm:$0xff]  ;;  %v510_v11 = vld [vmem:[%s2406_s1 + $0x60] sm:$0xff]  ;;  %v525_v13 = vld [vmem:[%s2406_s1 + $0xd8] sm:$0xff] }
  0x50   : > { %1594 = vmatprep.subr.mxu1 %v594_v30  ;;  %1404 = vmatprep.subr.mxu0 %v577_v31  ;;  %v543_v9 = vld [vmem:[%s2406_s1 + $0x168] sm:$0xff]  ;;  %v542_v12 = vld [vmem:[%s2406_s1 + $0x160] sm:$0xff]  ;;  %v509_v14 = vld [vmem:[%s2406_s1 + $0x58] sm:$0xff] }
  0x51   : > { %1595 = vmatpush3.msra.mxu1 %v594_v30  ;;  %1405 = vmatpush3.msra.mxu0 %v561_v32  ;;  %v541_v15 = vld [vmem:[%s2406_s1 + $0x158] sm:$0xff]  ;;  %v524_v16 = vld [vmem:[%s2406_s1 + $0xd0] sm:$0xff]  ;;  %v523_v19 = vld [vmem:[%s2406_s1 + $0xc8] sm:$0xff] }
  0x52   : > { %1596 = vmatprep.subr.mxu1 %v593_v33  ;;  %1406 = vmatprep.subr.mxu0 %v576_v34  ;;  %v508_v17 = vld [vmem:[%s2406_s1 + $0x50] sm:$0xff]  ;;  %v507_v20 = vld [vmem:[%s2406_s1 + $0x48] sm:$0xff]  ;;  %v522_v22 = vld [vmem:[%s2406_s1 + $0xc0] sm:$0xff] }
  0x53   : > { %1597 = vmatpush3.msra.mxu1 %v593_v33  ;;  %1407 = vmatpush3.msra.mxu0 %v560_v35  ;;  %v540_v18 = vld [vmem:[%s2406_s1 + $0x150] sm:$0xff]  ;;  %v539_v21 = vld [vmem:[%s2406_s1 + $0x148] sm:$0xff]  ;;  %v451_v24 = vld [vmem:[#allocation2 + $0x38] sm:$0x3] }
  0x54   : > { %1598 = vmatprep.subr.mxu1 %v592_v36  ;;  %1408 = vmatprep.subr.mxu0 %v575_v39  ;;  %v2111_v23 = vld [vmem:[#allocation2 + $0x30] sm:$0xff]  ;;  %v506_v25 = vld [vmem:[%s2406_s1 + $0x40] sm:$0xff]  ;;  %v521_v27 = vld [vmem:[%s2406_s1 + $0xb8] sm:$0xff]  ;;  %v475_v31 = vrot.slane %v451_v24, 1 }
  0x55   : > { %1599 = vmatpush3.msra.mxu1 %v592_v36  ;;  %1409 = vmatpush3.msra.mxu0 %v559_v40  ;;  %v538_v26 = vld [vmem:[%s2406_s1 + $0x140] sm:$0xff]  ;;  %v505_v28 = vld [vmem:[%s2406_s1 + $0x38] sm:$0xff]  ;;  %v474_v30 = vrot.slane %v2111_v23, 1  ;;  %v520_v32 = vld [vmem:[%s2406_s1 + $0xb0] sm:$0xff]  ;;  %v491_v39 = vrot.slane %v2111_v23, 2  ;;  %v492_v40 = vrot.slane %v451_v24, 2 }
  0x56   : > { %1600 = vmatprep.subr.mxu1 %v591_v41  ;;  %1410 = vmatprep.subr.mxu0 %v574_v42  ;;  %v537_v29 = vld [vmem:[%s2406_s1 + $0x138] sm:$0xff]  ;;  %v504_v33 = vld [vmem:[%s2406_s1 + $0x30] sm:$0xff]  ;;  %v2138_v35 = vld [vmem:[#allocation2 + $0x40] sm:$0xff] }
  0x57   : > { %1601 = vmatpush3.msra.mxu1 %v591_v41  ;;  %1411 = vmatpush3.msra.mxu0 %v558_v45  ;;  %v536_v34 = vld [vmem:[%s2406_s1 + $0x130] sm:$0xff]  ;;  %v453_v36 = vld [vmem:[#allocation2 + $0x48] sm:$0x3]  ;;  %v2148_v42 = vsel %vm464_vm0, %v474_v30, %v475_v31  ;;  %v518_v43 = vld [vmem:[%s2406_s1 + $0xa0] sm:$0xff]  ;;  %v552_v45 = vrot.slane %v2138_v35, 2 }
  0x58   : > { %1602 = vmatprep.subr.mxu1 %v590_v46  ;;  %1412 = vmatprep.subr.mxu0 %v573_v47  ;;  %v519_v38 = vld [vmem:[%s2406_s1 + $0xa8] sm:$0xff]  ;;  %v548_v47 = vrot.slane %v2138_v35, 1  ;;  %v549_v49 = vrot.slane %v453_v36, 1  ;;  %v534_v54 = vld [vmem:[%s2406_s1 + $0x120] sm:$0xff]  ;;  %v533_v61 = vld [vmem:[%s2406_s1 + $0x118] sm:$0xff] }
  0x59   : > { %1603 = vmatpush3.msra.mxu1 %v590_v46  ;;  %1413 = vmatpush3.msra.mxu0 %v557_v50  ;;  %v503_v41 = vld [vmem:[%s2406_s1 + $0x28] sm:$0xff]  ;;  %v553_v46 = vrot.slane %v453_v36, 2  ;;  %v502_v50 = vld [vmem:[%s2406_s1 + $0x20] sm:$0xff]  ;;  %v996_v31 = vld [vmem:[%s2406_s1 + $0x450] sm:$0xff] }
  0x5a   : > { %1604 = vmatprep.subr.mxu1 %v589_v51  ;;  %1414 = vmatprep.subr.mxu0 %v572_v52  ;;  %v535_v44 = vld [vmem:[%s2406_s1 + $0x128] sm:$0xff]  ;;  %v517_v52 = vld [vmem:[%s2406_s1 + $0x98] sm:$0xff]  ;;  %v444_v57 = vld [vmem:[#allocation2] sm:$0xff] }
  0x5b   : > { %668 = vmatprep.mubr.f32.mxu0 %v2019_v53  ;;  %1415 = vmatpush3.msra.mxu0 %v556_v56  ;;  %v2173_v55 = vsel %vm481_vm1, %v552_v45, %v553_v46  ;;  %v501_v56 = vld [vmem:[%s2406_s1 + $0x18] sm:$0xff]  ;;  %v445_v58 = vld [vmem:[#allocation2 + $0x8] sm:$0x3]  ;;  %v465_v62 = vrot.slane %v444_v57, 1  ;;  %v982_v24 = vld [vmem:[%s2406_s1 + $0x3e0] sm:$0xff] }
  0x5c   : > { %1605 = vmatpush3.msra.mxu1 %v589_v51  ;;  %669 = vmatmul.mubr.f32.vlgmr.msra.gmra.mxu0 %v1983_v37  ;;  %v2163_v51 = vsel %vm481_vm1, %v491_v39, %v492_v40  ;;  %v979_v30 = vld [vmem:[%s2406_s1 + $0x3c8] sm:$0xff]  ;;  %v962_v36 = vld [vmem:[%s2406_s1 + $0x340] sm:$0xff]  ;;  %v961_v40 = vld [vmem:[%s2406_s1 + $0x338] sm:$0xff] }
  0x5d   : > { %1606 = vmatprep.subr.mxu1 %v588_v59  ;;  %1448 = vmatprep.subr.mxu0 %v529_v60  ;;  %v516_v60 = vld [vmem:[%s2406_s1 + $0x90] sm:$0xff]  ;;  %v994_v39 = vld [vmem:[%s2406_s1 + $0x440] sm:$0xff]  ;;  %v975_v45 = vld [vmem:[%s2406_s1 + $0x3a8] sm:$0xff] }
  0x5e   : > { %1607 = vmatpush3.msra.mxu1 %v588_v59  ;;  %1608 = vmatprep.mubr.f32.mxu1 %v2035_v63  ;;  %v2180_v59 = vsel %vm464_vm0, %v548_v47, %v549_v49  ;;  %v992_v46 = vld [vmem:[%s2406_s1 + $0x430] sm:$0xff]  ;;  %v959_v47 = vld [vmem:[%s2406_s1 + $0x328] sm:$0xff]  ;;  %v974_v49 = vld [vmem:[%s2406_s1 + $0x3a0] sm:$0xff] }
  0x5f   : > { %1449 = vmatpush3.msra.mxu0 %v513_v0  ;;  %1609 = vmatmul.mubr.f32.vlgmr.msra.gmra.mxu1 %v2042_v1  ;;  %v466_v0 = vrot.slane %v445_v58, 1 }
  0x60   : > { %1450 = vmatprep.subr.mxu0 %v528_v2  ;;  %1614 = vmatprep.subr.mxu1 %v545_v3  ;;  %v500_v2 = vld [vmem:[%s2406_s1 + $0x10] sm:$0xff] }
  0x61   : > { %1451 = vmatpush3.msra.mxu0 %v512_v4  ;;  %1615 = vmatpush3.msra.mxu1 %v545_v3  ;;  %v532_v3 = vld [vmem:[%s2406_s1 + $0x110] sm:$0xff]  ;;  %v515_v4 = vld [vmem:[%s2406_s1 + $0x88] sm:$0xff] }
  0x62   : > { %673 = vmatprep.mubr.f32.mxu0 %v2055_v5  ;;  %1452 = vmatprep.subr.mxu0 %v527_v6  ;;  %v499_v6 = vld [vmem:[%s2406_s1 + $0x8] sm:$0xff] }
  0x63   : > { %1616 = vmatprep.subr.mxu1 %v544_v7  ;;  %674 = vmatmul.mubr.f32.gmra.mxu0 %v2007_v48 }
  0x64   : > { %1617 = vmatpush3.msra.mxu1 %v544_v7  ;;  %1453 = vmatpush3.msra.mxu0 %v511_v8  ;;  %v531_v7 = vld [vmem:[%s2406_s1 + $0x108] sm:$0xff]  ;;  %v514_v8 = vld [vmem:[%s2406_s1 + $0x80] sm:$0xff] }
  0x65   : > { %1618 = vmatprep.subr.mxu1 %v543_v9  ;;  %1454 = vmatprep.subr.mxu0 %v526_v10  ;;  %v482_v10 = vrot.slane %v444_v57, 2 }
  0x66   : > { %1619 = vmatpush3.msra.mxu1 %v543_v9  ;;  %1455 = vmatpush3.msra.mxu0 %v510_v11  ;;  %v467_v9 = vsel %vm464_vm0, %v465_v62, %v466_v0  ;;  %v483_v11 = vrot.slane %v445_v58, 2  ;;  %v972_v58 = vld [vmem:[%s2406_s1 + $0x390] sm:$0xff]  ;;  %v971_v62 = vld [vmem:[%s2406_s1 + $0x388] sm:$0xff] }
  0x67   : > { %1620 = vmatprep.subr.mxu1 %v542_v12  ;;  %1456 = vmatprep.subr.mxu0 %v525_v13  ;;  %v530_v13 = vld [vmem:[%s2406_s1 + $0x100] sm:$0xff]  ;;  %v988_v0 = vld [vmem:[%s2406_s1 + $0x410] sm:$0xff] }
  0x68   : > { %1621 = vmatpush3.msra.mxu1 %v542_v12  ;;  %1457 = vmatpush3.msra.mxu0 %v509_v14  ;;  %v498_v12 = vld [vmem:[%s2406_s1] sm:$0xff]  ;;  %v985_v14 = vld [vmem:[%s2406_s1 + $0x3f8] sm:$0xff] }
  0x69   : > { %1622 = vmatprep.subr.mxu1 %v541_v15  ;;  %1458 = vmatprep.subr.mxu0 %v524_v16  ;;  %v484_v16 = vsel %vm481_vm1, %v482_v10, %v483_v11 }
  0x6a   : > { %1623 = vmatpush3.msra.mxu1 %v541_v15  ;;  %1459 = vmatpush3.msra.mxu0 %v508_v17  ;;  %v969_v15 = vld [vmem:[%s2406_s1 + $0x378] sm:$0xff]  ;;  %v984_v17 = vld [vmem:[%s2406_s1 + $0x3f0] sm:$0xff] }
  0x6b   : > { %1624 = vmatprep.subr.mxu1 %v540_v18  ;;  %1460 = vmatprep.subr.mxu0 %v523_v19  ;;  %v968_v19 = vld [vmem:[%s2406_s1 + $0x370] sm:$0xff] }
  0x6c   : > { %1625 = vmatpush3.msra.mxu1 %v540_v18  ;;  %1461 = vmatpush3.msra.mxu0 %v507_v20  ;;  %v1001_v18 = vld [vmem:[%s2406_s1 + $0x478] sm:$0xff]  ;;  %v983_v20 = vld [vmem:[%s2406_s1 + $0x3e8] sm:$0xff] }
  0x6d   : > { %1626 = vmatprep.subr.mxu1 %v539_v21  ;;  %1462 = vmatprep.subr.mxu0 %v522_v22  ;;  %v967_v22 = vld [vmem:[%s2406_s1 + $0x368] sm:$0xff] }
  0x6e   : > { %1627 = vmatpush3.msra.mxu1 %v539_v21  ;;  %1463 = vmatpush3.msra.mxu0 %v506_v25  ;;  %v1000_v21 = vld [vmem:[%s2406_s1 + $0x470] sm:$0xff]  ;;  %v981_v25 = vld [vmem:[%s2406_s1 + $0x3d8] sm:$0xff] }
  0x6f   : > { %1628 = vmatprep.subr.mxu1 %v538_v26  ;;  %1464 = vmatprep.subr.mxu0 %v521_v27  ;;  %v980_v27 = vld [vmem:[%s2406_s1 + $0x3d0] sm:$0xff] }
  0x70   : > { %1629 = vmatpush3.msra.mxu1 %v538_v26  ;;  %1465 = vmatpush3.msra.mxu0 %v505_v28  ;;  %v965_v26 = vld [vmem:[%s2406_s1 + $0x358] sm:$0xff] }
  0x71   : > { %1630 = vmatprep.subr.mxu1 %v537_v29  ;;  %1466 = vmatprep.subr.mxu0 %v520_v32  ;;  %v997_v28 = vld [vmem:[%s2406_s1 + $0x458] sm:$0xff]  ;;  %v963_v32 = vld [vmem:[%s2406_s1 + $0x348] sm:$0xff] }
  0x72   : > { %1631 = vmatpush3.msra.mxu1 %v537_v29  ;;  %1467 = vmatpush3.msra.mxu0 %v504_v33  ;;  %v964_v29 = vld [vmem:[%s2406_s1 + $0x350] sm:$0xff]  ;;  %v978_v33 = vld [vmem:[%s2406_s1 + $0x3c0] sm:$0xff] }
  0x73   : > { %1632 = vmatprep.subr.mxu1 %v536_v34  ;;  %1468 = vmatprep.subr.mxu0 %v519_v38  ;;  %v977_v38 = vld [vmem:[%s2406_s1 + $0x3b8] sm:$0xff] }
  0x74   : > { %1633 = vmatpush3.msra.mxu1 %v536_v34  ;;  %1469 = vmatpush3.msra.mxu0 %v503_v41  ;;  %v995_v34 = vld [vmem:[%s2406_s1 + $0x448] sm:$0xff]  ;;  %v976_v41 = vld [vmem:[%s2406_s1 + $0x3b0] sm:$0xff] }
  0x75   : > { %678 = vmatprep.mubr.f32.mxu0 %v2148_v42  ;;  %1470 = vmatprep.subr.mxu0 %v518_v43  ;;  %v993_v43 = vld [vmem:[%s2406_s1 + $0x438] sm:$0xff] }
  0x76   : > { %1634 = vmatprep.subr.mxu1 %v535_v44  ;;  %679 = vmatmul.mubr.f32.gmra.mxu0 %v2111_v23 }
  0x77   : > { %1635 = vmatpush3.msra.mxu1 %v535_v44  ;;  %1471 = vmatpush3.msra.mxu0 %v502_v50  ;;  %v960_v44 = vld [vmem:[%s2406_s1 + $0x330] sm:$0xff]  ;;  %v991_v50 = vld [vmem:[%s2406_s1 + $0x428] sm:$0xff] }
  0x78   : > { %1611 = vmatprep.mubr.f32.mxu1 %v2163_v51  ;;  %1472 = vmatprep.subr.mxu0 %v517_v52  ;;  %v958_v52 = vld [vmem:[%s2406_s1 + $0x320] sm:$0xff] }
  0x79   : > { %1636 = vmatprep.subr.mxu1 %v534_v54  ;;  %1612 = vmatmul.mubr.f32.gmra.mxu1 %v2173_v55 }
  0x7a   : > { %1473 = vmatpush3.msra.mxu0 %v501_v56  ;;  %1637 = vmatpush3.msra.mxu1 %v534_v54  ;;  %v973_v54 = vld [vmem:[%s2406_s1 + $0x398] sm:$0xff]  ;;  %v990_v56 = vld [vmem:[%s2406_s1 + $0x420] sm:$0xff] }
  0x7b   : > { %683 = vmatprep.mubr.f32.mxu0 %v2180_v59  ;;  %1474 = vmatprep.subr.mxu0 %v516_v60  ;;  %v989_v60 = vld [vmem:[%s2406_s1 + $0x418] sm:$0xff] }
  0x7c   : > { %1638 = vmatprep.subr.mxu1 %v533_v61  ;;  %684 = vmatmul.mubr.f32.gmra.mxu0 %v2138_v35 }
  0x7d   : > { %1639 = vmatpush3.msra.mxu1 %v533_v61  ;;  %1475 = vmatpush3.msra.mxu0 %v500_v2  ;;  %v956_v61 = vld [vmem:[%s2406_s1 + $0x310] sm:$0xff]  ;;  %v955_v2 = vld [vmem:[%s2406_s1 + $0x308] sm:$0xff] }
  0x7e   : > { %1640 = vmatprep.subr.mxu1 %v532_v3  ;;  %1476 = vmatprep.subr.mxu0 %v515_v4  ;;  %v987_v4 = vld [vmem:[%s2406_s1 + $0x408] sm:$0xff] }
  0x7f   : > { %1641 = vmatpush3.msra.mxu1 %v532_v3  ;;  %1477 = vmatpush3.msra.mxu0 %v499_v6  ;;  %v970_v3 = vld [vmem:[%s2406_s1 + $0x380] sm:$0xff] }
  0x80   : > { %1642 = vmatprep.subr.mxu1 %v531_v7  ;;  %1478 = vmatprep.subr.mxu0 %v514_v8  ;;  %v954_v6 = vld [vmem:[%s2406_s1 + $0x300] sm:$0xff]  ;;  %v455_v8 = vld [vmem:[#allocation2 + $0x58] sm:$0x3] }
  0x81   : > { %838 = vmatprep.mubr.f32.mxu0 %v467_v9  ;;  %1479 = vmatpush3.msra.mxu0 %v498_v12  ;;  %v986_v9 = vld [vmem:[%s2406_s1 + $0x400] sm:$0xff]  ;;  %v951_v11 = vrot.slane %v455_v8, 2 }
  0x82   : > { %1643 = vmatpush3.msra.mxu1 %v531_v7  ;;  %839 = vmatmul.mubr.f32.vlgmr.msra.gmra.mxu0 %v444_v57  ;;  %v957_v57 = vld [vmem:[%s2406_s1 + $0x318] sm:$0xff]  ;;  %v454_v7 = vld [vmem:[#allocation2 + $0x50] sm:$0xff] }
  0x83   : > { %1644 = vmatprep.subr.mxu1 %v530_v13  ;;  %1512 = vmatprep.subr.mxu0 %v985_v14  ;;  %v950_v10 = vrot.slane %v454_v7, 2  ;;  %v946_v12 = vrot.slane %v454_v7, 1 }
  0x84   : > { %1645 = vmatpush3.msra.mxu1 %v530_v13  ;;  %1513 = vmatpush3.msra.mxu0 %v969_v15  ;;  %v947_v13 = vrot.slane %v455_v8, 1 }
  0x85   : > { %1646 = vmatprep.mubr.f32.mxu1 %v484_v16  ;;  %1514 = vmatprep.subr.mxu0 %v984_v17  ;;  %v952_v14 = vsel %vm481_vm1, %v950_v10, %v951_v11 }
  0x86   : > { %1652 = vmatprep.subr.mxu1 %v1001_v18  ;;  %843 = vmatprep.mubr.f32.mxu0 %v2019_v53  ;;  %v999_v53 = vld [vmem:[%s2406_s1 + $0x468] sm:$0xff] }
  0x87   : > { %1647 = vmatmul.mubr.f32.vlgmr.msra.gmra.mxu1 %v2035_v63  ;;  %1515 = vmatpush3.msra.mxu0 %v968_v19  ;;  %v966_v63 = vld [vmem:[%s2406_s1 + $0x360] sm:$0xff] }
  0x88   : > { %1653 = vmatpush3.msra.mxu1 %v1001_v18  ;;  %844 = vmatmul.mubr.f32.gmra.mxu0 %v1983_v37  ;;  %v998_v37 = vld [vmem:[%s2406_s1 + $0x460] sm:$0xff] }
  0x89   : > { %1516 = vmatprep.subr.mxu0 %v983_v20  ;;  %1654 = vmatprep.subr.mxu1 %v1000_v21 }
  0x8a   : > { %1517 = vmatpush3.msra.mxu0 %v967_v22  ;;  %1655 = vmatpush3.msra.mxu1 %v1000_v21 }
  0x8b   : > { %1518 = vmatprep.subr.mxu0 %v982_v24  ;;  %1656 = vmatprep.subr.mxu1 %v999_v53 }
  0x8c   : > { %848 = vmatprep.mubr.f32.mxu0 %v2055_v5  ;;  %1519 = vmatpush3.msra.mxu0 %v966_v63 }
  0x8d   : > { %1657 = vmatpush3.msra.mxu1 %v999_v53  ;;  %849 = vmatmul.mubr.f32.gmra.mxu0 %v2007_v48 }
  0x8e   : > { %1520 = vmatprep.subr.mxu0 %v981_v25  ;;  %1658 = vmatprep.subr.mxu1 %v998_v37 }
  0x8f   : > { %1521 = vmatpush3.msra.mxu0 %v965_v26  ;;  %1659 = vmatpush3.msra.mxu1 %v998_v37 }
  0x90   : > { %1522 = vmatprep.subr.mxu0 %v980_v27  ;;  %1660 = vmatprep.subr.mxu1 %v997_v28 }
  0x91   : > { %853 = vmatprep.mubr.f32.mxu0 %v2148_v42  ;;  %1649 = vmatprep.mubr.f32.mxu1 %v2042_v1 }
  0x92   : > { %1523 = vmatpush3.msra.mxu0 %v964_v29  ;;  %1661 = vmatpush3.msra.mxu1 %v997_v28 }
  0x93   : > { %854 = vmatmul.mubr.f32.gmra.mxu0 %v2111_v23  ;;  %1650 = vmatmul.mubr.f32.gmra.mxu1 %v2163_v51 }
  0x94   : > { %1524 = vmatprep.subr.mxu0 %v979_v30  ;;  %1662 = vmatprep.subr.mxu1 %v996_v31 }
  0x95   : > { %1525 = vmatpush3.msra.mxu0 %v963_v32  ;;  %1663 = vmatpush3.msra.mxu1 %v996_v31 }
  0x96   : > { %1526 = vmatprep.subr.mxu0 %v978_v33  ;;  %1664 = vmatprep.subr.mxu1 %v995_v34 }
  0x97   : > { %1527 = vmatpush3.msra.mxu0 %v962_v36  ;;  %1665 = vmatpush3.msra.mxu1 %v995_v34 }
  0x98   : > { %1528 = vmatprep.subr.mxu0 %v977_v38  ;;  %1666 = vmatprep.subr.mxu1 %v994_v39 }
  0x99   : > { %1529 = vmatpush3.msra.mxu0 %v961_v40  ;;  %1667 = vmatpush3.msra.mxu1 %v994_v39 }
  0x9a   : > { %1530 = vmatprep.subr.mxu0 %v976_v41  ;;  %1668 = vmatprep.subr.mxu1 %v993_v43 }
  0x9b   : > { %1531 = vmatpush3.msra.mxu0 %v960_v44  ;;  %1669 = vmatpush3.msra.mxu1 %v993_v43 }
  0x9c   : > { %1532 = vmatprep.subr.mxu0 %v975_v45  ;;  %1670 = vmatprep.subr.mxu1 %v992_v46 }
  0x9d   : > { %1533 = vmatpush3.msra.mxu0 %v959_v47  ;;  %1671 = vmatpush3.msra.mxu1 %v992_v46 }
  0x9e   : > { %1534 = vmatprep.subr.mxu0 %v974_v49  ;;  %1672 = vmatprep.subr.mxu1 %v991_v50 }
  0x9f   : > { %1535 = vmatpush3.msra.mxu0 %v958_v52  ;;  %1673 = vmatpush3.msra.mxu1 %v991_v50  ;;  %v1379_v52 = vld [vmem:[%s2407_s2] ss:$0 sm:$0xff] }
  0xa0   : > { %1536 = vmatprep.subr.mxu0 %v973_v54  ;;  %1674 = vmatprep.subr.mxu1 %v990_v56 }
  0xa1   : > { %1537 = vmatpush3.msra.mxu0 %v957_v57  ;;  %1675 = vmatpush3.msra.mxu1 %v990_v56 }
  0xa2   : > { %1538 = vmatprep.subr.mxu0 %v972_v58  ;;  %1676 = vmatprep.subr.mxu1 %v989_v60 }
  0xa3   : > { %1539 = vmatpush3.msra.mxu0 %v956_v61  ;;  %1677 = vmatpush3.msra.mxu1 %v989_v60 }
  0xa4   : > { %1540 = vmatprep.subr.mxu0 %v971_v62  ;;  %1678 = vmatprep.subr.mxu1 %v988_v0 }
  0xa5   : > { %1541 = vmatpush3.msra.mxu0 %v955_v2  ;;  %1679 = vmatpush3.msra.mxu1 %v988_v0 }
  0xa6   : > { %1542 = vmatprep.subr.mxu0 %v970_v3  ;;  %1680 = vmatprep.subr.mxu1 %v987_v4 }
  0xa7   : > { %1543 = vmatpush3.msra.mxu0 %v954_v6  ;;  %1066 = vmatprep.mubr.f32.mxu0 %v2055_v5 }
  0xa8   : > { %1681 = vmatpush3.msra.mxu1 %v987_v4  ;;  %1067 = vmatmul.mubr.f32.vlgmr.msra.gmra.mxu0 %v2007_v48  ;;  %v948_v48 = vsel %vm464_vm0, %v946_v12, %v947_v13 }
  0xa9   : > { %1682 = vmatprep.subr.mxu1 %v986_v9  ;;  %1684 = vmatprep.mubr.f32.mxu1 %v2042_v1 }
  0xaa   : > { %1683 = vmatpush3.msra.mxu1 %v986_v9  ;;  %1071 = vmatprep.mubr.f32.mxu0 %v2148_v42 }
  0xab   : > { %1685 = vmatmul.mubr.f32.vlgmr.msra.gmra.mxu1 %v2163_v51 }
  0xac   : > { %1687 = vmatprep.mubr.f32.mxu1 %v2173_v55  ;;  %1072 = vmatmul.mubr.f32.gmra.mxu0 %v2111_v23 }
  0xad   : > { %1076 = vmatprep.mubr.f32.mxu0 %v2180_v59 }
  0xaf   : > { %1688 = vmatmul.mubr.f32.gmra.mxu1 %v952_v14 }
  0xb0   : > { %1077 = vmatmul.mubr.f32.gmra.mxu0 %v2138_v35 }
  0xb1   : > { %1081 = vmatprep.mubr.f32.mxu0 %v948_v48 }
  0xb4   : > { %1082 = vmatmul.mubr.f32.gmra.mxu0 %v454_v7 }
 0x11c   : > { %v1416_v1 = vpop.f32.mrf.mxu0 }
 0x11e   : > { %v1417_v5 = vpop.f32.mrf.mxu0 }
 0x11f   : > { %v1610_v23 = vpop.f32.mrf.mxu1  ;;  %v1418_v26 = vadd.f32 %v1417_v5, %v1416_v1 }
 0x121   : > { %v755_v59 = vpop.f32.mrf.mxu1 }
 0x122   : > { %v756_v31 = vadd.f32 %v1418_v26, %v755_v59 }
 0x123   : > { %v1419_v42 = vpop.f32.mrf.mxu0 }
 0x125   : > { %v1420_v51 = vpop.f32.mrf.mxu0 }
 0x126   : > { %v1421_v29 = vadd.f32 %v1420_v51, %v1419_v42 }
 0x128   : > { %v761_v38 = vadd.f32 %v1610_v23, %v1421_v29 }
 0x136   : > { %v1422_v15 = vpop.f32.mrf.mxu0 }
 0x138   : > { %v1423_v16 = vpop.f32.mrf.mxu0 }
 0x139   : > { %v1613_v22 = vpop.f32.mrf.mxu1  ;;  %v1424_v41 = vadd.f32 %v1423_v16, %v1422_v15 }
 0x13b   : > { %v765_v53 = vpop.f32.mrf.mxu1 }
 0x13c   : > { %v1425_v55 = vpop.f32.mrf.mxu0  ;;  %v766_v57 = vadd.f32 %v1424_v41, %v765_v53 }
 0x13e   : > { %v1426_v17 = vpop.f32.mrf.mxu0 }
 0x13f   : > { %v1427_v58 = vadd.f32 %v1426_v17, %v1425_v55 }
 0x141   : > { %v771_v9 = vadd.f32 %v1613_v22, %v1427_v58 }
 0x142   : > { %v1480_v18 = vpop.f32.mrf.mxu0 }
 0x144   : > { %v1481_v19 = vpop.f32.mrf.mxu0 }
 0x145   : > { %v1482_v28 = vadd.f32 %v1481_v19, %v1480_v18 }
 0x147   : > { %v1648_v35 = vpop.f32.mrf.mxu1  ;;  %v841_v36 = vadd.f32 %v1482_v28, %v756_v31 }
 0x148   : > { %v1483_v20 = vpop.f32.mrf.mxu0 }
 0x149   : > { %v925_v25 = vpop.f32.mrf.mxu1 }
 0x14a   : > { %v1484_v21 = vpop.f32.mrf.mxu0  ;;  %v926_v47 = vadd.f32 %v925_v25, %v841_v36 }
 0x14b   : > { %v1485_v32 = vadd.f32 %v1484_v21, %v1483_v20 }
 0x14d   : > { %v1486_v24 = vpop.f32.mrf.mxu0  ;;  %v846_v44 = vadd.f32 %v1485_v32, %v761_v38 }
 0x14f   : > { %v1487_v63 = vpop.f32.mrf.mxu0  ;;  %v931_v62 = vadd.f32 %v1648_v35, %v846_v44 }
 0x150   : > { %v1488_v49 = vadd.f32 %v1487_v63, %v1486_v24 }
 0x152   : > { %v851_v3 = vadd.f32 %v1488_v49, %v766_v57 }
 0x153   : > { %v1489_v37 = vpop.f32.mrf.mxu0  ;;  %v1651_v27 = vpop.f32.mrf.mxu1 }
 0x155   : > { %v1490_v30 = vpop.f32.mrf.mxu0  ;;  %v935_v33 = vpop.f32.mrf.mxu1 }
 0x156   : > { %v1491_v2 = vadd.f32 %v1490_v30, %v1489_v37  ;;  %v936_v14 = vadd.f32 %v935_v33, %v851_v3 }
 0x158   : > { %v856_v13 = vadd.f32 %v1491_v2, %v771_v9 }
 0x15a   : > { %v941_v15 = vadd.f32 %v1651_v27, %v856_v13 }
 0x168   : > { %v1544_v34 = vpop.f32.mrf.mxu0 }
 0x16a   : > { %v1545_v39 = vpop.f32.mrf.mxu0 }
 0x16b   : > { %v1686_v40 = vpop.f32.mrf.mxu1  ;;  %v1546_v43 = vadd.f32 %v1545_v39, %v1544_v34 }
 0x16c   : > { %v1547_v45 = vpop.f32.mrf.mxu0 }
 0x16d   : > { %v1153_v46 = vpop.f32.mrf.mxu1 }
 0x16e   : > { %v1154_v50 = vadd.f32 %v1546_v43, %v1153_v46  ;;  %v1548_v54 = vpop.f32.mrf.mxu0 }
 0x16f   : > { %v1689_v56 = vpop.f32.mrf.mxu1  ;;  %v1549_v61 = vadd.f32 %v1548_v54, %v1547_v45 }
 0x170   : > { %v1172_v60 = vadd.f32 %v1154_v50, %v926_v47  ;;  %v1550_v0 = vpop.f32.mrf.mxu0 }
 0x171   : > { %v1159_v6 = vadd.f32 %v1686_v40, %v1549_v61  ;;  %v1163_v8 = vpop.f32.mrf.mxu1 }
 0x172   : > { %v1183_v4 = vadd.f32 %v1379_v52, %v1172_v60  ;;  %v1551_v7 = vpop.f32.mrf.mxu0 }
 0x173   : > { %v1173_v10 = vadd.f32 %v1159_v6, %v931_v62  ;;  %v1552_v11 = vadd.f32 %v1551_v7, %v1550_v0 }
 0x174   : > { %1211 = vst [vmem:[%s1856_s13] sm:$0xff] %v1183_v4  ;;  %v1553_v12 = vpop.f32.mrf.mxu0  ;;  %v1197_v18 = vmul.f32 %v1183_v4, %v1183_v4 }
 0x175   : > { %v1184_v48 = vadd.f32 %v1379_v52, %v1173_v10  ;;  %v1164_v1 = vadd.f32 %v1552_v11, %v1163_v8 }
 0x176   : > { %v1554_v5 = vpop.f32.mrf.mxu0 }
 0x177   : > { %1212 = vst [vmem:[%s1856_s13 + $0x8] sm:$0xff] %v1184_v48  ;;  %v1174_v42 = vadd.f32 %v1164_v1, %v936_v14  ;;  %v1555_v51 = vadd.f32 %v1554_v5, %v1553_v12  ;;  %v1198_v16 = vmul.f32 %v1184_v48, %v1184_v48  ;;  %v1187_v19 = vadd.f32 %v1184_v48, %v1183_v4 }
 0x179   : > { %v1185_v55 = vadd.f32 %v1379_v52, %v1174_v42  ;;  %v1169_v17 = vadd.f32 %v1689_v56, %v1555_v51  ;;  %v1201_v21 = vadd.f32 %v1198_v16, %v1197_v18 }
 0x17b   : > { %v1199_v23 = vmul.f32 %v1185_v55, %v1185_v55  ;;  %1213 = vst [vmem:[%s1856_s13 + $0x10] sm:$0xff] %v1185_v55  ;;  %v1175_v20 = vadd.f32 %v1169_v17, %v941_v15  ;;  %v1188_v59 = vadd.f32 %v1187_v19, %v1185_v55 }
 0x17d   : > { %v1186_v22 = vadd.f32 %v1379_v52, %v1175_v20  ;;  %v1202_v24 = vadd.f32 %v1201_v21, %v1199_v23 }
 0x17f   : > { %v1189_v53 = vadd.f32 %v1188_v59, %v1186_v22  ;;  %v1200_v35 = vmul.f32 %v1186_v22, %v1186_v22  ;;  %1214 = vst [vmem:[%s1856_s13 + $0x18] sm:$0xff] %v1186_v22 }
 0x181   : > { %v1190_v63 = vrot.slane %v1189_v53, 4  ;;  %v1203_v25 = vadd.f32 %v1202_v24, %v1200_v35 }
 0x183   : > { %v1191_v37 = vadd.f32 %v1190_v63, %v1189_v53  ;;  %v1204_v26 = vrot.slane %v1203_v25, 4 }
 0x185   : > { %v1192_v27 = vrot.slane %v1191_v37, 2  ;;  %v1205_v28 = vadd.f32 %v1204_v26, %v1203_v25 }
 0x187   : > { %v1193_v29 = vadd.f32 %v1192_v27, %v1191_v37  ;;  %v1206_v30 = vrot.slane %v1205_v28, 2 }
 0x189   : > { %v1194_v31 = vrot.slane %v1193_v29, 1  ;;  %v1207_v32 = vadd.f32 %v1206_v30, %v1205_v28 }
 0x18b   : > { %v1195_v33 = vadd.f32 %v1194_v31, %v1193_v29  ;;  %v1208_v34 = vrot.slane %v1207_v32, 1 }
 0x18d   : > { %1196 = vst [vmem:[%s1865_s22] sm:$0x1] %v1195_v33  ;;  %v1209_v36 = vadd.f32 %v1208_v34, %v1207_v32 }
 0x18f   : > { %1210 = vst [vmem:[%s1865_s22 + $0x1] sm:$0x1] %v1209_v36 }
 0x190 PF: > { %s17_s25 = sadd.s32 1, %s1773_s25   ;;  %s2413_s13 = sld [smem:[#allocation6_spill]] }
 0x191   : > { %p14_p10 = scmp.ge.s32.totalorder %s17_s25, 6   ;;  %s2414_s21 = smov %s1765_s23 }
 0x192   : > { %s2415_s22 = smov %s1769_s24  ;;  %s2416_s23 = smov %s2419_s26 }
 0x193   :  { %16 = sbr.rel (!%p14_p10) target bundleno = 3 (0x3), region = 136 }
 0x196   : > { %s2417_s24 = smov %s2413_s13 }
 0x198   :  { %1267 = vsyncmov [#allocation3] }
 0x19b   :  { %s1268_s11 = vpop.sfrf %1267 }
 0x19c   :  { %p1382_p11 = scmp.ne.s32.totalorder %s1268_s11, 0 }
 0x19e   :  { %1272 = shalt.err (%p1382_p11)  }

</bundles_post_ra>
